<compile_context>
chip_gen: v5e
topology: v5e:2x2
jax: 0.10.0
libtpu: 0.0.40
codegen_flags: <defaults>
</compile_context>

<pallas_src>
import functools

import jax
import jax.numpy as jnp
from jax import lax
from jax.experimental import pallas as pl
from jax.experimental.pallas import tpu as pltpu


def _round_up(x, m):
    return ((x + m - 1) // m) * m


# --------------------------------------------------------------------------- #
# Kernel
# --------------------------------------------------------------------------- #
def attention_kernel(x_ref, wq_ref, wkv_ref, wp3_ref, bp_ref, o_ref,
                     k_scr, v_scr, *, num_heads, head_dim, head_dim_pad,
                     q_tile, kv_len, use_ones_column, bf16_exp):
    qi = pl.program_id(1)
    n_pad = x_ref.shape[1]
    c = x_ref.shape[2]
    h, hd, hdp = num_heads, head_dim, head_dim_pad

    # ---- fused K|V projection for the whole (padded) sequence, once per batch.
    # Chunked over rows so the f32 projection transient stays ~q_tile-sized.
    @pl.when(qi == 0)
    def _():
        for c0 in range(0, n_pad, q_tile):
            xb = x_ref[0, pl.ds(c0, q_tile), :]                      # (t, C) bf16
            kv = jnp.dot(xb, wkv_ref[...],
                         preferred_element_type=jnp.float32)         # (t, C + H*hdp)
            k2 = kv[:, :c]                                           # (t, C)
            v2 = kv[:, c:]                                           # (t, H*hdp)
            # K scratch pre-transposed (H, hd, N): QK matmul is native (M,K)x(K,N)
            # with a lane-dense N minor dim; transpose paid once per batch.
            k_scr[:, :, pl.ds(c0, q_tile)] = jnp.transpose(
                k2.reshape(q_tile, h, hd), (1, 2, 0)).astype(jnp.bfloat16)
            vh = jnp.transpose(v2.reshape(q_tile, h, hdp), (1, 0, 2))  # (H, t, hdp)
            if use_ones_column:
                lane = lax.broadcasted_iota(jnp.int32, vh.shape, 2)
                vh = jnp.where(lane == hd, 1.0, vh)   # ones col -> MXU row-sum
            v_scr[:, pl.ds(c0, q_tile), :] = vh.astype(jnp.bfloat16)

    # ---- Q projection for this query tile (scale pre-folded into Wq) --------
    start = pl.multiple_of(qi * q_tile, q_tile)
    xq = x_ref[0, pl.ds(start, q_tile), :]                            # (t, C) bf16
    q2 = jnp.dot(xq, wq_ref[...], preferred_element_type=jnp.float32)
    qh = jnp.transpose(q2.reshape(q_tile, h, hd), (1, 0, 2)).astype(jnp.bfloat16)

    # ---- scores + softmax with deferred normalization ------------------------
    s = jnp.einsum('hqd,hdk->hqk', qh, k_scr[...],
                   preferred_element_type=jnp.float32)                # (H, t, N) f32
    if kv_len < n_pad:                                                # padded keys
        kidx = lax.broadcasted_iota(jnp.int32, s.shape, 2)
        s = jnp.where(kidx < kv_len, s, -1e30)
    m = jnp.max(s, axis=-1, keepdims=True)
    if bf16_exp:
        p = jnp.exp((s - m).astype(jnp.bfloat16))                     # bf16 EUP exp
    else:
        p = jnp.exp(s - m).astype(jnp.bfloat16)                       # f32 exp (v5e)

    pv = jnp.einsum('hqk,hkp->hqp', p, v_scr[...],
                    preferred_element_type=jnp.float32)               # (H, t, hdp) f32
    if use_ones_column:
        denom = pv[:, :, hd:hd + 1]                   # row-sum straight off the MXU
    else:
        denom = jnp.sum(p.astype(jnp.float32), axis=-1, keepdims=True)
    pv = (pv * pl.reciprocal(denom, approx=True)).astype(jnp.bfloat16)

    # ---- head merge folded into the output projection (per-head MXU acc) ----
    acc = jnp.zeros((q_tile, c), jnp.float32)
    for hh in range(h):                     # padded rows of wp3 are zero
        acc = acc + jnp.dot(pv[hh], wp3_ref[hh],
                            preferred_element_type=jnp.float32)
    o_ref[0] = (acc + bp_ref[0]).astype(o_ref.dtype)


# --------------------------------------------------------------------------- #
# Parameter prep (one-time)
# --------------------------------------------------------------------------- #
def prepare_params(w_qkv, w_proj, b_proj, num_heads):
    """w_qkv: (3C, C) torch layout (out, in); w_proj: (C, C); b_proj: (C,)."""
    C = w_proj.shape[0]
    assert C % num_heads == 0
    hd = C // num_heads
    hd_pad = hd if hd % 128 == 0 else _round_up(hd, 128)
    scale = hd ** (-0.5)

    wq = (w_qkv[0:C, :].T * scale).astype(jnp.bfloat16)               # (C, C)
    wk = w_qkv[C:2 * C, :].T                                          # (C, C)
    wv = w_qkv[2 * C:3 * C, :].T.reshape(C, num_heads, hd)            # (C, H, hd)
    if hd_pad != hd:
        wv = jnp.pad(wv, ((0, 0), (0, 0), (0, hd_pad - hd)))
    wkv = jnp.concatenate([wk, wv.reshape(C, num_heads * hd_pad)],
                          axis=1).astype(jnp.bfloat16)                # (C, C+H*hdp)

    wp3 = w_proj.T.reshape(num_heads, hd, C)                          # (H, hd, C)
    if hd_pad != hd:
        wp3 = jnp.pad(wp3, ((0, 0), (0, hd_pad - hd), (0, 0)))
    wp3 = wp3.astype(jnp.bfloat16)                                    # (H, hdp, C)

    bp = b_proj.astype(jnp.float32)[None, :]                          # (1, C)
    return wq, wkv, wp3, bp


# --------------------------------------------------------------------------- #
# Chip-aware tuning helpers
# --------------------------------------------------------------------------- #
def _vmem_limit_bytes():
    cap = 64 * 1024 * 1024                              # conservative default
    try:
        cap = int(pltpu.get_tpu_info().vmem_capacity_bytes)
    except Exception:
        pass
    try:
        kind = jax.devices()[0].device_kind.lower()
        if "7" in kind:                                 # v7x: 64 MiB per TC
            cap = min(cap, 64 * 1024 * 1024)
    except Exception:
        pass
    return max(32 * 1024 * 1024, cap - 16 * 1024 * 1024)  # Mosaic headroom


def _use_bf16_exp():
    # bf16 EUP exists on v6e/v7x but not v5e/older; perf knob only (lowers
    # correctly everywhere).
    try:
        kind = jax.devices()[0].device_kind.lower()
    except Exception:
        return False
    return not any(v in kind for v in ("v2", "v3", "v4", "v5"))


def _vmem_estimate(n_pad, c, h, hd, hd_pad, q_tile, out_itemsize, bf16_exp):
    x_blk = 2 * n_pad * c * 2                                     # bf16, dbl-buffered
    weights = 2 * (c * c + c * (c + h * hd_pad) + h * hd_pad * c) * 2 + 2 * c * 4
    scratch = (h * hd * n_pad + h * n_pad * hd_pad) * 2           # K/V bf16 scratch
    out_blk = 2 * q_tile * c * out_itemsize
    s_bytes = h * q_tile * n_pad * 4
    p_bytes = h * q_tile * n_pad * (2 if bf16_exp else 4)
    pv_bytes = 2 * h * q_tile * hd_pad * 4
    proj = 2 * q_tile * (c + h * hd_pad) * 4                      # chunked KV proj
    return x_blk + weights + scratch + out_blk + s_bytes + p_bytes + pv_bytes \
        + proj + 2 * 1024 * 1024


def _pick_q_tile(n, c, h, hd, hd_pad, out_itemsize, bf16_exp, vmem_limit):
    cap = _round_up(n, 8)
    for t in (512, 256, 128, 64, 32, 16, 8):
        if t > cap:
            continue
        n_pad = _round_up(n, t)
        if _vmem_estimate(n_pad, c, h, hd, hd_pad, t, out_itemsize,
                          bf16_exp) <= vmem_limit:
            return t
    return 8


# --------------------------------------------------------------------------- #
# Wrapper
# --------------------------------------------------------------------------- #
def attention(x, params, num_heads, q_tile=None):
    """x: (B, N, C) float; params from prepare_params(...)."""
    wq, wkv, wp3, bp = params
    B, N, C = x.shape
    assert C % num_heads == 0
    hd = C // num_heads
    hd_pad = wp3.shape[1]
    use_ones = hd_pad > hd
    out_dtype = x.dtype
    bf16_exp = _use_bf16_exp()
    vmem_limit = _vmem_limit_bytes()

    if q_tile is None:
        q_tile = _pick_q_tile(N, C, num_heads, hd, hd_pad,
                              jnp.dtype(out_dtype).itemsize, bf16_exp, vmem_limit)
    assert q_tile % 8 == 0, "q_tile must be a multiple of 8"
    n_pad = _round_up(N, q_tile)

    # x is only ever consumed in bf16: cast (and zero-pad N) once in HBM.
    xb = x.astype(jnp.bfloat16)
    if n_pad != N:
        xb = jnp.pad(xb, ((0, 0), (0, n_pad - N), (0, 0)))

    kernel = functools.partial(
        attention_kernel, num_heads=num_heads, head_dim=hd, head_dim_pad=hd_pad,
        q_tile=q_tile, kv_len=N, use_ones_column=use_ones, bf16_exp=bf16_exp)

    def build(single_buffer):
        def w_spec(shape):
            if single_buffer:   # grid-constant blocks: no second buffer needed
                return pl.BlockSpec(shape, lambda b, i: (0,) * len(shape),
                                    pipeline_mode=pl.Buffered(1))
            return pl.BlockSpec(shape, lambda b, i: (0,) * len(shape))

        return pl.pallas_call(
            kernel,
            out_shape=jax.ShapeDtypeStruct((B, n_pad, C), out_dtype),
            grid=(B, n_pad // q_tile),
            in_specs=[
                # full (padded) sequence per batch element; block index constant
                # along the q-tile axis -> resident in VMEM across query tiles.
                pl.BlockSpec((1, n_pad, C), lambda b, i: (b, 0, 0)),
                w_spec((C, C)),                          # Wq (scale folded, bf16)
                w_spec((C, C + num_heads * hd_pad)),     # fused Wk|Wv (bf16)
                w_spec((num_heads, hd_pad, C)),          # Wproj as (H, hdp, C)
                w_spec((1, C)),                          # proj bias (f32)
            ],
            out_specs=pl.BlockSpec((1, q_tile, C), lambda b, i: (b, i, 0)),
            scratch_shapes=[
                pltpu.VMEM((num_heads, hd, n_pad), jnp.bfloat16),      # K^T scratch
                pltpu.VMEM((num_heads, n_pad, hd_pad), jnp.bfloat16),  # V (+ones col)
            ],
            compiler_params=pltpu.CompilerParams(
                # Batch axis shards across megacore TCs; the q-tile axis MUST
                # stay sequential (K/V scratch is filled at q-tile 0).
                dimension_semantics=("parallel", "arbitrary"),
                vmem_limit_bytes=vmem_limit,
            ),
        )

    out, err = None, None
    for single_buffer in (True, False):
        try:
            out = build(single_buffer)(xb, wq, wkv, wp3, bp)
            out = jax.block_until_ready(out)
            break
        except Exception as e:  # pl.Buffered(1) unsupported -> default buffering
            err, out = e, None
    if out is None:
        raise err
    if n_pad != N:
        out = out[:, :N, :]
    return out


# --------------------------------------------------------------------------- #
# Pure-JAX reference (mirrors the PyTorch forward)
# --------------------------------------------------------------------------- #
def attention_ref(x, w_qkv, w_proj, b_proj, num_heads):
    B, N, C = x.shape
    hd = C // num_heads
    scale = hd ** (-0.5)
    qkv = x @ w_qkv.T
    qkv = qkv.reshape(B, N, 3, num_heads, hd).transpose(2, 0, 3, 1, 4)
    q, k, v = qkv[0] * scale, qkv[1], qkv[2]
    attn = jax.nn.softmax(q @ jnp.swapaxes(k, -2, -1), axis=-1)
    out = (attn @ v).transpose(0, 2, 1, 3).reshape(B, N, C)
    return out @ w_proj.T + b_proj


if __name__ == "__main__":
    B, N, C, H = 2, 16, 64, 8   # batch, seq, dim, heads (head_dim = 8)

    key = jax.random.PRNGKey(0)
    kx, kqkv, kp, kb = jax.random.split(key, 4)
    x = jax.random.normal(kx, (B, N, C), dtype=jnp.float32)
    w_qkv = jax.random.normal(kqkv, (3 * C, C), dtype=jnp.float32) * 0.05
    w_proj = jax.random.normal(kp, (C, C), dtype=jnp.float32) * 0.05
    b_proj = jax.random.normal(kb, (C,), dtype=jnp.float32) * 0.05

    params = prepare_params(w_qkv, w_proj, b_proj, num_heads=H)

    # (1) multi-tile query axis (exercises the resident-KV pipeline)
    out = jax.block_until_ready(attention(x, params, num_heads=H, q_tile=8))
    ref = attention_ref(x, w_qkv, w_proj, b_proj, num_heads=H)
    assert out.shape == (B, N, C)
    err = float(jnp.max(jnp.abs(out - ref)))
    assert err < 5e-2, f"mismatch vs reference (divisible N): {err}"

    # (2) sequence length not divisible by the tile (ViT N=197 analogue):
    #     exercises padding + key masking + auto q_tile selection.
    N2 = 12
    x2 = x[:, :N2, :]
    out2 = jax.block_until_ready(attention(x2, params, num_heads=H))
    ref2 = attention_ref(x2, w_qkv, w_proj, b_proj, num_heads=H)
    assert out2.shape == (B, N2, C)
    err2 = float(jnp.max(jnp.abs(out2 - ref2)))
    assert err2 < 5e-2, f"mismatch vs reference (padded N): {err2}"

    print("KERNEL_OK")
</pallas_src>

<mosaic_0001>
module attributes {stable_mosaic.version = 11 : i64} {
  func.func @attention_kernel(%arg0: i32, %arg1: i32, %arg2: memref<1x16x64xbf16, #tpu.memory_space<vmem>>, %arg3: memref<64x64xbf16, #tpu.memory_space<vmem>>, %arg4: memref<64x1088xbf16, #tpu.memory_space<vmem>>, %arg5: memref<8x128x64xbf16, #tpu.memory_space<vmem>>, %arg6: memref<1x64xf32, #tpu.memory_space<vmem>>, %arg7: memref<1x8x64xf32, #tpu.memory_space<vmem>>, %arg8: memref<8x8x16xbf16, #tpu.memory_space<vmem>>, %arg9: memref<8x16x128xbf16, #tpu.memory_space<vmem>>) attributes {dimension_semantics = [#tpu.dimension_semantics<parallel>, #tpu.dimension_semantics<arbitrary>], iteration_bounds = array<i64: 2, 2>, scalar_prefetch = 0 : i64, scratch_operands = 2 : i64, tpu.core_type = #tpu.core_type<tc>, window_params = [{transform_indices = @transform_0, window_bounds = array<i64: 1, 16, 64>}, {pipeline_mode = #tpu.pipeline_mode<synchronous>, transform_indices = @transform_1, window_bounds = array<i64: 64, 64>}, {pipeline_mode = #tpu.pipeline_mode<synchronous>, transform_indices = @transform_2, window_bounds = array<i64: 64, 1088>}, {pipeline_mode = #tpu.pipeline_mode<synchronous>, transform_indices = @transform_3, window_bounds = array<i64: 8, 128, 64>}, {pipeline_mode = #tpu.pipeline_mode<synchronous>, transform_indices = @transform_4, window_bounds = array<i64: 1, 64>}, {transform_indices = @transform_5, window_bounds = array<i64: 1, 8, 64>}]} {
    %c0_i32 = arith.constant 0 : i32
    %0 = arith.cmpi eq, %arg1, %c0_i32 : i32
    %1 = arith.extui %0 : i1 to i32
    %c0_i32_0 = arith.constant 0 : i32
    %2 = arith.cmpi ne, %1, %c0_i32_0 : i32
    scf.if %2 {
      %c0_44 = arith.constant 0 : index
      %c0_45 = arith.constant 0 : index
      %c0_46 = arith.constant 0 : index
      %85 = vector.load %arg2[%c0_44, %c0_45, %c0_46] : memref<1x16x64xbf16, #tpu.memory_space<vmem>>, vector<1x8x64xbf16>
      %86 = vector.shape_cast %85 : vector<1x8x64xbf16> to vector<8x64xbf16>
      %c0_47 = arith.constant 0 : index
      %c0_48 = arith.constant 0 : index
      %87 = vector.load %arg4[%c0_47, %c0_48] : memref<64x1088xbf16, #tpu.memory_space<vmem>>, vector<64x1088xbf16>
      %cst_49 = arith.constant dense<0.000000e+00> : vector<8x1088xf32>
      %88 = tpu.matmul %86, %87, %cst_49 {dimension_numbers = #tpu.dot_dimension_numbers<[1], [0], [0], [1], [0, 0, 1, 1], [], []>} : vector<8x64xbf16>, vector<64x1088xbf16>, vector<8x1088xf32> -> vector<8x1088xf32>
      %89 = vector.extract_strided_slice %88 {offsets = [0, 0], sizes = [8, 64], strides = [1, 1]} : vector<8x1088xf32> to vector<8x64xf32>
      %90 = vector.extract_strided_slice %88 {offsets = [0, 64], sizes = [8, 1024], strides = [1, 1]} : vector<8x1088xf32> to vector<8x1024xf32>
      %91 = vector.shape_cast %89 : vector<8x64xf32> to vector<8x8x8xf32>
      %92 = tpu.transpose %91, [1, 2, 0] : vector<8x8x8xf32> -> vector<8x8x8xf32>
      %93 = arith.truncf %92 : vector<8x8x8xf32> to vector<8x8x8xbf16>
      %c0_50 = arith.constant 0 : index
      %c0_51 = arith.constant 0 : index
      %c0_52 = arith.constant 0 : index
      %94 = vector.load %arg8[%c0_50, %c0_51, %c0_52] : memref<8x8x16xbf16, #tpu.memory_space<vmem>>, vector<8x8x8xbf16>
      tpu.vector_store %arg8[%c0_50, %c0_51, %c0_52], %93 {strides = array<i32>} : memref<8x8x16xbf16, #tpu.memory_space<vmem>>, vector<8x8x8xbf16>,
      %95 = vector.shape_cast %90 : vector<8x1024xf32> to vector<8x8x128xf32>
      %96 = tpu.transpose %95, [1, 0, 2] : vector<8x8x128xf32> -> vector<8x8x128xf32>
      %97 = tpu.iota {dimensions = array<i32: 2>} : vector<8x8x128xi32>
      %c8_i32_53 = arith.constant 8 : i32
      %98 = vector.broadcast %c8_i32_53 : i32 to vector<8x8x128xi32>
      %99 = arith.cmpi eq, %97, %98 : vector<8x8x128xi32>
      %cst_54 = arith.constant 1.000000e+00 : f32
      %100 = vector.broadcast %cst_54 : f32 to vector<8x8x128xf32>
      %101 = arith.select %99, %100, %96 : vector<8x8x128xi1>, vector<8x8x128xf32>
      %102 = arith.truncf %101 : vector<8x8x128xf32> to vector<8x8x128xbf16>
      %c0_55 = arith.constant 0 : index
      %c0_56 = arith.constant 0 : index
      %c0_57 = arith.constant 0 : index
      %103 = vector.load %arg9[%c0_55, %c0_56, %c0_57] : memref<8x16x128xbf16, #tpu.memory_space<vmem>>, vector<8x8x128xbf16>
      tpu.vector_store %arg9[%c0_55, %c0_56, %c0_57], %102 {strides = array<i32>} : memref<8x16x128xbf16, #tpu.memory_space<vmem>>, vector<8x8x128xbf16>,
      %c0_58 = arith.constant 0 : index
      %c8 = arith.constant 8 : index
      %c0_59 = arith.constant 0 : index
      %104 = vector.load %arg2[%c0_58, %c8, %c0_59] : memref<1x16x64xbf16, #tpu.memory_space<vmem>>, vector<1x8x64xbf16>
      %105 = vector.shape_cast %104 : vector<1x8x64xbf16> to vector<8x64xbf16>
      %c0_60 = arith.constant 0 : index
      %c0_61 = arith.constant 0 : index
      %106 = vector.load %arg4[%c0_60, %c0_61] : memref<64x1088xbf16, #tpu.memory_space<vmem>>, vector<64x1088xbf16>
      %cst_62 = arith.constant dense<0.000000e+00> : vector<8x1088xf32>
      %107 = tpu.matmul %105, %106, %cst_62 {dimension_numbers = #tpu.dot_dimension_numbers<[1], [0], [0], [1], [0, 0, 1, 1], [], []>} : vector<8x64xbf16>, vector<64x1088xbf16>, vector<8x1088xf32> -> vector<8x1088xf32>
      %108 = vector.extract_strided_slice %107 {offsets = [0, 0], sizes = [8, 64], strides = [1, 1]} : vector<8x1088xf32> to vector<8x64xf32>
      %109 = vector.extract_strided_slice %107 {offsets = [0, 64], sizes = [8, 1024], strides = [1, 1]} : vector<8x1088xf32> to vector<8x1024xf32>
      %110 = vector.shape_cast %108 : vector<8x64xf32> to vector<8x8x8xf32>
      %111 = tpu.transpose %110, [1, 2, 0] : vector<8x8x8xf32> -> vector<8x8x8xf32>
      %112 = arith.truncf %111 : vector<8x8x8xf32> to vector<8x8x8xbf16>
      %c0_63 = arith.constant 0 : index
      %c0_64 = arith.constant 0 : index
      %c8_65 = arith.constant 8 : index
      %113 = vector.load %arg8[%c0_63, %c0_64, %c8_65] : memref<8x8x16xbf16, #tpu.memory_space<vmem>>, vector<8x8x8xbf16>
      tpu.vector_store %arg8[%c0_63, %c0_64, %c8_65], %112 {strides = array<i32>} : memref<8x8x16xbf16, #tpu.memory_space<vmem>>, vector<8x8x8xbf16>,
      %114 = vector.shape_cast %109 : vector<8x1024xf32> to vector<8x8x128xf32>
      %115 = tpu.transpose %114, [1, 0, 2] : vector<8x8x128xf32> -> vector<8x8x128xf32>
      %116 = tpu.iota {dimensions = array<i32: 2>} : vector<8x8x128xi32>
      %c8_i32_66 = arith.constant 8 : i32
      %117 = vector.broadcast %c8_i32_66 : i32 to vector<8x8x128xi32>
      %118 = arith.cmpi eq, %116, %117 : vector<8x8x128xi32>
      %cst_67 = arith.constant 1.000000e+00 : f32
      %119 = vector.broadcast %cst_67 : f32 to vector<8x8x128xf32>
      %120 = arith.select %118, %119, %115 : vector<8x8x128xi1>, vector<8x8x128xf32>
      %121 = arith.truncf %120 : vector<8x8x128xf32> to vector<8x8x128xbf16>
      %c0_68 = arith.constant 0 : index
      %c8_69 = arith.constant 8 : index
      %c0_70 = arith.constant 0 : index
      %122 = vector.load %arg9[%c0_68, %c8_69, %c0_70] : memref<8x16x128xbf16, #tpu.memory_space<vmem>>, vector<8x8x128xbf16>
      tpu.vector_store %arg9[%c0_68, %c8_69, %c0_70], %121 {strides = array<i32>} : memref<8x16x128xbf16, #tpu.memory_space<vmem>>, vector<8x8x128xbf16>,
    } else {
    }
    %c8_i32 = arith.constant 8 : i32
    %3 = arith.muli %arg1, %c8_i32 : i32
    %4 = tpu.assume_multiple %3, 8 : i32
    %c0 = arith.constant 0 : index
    %5 = arith.index_cast %4 : i32 to index
    %c0_1 = arith.constant 0 : index
    %6 = vector.load %arg2[%c0, %5, %c0_1] : memref<1x16x64xbf16, #tpu.memory_space<vmem>>, vector<1x8x64xbf16>
    %7 = vector.shape_cast %6 : vector<1x8x64xbf16> to vector<8x64xbf16>
    %c0_2 = arith.constant 0 : index
    %c0_3 = arith.constant 0 : index
    %8 = vector.load %arg3[%c0_2, %c0_3] : memref<64x64xbf16, #tpu.memory_space<vmem>>, vector<64x64xbf16>
    %cst = arith.constant dense<0.000000e+00> : vector<8x64xf32>
    %9 = tpu.matmul %7, %8, %cst {dimension_numbers = #tpu.dot_dimension_numbers<[1], [0], [0], [1], [0, 0, 1, 1], [], []>} : vector<8x64xbf16>, vector<64x64xbf16>, vector<8x64xf32> -> vector<8x64xf32>
    %10 = vector.shape_cast %9 : vector<8x64xf32> to vector<8x8x8xf32>
    %11 = tpu.transpose %10, [1, 0, 2] : vector<8x8x8xf32> -> vector<8x8x8xf32>
    %12 = arith.truncf %11 : vector<8x8x8xf32> to vector<8x8x8xbf16>
    %c0_4 = arith.constant 0 : index
    %c0_5 = arith.constant 0 : index
    %c0_6 = arith.constant 0 : index
    %13 = vector.load %arg8[%c0_4, %c0_5, %c0_6] : memref<8x8x16xbf16, #tpu.memory_space<vmem>>, vector<8x8x16xbf16>
    "tpu.trace_start"() <{level = 10 : i32, message = "hqd,hdk->hqk"}> : () -> ()
    %cst_7 = arith.constant dense<0.000000e+00> : vector<8x8x16xf32>
    %14 = tpu.matmul %12, %13, %cst_7 {dimension_numbers = #tpu.dot_dimension_numbers<[2], [1], [1], [2], [0, 0, 0, 1, 1, 2], [0], [0]>} : vector<8x8x8xbf16>, vector<8x8x16xbf16>, vector<8x8x16xf32> -> vector<8x8x16xf32>
    "tpu.trace_stop"() : () -> ()
    %cst_8 = arith.constant dense<0xFF800000> : vector<8x8xf32>
    %15 = vector.multi_reduction <maximumf>, %14, %cst_8 [2] : vector<8x8x16xf32> to vector<8x8xf32>
    %16 = vector.shape_cast %15 : vector<8x8xf32> to vector<8x8x1xf32>
    %17 = vector.broadcast %16 : vector<8x8x1xf32> to vector<8x8x16xf32>
    %18 = arith.subf %14, %17 : vector<8x8x16xf32>
    %19 = arith.truncf %18 : vector<8x8x16xf32> to vector<8x8x16xbf16>
    %20 = math.exp %19 : vector<8x8x16xbf16>
    %c0_9 = arith.constant 0 : index
    %c0_10 = arith.constant 0 : index
    %c0_11 = arith.constant 0 : index
    %21 = vector.load %arg9[%c0_9, %c0_10, %c0_11] : memref<8x16x128xbf16, #tpu.memory_space<vmem>>, vector<8x16x128xbf16>
    "tpu.trace_start"() <{level = 10 : i32, message = "hqk,hkp->hqp"}> : () -> ()
    %cst_12 = arith.constant dense<0.000000e+00> : vector<8x8x128xf32>
    %22 = tpu.matmul %20, %21, %cst_12 {dimension_numbers = #tpu.dot_dimension_numbers<[2], [1], [1], [2], [0, 0, 0, 1, 1, 2], [0], [0]>} : vector<8x8x16xbf16>, vector<8x16x128xbf16>, vector<8x8x128xf32> -> vector<8x8x128xf32>
    "tpu.trace_stop"() : () -> ()
    %23 = vector.extract_strided_slice %22 {offsets = [0, 0, 8], sizes = [8, 8, 1], strides = [1, 1, 1]} : vector<8x8x128xf32> to vector<8x8x1xf32>
    %24 = tpu.reciprocal %23 {approx = true} : vector<8x8x1xf32> -> vector<8x8x1xf32>
    %25 = vector.broadcast %24 : vector<8x8x1xf32> to vector<8x8x128xf32>
    %26 = arith.mulf %22, %25 : vector<8x8x128xf32>
    %27 = arith.truncf %26 : vector<8x8x128xf32> to vector<8x8x128xbf16>
    %cst_13 = arith.constant 0.000000e+00 : f32
    %28 = vector.broadcast %cst_13 : f32 to vector<8x64xf32>
    %29 = vector.extract_strided_slice %27 {offsets = [0, 0, 0], sizes = [1, 8, 128], strides = [1, 1, 1]} : vector<8x8x128xbf16> to vector<1x8x128xbf16>
    %30 = vector.shape_cast %29 : vector<1x8x128xbf16> to vector<8x128xbf16>
    %c0_14 = arith.constant 0 : index
    %c0_15 = arith.constant 0 : index
    %c0_16 = arith.constant 0 : index
    %31 = vector.load %arg5[%c0_14, %c0_15, %c0_16] : memref<8x128x64xbf16, #tpu.memory_space<vmem>>, vector<1x128x64xbf16>
    %32 = vector.shape_cast %31 : vector<1x128x64xbf16> to vector<128x64xbf16>
    %cst_17 = arith.constant dense<0.000000e+00> : vector<8x64xf32>
    %33 = tpu.matmul %30, %32, %cst_17 {dimension_numbers = #tpu.dot_dimension_numbers<[1], [0], [0], [1], [0, 0, 1, 1], [], []>} : vector<8x128xbf16>, vector<128x64xbf16>, vector<8x64xf32> -> vector<8x64xf32>
    %34 = arith.addf %28, %33 : vector<8x64xf32>
    %35 = vector.extract_strided_slice %27 {offsets = [1, 0, 0], sizes = [1, 8, 128], strides = [1, 1, 1]} : vector<8x8x128xbf16> to vector<1x8x128xbf16>
    %36 = vector.shape_cast %35 : vector<1x8x128xbf16> to vector<8x128xbf16>
    %c1 = arith.constant 1 : index
    %c0_18 = arith.constant 0 : index
    %c0_19 = arith.constant 0 : index
    %37 = vector.load %arg5[%c1, %c0_18, %c0_19] : memref<8x128x64xbf16, #tpu.memory_space<vmem>>, vector<1x128x64xbf16>
    %38 = vector.shape_cast %37 : vector<1x128x64xbf16> to vector<128x64xbf16>
    %cst_20 = arith.constant dense<0.000000e+00> : vector<8x64xf32>
    %39 = tpu.matmul %36, %38, %cst_20 {dimension_numbers = #tpu.dot_dimension_numbers<[1], [0], [0], [1], [0, 0, 1, 1], [], []>} : vector<8x128xbf16>, vector<128x64xbf16>, vector<8x64xf32> -> vector<8x64xf32>
    %40 = arith.addf %34, %39 : vector<8x64xf32>
    %41 = vector.extract_strided_slice %27 {offsets = [2, 0, 0], sizes = [1, 8, 128], strides = [1, 1, 1]} : vector<8x8x128xbf16> to vector<1x8x128xbf16>
    %42 = vector.shape_cast %41 : vector<1x8x128xbf16> to vector<8x128xbf16>
    %c2 = arith.constant 2 : index
    %c0_21 = arith.constant 0 : index
    %c0_22 = arith.constant 0 : index
    %43 = vector.load %arg5[%c2, %c0_21, %c0_22] : memref<8x128x64xbf16, #tpu.memory_space<vmem>>, vector<1x128x64xbf16>
    %44 = vector.shape_cast %43 : vector<1x128x64xbf16> to vector<128x64xbf16>
    %cst_23 = arith.constant dense<0.000000e+00> : vector<8x64xf32>
    %45 = tpu.matmul %42, %44, %cst_23 {dimension_numbers = #tpu.dot_dimension_numbers<[1], [0], [0], [1], [0, 0, 1, 1], [], []>} : vector<8x128xbf16>, vector<128x64xbf16>, vector<8x64xf32> -> vector<8x64xf32>
    %46 = arith.addf %40, %45 : vector<8x64xf32>
    %47 = vector.extract_strided_slice %27 {offsets = [3, 0, 0], sizes = [1, 8, 128], strides = [1, 1, 1]} : vector<8x8x128xbf16> to vector<1x8x128xbf16>
    %48 = vector.shape_cast %47 : vector<1x8x128xbf16> to vector<8x128xbf16>
    %c3 = arith.constant 3 : index
    %c0_24 = arith.constant 0 : index
    %c0_25 = arith.constant 0 : index
    %49 = vector.load %arg5[%c3, %c0_24, %c0_25] : memref<8x128x64xbf16, #tpu.memory_space<vmem>>, vector<1x128x64xbf16>
    %50 = vector.shape_cast %49 : vector<1x128x64xbf16> to vector<128x64xbf16>
    %cst_26 = arith.constant dense<0.000000e+00> : vector<8x64xf32>
    %51 = tpu.matmul %48, %50, %cst_26 {dimension_numbers = #tpu.dot_dimension_numbers<[1], [0], [0], [1], [0, 0, 1, 1], [], []>} : vector<8x128xbf16>, vector<128x64xbf16>, vector<8x64xf32> -> vector<8x64xf32>
    %52 = arith.addf %46, %51 : vector<8x64xf32>
    %53 = vector.extract_strided_slice %27 {offsets = [4, 0, 0], sizes = [1, 8, 128], strides = [1, 1, 1]} : vector<8x8x128xbf16> to vector<1x8x128xbf16>
    %54 = vector.shape_cast %53 : vector<1x8x128xbf16> to vector<8x128xbf16>
    %c4 = arith.constant 4 : index
    %c0_27 = arith.constant 0 : index
    %c0_28 = arith.constant 0 : index
    %55 = vector.load %arg5[%c4, %c0_27, %c0_28] : memref<8x128x64xbf16, #tpu.memory_space<vmem>>, vector<1x128x64xbf16>
    %56 = vector.shape_cast %55 : vector<1x128x64xbf16> to vector<128x64xbf16>
    %cst_29 = arith.constant dense<0.000000e+00> : vector<8x64xf32>
    %57 = tpu.matmul %54, %56, %cst_29 {dimension_numbers = #tpu.dot_dimension_numbers<[1], [0], [0], [1], [0, 0, 1, 1], [], []>} : vector<8x128xbf16>, vector<128x64xbf16>, vector<8x64xf32> -> vector<8x64xf32>
    %58 = arith.addf %52, %57 : vector<8x64xf32>
    %59 = vector.extract_strided_slice %27 {offsets = [5, 0, 0], sizes = [1, 8, 128], strides = [1, 1, 1]} : vector<8x8x128xbf16> to vector<1x8x128xbf16>
    %60 = vector.shape_cast %59 : vector<1x8x128xbf16> to vector<8x128xbf16>
    %c5 = arith.constant 5 : index
    %c0_30 = arith.constant 0 : index
    %c0_31 = arith.constant 0 : index
    %61 = vector.load %arg5[%c5, %c0_30, %c0_31] : memref<8x128x64xbf16, #tpu.memory_space<vmem>>, vector<1x128x64xbf16>
    %62 = vector.shape_cast %61 : vector<1x128x64xbf16> to vector<128x64xbf16>
    %cst_32 = arith.constant dense<0.000000e+00> : vector<8x64xf32>
    %63 = tpu.matmul %60, %62, %cst_32 {dimension_numbers = #tpu.dot_dimension_numbers<[1], [0], [0], [1], [0, 0, 1, 1], [], []>} : vector<8x128xbf16>, vector<128x64xbf16>, vector<8x64xf32> -> vector<8x64xf32>
    %64 = arith.addf %58, %63 : vector<8x64xf32>
    %65 = vector.extract_strided_slice %27 {offsets = [6, 0, 0], sizes = [1, 8, 128], strides = [1, 1, 1]} : vector<8x8x128xbf16> to vector<1x8x128xbf16>
    %66 = vector.shape_cast %65 : vector<1x8x128xbf16> to vector<8x128xbf16>
    %c6 = arith.constant 6 : index
    %c0_33 = arith.constant 0 : index
    %c0_34 = arith.constant 0 : index
    %67 = vector.load %arg5[%c6, %c0_33, %c0_34] : memref<8x128x64xbf16, #tpu.memory_space<vmem>>, vector<1x128x64xbf16>
    %68 = vector.shape_cast %67 : vector<1x128x64xbf16> to vector<128x64xbf16>
    %cst_35 = arith.constant dense<0.000000e+00> : vector<8x64xf32>
    %69 = tpu.matmul %66, %68, %cst_35 {dimension_numbers = #tpu.dot_dimension_numbers<[1], [0], [0], [1], [0, 0, 1, 1], [], []>} : vector<8x128xbf16>, vector<128x64xbf16>, vector<8x64xf32> -> vector<8x64xf32>
    %70 = arith.addf %64, %69 : vector<8x64xf32>
    %71 = vector.extract_strided_slice %27 {offsets = [7, 0, 0], sizes = [1, 8, 128], strides = [1, 1, 1]} : vector<8x8x128xbf16> to vector<1x8x128xbf16>
    %72 = vector.shape_cast %71 : vector<1x8x128xbf16> to vector<8x128xbf16>
    %c7 = arith.constant 7 : index
    %c0_36 = arith.constant 0 : index
    %c0_37 = arith.constant 0 : index
    %73 = vector.load %arg5[%c7, %c0_36, %c0_37] : memref<8x128x64xbf16, #tpu.memory_space<vmem>>, vector<1x128x64xbf16>
    %74 = vector.shape_cast %73 : vector<1x128x64xbf16> to vector<128x64xbf16>
    %cst_38 = arith.constant dense<0.000000e+00> : vector<8x64xf32>
    %75 = tpu.matmul %72, %74, %cst_38 {dimension_numbers = #tpu.dot_dimension_numbers<[1], [0], [0], [1], [0, 0, 1, 1], [], []>} : vector<8x128xbf16>, vector<128x64xbf16>, vector<8x64xf32> -> vector<8x64xf32>
    %76 = arith.addf %70, %75 : vector<8x64xf32>
    %c0_39 = arith.constant 0 : index
    %c0_40 = arith.constant 0 : index
    %77 = vector.load %arg6[%c0_39, %c0_40] : memref<1x64xf32, #tpu.memory_space<vmem>>, vector<1x64xf32>
    %78 = vector.shape_cast %77 : vector<1x64xf32> to vector<64xf32>
    %79 = vector.shape_cast %78 : vector<64xf32> to vector<1x64xf32>
    %80 = vector.broadcast %79 : vector<1x64xf32> to vector<8x64xf32>
    %81 = arith.addf %76, %80 : vector<8x64xf32>
    %c0_41 = arith.constant 0 : index
    %c0_42 = arith.constant 0 : index
    %c0_43 = arith.constant 0 : index
    %82 = vector.load %arg7[%c0_41, %c0_42, %c0_43] : memref<1x8x64xf32, #tpu.memory_space<vmem>>, vector<1x8x64xf32>
    %83 = vector.shape_cast %82 : vector<1x8x64xf32> to vector<8x64xf32>
    %84 = vector.shape_cast %81 : vector<8x64xf32> to vector<1x8x64xf32>
    tpu.vector_store %arg7[%c0_41, %c0_42, %c0_43], %84 {strides = array<i32>} : memref<1x8x64xf32, #tpu.memory_space<vmem>>, vector<1x8x64xf32>,
    return
  }
  func.func @transform_0(%arg0: i32, %arg1: i32) -> (i32, i32, i32) {
    %c0_i32 = arith.constant 0 : i32
    %c0_i32_0 = arith.constant 0 : i32
    %c0_i32_1 = arith.constant 0 : i32
    return %arg0, %c0_i32, %c0_i32_0 : i32, i32, i32
  }
  func.func @transform_1(%arg0: i32, %arg1: i32) -> (i32, i32) {
    %c0_i32 = arith.constant 0 : i32
    %c0_i32_0 = arith.constant 0 : i32
    %c0_i32_1 = arith.constant 0 : i32
    return %c0_i32, %c0_i32_0 : i32, i32
  }
  func.func @transform_2(%arg0: i32, %arg1: i32) -> (i32, i32) {
    %c0_i32 = arith.constant 0 : i32
    %c0_i32_0 = arith.constant 0 : i32
    %c0_i32_1 = arith.constant 0 : i32
    return %c0_i32, %c0_i32_0 : i32, i32
  }
  func.func @transform_3(%arg0: i32, %arg1: i32) -> (i32, i32, i32) {
    %c0_i32 = arith.constant 0 : i32
    %c0_i32_0 = arith.constant 0 : i32
    %c0_i32_1 = arith.constant 0 : i32
    %c0_i32_2 = arith.constant 0 : i32
    return %c0_i32, %c0_i32_0, %c0_i32_1 : i32, i32, i32
  }
  func.func @transform_4(%arg0: i32, %arg1: i32) -> (i32, i32) {
    %c0_i32 = arith.constant 0 : i32
    %c0_i32_0 = arith.constant 0 : i32
    %c0_i32_1 = arith.constant 0 : i32
    return %c0_i32, %c0_i32_0 : i32, i32
  }
  func.func @transform_5(%arg0: i32, %arg1: i32) -> (i32, i32, i32) {
    %c0_i32 = arith.constant 0 : i32
    %c0_i32_0 = arith.constant 0 : i32
    return %arg0, %arg1, %c0_i32 : i32, i32, i32
  }
}

module attributes {stable_mosaic.version = 11 : i64} {
  func.func @attention_kernel(%arg0: i32, %arg1: i32, %arg2: memref<1x16x64xbf16, #tpu.memory_space<vmem>>, %arg3: memref<64x64xbf16, #tpu.memory_space<vmem>>, %arg4: memref<64x1088xbf16, #tpu.memory_space<vmem>>, %arg5: memref<8x128x64xbf16, #tpu.memory_space<vmem>>, %arg6: memref<1x64xf32, #tpu.memory_space<vmem>>, %arg7: memref<1x8x64xf32, #tpu.memory_space<vmem>>, %arg8: memref<8x8x16xbf16, #tpu.memory_space<vmem>>, %arg9: memref<8x16x128xbf16, #tpu.memory_space<vmem>>) attributes {dimension_semantics = [#tpu.dimension_semantics<parallel>, #tpu.dimension_semantics<arbitrary>], iteration_bounds = array<i64: 2, 2>, scalar_prefetch = 0 : i64, scratch_operands = 2 : i64, tpu.core_type = #tpu.core_type<tc>, window_params = [{transform_indices = @transform_0, window_bounds = array<i64: 1, 16, 64>}, {pipeline_mode = #tpu.pipeline_mode<synchronous>, transform_indices = @transform_1, window_bounds = array<i64: 64, 64>}, {pipeline_mode = #tpu.pipeline_mode<synchronous>, transform_indices = @transform_2, window_bounds = array<i64: 64, 1088>}, {pipeline_mode = #tpu.pipeline_mode<synchronous>, transform_indices = @transform_3, window_bounds = array<i64: 8, 128, 64>}, {pipeline_mode = #tpu.pipeline_mode<synchronous>, transform_indices = @transform_4, window_bounds = array<i64: 1, 64>}, {transform_indices = @transform_5, window_bounds = array<i64: 1, 8, 64>}]} {
    %c0_i32 = arith.constant 0 : i32
    %0 = arith.cmpi eq, %arg1, %c0_i32 : i32
    %1 = arith.extui %0 : i1 to i32
    %c0_i32_0 = arith.constant 0 : i32
    %2 = arith.cmpi ne, %1, %c0_i32_0 : i32
    scf.if %2 {
      %c0_44 = arith.constant 0 : index
      %c0_45 = arith.constant 0 : index
      %c0_46 = arith.constant 0 : index
      %85 = vector.load %arg2[%c0_44, %c0_45, %c0_46] : memref<1x16x64xbf16, #tpu.memory_space<vmem>>, vector<1x8x64xbf16>
      %86 = vector.shape_cast %85 : vector<1x8x64xbf16> to vector<8x64xbf16>
      %c0_47 = arith.constant 0 : index
      %c0_48 = arith.constant 0 : index
      %87 = vector.load %arg4[%c0_47, %c0_48] : memref<64x1088xbf16, #tpu.memory_space<vmem>>, vector<64x1088xbf16>
      %cst_49 = arith.constant dense<0.000000e+00> : vector<8x1088xf32>
      %88 = tpu.matmul %86, %87, %cst_49 {dimension_numbers = #tpu.dot_dimension_numbers<[1], [0], [0], [1], [0, 0, 1, 1], [], []>} : vector<8x64xbf16>, vector<64x1088xbf16>, vector<8x1088xf32> -> vector<8x1088xf32>
      %89 = vector.extract_strided_slice %88 {offsets = [0, 0], sizes = [8, 64], strides = [1, 1]} : vector<8x1088xf32> to vector<8x64xf32>
      %90 = vector.extract_strided_slice %88 {offsets = [0, 64], sizes = [8, 1024], strides = [1, 1]} : vector<8x1088xf32> to vector<8x1024xf32>
      %91 = vector.shape_cast %89 : vector<8x64xf32> to vector<8x8x8xf32>
      %92 = tpu.transpose %91, [1, 2, 0] : vector<8x8x8xf32> -> vector<8x8x8xf32>
      %93 = arith.truncf %92 : vector<8x8x8xf32> to vector<8x8x8xbf16>
      %c0_50 = arith.constant 0 : index
      %c0_51 = arith.constant 0 : index
      %c0_52 = arith.constant 0 : index
      %94 = vector.load %arg8[%c0_50, %c0_51, %c0_52] : memref<8x8x16xbf16, #tpu.memory_space<vmem>>, vector<8x8x8xbf16>
      tpu.vector_store %arg8[%c0_50, %c0_51, %c0_52], %93 {strides = array<i32>} : memref<8x8x16xbf16, #tpu.memory_space<vmem>>, vector<8x8x8xbf16>,
      %95 = vector.shape_cast %90 : vector<8x1024xf32> to vector<8x8x128xf32>
      %96 = tpu.transpose %95, [1, 0, 2] : vector<8x8x128xf32> -> vector<8x8x128xf32>
      %97 = tpu.iota {dimensions = array<i32: 2>} : vector<8x8x128xi32>
      %c8_i32_53 = arith.constant 8 : i32
      %98 = vector.broadcast %c8_i32_53 : i32 to vector<8x8x128xi32>
      %99 = arith.cmpi eq, %97, %98 : vector<8x8x128xi32>
      %cst_54 = arith.constant 1.000000e+00 : f32
      %100 = vector.broadcast %cst_54 : f32 to vector<8x8x128xf32>
      %101 = arith.select %99, %100, %96 : vector<8x8x128xi1>, vector<8x8x128xf32>
      %102 = arith.truncf %101 : vector<8x8x128xf32> to vector<8x8x128xbf16>
      %c0_55 = arith.constant 0 : index
      %c0_56 = arith.constant 0 : index
      %c0_57 = arith.constant 0 : index
      %103 = vector.load %arg9[%c0_55, %c0_56, %c0_57] : memref<8x16x128xbf16, #tpu.memory_space<vmem>>, vector<8x8x128xbf16>
      tpu.vector_store %arg9[%c0_55, %c0_56, %c0_57], %102 {strides = array<i32>} : memref<8x16x128xbf16, #tpu.memory_space<vmem>>, vector<8x8x128xbf16>,
      %c0_58 = arith.constant 0 : index
      %c8 = arith.constant 8 : index
      %c0_59 = arith.constant 0 : index
      %104 = vector.load %arg2[%c0_58, %c8, %c0_59] : memref<1x16x64xbf16, #tpu.memory_space<vmem>>, vector<1x8x64xbf16>
      %105 = vector.shape_cast %104 : vector<1x8x64xbf16> to vector<8x64xbf16>
      %c0_60 = arith.constant 0 : index
      %c0_61 = arith.constant 0 : index
      %106 = vector.load %arg4[%c0_60, %c0_61] : memref<64x1088xbf16, #tpu.memory_space<vmem>>, vector<64x1088xbf16>
      %cst_62 = arith.constant dense<0.000000e+00> : vector<8x1088xf32>
      %107 = tpu.matmul %105, %106, %cst_62 {dimension_numbers = #tpu.dot_dimension_numbers<[1], [0], [0], [1], [0, 0, 1, 1], [], []>} : vector<8x64xbf16>, vector<64x1088xbf16>, vector<8x1088xf32> -> vector<8x1088xf32>
      %108 = vector.extract_strided_slice %107 {offsets = [0, 0], sizes = [8, 64], strides = [1, 1]} : vector<8x1088xf32> to vector<8x64xf32>
      %109 = vector.extract_strided_slice %107 {offsets = [0, 64], sizes = [8, 1024], strides = [1, 1]} : vector<8x1088xf32> to vector<8x1024xf32>
      %110 = vector.shape_cast %108 : vector<8x64xf32> to vector<8x8x8xf32>
      %111 = tpu.transpose %110, [1, 2, 0] : vector<8x8x8xf32> -> vector<8x8x8xf32>
      %112 = arith.truncf %111 : vector<8x8x8xf32> to vector<8x8x8xbf16>
      %c0_63 = arith.constant 0 : index
      %c0_64 = arith.constant 0 : index
      %c8_65 = arith.constant 8 : index
      %113 = vector.load %arg8[%c0_63, %c0_64, %c8_65] : memref<8x8x16xbf16, #tpu.memory_space<vmem>>, vector<8x8x8xbf16>
      tpu.vector_store %arg8[%c0_63, %c0_64, %c8_65], %112 {strides = array<i32>} : memref<8x8x16xbf16, #tpu.memory_space<vmem>>, vector<8x8x8xbf16>,
      %114 = vector.shape_cast %109 : vector<8x1024xf32> to vector<8x8x128xf32>
      %115 = tpu.transpose %114, [1, 0, 2] : vector<8x8x128xf32> -> vector<8x8x128xf32>
      %116 = tpu.iota {dimensions = array<i32: 2>} : vector<8x8x128xi32>
      %c8_i32_66 = arith.constant 8 : i32
      %117 = vector.broadcast %c8_i32_66 : i32 to vector<8x8x128xi32>
      %118 = arith.cmpi eq, %116, %117 : vector<8x8x128xi32>
      %cst_67 = arith.constant 1.000000e+00 : f32
      %119 = vector.broadcast %cst_67 : f32 to vector<8x8x128xf32>
      %120 = arith.select %118, %119, %115 : vector<8x8x128xi1>, vector<8x8x128xf32>
      %121 = arith.truncf %120 : vector<8x8x128xf32> to vector<8x8x128xbf16>
      %c0_68 = arith.constant 0 : index
      %c8_69 = arith.constant 8 : index
      %c0_70 = arith.constant 0 : index
      %122 = vector.load %arg9[%c0_68, %c8_69, %c0_70] : memref<8x16x128xbf16, #tpu.memory_space<vmem>>, vector<8x8x128xbf16>
      tpu.vector_store %arg9[%c0_68, %c8_69, %c0_70], %121 {strides = array<i32>} : memref<8x16x128xbf16, #tpu.memory_space<vmem>>, vector<8x8x128xbf16>,
    } else {
    }
    %c8_i32 = arith.constant 8 : i32
    %3 = arith.muli %arg1, %c8_i32 : i32
    %4 = tpu.assume_multiple %3, 8 : i32
    %c0 = arith.constant 0 : index
    %5 = arith.index_cast %4 : i32 to index
    %c0_1 = arith.constant 0 : index
    %6 = vector.load %arg2[%c0, %5, %c0_1] : memref<1x16x64xbf16, #tpu.memory_space<vmem>>, vector<1x8x64xbf16>
    %7 = vector.shape_cast %6 : vector<1x8x64xbf16> to vector<8x64xbf16>
    %c0_2 = arith.constant 0 : index
    %c0_3 = arith.constant 0 : index
    %8 = vector.load %arg3[%c0_2, %c0_3] : memref<64x64xbf16, #tpu.memory_space<vmem>>, vector<64x64xbf16>
    %cst = arith.constant dense<0.000000e+00> : vector<8x64xf32>
    %9 = tpu.matmul %7, %8, %cst {dimension_numbers = #tpu.dot_dimension_numbers<[1], [0], [0], [1], [0, 0, 1, 1], [], []>} : vector<8x64xbf16>, vector<64x64xbf16>, vector<8x64xf32> -> vector<8x64xf32>
    %10 = vector.shape_cast %9 : vector<8x64xf32> to vector<8x8x8xf32>
    %11 = tpu.transpose %10, [1, 0, 2] : vector<8x8x8xf32> -> vector<8x8x8xf32>
    %12 = arith.truncf %11 : vector<8x8x8xf32> to vector<8x8x8xbf16>
    %c0_4 = arith.constant 0 : index
    %c0_5 = arith.constant 0 : index
    %c0_6 = arith.constant 0 : index
    %13 = vector.load %arg8[%c0_4, %c0_5, %c0_6] : memref<8x8x16xbf16, #tpu.memory_space<vmem>>, vector<8x8x16xbf16>
    "tpu.trace_start"() <{level = 10 : i32, message = "hqd,hdk->hqk"}> : () -> ()
    %cst_7 = arith.constant dense<0.000000e+00> : vector<8x8x16xf32>
    %14 = tpu.matmul %12, %13, %cst_7 {dimension_numbers = #tpu.dot_dimension_numbers<[2], [1], [1], [2], [0, 0, 0, 1, 1, 2], [0], [0]>} : vector<8x8x8xbf16>, vector<8x8x16xbf16>, vector<8x8x16xf32> -> vector<8x8x16xf32>
    "tpu.trace_stop"() : () -> ()
    %cst_8 = arith.constant dense<0xFF800000> : vector<8x8xf32>
    %15 = vector.multi_reduction <maximumf>, %14, %cst_8 [2] : vector<8x8x16xf32> to vector<8x8xf32>
    %16 = vector.shape_cast %15 : vector<8x8xf32> to vector<8x8x1xf32>
    %17 = vector.broadcast %16 : vector<8x8x1xf32> to vector<8x8x16xf32>
    %18 = arith.subf %14, %17 : vector<8x8x16xf32>
    %19 = arith.truncf %18 : vector<8x8x16xf32> to vector<8x8x16xbf16>
    %20 = math.exp %19 : vector<8x8x16xbf16>
    %c0_9 = arith.constant 0 : index
    %c0_10 = arith.constant 0 : index
    %c0_11 = arith.constant 0 : index
    %21 = vector.load %arg9[%c0_9, %c0_10, %c0_11] : memref<8x16x128xbf16, #tpu.memory_space<vmem>>, vector<8x16x128xbf16>
    "tpu.trace_start"() <{level = 10 : i32, message = "hqk,hkp->hqp"}> : () -> ()
    %cst_12 = arith.constant dense<0.000000e+00> : vector<8x8x128xf32>
    %22 = tpu.matmul %20, %21, %cst_12 {dimension_numbers = #tpu.dot_dimension_numbers<[2], [1], [1], [2], [0, 0, 0, 1, 1, 2], [0], [0]>} : vector<8x8x16xbf16>, vector<8x16x128xbf16>, vector<8x8x128xf32> -> vector<8x8x128xf32>
    "tpu.trace_stop"() : () -> ()
    %23 = vector.extract_strided_slice %22 {offsets = [0, 0, 8], sizes = [8, 8, 1], strides = [1, 1, 1]} : vector<8x8x128xf32> to vector<8x8x1xf32>
    %24 = tpu.reciprocal %23 {approx = true} : vector<8x8x1xf32> -> vector<8x8x1xf32>
    %25 = vector.broadcast %24 : vector<8x8x1xf32> to vector<8x8x128xf32>
    %26 = arith.mulf %22, %25 : vector<8x8x128xf32>
    %27 = arith.truncf %26 : vector<8x8x128xf32> to vector<8x8x128xbf16>
    %cst_13 = arith.constant 0.000000e+00 : f32
    %28 = vector.broadcast %cst_13 : f32 to vector<8x64xf32>
    %29 = vector.extract_strided_slice %27 {offsets = [0, 0, 0], sizes = [1, 8, 128], strides = [1, 1, 1]} : vector<8x8x128xbf16> to vector<1x8x128xbf16>
    %30 = vector.shape_cast %29 : vector<1x8x128xbf16> to vector<8x128xbf16>
    %c0_14 = arith.constant 0 : index
    %c0_15 = arith.constant 0 : index
    %c0_16 = arith.constant 0 : index
    %31 = vector.load %arg5[%c0_14, %c0_15, %c0_16] : memref<8x128x64xbf16, #tpu.memory_space<vmem>>, vector<1x128x64xbf16>
    %32 = vector.shape_cast %31 : vector<1x128x64xbf16> to vector<128x64xbf16>
    %cst_17 = arith.constant dense<0.000000e+00> : vector<8x64xf32>
    %33 = tpu.matmul %30, %32, %cst_17 {dimension_numbers = #tpu.dot_dimension_numbers<[1], [0], [0], [1], [0, 0, 1, 1], [], []>} : vector<8x128xbf16>, vector<128x64xbf16>, vector<8x64xf32> -> vector<8x64xf32>
    %34 = arith.addf %28, %33 : vector<8x64xf32>
    %35 = vector.extract_strided_slice %27 {offsets = [1, 0, 0], sizes = [1, 8, 128], strides = [1, 1, 1]} : vector<8x8x128xbf16> to vector<1x8x128xbf16>
    %36 = vector.shape_cast %35 : vector<1x8x128xbf16> to vector<8x128xbf16>
    %c1 = arith.constant 1 : index
    %c0_18 = arith.constant 0 : index
    %c0_19 = arith.constant 0 : index
    %37 = vector.load %arg5[%c1, %c0_18, %c0_19] : memref<8x128x64xbf16, #tpu.memory_space<vmem>>, vector<1x128x64xbf16>
    %38 = vector.shape_cast %37 : vector<1x128x64xbf16> to vector<128x64xbf16>
    %cst_20 = arith.constant dense<0.000000e+00> : vector<8x64xf32>
    %39 = tpu.matmul %36, %38, %cst_20 {dimension_numbers = #tpu.dot_dimension_numbers<[1], [0], [0], [1], [0, 0, 1, 1], [], []>} : vector<8x128xbf16>, vector<128x64xbf16>, vector<8x64xf32> -> vector<8x64xf32>
    %40 = arith.addf %34, %39 : vector<8x64xf32>
    %41 = vector.extract_strided_slice %27 {offsets = [2, 0, 0], sizes = [1, 8, 128], strides = [1, 1, 1]} : vector<8x8x128xbf16> to vector<1x8x128xbf16>
    %42 = vector.shape_cast %41 : vector<1x8x128xbf16> to vector<8x128xbf16>
    %c2 = arith.constant 2 : index
    %c0_21 = arith.constant 0 : index
    %c0_22 = arith.constant 0 : index
    %43 = vector.load %arg5[%c2, %c0_21, %c0_22] : memref<8x128x64xbf16, #tpu.memory_space<vmem>>, vector<1x128x64xbf16>
    %44 = vector.shape_cast %43 : vector<1x128x64xbf16> to vector<128x64xbf16>
    %cst_23 = arith.constant dense<0.000000e+00> : vector<8x64xf32>
    %45 = tpu.matmul %42, %44, %cst_23 {dimension_numbers = #tpu.dot_dimension_numbers<[1], [0], [0], [1], [0, 0, 1, 1], [], []>} : vector<8x128xbf16>, vector<128x64xbf16>, vector<8x64xf32> -> vector<8x64xf32>
    %46 = arith.addf %40, %45 : vector<8x64xf32>
    %47 = vector.extract_strided_slice %27 {offsets = [3, 0, 0], sizes = [1, 8, 128], strides = [1, 1, 1]} : vector<8x8x128xbf16> to vector<1x8x128xbf16>
    %48 = vector.shape_cast %47 : vector<1x8x128xbf16> to vector<8x128xbf16>
    %c3 = arith.constant 3 : index
    %c0_24 = arith.constant 0 : index
    %c0_25 = arith.constant 0 : index
    %49 = vector.load %arg5[%c3, %c0_24, %c0_25] : memref<8x128x64xbf16, #tpu.memory_space<vmem>>, vector<1x128x64xbf16>
    %50 = vector.shape_cast %49 : vector<1x128x64xbf16> to vector<128x64xbf16>
    %cst_26 = arith.constant dense<0.000000e+00> : vector<8x64xf32>
    %51 = tpu.matmul %48, %50, %cst_26 {dimension_numbers = #tpu.dot_dimension_numbers<[1], [0], [0], [1], [0, 0, 1, 1], [], []>} : vector<8x128xbf16>, vector<128x64xbf16>, vector<8x64xf32> -> vector<8x64xf32>
    %52 = arith.addf %46, %51 : vector<8x64xf32>
    %53 = vector.extract_strided_slice %27 {offsets = [4, 0, 0], sizes = [1, 8, 128], strides = [1, 1, 1]} : vector<8x8x128xbf16> to vector<1x8x128xbf16>
    %54 = vector.shape_cast %53 : vector<1x8x128xbf16> to vector<8x128xbf16>
    %c4 = arith.constant 4 : index
    %c0_27 = arith.constant 0 : index
    %c0_28 = arith.constant 0 : index
    %55 = vector.load %arg5[%c4, %c0_27, %c0_28] : memref<8x128x64xbf16, #tpu.memory_space<vmem>>, vector<1x128x64xbf16>
    %56 = vector.shape_cast %55 : vector<1x128x64xbf16> to vector<128x64xbf16>
    %cst_29 = arith.constant dense<0.000000e+00> : vector<8x64xf32>
    %57 = tpu.matmul %54, %56, %cst_29 {dimension_numbers = #tpu.dot_dimension_numbers<[1], [0], [0], [1], [0, 0, 1, 1], [], []>} : vector<8x128xbf16>, vector<128x64xbf16>, vector<8x64xf32> -> vector<8x64xf32>
    %58 = arith.addf %52, %57 : vector<8x64xf32>
    %59 = vector.extract_strided_slice %27 {offsets = [5, 0, 0], sizes = [1, 8, 128], strides = [1, 1, 1]} : vector<8x8x128xbf16> to vector<1x8x128xbf16>
    %60 = vector.shape_cast %59 : vector<1x8x128xbf16> to vector<8x128xbf16>
    %c5 = arith.constant 5 : index
    %c0_30 = arith.constant 0 : index
    %c0_31 = arith.constant 0 : index
    %61 = vector.load %arg5[%c5, %c0_30, %c0_31] : memref<8x128x64xbf16, #tpu.memory_space<vmem>>, vector<1x128x64xbf16>
    %62 = vector.shape_cast %61 : vector<1x128x64xbf16> to vector<128x64xbf16>
    %cst_32 = arith.constant dense<0.000000e+00> : vector<8x64xf32>
    %63 = tpu.matmul %60, %62, %cst_32 {dimension_numbers = #tpu.dot_dimension_numbers<[1], [0], [0], [1], [0, 0, 1, 1], [], []>} : vector<8x128xbf16>, vector<128x64xbf16>, vector<8x64xf32> -> vector<8x64xf32>
    %64 = arith.addf %58, %63 : vector<8x64xf32>
    %65 = vector.extract_strided_slice %27 {offsets = [6, 0, 0], sizes = [1, 8, 128], strides = [1, 1, 1]} : vector<8x8x128xbf16> to vector<1x8x128xbf16>
    %66 = vector.shape_cast %65 : vector<1x8x128xbf16> to vector<8x128xbf16>
    %c6 = arith.constant 6 : index
    %c0_33 = arith.constant 0 : index
    %c0_34 = arith.constant 0 : index
    %67 = vector.load %arg5[%c6, %c0_33, %c0_34] : memref<8x128x64xbf16, #tpu.memory_space<vmem>>, vector<1x128x64xbf16>
    %68 = vector.shape_cast %67 : vector<1x128x64xbf16> to vector<128x64xbf16>
    %cst_35 = arith.constant dense<0.000000e+00> : vector<8x64xf32>
    %69 = tpu.matmul %66, %68, %cst_35 {dimension_numbers = #tpu.dot_dimension_numbers<[1], [0], [0], [1], [0, 0, 1, 1], [], []>} : vector<8x128xbf16>, vector<128x64xbf16>, vector<8x64xf32> -> vector<8x64xf32>
    %70 = arith.addf %64, %69 : vector<8x64xf32>
    %71 = vector.extract_strided_slice %27 {offsets = [7, 0, 0], sizes = [1, 8, 128], strides = [1, 1, 1]} : vector<8x8x128xbf16> to vector<1x8x128xbf16>
    %72 = vector.shape_cast %71 : vector<1x8x128xbf16> to vector<8x128xbf16>
    %c7 = arith.constant 7 : index
    %c0_36 = arith.constant 0 : index
    %c0_37 = arith.constant 0 : index
    %73 = vector.load %arg5[%c7, %c0_36, %c0_37] : memref<8x128x64xbf16, #tpu.memory_space<vmem>>, vector<1x128x64xbf16>
    %74 = vector.shape_cast %73 : vector<1x128x64xbf16> to vector<128x64xbf16>
    %cst_38 = arith.constant dense<0.000000e+00> : vector<8x64xf32>
    %75 = tpu.matmul %72, %74, %cst_38 {dimension_numbers = #tpu.dot_dimension_numbers<[1], [0], [0], [1], [0, 0, 1, 1], [], []>} : vector<8x128xbf16>, vector<128x64xbf16>, vector<8x64xf32> -> vector<8x64xf32>
    %76 = arith.addf %70, %75 : vector<8x64xf32>
    %c0_39 = arith.constant 0 : index
    %c0_40 = arith.constant 0 : index
    %77 = vector.load %arg6[%c0_39, %c0_40] : memref<1x64xf32, #tpu.memory_space<vmem>>, vector<1x64xf32>
    %78 = vector.shape_cast %77 : vector<1x64xf32> to vector<64xf32>
    %79 = vector.shape_cast %78 : vector<64xf32> to vector<1x64xf32>
    %80 = vector.broadcast %79 : vector<1x64xf32> to vector<8x64xf32>
    %81 = arith.addf %76, %80 : vector<8x64xf32>
    %c0_41 = arith.constant 0 : index
    %c0_42 = arith.constant 0 : index
    %c0_43 = arith.constant 0 : index
    %82 = vector.load %arg7[%c0_41, %c0_42, %c0_43] : memref<1x8x64xf32, #tpu.memory_space<vmem>>, vector<1x8x64xf32>
    %83 = vector.shape_cast %82 : vector<1x8x64xf32> to vector<8x64xf32>
    %84 = vector.shape_cast %81 : vector<8x64xf32> to vector<1x8x64xf32>
    tpu.vector_store %arg7[%c0_41, %c0_42, %c0_43], %84 {strides = array<i32>} : memref<1x8x64xf32, #tpu.memory_space<vmem>>, vector<1x8x64xf32>,
    return
  }
  func.func @transform_0(%arg0: i32, %arg1: i32) -> (i32, i32, i32) {
    %c0_i32 = arith.constant 0 : i32
    %c0_i32_0 = arith.constant 0 : i32
    %c0_i32_1 = arith.constant 0 : i32
    return %arg0, %c0_i32, %c0_i32_0 : i32, i32, i32
  }
  func.func @transform_1(%arg0: i32, %arg1: i32) -> (i32, i32) {
    %c0_i32 = arith.constant 0 : i32
    %c0_i32_0 = arith.constant 0 : i32
    %c0_i32_1 = arith.constant 0 : i32
    return %c0_i32, %c0_i32_0 : i32, i32
  }
  func.func @transform_2(%arg0: i32, %arg1: i32) -> (i32, i32) {
    %c0_i32 = arith.constant 0 : i32
    %c0_i32_0 = arith.constant 0 : i32
    %c0_i32_1 = arith.constant 0 : i32
    return %c0_i32, %c0_i32_0 : i32, i32
  }
  func.func @transform_3(%arg0: i32, %arg1: i32) -> (i32, i32, i32) {
    %c0_i32 = arith.constant 0 : i32
    %c0_i32_0 = arith.constant 0 : i32
    %c0_i32_1 = arith.constant 0 : i32
    %c0_i32_2 = arith.constant 0 : i32
    return %c0_i32, %c0_i32_0, %c0_i32_1 : i32, i32, i32
  }
  func.func @transform_4(%arg0: i32, %arg1: i32) -> (i32, i32) {
    %c0_i32 = arith.constant 0 : i32
    %c0_i32_0 = arith.constant 0 : i32
    %c0_i32_1 = arith.constant 0 : i32
    return %c0_i32, %c0_i32_0 : i32, i32
  }
  func.func @transform_5(%arg0: i32, %arg1: i32) -> (i32, i32, i32) {
    %c0_i32 = arith.constant 0 : i32
    %c0_i32_0 = arith.constant 0 : i32
    return %arg0, %arg1, %c0_i32 : i32, i32, i32
  }
}

</mosaic_0001>

<bundles_post_ra>
// kernel: tpu_custom_call.1
= control target key start
LH: loop header
LB: loop body
LE: loop exit
PB: predicated region body
PF: predicated region fallthrough
CT: control target
= control target key end

     0   :  { %s8012_s0 = inlined_call_operand.vmem [shape: bf16[2,16,64], index: 0, kind: input, shape index: {}]   ;;  %s8013_s1 = inlined_call_operand.vmem [shape: bf16[64,64], index: 1, kind: input, shape index: {}]   ;;  %s8014_s2 = inlined_call_operand.vmem [shape: bf16[64,1088], index: 2, kind: input, shape index: {}]   ;;  %s8015_s3 = inlined_call_operand.vmem [shape: bf16[8,128,64], index: 3, kind: input, shape index: {}]   ;;  %s8016_s4 = inlined_call_operand.vmem [shape: f32[1,64], index: 4, kind: input, shape index: {}]   ;;  %s8017_s5 = inlined_call_operand.hbm [shape: f32[2,16,64], index: 5, kind: output, shape index: {}]  }
   0x1   :  { %8020 = sst [smem:[#allocation8_spill]] %s8012_s0 }
   0x2   :  { %10 = vsyncpa [#allocation5], 0 }
   0x3   :  { %12 = vsyncpa [#allocation5 + $0x1], 0  ;;  %s6224_s18 = smov 0   ;;  %s6226_s19 = smov 0  }
   0x4   :  { %s6228_s20 = smov 0   ;;  %s6230_s21 = smov 0  }
   0x5   :  { %s6232_s22 = smov 0   ;;  %s6234_s23 = smov 0  }
   0x6   :  { %s6236_s24 = smov 0   ;;  %s6238_s25 = smov 0  }
   0x7 LB: > { %s4851_s26 = sadd.s32 4294967295, %s6171_s25   ;;  %s4852_s27 = sadd.s32 4294967294, %s6171_s25   ;;  %s6171_s25 = sphi %s6238_s25, %s18_s25   ;;  %s6167_s24 = sphi %s6236_s24, %s8035_s24   ;;  %s6163_s23 = sphi %s6234_s23, %s8034_s23   ;;  %s6159_s22 = sphi %s6232_s22, %s8033_s22   ;;  %s6155_s21 = sphi %s6230_s21, %s8032_s21   ;;  %s6151_s20 = sphi %s6228_s20, %s8031_s20   ;;  %s6147_s19 = sphi %s6226_s19, %s8030_s19   ;;  %s6143_s18 = sphi %s6224_s18, %s8029_s18  }
   0x8   : > { %s27_s28 = sadd.s32 1, %s6163_s23  ;;  %s30_s29 = sadd.s32 1, %s6167_s24 }
   0x9   : > { %p28_p0 = scmp.ge.s32.totalorder %s27_s28, 2  ;;  %p159_p1 = scmp.ne.s32.totalorder %s6151_s20, %s6147_s19 }
   0xa   : > { %p160_p2 = scmp.eq.s32.totalorder %s4851_s26, 3  ;;  %p165_p5 = scmp.ne.s32.totalorder %s6147_s19, %s6143_s18 }
   0xb   : > { %s8037_s28 = smov (%p28_p0, %s27_s28), 0  ;;  %s8039_s29 = smov (!%p28_p0, %s30_s29), %s6167_s24 }
   0xc   : > { %s145_s30 = ssub.s32 %s6163_s23, %s8037_s28  ;;  %p6275_p3 = por %p160_p2, %p159_p1 }
   0xd   : > { %p32_p4 = scmp.ge.s32.totalorder %s8039_s29, 2  ;;  %p166_p6 = scmp.eq.s32.totalorder %s4852_s27, 3 }
   0xe   : > { %p4855_p7 = scmp.ge.s32.totalorder %s6171_s25, 1  ;;  %p204_p9 = scmp.lt.s32.totalorder %s6171_s25, 5 }
   0xf   : > { %s8041_s29 = smov (%p32_p4, %s8039_s29), 0  ;;  %p6284_p8 = por %p166_p6, %p165_p5 }
  0x10   : > { %8022 = sst [smem:[#allocation7_spill]] %s8041_s29  ;;  %s144_s8 = ssub.s32 %s6167_s24, %s8041_s29 }
  0x11   : > { %s149_s9 = sadd.s32 1, %s6151_s20  ;;  %s146_s10 = sor.u32 %s145_s30, %s144_s8 }
  0x12   : > { %p205_p10 = pnand %p4855_p7, %p204_p9  ;;  %p147_p11 = scmp.eq.s32.totalorder %s146_s10, 0 }
  0x13   : > { %s8018_s12 = sand.u32 (!%p205_p10), 1, %s6147_s19   ;;  %p232_p12 = scmp.lt.s32.totalorder (!%p205_p10), %s6159_s22, 1 }
  0x14   : > { %s6293_s11 = scalar_select %p147_p11, %s6151_s20, %s149_s9  }
  0x15   : > { %208 = sbr.rel (%p205_p10) target bundleno = 1902 (0x76e), region = 40  ;;  %s6299_s13 = sshll.u32 (!%p205_p10), %s8018_s12, 3 }
  0x16   : > { %s8024_s0 = sld [smem:[#allocation8_spill]] (!%p205_p10)  ;;  %p4859_p13 = scmp.ne.s32.totalorder (!%p205_p10), %s6155_s21, 0 }
  0x1a   : > { %s233_s14 = scalar_select %p232_p12, %s6159_s22, 1 }
  0x1b   : > { %241 = sbr.rel (%p4859_p13) target bundleno = 917 (0x395), region = 44  ;;  %s6173_s9 = smov (!%p4859_p13), 64  }
  0x1c   : > { %s5606_s15 = sshll.u32 %s233_s14, 3  ;;  %s6174_s29 = smov (!%p4859_p13), 120  }
  0x1d   : > { %s6305_s26 = scalar_lea.vmem %s8024_s0, %s5606_s15  ;;  %s6175_s12 = smov (!%p4859_p13), 88  }
  0x1e   : > { %s6176_s10 = smov (!%p4859_p13), 104   ;;  %s6177_s14 = smov (!%p4859_p13), 112  }
  0x1f   : > { %s6178_s15 = smov (!%p4859_p13), 80   ;;  %s6179_s0 = smov (!%p4859_p13), 96  }
  0x20   : > { %v4970_v0 = vld [vmem:[%s8014_s2 + $0xd8] sm:$0xf]  ;;  %v5638_v1 = vld [vmem:[%s8014_s2 + $0xf8] sm:$0xf0]  ;;  %v4972_v4 = vld [vmem:[%s8014_s2 + $0xfc] sm:$0xf0] }
  0x21   : > { %v5634_v2 = vld [vmem:[%s8014_s2 + $0xdc] sm:$0xf]  ;;  %v4971_v3 = vor.u32 %v5638_v1, %v4970_v0  ;;  %v4978_v5 = vld [vmem:[%s8014_s2 + $0xe0] sm:$0xf]  ;;  %v5639_v6 = vld [vmem:[%s8014_s2 + $0x100] sm:$0xf0] }
  0x22   : > { %v4975_v7 = vor.u32 %v5634_v2, %v4972_v4  ;;  %v4979_v8 = vor.u32 %v5639_v6, %v4978_v5  ;;  %v5635_v9 = vld [vmem:[%s8014_s2 + $0xe4] sm:$0xf]  ;;  %v4980_v10 = vld [vmem:[%s8014_s2 + $0x104] sm:$0xf0]  ;;  %v4934_v11 = vld [vmem:[%s8014_s2 + $0x90] sm:$0xf] }
  0x23   : > { %475 = vmatpush.bf16.msra.mxu0 %v4971_v3  ;;  %v4983_v12 = vor.u32 %v5635_v9, %v4980_v10  ;;  %v5629_v13 = vld [vmem:[%s8014_s2 + $0xb0] sm:$0xf0]  ;;  %v4936_v15 = vld [vmem:[%s8014_s2 + $0xb4] sm:$0xf0]  ;;  %v5630_v19 = vld [vmem:[%s8014_s2 + $0xb8] sm:$0xf0] }
  0x24   : > { %v5625_v14 = vld [vmem:[%s8014_s2 + $0x94] sm:$0xf]  ;;  %488 = vmatpush.bf16.msra.mxu1 %v4975_v7  ;;  %501 = vmatpush.bf16.msra.mxu2 %v4979_v8  ;;  %v4935_v16 = vor.u32 %v5629_v13, %v4934_v11  ;;  %v4942_v18 = vld [vmem:[%s8014_s2 + $0x98] sm:$0xf]  ;;  %v5626_v20 = vld [vmem:[%s8014_s2 + $0x9c] sm:$0xf] }
  0x25   : > { %v4939_v17 = vor.u32 %v5625_v14, %v4936_v15  ;;  %514 = vmatpush.bf16.msra.mxu3 %v4983_v12  ;;  %v4943_v21 = vor.u32 %v5630_v19, %v4942_v18  ;;  %v4944_v22 = vld [vmem:[%s8014_s2 + $0xbc] sm:$0xf0]  ;;  %v4898_v23 = vld [vmem:[%s8014_s2 + $0x48] sm:$0xf]  ;;  %v5620_v24 = vld [vmem:[%s8014_s2 + $0x68] sm:$0xf0] }
  0x26   : > { %v4947_v25 = vor.u32 %v5626_v20, %v4944_v22  ;;  %v5616_v26 = vld [vmem:[%s8014_s2 + $0x4c] sm:$0xf]  ;;  %v4900_v27 = vld [vmem:[%s8014_s2 + $0x6c] sm:$0xf0]  ;;  %v4899_v29 = vor.u32 %v5620_v24, %v4898_v23  ;;  %v5621_v30 = vld [vmem:[%s8014_s2 + $0x70] sm:$0xf0] }
  0x27   : > { %v4906_v28 = vld [vmem:[%s8014_s2 + $0x50] sm:$0xf]  ;;  %476 = vmatpush.bf16.msra.mxu0 %v4935_v16  ;;  %v5617_v31 = vld [vmem:[%s8014_s2 + $0x54] sm:$0xf]  ;;  %v4908_v32 = vld [vmem:[%s8014_s2 + $0x74] sm:$0xf0]  ;;  %v4903_v33 = vor.u32 %v5616_v26, %v4900_v27 }
  0x28   : > { %489 = vmatpush.bf16.msra.mxu1 %v4939_v17  ;;  %502 = vmatpush.bf16.msra.mxu2 %v4943_v21  ;;  %v4907_v34 = vor.u32 %v5621_v30, %v4906_v28  ;;  %v4862_v35 = vld [vmem:[%s8014_s2] sm:$0xf]  ;;  %v5611_v36 = vld [vmem:[%s8014_s2 + $0x20] sm:$0xf0]  ;;  %v4911_v38 = vor.u32 %v5617_v31, %v4908_v32  ;;  %v4864_v39 = vld [vmem:[%s8014_s2 + $0x24] sm:$0xf0] }
  0x29   : > { %v5607_v37 = vld [vmem:[%s8014_s2 + $0x4] sm:$0xf]  ;;  %515 = vmatpush.bf16.msra.mxu3 %v4947_v25  ;;  %v4870_v40 = vld [vmem:[%s8014_s2 + $0x8] sm:$0xf]  ;;  %v5612_v41 = vld [vmem:[%s8014_s2 + $0x28] sm:$0xf0]  ;;  %v4863_v44 = vor.u32 %v5611_v36, %v4862_v35 }
  0x2a   : > { %v5608_v42 = vld [vmem:[%s8014_s2 + $0xc] sm:$0xf]  ;;  %v4872_v43 = vld [vmem:[%s8014_s2 + $0x2c] sm:$0xf0]  ;;  %v4867_v47 = vor.u32 %v5607_v37, %v4864_v39  ;;  %v4871_v48 = vor.u32 %v5612_v41, %v4870_v40  ;;  %v4986_v49 = vld [vmem:[%s8014_s2 + $0xe8] sm:$0xf] }
  0x2b   : > { %477 = vmatpush.bf16.msra.mxu0 %v4899_v29  ;;  %v5636_v45 = vld [vmem:[%s8014_s2 + $0xec] sm:$0xf]  ;;  %v4988_v46 = vld [vmem:[%s8014_s2 + $0x10c] sm:$0xf0]  ;;  %v4875_v51 = vor.u32 %v5608_v42, %v4872_v43  ;;  %v6418_v52 = vld [vmem:[%s6305_s26] sm:$0xf] }
  0x2c   : > { %490 = vmatpush.bf16.msra.mxu1 %v4903_v33  ;;  %503 = vmatpush.bf16.msra.mxu2 %v4907_v34  ;;  %v4994_v50 = vld [vmem:[%s8014_s2 + $0xf0] sm:$0xf]  ;;  %v4991_v53 = vor.u32 %v5636_v45, %v4988_v46  ;;  %v5640_v54 = vld [vmem:[%s8014_s2 + $0x108] sm:$0xf0]  ;;  %v5641_v55 = vld [vmem:[%s8014_s2 + $0x110] sm:$0xf0] }
  0x2d   : > { %516 = vmatpush.bf16.msra.mxu3 %v4911_v38  ;;  %v5637_v56 = vld [vmem:[%s8014_s2 + $0xf4] sm:$0xf]  ;;  %v4995_v57 = vor.u32 %v5641_v55, %v4994_v50  ;;  %v4996_v58 = vld [vmem:[%s8014_s2 + $0x114] sm:$0xf0]  ;;  %v5627_v59 = vld [vmem:[%s8014_s2 + $0xa4] sm:$0xf]  ;;  %v4987_v63 = vor.u32 %v5640_v54, %v4986_v49 }
  0x2e   : > { %v4952_v60 = vld [vmem:[%s8014_s2 + $0xc4] sm:$0xf0]  ;;  %vm467_vm0 = vcmask 523264   ;;  %v5632_v62 = vld [vmem:[%s8014_s2 + $0xc8] sm:$0xf0]  ;;  %v4999_v0 = vor.u32 %v5637_v56, %v4996_v58  ;;  %s6180_s16 = smov 72  }
  0x2f   : > { %478 = vmatpush.bf16.msra.mxu0 %v4863_v44  ;;  %v4958_v61 = vld [vmem:[%s8014_s2 + $0xa8] sm:$0xf]  ;;  %v4955_v1 = vor.u32 %v5627_v59, %v4952_v60  ;;  %v4950_v2 = vld [vmem:[%s8014_s2 + $0xa0] sm:$0xf]  ;;  %v5631_v3 = vld [vmem:[%s8014_s2 + $0xc0] sm:$0xf0] }
  0x30   : > { %491 = vmatpush.bf16.msra.mxu1 %v4867_v47  ;;  %504 = vmatpush.bf16.msra.mxu2 %v4871_v48  ;;  %v5628_v4 = vld [vmem:[%s8014_s2 + $0xac] sm:$0xf]  ;;  %v4959_v5 = vor.u32 %v5632_v62, %v4958_v61  ;;  %v4960_v6 = vld [vmem:[%s8014_s2 + $0xcc] sm:$0xf0]  ;;  %v5618_v7 = vld [vmem:[%s8014_s2 + $0x5c] sm:$0xf]  ;;  %v4951_v11 = vor.u32 %v5631_v3, %v4950_v2 }
  0x31   : > { %517 = vmatpush.bf16.msra.mxu3 %v4875_v51  ;;  %v4916_v8 = vld [vmem:[%s8014_s2 + $0x7c] sm:$0xf0]  ;;  %v5623_v10 = vld [vmem:[%s8014_s2 + $0x80] sm:$0xf0]  ;;  %v4914_v12 = vld [vmem:[%s8014_s2 + $0x58] sm:$0xf]  ;;  %v4963_v13 = vor.u32 %v5628_v4, %v4960_v6 }
  0x32   : > { %5004 = vmatmul.msk.bf16.vlgmr.msra.gmra.mxu0 %vm467_vm0, %v6418_v52  ;;  %v4922_v9 = vld [vmem:[%s8014_s2 + $0x60] sm:$0xf]  ;;  %v4919_v14 = vor.u32 %v5618_v7, %v4916_v8  ;;  %v5622_v15 = vld [vmem:[%s8014_s2 + $0x78] sm:$0xf0]  ;;  %v5619_v16 = vld [vmem:[%s8014_s2 + $0x64] sm:$0xf] }
  0x33   : > { %5005 = vmatmul.msk.bf16.vlgmr.msra.gmra.mxu1 %vm467_vm0, %v6418_v52  ;;  %5006 = vmatmul.msk.bf16.vlgmr.msra.gmra.mxu2 %vm467_vm0, %v6418_v52  ;;  %v4924_v17 = vld [vmem:[%s8014_s2 + $0x84] sm:$0xf0]  ;;  %v4923_v18 = vor.u32 %v5623_v10, %v4922_v9  ;;  %v5609_v19 = vld [vmem:[%s8014_s2 + $0x14] sm:$0xf]  ;;  %v4880_v20 = vld [vmem:[%s8014_s2 + $0x34] sm:$0xf0]  ;;  %v4915_v25 = vor.u32 %v5622_v15, %v4914_v12 }
  0x34   : > { %540 = vmatpush.bf16.msrb.mxu1 %v4991_v53  ;;  %553 = vmatpush.bf16.msrb.mxu2 %v4995_v57  ;;  %v4886_v21 = vld [vmem:[%s8014_s2 + $0x18] sm:$0xf]  ;;  %v5614_v22 = vld [vmem:[%s8014_s2 + $0x38] sm:$0xf0]  ;;  %v4927_v26 = vor.u32 %v5619_v16, %v4924_v17  ;;  %v4883_v27 = vor.u32 %v5609_v19, %v4880_v20  ;;  %v4878_v28 = vld [vmem:[%s8014_s2 + $0x10] sm:$0xf] }
  0x35   : > { %5007 = vmatmul.msk.bf16.vlgmr.msra.gmra.mxu3 %vm467_vm0, %v6418_v52  ;;  %527 = vmatpush.bf16.msrb.mxu0 %v4987_v63  ;;  %v5123_v23 = vld [vmem:[%s8014_s2 + $0xd8] sm:$0xf]  ;;  %v5674_v24 = vld [vmem:[%s8014_s2 + $0xf8] sm:$0xf0]  ;;  %v5613_v29 = vld [vmem:[%s8014_s2 + $0x30] sm:$0xf0]  ;;  %v4887_v31 = vor.u32 %v5614_v22, %v4886_v21 }
  0x36   : > { %566 = vmatpush.bf16.msrb.mxu3 %v4999_v0  ;;  %v5610_v30 = vld [vmem:[%s8014_s2 + $0x1c] sm:$0xf]  ;;  %v4888_v32 = vld [vmem:[%s8014_s2 + $0x3c] sm:$0xf0]  ;;  %v5124_v33 = vor.u32 %v5674_v24, %v5123_v23  ;;  %v5002_v34 = vld [vmem:[%s8014_s2 + $0xf8] sm:$0xf]  ;;  %v4879_v39 = vor.u32 %v5613_v29, %v4878_v28 }
  0x37   : > { %v5642_v35 = vld [vmem:[%s8014_s2 + $0x118] sm:$0xf0]  ;;  %v5087_v36 = vld [vmem:[%s8014_s2 + $0x90] sm:$0xf]  ;;  %v5665_v37 = vld [vmem:[%s8014_s2 + $0xb0] sm:$0xf0]  ;;  %v4891_v43 = vor.u32 %v5610_v30, %v4888_v32 }
  0x38   : > { %541 = vmatpush.bf16.msrb.mxu1 %v4955_v1  ;;  %554 = vmatpush.bf16.msrb.mxu2 %v4959_v5  ;;  %v5670_v38 = vld [vmem:[%s8014_s2 + $0xdc] sm:$0xf]  ;;  %v5125_v40 = vld [vmem:[%s8014_s2 + $0xfc] sm:$0xf0]  ;;  %v5675_v42 = vld [vmem:[%s8014_s2 + $0x100] sm:$0xf0]  ;;  %v5003_v44 = vor.u32 %v5642_v35, %v5002_v34  ;;  %v5088_v48 = vor.u32 %v5665_v37, %v5087_v36 }
  0x39   : > { %528 = vmatpush.bf16.msrb.mxu0 %v4951_v11  ;;  %v5131_v41 = vld [vmem:[%s8014_s2 + $0xe0] sm:$0xf]  ;;  %v4966_v45 = vld [vmem:[%s8014_s2 + $0xb0] sm:$0xf]  ;;  %v5633_v46 = vld [vmem:[%s8014_s2 + $0xd0] sm:$0xf0]  ;;  %v5128_v47 = vor.u32 %v5670_v38, %v5125_v40 }
  0x3a   : > { %567 = vmatpush.bf16.msrb.mxu3 %v4963_v13  ;;  %v5051_v49 = vld [vmem:[%s8014_s2 + $0x48] sm:$0xf]  ;;  %v5132_v50 = vor.u32 %v5675_v42, %v5131_v41  ;;  %v5661_v51 = vld [vmem:[%s8014_s2 + $0x94] sm:$0xf]  ;;  %v5089_v53 = vld [vmem:[%s8014_s2 + $0xb4] sm:$0xf0]  ;;  %v4967_v57 = vor.u32 %v5633_v46, %v4966_v45 }
  0x3b   : > { %v5656_v54 = vld [vmem:[%s8014_s2 + $0x68] sm:$0xf0]  ;;  %v5095_v55 = vld [vmem:[%s8014_s2 + $0x98] sm:$0xf]  ;;  %v5666_v56 = vld [vmem:[%s8014_s2 + $0xb8] sm:$0xf0]  ;;  %v5092_v60 = vor.u32 %v5661_v51, %v5089_v53 }
  0x3c   : > { %542 = vmatpush.bf16.msrb.mxu1 %v4919_v14  ;;  %555 = vmatpush.bf16.msrb.mxu2 %v4923_v18  ;;  %v4930_v58 = vld [vmem:[%s8014_s2 + $0x68] sm:$0xf]  ;;  %v5624_v59 = vld [vmem:[%s8014_s2 + $0x88] sm:$0xf0]  ;;  %v5052_v61 = vor.u32 %v5656_v54, %v5051_v49  ;;  %v5015_v62 = vld [vmem:[%s8014_s2] sm:$0xf]  ;;  %v5096_v63 = vor.u32 %v5666_v56, %v5095_v55 }
  0x3d   : > { %529 = vmatpush.bf16.msrb.mxu0 %v4915_v25  ;;  %v5652_v0 = vld [vmem:[%s8014_s2 + $0x4c] sm:$0xf]  ;;  %v5053_v1 = vld [vmem:[%s8014_s2 + $0x6c] sm:$0xf0]  ;;  %v5647_v2 = vld [vmem:[%s8014_s2 + $0x20] sm:$0xf0]  ;;  %v4931_v7 = vor.u32 %v5624_v59, %v4930_v58 }
  0x3e   : > { %568 = vmatpush.bf16.msrb.mxu3 %v4927_v26  ;;  %v5059_v3 = vld [vmem:[%s8014_s2 + $0x50] sm:$0xf]  ;;  %v5657_v4 = vld [vmem:[%s8014_s2 + $0x70] sm:$0xf0]  ;;  %v5139_v5 = vld [vmem:[%s8014_s2 + $0xe8] sm:$0xf]  ;;  %v5056_v10 = vor.u32 %v5652_v0, %v5053_v1  ;;  %v5016_v12 = vor.u32 %v5647_v2, %v5015_v62 }
  0x3f   : > { %v5676_v6 = vld [vmem:[%s8014_s2 + $0x108] sm:$0xf0]  ;;  %v4894_v8 = vld [vmem:[%s8014_s2 + $0x20] sm:$0xf]  ;;  %v5615_v9 = vld [vmem:[%s8014_s2 + $0x40] sm:$0xf0]  ;;  %v5060_v13 = vor.u32 %v5657_v4, %v5059_v3 }
  0x40   : > { %543 = vmatpush.bf16.msrb.mxu1 %v4883_v27  ;;  %556 = vmatpush.bf16.msrb.mxu2 %v4887_v31  ;;  %v5643_v11 = vld [vmem:[%s8014_s2 + $0x4] sm:$0xf]  ;;  %v5017_v14 = vld [vmem:[%s8014_s2 + $0x24] sm:$0xf0]  ;;  %v5648_v16 = vld [vmem:[%s8014_s2 + $0x28] sm:$0xf0]  ;;  %v5140_v19 = vor.u32 %v5676_v6, %v5139_v5  ;;  %v4895_v24 = vor.u32 %v5615_v9, %v4894_v8 }
  0x41   : > { %530 = vmatpush.bf16.msrb.mxu0 %v4879_v39  ;;  %v5023_v15 = vld [vmem:[%s8014_s2 + $0x8] sm:$0xf]  ;;  %v5671_v17 = vld [vmem:[%s8014_s2 + $0xe4] sm:$0xf]  ;;  %v5103_v20 = vld [vmem:[%s8014_s2 + $0xa0] sm:$0xf]  ;;  %v5020_v25 = vor.u32 %v5643_v11, %v5017_v14 }
  0x42   : > { %569 = vmatpush.bf16.msrb.mxu3 %v4891_v43  ;;  %v5133_v18 = vld [vmem:[%s8014_s2 + $0x104] sm:$0xf0]  ;;  %v5667_v21 = vld [vmem:[%s8014_s2 + $0xc0] sm:$0xf0]  ;;  %v5672_v22 = vld [vmem:[%s8014_s2 + $0xec] sm:$0xf]  ;;  %v5024_v28 = vor.u32 %v5648_v16, %v5023_v15 }
  0x43   : > { %5009 = vmatmul.msk.bf16.vlgmr.msrb.gmra.mxu1 %vm467_vm0, %v6418_v52  ;;  %5010 = vmatmul.msk.bf16.vlgmr.msrb.gmra.mxu2 %vm467_vm0, %v6418_v52  ;;  %v5141_v23 = vld [vmem:[%s8014_s2 + $0x10c] sm:$0xf0]  ;;  %v5677_v27 = vld [vmem:[%s8014_s2 + $0x110] sm:$0xf0]  ;;  %v5136_v29 = vor.u32 %v5671_v17, %v5133_v18  ;;  %v5662_v30 = vld [vmem:[%s8014_s2 + $0x9c] sm:$0xf]  ;;  %v5104_v32 = vor.u32 %v5667_v21, %v5103_v20 }
  0x44   : > { %2001 = vmatpush.bf16.msra.mxu1 %v5124_v33  ;;  %2014 = vmatpush.bf16.msra.mxu2 %v5128_v47  ;;  %v5147_v26 = vld [vmem:[%s8014_s2 + $0xf0] sm:$0xf]  ;;  %v5097_v31 = vld [vmem:[%s8014_s2 + $0xbc] sm:$0xf0]  ;;  %v5144_v33 = vor.u32 %v5672_v22, %v5141_v23  ;;  %v5653_v35 = vld [vmem:[%s8014_s2 + $0x54] sm:$0xf] }
  0x45   : > { %579 = vmatpush.bf16.msra.mxu0 %v5003_v44  ;;  %5011 = vmatmul.msk.bf16.vlgmr.msrb.gmra.mxu3 %vm467_vm0, %v6418_v52  ;;  %v5148_v34 = vor.u32 %v5677_v27, %v5147_v26  ;;  %v5067_v36 = vld [vmem:[%s8014_s2 + $0x58] sm:$0xf]  ;;  %v5100_v37 = vor.u32 %v5662_v30, %v5097_v31  ;;  %v5658_v38 = vld [vmem:[%s8014_s2 + $0x78] sm:$0xf0]  ;;  %v5663_v39 = vld [vmem:[%s8014_s2 + $0xa4] sm:$0xf] }
  0x46   : > { %2027 = vmatpush.bf16.msra.mxu3 %v5132_v50  ;;  %5008 = vmatmul.msk.bf16.vlgmr.msrb.gmra.mxu0 %vm467_vm0, %v6418_v52  ;;  %v5105_v40 = vld [vmem:[%s8014_s2 + $0xc4] sm:$0xf0]  ;;  %v5061_v41 = vld [vmem:[%s8014_s2 + $0x74] sm:$0xf0]  ;;  %v5668_v43 = vld [vmem:[%s8014_s2 + $0xc8] sm:$0xf0]  ;;  %v5068_v45 = vor.u32 %v5658_v38, %v5067_v36 }
  0x47   : > { %v5111_v42 = vld [vmem:[%s8014_s2 + $0xa8] sm:$0xf]  ;;  %v1769_v44 = vld [vmem:[%s6305_s26 + $0x4] sm:$0xf]  ;;  %v5644_v46 = vld [vmem:[%s8014_s2 + $0xc] sm:$0xf]  ;;  %v5064_v49 = vor.u32 %v5653_v35, %v5061_v41 }
  0x48   : > { %2002 = vmatpush.bf16.msra.mxu1 %v5088_v48  ;;  %2015 = vmatpush.bf16.msra.mxu2 %v5092_v60  ;;  %v5031_v47 = vld [vmem:[%s8014_s2 + $0x10] sm:$0xf]  ;;  %v5108_v48 = vor.u32 %v5663_v39, %v5105_v40  ;;  %v5649_v50 = vld [vmem:[%s8014_s2 + $0x30] sm:$0xf0]  ;;  %v5112_v51 = vor.u32 %v5668_v43, %v5111_v42  ;;  %v5654_v53 = vld [vmem:[%s8014_s2 + $0x5c] sm:$0xf] }
  0x49   : > { %580 = vmatpush.bf16.msra.mxu0 %v4967_v57  ;;  %v5069_v54 = vld [vmem:[%s8014_s2 + $0x7c] sm:$0xf0]  ;;  %v5025_v55 = vld [vmem:[%s8014_s2 + $0x2c] sm:$0xf0]  ;;  %v5659_v57 = vld [vmem:[%s8014_s2 + $0x80] sm:$0xf0] }
  0x4a   : > { %2028 = vmatpush.bf16.msra.mxu3 %v5096_v63  ;;  %v5075_v56 = vld [vmem:[%s8014_s2 + $0x60] sm:$0xf]  ;;  %v5072_v58 = vor.u32 %v5654_v53, %v5069_v54  ;;  %v5028_v59 = vor.u32 %v5644_v46, %v5025_v55  ;;  %v5033_v62 = vld [vmem:[%s8014_s2 + $0x34] sm:$0xf0]  ;;  %v5650_v0 = vld [vmem:[%s8014_s2 + $0x38] sm:$0xf0] }
  0x4b   : > { %v5076_v60 = vor.u32 %v5659_v57, %v5075_v56  ;;  %v5039_v63 = vld [vmem:[%s8014_s2 + $0x18] sm:$0xf]  ;;  %v6181_v55 = vmov 1983009808   ;;  %vm611_vm1 = vcmask 1047556   ;;  %vm1467_vm3 = vcmask 60416  }
  0x4c   : > { %2003 = vmatpush.bf16.msra.mxu1 %v5052_v61  ;;  %2016 = vmatpush.bf16.msra.mxu2 %v5056_v10  ;;  %v5645_v61 = vld [vmem:[%s8014_s2 + $0x14] sm:$0xf]  ;;  %v5040_v2 = vor.u32 %v5650_v0, %v5039_v63  ;;  %v616_v56 = vunpack.c.l.s4 %v6181_v55  ;;  %vm3024_vm4 = vcmask 126016  }
  0x4d   : > { %581 = vmatpush.bf16.msra.mxu0 %v4931_v7  ;;  %v5036_v1 = vor.u32 %v5645_v61, %v5033_v62 }
  0x4e   : > { %2029 = vmatpush.bf16.msra.mxu3 %v5060_v13  ;;  %v6747_v63 = vunpack.c.0.s8 %v616_v56 }
  0x50   : > { %2004 = vmatpush.bf16.msra.mxu1 %v5016_v12  ;;  %2017 = vmatpush.bf16.msra.mxu2 %v5020_v25 }
  0x51   : > { %582 = vmatpush.bf16.msra.mxu0 %v4895_v24 }
  0x52   : > { %2030 = vmatpush.bf16.msra.mxu3 %v5024_v28 }
  0x53   : > { %5157 = vmatmul.msk.bf16.vlgmr.msra.gmra.mxu1 %vm467_vm0, %v1769_v44  ;;  %5158 = vmatmul.msk.bf16.vlgmr.msra.gmra.mxu2 %vm467_vm0, %v1769_v44 }
  0x54   : > { %2053 = vmatpush.bf16.msrb.mxu1 %v5140_v19  ;;  %2066 = vmatpush.bf16.msrb.mxu2 %v5144_v33 }
  0x55   : > { %2040 = vmatpush.bf16.msrb.mxu0 %v5136_v29  ;;  %5159 = vmatmul.msk.bf16.vlgmr.msra.gmra.mxu3 %vm467_vm0, %v1769_v44 }
  0x56   : > { %2079 = vmatpush.bf16.msrb.mxu3 %v5148_v34  ;;  %5012 = vmatmul.msk.bf16.vlgmr.msra.gmra.mxu0 %vm467_vm0, %v6418_v52  ;;  %v5032_v52 = vor.u32 %v5649_v50, %v5031_v47 }
  0x58   : > { %2054 = vmatpush.bf16.msrb.mxu1 %v5104_v32  ;;  %2067 = vmatpush.bf16.msrb.mxu2 %v5108_v48 }
  0x59   : > { %2041 = vmatpush.bf16.msrb.mxu0 %v5100_v37 }
  0x5a   : > { %2080 = vmatpush.bf16.msrb.mxu3 %v5112_v51 }
  0x5c   : > { %2055 = vmatpush.bf16.msrb.mxu1 %v5068_v45  ;;  %2068 = vmatpush.bf16.msrb.mxu2 %v5072_v58 }
  0x5d   : > { %2042 = vmatpush.bf16.msrb.mxu0 %v5064_v49 }
  0x5e   : > { %2081 = vmatpush.bf16.msrb.mxu3 %v5076_v60 }
  0x60   : > { %2056 = vmatpush.bf16.msrb.mxu1 %v5032_v52  ;;  %2069 = vmatpush.bf16.msrb.mxu2 %v5036_v1 }
  0x61   : > { %2043 = vmatpush.bf16.msrb.mxu0 %v5028_v59 }
  0x62   : > { %2082 = vmatpush.bf16.msrb.mxu3 %v5040_v2 }
  0x63   : > { %5161 = vmatmul.msk.bf16.vlgmr.msrb.gmra.mxu1 %vm467_vm0, %v1769_v44  ;;  %5162 = vmatmul.msk.bf16.vlgmr.msrb.gmra.mxu2 %vm467_vm0, %v1769_v44 }
  0x65   : > { %5163 = vmatmul.msk.bf16.vlgmr.msrb.gmra.mxu3 %vm467_vm0, %v1769_v44 }
  0x66   : > { %5160 = vmatmul.msk.bf16.vlgmr.msrb.gmra.mxu0 %vm467_vm0, %v1769_v44 }
  0xaf   : > { %v6722_v3 = vpop.f32.mrf.mxu0 }
  0xb0   : > { %v493_v4 = vpop.f32.mrf.mxu1 }
  0xb1   : > { %v5848_v5 = vpack.i.bf16 %v493_v4, %v6722_v3 }
  0xb3   : > { %5849 = vrot.lane.b32.xlu2 %v5848_v5, %s6173_s9 }
  0xb6   : > { %v506_v6 = vpop.f32.mrf.mxu2 }
  0xb7   : > { %v482_v8 = vpop.f32.mrf.mxu0 }
  0xb8   : > { %v519_v7 = vpop.f32.mrf.mxu3  ;;  %v495_v10 = vpop.f32.mrf.mxu1 }
  0xb9   : > { %v5853_v9 = vpack.i.bf16 %v519_v7, %v506_v6 }
  0xbb   : > { %5854 = vrot.lane.b32.xlu0 %v5853_v9, %s6173_s9 }
  0xbe   : > { %v508_v11 = vpop.f32.mrf.mxu2 }
  0xbf   : > { %v6182_v11 = vmov 1934713408  }
  0xc0   : > { %v521_v12 = vpop.f32.mrf.mxu3  ;;  %v545_v14 = vpop.f32.mrf.mxu1 }
  0xc1   : > { %v664_v12 = vunpack.c.l.s4 %v6182_v11 }
  0xc3   : > { %v532_v13 = vpop.f32.mrf.mxu0 }
  0xc4   : > { %v5858_v15 = vpack.i.bf16 %v545_v14, %v532_v13 }
  0xc6   : > { %5859 = vrot.lane.b32.xlu1 %v5858_v15, %s6173_s9  ;;  %v558_v16 = vpop.f32.mrf.mxu2 }
  0xc8   : > { %v571_v17 = vpop.f32.mrf.mxu3  ;;  %v547_v19 = vpop.f32.mrf.mxu1 }
  0xc9   : > { %v5863_v20 = vpack.i.bf16 %v571_v17, %v558_v16 }
  0xcb   : > { %v534_v18 = vpop.f32.mrf.mxu0 }
  0xce   : > { %5864 = vrot.lane.b32.xlu1 %v5863_v20, %s6173_s9  ;;  %v560_v21 = vpop.f32.mrf.mxu2 }
  0xd0   : > { %v573_v22 = vpop.f32.mrf.mxu3  ;;  %v6729_v24 = vpop.f32.mrf.mxu1 }
  0xd1   : > { %v5868_v25 = vpack.i.bf16 %v6729_v24, %v6722_v3  ;;  %v613_v22 = vrot.slane %v6722_v3, 4 }
  0xd3   : > { %v584_v23 = vpop.f32.mrf.mxu0  ;;  %5869 = vrot.lane.b32.xlu0 %v5868_v25, %s6174_s29  ;;  %5889 = vrot.lane.b32.xlu2 %v5868_v25, %s6175_s12 }
  0xd4   : > { %v5903_v35 = vpack.i.bf16 %v6729_v24, %v584_v23 }
  0xd6   : > { %5879 = vrot.lane.b32.xlu1 %v5868_v25, %s6176_s10  ;;  %v2019_v26 = vpop.f32.mrf.mxu2 }
  0xd8   : > { %v2032_v27 = vpop.f32.mrf.mxu3  ;;  %v2008_v28 = vpop.f32.mrf.mxu1 }
  0xd9   : > { %v5908_v36 = vpack.i.bf16 %v2032_v27, %v2019_v26  ;;  %v2138_v27 = vrot.slane %v6729_v24, 4 }
  0xdb   : > { %v586_v29 = vpop.f32.mrf.mxu0  ;;  %5874 = vrot.lane.b32.xlu0 %v5868_v25, %s6177_s14  ;;  %5894 = vrot.lane.b32.xlu2 %v5868_v25, %s6178_s15 }
  0xde   : > { %5884 = vrot.lane.b32.xlu1 %v5868_v25, %s6179_s0  ;;  %v2021_v30 = vpop.f32.mrf.mxu2 }
  0xe0   : > { %v2034_v31 = vpop.f32.mrf.mxu3  ;;  %v2058_v33 = vpop.f32.mrf.mxu1 }
  0xe3   : > { %v2045_v32 = vpop.f32.mrf.mxu0  ;;  %5899 = vrot.lane.b32.xlu0 %v5868_v25, %s6180_s16  ;;  %v6768_v25 = vunpack.c.0.s8 %v664_v12 }
  0xe4   : > { %v5913_v34 = vpack.i.bf16 %v2058_v33, %v2045_v32 }
  0xe6   : > { %5914 = vrot.lane.b32.xlu2 %v5913_v34, %s6173_s9  ;;  %5904 = vrot.lane.b32.xlu1 %v5903_v35, %s6173_s9  ;;  %v2071_v39 = vpop.f32.mrf.mxu2 }
  0xe8   : > { %v2060_v38 = vpop.f32.mrf.mxu1  ;;  %v2084_v40 = vpop.f32.mrf.mxu3 }
  0xe9   : > { %v5960_v41 = vpack.i.bf16 %v2084_v40, %v2071_v39 }
  0xeb   : > { %v2047_v37 = vpop.f32.mrf.mxu0 }
  0xee   : > { %5909 = vrot.lane.b32.xlu1 %v5908_v36, %s6173_s9  ;;  %v2073_v42 = vpop.f32.mrf.mxu2 }
  0xf0   : > { %v2086_v43 = vpop.f32.mrf.mxu3 }
  0xf6   : > { %5961 = vrot.lane.b32.xlu1 %v5960_v41, %s6173_s9 }
 0x10d   : > { %v5850_v44 = vpop.permute.xlu2 %5849 }
 0x10e   : > { %v5852_v48 = vunpack.i.h.bf16 %v5850_v44  ;;  %v5851_v49 = vunpack.i.l.bf16 %v5850_v44 }
 0x110   : > { %v1502_v54 = vsel %vm467_vm0, %v5851_v49, %v5852_v48 }
 0x111   : > { %v1520_v61 = vrot.slane %v1502_v54, 4 }
 0x12d   : > { %v5855_v45 = vpop.permute.xlu0 %5854  ;;  %v6743_v57 = vpop.permute.xlu2 %5889 }
 0x12e   : > { %v5857_v46 = vunpack.i.h.bf16 %v5855_v45  ;;  %v5856_v47 = vunpack.i.l.bf16 %v5855_v45  ;;  %v5892_v15 = vunpack.i.h.bf16 %v6743_v57  ;;  %v5891_v16 = vunpack.i.l.bf16 %v6743_v57 }
 0x12f   : > { %v1742_v45 = vlaneseq }
 0x130   : > { %v1503_v50 = vsel %vm467_vm0, %v5852_v48, %v5856_v47  ;;  %v1504_v51 = vsel %vm467_vm0, %v5856_v47, %v5857_v46  ;;  %v6776_v28 = vrot.slane %v5892_v15, 4  ;;  %v6780_v29 = vrot.slane %v5891_v16, 4 }
 0x131   : > { %v1518_v58 = vrot.slane %v1504_v51, 4  ;;  %v1532_v59 = vrot.slane %v1503_v50, 4  ;;  %v1521_v1 = vsel %vm611_vm1, %v1504_v51, %v1520_v61  ;;  %v6815_v61 = vand.u32 127, %v1742_v45 }
 0x132   : > { %v1529_v7 = vperm.slane %v1521_v1, %v6747_v63 }
 0x133   : > { %v1519_v4 = vsel %vm611_vm1, %v1518_v58, %v1502_v54  ;;  %vm1744_vm2 = vcmp.eq.s32.totalorder %v6815_v61, 8 }
 0x134   : > { %v1525_v10 = vperm.slane %v1519_v4, %v6747_v63  ;;  %v1580_v19 = vrot.slane %v1529_v7, 4 }
 0x135   : > { %v6764_v17 = vpop.permute.xlu2 %5894 }
 0x136   : > { %v1568_v23 = vrot.slane %v1525_v10, 4  ;;  %v5897_v30 = vunpack.i.h.bf16 %v6764_v17  ;;  %v5896_v32 = vunpack.i.l.bf16 %v6764_v17 }
 0x138   : > { %v6740_v53 = vpop.permute.xlu1 %5859  ;;  %v635_v56 = vrot.slane %v5896_v32, 4 }
 0x139   : > { %v5861_v52 = vunpack.i.l.bf16 %v6740_v53  ;;  %v5862_v8 = vunpack.i.h.bf16 %v6740_v53 }
 0x13b   : > { %v1505_v60 = vsel %vm467_vm0, %v5857_v46, %v5861_v52  ;;  %v1506_v20 = vsel %vm467_vm0, %v5861_v52, %v5862_v8  ;;  %v2160_v46 = vrot.slane %v5897_v30, 4 }
 0x13c   : > { %v1530_v62 = vrot.slane %v1505_v60, 4  ;;  %v1533_v0 = vsel %vm611_vm1, %v1505_v60, %v1532_v59  ;;  %v1544_v33 = vrot.slane %v1506_v20, 4 }
 0x13d   : > { %v1541_v5 = vperm.slane %v1533_v0, %v6747_v63 }
 0x13e   : > { %v1531_v2 = vsel %vm611_vm1, %v1530_v62, %v1503_v50 }
 0x13f   : > { %v1537_v9 = vperm.slane %v1531_v2, %v6747_v63  ;;  %v1578_v18 = vrot.slane %v1541_v5, 4  ;;  %v1581_v31 = vsel %vm611_vm1, %v1541_v5, %v1580_v19 }
 0x140   : > { %v6754_v6 = vpop.permute.xlu1 %5864  ;;  %v6789_v42 = vperm.slane %v1581_v31, %v6768_v25  ;;  %v6800_v50 = vpop.permute.xlu2 %5914 }
 0x141   : > { %v5867_v13 = vunpack.i.h.bf16 %v6754_v6  ;;  %v5866_v14 = vunpack.i.l.bf16 %v6754_v6  ;;  %v1566_v21 = vrot.slane %v1537_v9, 4  ;;  %v1569_v34 = vsel %vm611_vm1, %v1537_v9, %v1568_v23 }
 0x142   : > { %v1579_v35 = vsel %vm611_vm1, %v1578_v18, %v1529_v7  ;;  %v6795_v47 = vperm.slane %v1569_v34, %v6768_v25  ;;  %v1628_v60 = vrot.slane %v6789_v42, 4  ;;  %v5917_v62 = vunpack.i.h.bf16 %v6800_v50 }
 0x143   : > { %v1508_v26 = vsel %vm467_vm0, %v5866_v14, %v5867_v13  ;;  %v1567_v37 = vsel %vm611_vm1, %v1566_v21, %v1525_v10  ;;  %v6798_v48 = vperm.slane %v1579_v35, %v6768_v25  ;;  %v6806_v53 = vsel %vm467_vm0, %v5862_v8, %v5866_v14 }
 0x144   : > { %v1542_v38 = vrot.slane %v1508_v26, 4  ;;  %v1545_v43 = vsel %vm611_vm1, %v1508_v26, %v1544_v33  ;;  %v6803_v51 = vperm.slane %v1567_v37, %v6768_v25  ;;  %v5916_v0 = vunpack.i.l.bf16 %v6800_v50 }
 0x145   : > { %v5870_v36 = vpop.permute.xlu0 %5869  ;;  %v6812_v58 = vperm.slane %v1545_v43, %v6747_v63  ;;  %v1620_v1 = vrot.slane %v6795_v47, 4  ;;  %v1624_v2 = vrot.slane %v6798_v48, 4  ;;  %v1556_v4 = vrot.slane %v6806_v53, 4 }
 0x146   : > { %v5872_v39 = vunpack.i.h.bf16 %v5870_v36  ;;  %v5871_v40 = vunpack.i.l.bf16 %v5870_v36  ;;  %v1543_v52 = vsel %vm611_vm1, %v1542_v38, %v1506_v20  ;;  %v1616_v7 = vrot.slane %v6803_v51, 4 }
 0x147   : > { %v6825_v8 = vperm.slane %v1543_v52, %v6747_v63  ;;  %v1604_v12 = vrot.slane %v6812_v58, 4  ;;  %v6838_v31 = vsel %vm467_vm0, %v5916_v0, %v5917_v62 }
 0x148   : > { %v5880_v41 = vpop.permute.xlu1 %5879  ;;  %v2150_v49 = vrot.slane %v5872_v39, 4  ;;  %v625_v54 = vrot.slane %v5871_v40, 4 }
 0x149   : > { %v5881_v44 = vunpack.i.l.bf16 %v5880_v41  ;;  %v5882_v55 = vunpack.i.h.bf16 %v5880_v41  ;;  %v1592_v37 = vrot.slane %v6825_v8, 4 }
 0x14b   : > { %v623_v59 = vrot.slane %v5881_v44, 4  ;;  %v2151_v5 = vsel %vm611_vm1, %v5882_v55, %v2150_v49  ;;  %v2148_v9 = vrot.slane %v5882_v55, 4  ;;  %v626_v10 = vsel %vm611_vm1, %v5881_v44, %v625_v54 }
 0x14c   : > { %v6831_v21 = vperm.slane %v2151_v5, %v6747_v63  ;;  %v6841_v33 = vperm.slane %v626_v10, %v6747_v63  ;;  %v3087_v55 = vrot.slane %v6838_v31, 4 }
 0x14d   : > { %v5875_v11 = vpop.permute.xlu0 %5874  ;;  %v624_v14 = vsel %vm611_vm1, %v623_v59, %v5871_v40  ;;  %v2149_v38 = vsel %vm611_vm1, %v2148_v9, %v5872_v39 }
 0x14e   : > { %v5877_v18 = vunpack.i.h.bf16 %v5875_v11  ;;  %v5876_v19 = vunpack.i.l.bf16 %v5875_v11  ;;  %v6847_v40 = vperm.slane %v624_v14, %v6747_v63  ;;  %v671_v52 = vrot.slane %v6841_v33, 4 }
 0x150   : > { %v5885_v20 = vpop.permute.xlu1 %5884  ;;  %v2136_v34 = vrot.slane %v5877_v18, 4  ;;  %v610_v35 = vrot.slane %v5876_v19, 4  ;;  %v614_v36 = vsel %vm611_vm1, %v5876_v19, %v613_v22  ;;  %v2139_v41 = vsel %vm611_vm1, %v5877_v18, %v2138_v27 }
 0x151   : > { %v5887_v23 = vunpack.i.h.bf16 %v5885_v20  ;;  %v5886_v26 = vunpack.i.l.bf16 %v5885_v20  ;;  %v6853_v44 = vperm.slane %v614_v36, %v6747_v63  ;;  %v6864_v27 = vperm.slane %v2149_v38, %v6747_v63 }
 0x152   : > { %v612_v43 = vsel %vm611_vm1, %v610_v35, %v6722_v3  ;;  %v2137_v22 = vsel %vm611_vm1, %v2136_v34, %v6729_v24  ;;  %v2196_v3 = vrot.slane %v6831_v21, 4 }
 0x153   : > { %v2161_v45 = vsel %vm611_vm1, %v2160_v46, %v5887_v23  ;;  %v636_v49 = vsel %vm611_vm1, %v635_v56, %v5886_v26  ;;  %v6860_v39 = vperm.slane %v612_v43, %v6747_v63  ;;  %v2162_v54 = vrot.slane %v5887_v23, 4 }
 0x154   : > { %v637_v59 = vrot.slane %v5886_v26, 4  ;;  %v659_v46 = vrot.slane %v6847_v40, 4  ;;  %v6870_v56 = vperm.slane %v2139_v41, %v6747_v63  ;;  %v6873_v24 = vperm.slane %v2161_v45, %v6747_v63 }
 0x155   : > { %v6876_v5 = vperm.slane %v636_v49, %v6747_v63  ;;  %v5900_v9 = vpop.permute.xlu0 %5899  ;;  %v6879_v10 = vperm.slane %v2137_v22, %v6747_v63  ;;  %v673_v11 = vrot.slane %v6853_v44, 4  ;;  %v661_v20 = vrot.slane %v6860_v39, 4 }
 0x156   : > { %v5902_v14 = vunpack.i.h.bf16 %v5900_v9  ;;  %v5901_v18 = vunpack.i.l.bf16 %v5900_v9  ;;  %v6888_v23 = vsel %vm611_vm1, %v5897_v30, %v2162_v54  ;;  %v638_v26 = vsel %vm611_vm1, %v5896_v32, %v637_v59 }
 0x157   : > { %v685_v43 = vrot.slane %v6876_v5, 4  ;;  %v672_v30 = vsel %vm611_vm1, %v671_v52, %v6853_v44  ;;  %v6908_v32 = vperm.slane %v638_v26, %v6747_v63  ;;  %v6939_v57 = vsel %vm611_vm1, %v6847_v40, %v661_v20 }
 0x158   : > { %v6882_v19 = vpop.permute.xlu1 %5904  ;;  %v2172_v35 = vrot.slane %v5902_v14, 4  ;;  %v647_v36 = vrot.slane %v5901_v18, 4  ;;  %v650_v38 = vsel %vm611_vm1, %v5901_v18, %v6780_v29  ;;  %v2175_v41 = vsel %vm611_vm1, %v5902_v14, %v6776_v28 }
 0x159   : > { %v5906_v34 = vunpack.i.l.bf16 %v6882_v19  ;;  %v6900_v45 = vperm.slane %v650_v38, %v6747_v63  ;;  %v5907_v54 = vunpack.i.h.bf16 %v6882_v19  ;;  %v6931_v59 = vperm.slane %v672_v30, %v6768_v25 }
 0x15a   : > { %v648_v29 = vsel %vm611_vm1, %v647_v36, %v5891_v16  ;;  %v6925_v52 = vsel %vm611_vm1, %v2172_v35, %v5892_v15 }
 0x15b   : > { %v1509_v17 = vsel %vm467_vm0, %v5867_v13, %v5906_v34  ;;  %v6915_v22 = vperm.slane %v648_v29, %v6747_v63  ;;  %v695_v6 = vrot.slane %v6900_v45, 4  ;;  %v6919_v13 = vperm.slane %v2175_v41, %v6747_v63 }
 0x15c   : > { %v1554_v28 = vrot.slane %v1509_v17, 4  ;;  %v1557_v49 = vsel %vm611_vm1, %v1509_v17, %v1556_v4  ;;  %v717_v35 = vrot.slane %v6931_v59, 4 }
 0x15d   : > { %v1565_v4 = vperm.slane %v1557_v49, %v6747_v63  ;;  %v683_v9 = vrot.slane %v6915_v22, 4  ;;  %v696_v18 = vsel %vm611_vm1, %v695_v6, %v6908_v32 }
 0x15e   : > { %v1555_v16 = vsel %vm611_vm1, %v1554_v28, %v6806_v53  ;;  %v6947_v34 = vperm.slane %v696_v18, %v6768_v25 }
 0x15f   : > { %v1561_v14 = vperm.slane %v1555_v16, %v6747_v63  ;;  %v1602_v15 = vrot.slane %v1565_v4, 4  ;;  %v1605_v53 = vsel %vm611_vm1, %v1565_v4, %v1604_v12  ;;  %v684_v40 = vsel %vm611_vm1, %v683_v9, %v6876_v5 }
 0x160   : > { %v6944_v26 = vpop.permute.xlu1 %5909  ;;  %v1613_v41 = vperm.slane %v1605_v53, %v6768_v25  ;;  %v715_v29 = vrot.slane %v6947_v34, 4  ;;  %v2210_v5 = vrot.slane %v6873_v24, 4  ;;  %v690_v9 = vperm.slane %v684_v40, %v6768_v25 }
 0x161   : > { %v1590_v36 = vrot.slane %v1561_v14, 4  ;;  %v1593_v38 = vsel %vm611_vm1, %v1561_v14, %v1592_v37  ;;  %v5912_v20 = vunpack.i.h.bf16 %v6944_v26  ;;  %v1603_v30 = vsel %vm611_vm1, %v1602_v15, %v6812_v58 }
 0x162   : > { %v1601_v17 = vperm.slane %v1593_v38, %v6768_v25  ;;  %v5911_v12 = vunpack.i.l.bf16 %v6944_v26  ;;  %v1609_v49 = vperm.slane %v1603_v30, %v6768_v25  ;;  %v1626_v6 = vrot.slane %v1613_v41, 4 }
 0x163   : > { %v1591_v28 = vsel %vm611_vm1, %v1590_v36, %v6825_v8  ;;  %v1629_v37 = vsel %vm611_vm1, %v1613_v41, %v1628_v60  ;;  %v716_v19 = vsel %vm611_vm1, %v715_v29, %v6931_v59  ;;  %v718_v26 = vsel %vm611_vm1, %v6947_v34, %v717_v35 }
 0x164   : > { %v1597_v16 = vperm.slane %v1591_v28, %v6768_v25  ;;  %v1618_v4 = vrot.slane %v1601_v17, 4  ;;  %v1621_v58 = vsel %vm611_vm1, %v1601_v17, %v1620_v1  ;;  %v1666_v14 = vrot.slane %v1629_v37, 4 }
 0x165   : > { %v1622_v18 = vrot.slane %v1609_v49, 4  ;;  %v1625_v8 = vsel %vm611_vm1, %v1609_v49, %v1624_v2  ;;  %v1627_v15 = vsel %vm611_vm1, %v1626_v6, %v6789_v42  ;;  %v1642_v53 = vrot.slane %v1621_v58, 4 }
 0x166   : > { %v1614_v36 = vrot.slane %v1597_v16, 4  ;;  %v1617_v60 = vsel %vm611_vm1, %v1597_v16, %v1616_v7  ;;  %v1619_v38 = vsel %vm611_vm1, %v1618_v4, %v6795_v47  ;;  %v1654_v41 = vrot.slane %v1627_v15, 4 }
 0x167   : > { %v1623_v1 = vsel %vm611_vm1, %v1622_v18, %v6798_v48  ;;  %v1630_v17 = vrot.slane %v1619_v38, 4  ;;  %v1643_v30 = vsel %vm611_vm1, %v1642_v53, %v1617_v60  ;;  %v1644_v2 = vrot.slane %v1617_v60, 4 }
 0x168   : > { %v1615_v42 = vsel %vm611_vm1, %v1614_v36, %v6803_v51  ;;  %v1649_v28 = vperm.slane %v1643_v30, %v6747_v63  ;;  %v1655_v49 = vsel %vm611_vm1, %v1654_v41, %v1623_v1  ;;  %v1656_v6 = vrot.slane %v1623_v1, 4 }
 0x169   : > { %v1631_v7 = vsel %vm611_vm1, %v1630_v17, %v1615_v42  ;;  %v1632_v16 = vrot.slane %v1615_v42, 4  ;;  %v1645_v47 = vsel %vm611_vm1, %v1621_v58, %v1644_v2  ;;  %v1661_v4 = vperm.slane %v1655_v49, %v6747_v63 }
 0x16a   : > { %v1637_v48 = vperm.slane %v1631_v7, %v6747_v63  ;;  %v1653_v18 = vperm.slane %v1645_v47, %v6747_v63  ;;  %v1657_v53 = vsel %vm611_vm1, %v1627_v15, %v1656_v6  ;;  %v1667_v51 = vsel %vm611_vm1, %v1666_v14, %v1625_v8 }
 0x16b   : > { %v1633_v36 = vsel %vm611_vm1, %v1619_v38, %v1632_v16  ;;  %v1665_v60 = vperm.slane %v1657_v53, %v6747_v63  ;;  %v1668_v41 = vrot.slane %v1625_v8, 4  ;;  %v1673_v1 = vperm.slane %v1667_v51, %v6747_v63 }
 0x16c   : > { %v1641_v58 = vperm.slane %v1633_v36, %v6747_v63  ;;  %v1678_v17 = vrot.slane %v1649_v28, 4  ;;  %v1680_v30 = vrot.slane %v1637_v48, 4  ;;  %v1690_v2 = vrot.slane %v1653_v18, 4 }
 0x16d   : > { %v1669_v42 = vsel %vm611_vm1, %v1629_v37, %v1668_v41  ;;  %v1702_v49 = vrot.slane %v1673_v1, 4  ;;  %v1704_v15 = vrot.slane %v1661_v4, 4  ;;  %v1716_v6 = vrot.slane %v1665_v60, 4 }
 0x16e   : > { %v1677_v14 = vperm.slane %v1669_v42, %v6747_v63  ;;  %v1679_v7 = vsel %vm611_vm1, %v1678_v17, %v1637_v48  ;;  %v1681_v38 = vsel %vm611_vm1, %v1649_v28, %v1680_v30  ;;  %v1691_v8 = vsel %vm611_vm1, %v1690_v2, %v1641_v58 }
 0x16f   : > { %v1685_v16 = vperm.slane %v1679_v7, %v6768_v25  ;;  %v1689_v47 = vperm.slane %v1681_v38, %v6768_v25  ;;  %v1692_v53 = vrot.slane %v1641_v58, 4  ;;  %v1697_v51 = vperm.slane %v1691_v8, %v6768_v25 }
 0x170   : > { %v1703_v37 = vsel %vm611_vm1, %v1702_v49, %v1661_v4  ;;  %v1705_v36 = vsel %vm611_vm1, %v1673_v1, %v1704_v15  ;;  %v1714_v41 = vrot.slane %v1677_v14, 4  ;;  %v1717_v42 = vsel %vm611_vm1, %v1677_v14, %v1716_v6 }
 0x171   : > { %v1693_v48 = vsel %vm611_vm1, %v1653_v18, %v1692_v53  ;;  %v1709_v28 = vperm.slane %v1703_v37, %v6768_v25  ;;  %v1713_v17 = vperm.slane %v1705_v36, %v6768_v25  ;;  %v1725_v30 = vperm.slane %v1717_v42, %v6768_v25 }
 0x172   : > { %v1701_v2 = vperm.slane %v1693_v48, %v6768_v25  ;;  %v1715_v58 = vsel %vm611_vm1, %v1714_v41, %v1665_v60  ;;  %v1728_v7 = vrot.slane %v1685_v16, 4  ;;  %v1732_v38 = vrot.slane %v1689_v47, 4 }
 0x173   : > { %v1721_v4 = vperm.slane %v1715_v58, %v6768_v25  ;;  %v1726_v1 = vrot.slane %v1709_v28, 4  ;;  %v1730_v49 = vrot.slane %v1713_v17, 4  ;;  %v1736_v15 = vrot.slane %v1697_v51, 4 }
 0x174   : > { %v1729_v6 = vsel %vm611_vm1, %v1709_v28, %v1728_v7  ;;  %v1733_v18 = vsel %vm611_vm1, %v1713_v17, %v1732_v38  ;;  %v1738_v14 = vrot.slane %v1725_v30, 4  ;;  %v1740_v8 = vrot.slane %v1701_v2, 4 }
 0x175   : > { %v1727_v53 = vsel %vm611_vm1, %v1726_v1, %v1685_v16  ;;  %v1731_v37 = vsel %vm611_vm1, %v1730_v49, %v1689_v47  ;;  %v1734_v36 = vrot.slane %v1721_v4, 4  ;;  %v1737_v60 = vsel %vm611_vm1, %v1721_v4, %v1736_v15 }
 0x176   : > { %v1739_v41 = vsel %vm611_vm1, %v1738_v14, %v1701_v2  ;;  %v1741_v42 = vsel %vm611_vm1, %v1725_v30, %v1740_v8  ;;  %v1745_v48 = vsel %vm1744_vm2, 1.0, %v1727_v53  ;;  %v1746_v28 = vsel %vm1744_vm2, 1.0, %v1729_v6 }
 0x177   : > { %v1735_v17 = vsel %vm611_vm1, %v1734_v36, %v1697_v51  ;;  %v1747_v16 = vsel %vm1744_vm2, 1.0, %v1731_v37  ;;  %v1748_v47 = vsel %vm1744_vm2, 1.0, %v1733_v18  ;;  %v1750_v58 = vsel %vm1744_vm2, 1.0, %v1737_v60 }
 0x178   : > { %v1749_v30 = vsel %vm1744_vm2, 1.0, %v1735_v17  ;;  %v1751_v2 = vsel %vm1744_vm2, 1.0, %v1739_v41  ;;  %v1752_v7 = vsel %vm1744_vm2, 1.0, %v1741_v42  ;;  %v1753_v38 = vpack.c.bf16 %v1745_v48, %v1745_v48 }
 0x179   : > { %v1754_v51 = vpack.c.bf16 %v1746_v28, %v1746_v28  ;;  %v1755_v4 = vpack.c.bf16 %v1747_v16, %v1747_v16  ;;  %v1756_v1 = vpack.c.bf16 %v1748_v47, %v1748_v47  ;;  %v1757_v49 = vpack.c.bf16 %v1749_v30, %v1749_v30 }
 0x17a   : > { %v1758_v15 = vpack.c.bf16 %v1750_v58, %v1750_v58  ;;  %v1759_v6 = vpack.c.bf16 %v1751_v2, %v1751_v2  ;;  %v1760_v18 = vpack.c.bf16 %v1752_v7, %v1752_v7  ;;  %1761 = vst [vmem:[#allocation3] sm:$0xf] %v1753_v38  ;;  %v3059_v14 = vsel %vm467_vm0, %v5907_v54, %v5911_v12 }
 0x17b   : > { %1762 = vst [vmem:[#allocation3 + $0x8] sm:$0xf] %v1754_v51  ;;  %v3060_v8 = vsel %vm467_vm0, %v5911_v12, %v5912_v20  ;;  %v3061_v53 = vsel %vm467_vm0, %v5912_v20, %v5916_v0  ;;  %v3077_v37 = vrot.slane %v3059_v14, 4  ;;  %v5925_v12 = vpack.i.bf16 %v718_v26, %v716_v19 }
 0x17c   : > { %1763 = vst [vmem:[#allocation3 + $0x10] sm:$0xf] %v1755_v4  ;;  %v3075_v54 = vrot.slane %v3061_v53, 4  ;;  %v3088_v36 = vsel %vm611_vm1, %v3087_v55, %v3060_v8  ;;  %v3089_v60 = vrot.slane %v3060_v8, 4  ;;  %v670_v29 = vperm.slane %v6939_v57, %v6768_v25 }
 0x17d   : > { %1764 = vst [vmem:[#allocation3 + $0x18] sm:$0xf] %v1756_v1  ;;  %v3078_v0 = vsel %vm611_vm1, %v3061_v53, %v3077_v37  ;;  %v3094_v20 = vperm.slane %v3088_v36, %v6747_v63  ;;  %v686_v34 = vsel %vm611_vm1, %v6915_v22, %v685_v43  ;;  %5926 = vxpose.xlu0.b32.start.end [1/1] (short) (narrow) %v5925_v12, 8  ;;  %v2220_v2 = vrot.slane %v6919_v13, 4 }
 0x17e   : > { %1765 = vst [vmem:[#allocation3 + $0x20] sm:$0xf] %v1757_v49  ;;  %v3076_v41 = vsel %vm611_vm1, %v3075_v54, %v3059_v14  ;;  %v3086_v55 = vperm.slane %v3078_v0, %v6747_v63  ;;  %v3090_v59 = vsel %vm611_vm1, %v6838_v31, %v3089_v60  ;;  %v694_v57 = vperm.slane %v686_v34, %v6768_v25 }
 0x17f   : > { %1766 = vst [vmem:[#allocation3 + $0x28] sm:$0xf] %v1758_v15  ;;  %v3082_v35 = vperm.slane %v3076_v41, %v6747_v63  ;;  %v3098_v42 = vperm.slane %v3090_v59, %v6747_v63  ;;  %v3123_v48 = vrot.slane %v3094_v20, 4  ;;  %v2179_v28 = vperm.slane %v6925_v52, %v6747_v63 }
 0x180   : > { %1767 = vst [vmem:[#allocation3 + $0x30] sm:$0xf] %v1759_v6  ;;  %v3137_v17 = vrot.slane %v3086_v55, 4  ;;  %v713_v31 = vrot.slane %v670_v29, 4  ;;  %v660_v43 = vsel %vm611_vm1, %v659_v46, %v6860_v39  ;;  %v711_v30 = vrot.slane %v694_v57, 4 }
 0x181   : > { %1768 = vst [vmem:[#allocation3 + $0x38] sm:$0xf] %v1760_v18  ;;  %v7087_v16 = vsel %vm611_vm1, %v3123_v48, %v3082_v35  ;;  %v3125_v47 = vrot.slane %v3082_v35, 4  ;;  %v3135_v58 = vrot.slane %v3098_v42, 4  ;;  %v666_v51 = vperm.slane %v660_v43, %v6768_v25 }
 0x182   : > { %v7091_v7 = vsel %vm611_vm1, %v3098_v42, %v3137_v17  ;;  %v714_v52 = vsel %vm611_vm1, %v694_v57, %v713_v31  ;;  %v712_v38 = vsel %vm611_vm1, %v711_v30, %v670_v29  ;;  %v2186_v4 = vrot.slane %v6879_v10, 4  ;;  %v5673_v31 = vld [vmem:[%s8014_s2 + $0xf4] sm:$0xf]  ;;  %v5678_v30 = vld [vmem:[%s8014_s2 + $0x118] sm:$0xf0] }
 0x183   : > { %v7099_v39 = vsel %vm611_vm1, %v3094_v20, %v3125_v47  ;;  %v7102_v46 = vsel %vm611_vm1, %v3135_v58, %v3086_v55  ;;  %v2171_v1 = vperm.slane %v6888_v23, %v6747_v63  ;;  %v5918_v49 = vpack.i.bf16 %v714_v52, %v712_v38  ;;  %v5155_v58 = vld [vmem:[%s8014_s2 + $0xf8] sm:$0xf]  ;;  %v5664_v38 = vld [vmem:[%s8014_s2 + $0xac] sm:$0xf] }
 0x184   : > { %v2184_v22 = vrot.slane %v6864_v27, 4  ;;  %v2197_v15 = vsel %vm611_vm1, %v2196_v3, %v6870_v56  ;;  %v697_v6 = vrot.slane %v6908_v32, 4  ;;  %v2208_v18 = vrot.slane %v2179_v28, 4 }
 0x185   : > { %5919 = vxpose.xlu2.b32.start.end [1/1] (short) (narrow) %v5918_v49, 8  ;;  %v2203_v14 = vperm.slane %v2197_v15, %v6768_v25  ;;  %v2221_v23 = vsel %vm611_vm1, %v2220_v2, %v2171_v1  ;;  %v707_v8 = vrot.slane %v690_v9, 4  ;;  %v709_v53 = vrot.slane %v666_v51, 4  ;;  %v5669_v49 = vld [vmem:[%s8014_s2 + $0xd0] sm:$0xf0] }
 0x186   : > { %v2227_v37 = vperm.slane %v2221_v23, %v6768_v25  ;;  %v674_v19 = vsel %vm611_vm1, %v6841_v33, %v673_v11  ;;  %v698_v32 = vsel %vm611_vm1, %v6900_v45, %v697_v6  ;;  %v2187_v36 = vsel %vm611_vm1, %v6864_v27, %v2186_v4  ;;  %v5655_v23 = vld [vmem:[%s8014_s2 + $0x64] sm:$0xf] }
 0x187   : > { %v2242_v54 = vrot.slane %v2203_v14, 4  ;;  %v682_v3 = vperm.slane %v674_v19, %v6768_v25  ;;  %v708_v60 = vsel %vm611_vm1, %v707_v8, %v666_v51  ;;  %v710_v26 = vsel %vm611_vm1, %v690_v9, %v709_v53  ;;  %v5077_v8 = vld [vmem:[%s8014_s2 + $0x84] sm:$0xf0] }
 0x188   : > { %v2240_v0 = vrot.slane %v2227_v37, 4  ;;  %v706_v20 = vperm.slane %v698_v32, %v6768_v25  ;;  %v5965_v44 = vpack.i.bf16 %v710_v26, %v708_v60  ;;  %v2195_v33 = vperm.slane %v2187_v36, %v6768_v25  ;;  %v5646_v60 = vld [vmem:[%s8014_s2 + $0x1c] sm:$0xf]  ;;  %v5041_v26 = vld [vmem:[%s8014_s2 + $0x3c] sm:$0xf0] }
 0x189   : > { %v2243_v12 = vsel %vm611_vm1, %v2227_v37, %v2242_v54  ;;  %v2211_v11 = vsel %vm611_vm1, %v2179_v28, %v2210_v5  ;;  %v721_v41 = vrot.slane %v682_v3, 4  ;;  %v2185_v59 = vsel %vm611_vm1, %v2184_v22, %v6879_v10  ;;  %v5149_v10 = vld [vmem:[%s8014_s2 + $0x114] sm:$0xf0]  ;;  %v5083_v37 = vld [vmem:[%s8014_s2 + $0x68] sm:$0xf] }
 0x18a   : > { %v2241_v29 = vsel %vm611_vm1, %v2240_v0, %v2203_v14  ;;  %v719_v45 = vrot.slane %v706_v20, 4  ;;  %v2219_v27 = vperm.slane %v2211_v11, %v6768_v25  ;;  %5966 = vxpose.xlu1.b32.start.end [1/1] (short) (narrow) %v5965_v44, 8  ;;  %v2209_v34 = vsel %vm611_vm1, %v2208_v18, %v6873_v24  ;;  %v5047_v0 = vld [vmem:[%s8014_s2 + $0x20] sm:$0xf] }
 0x18b   : > { %v5946_v55 = vpack.i.bf16 %v2243_v12, %v2241_v29  ;;  %v722_v42 = vsel %vm611_vm1, %v706_v20, %v721_v41  ;;  %v2222_v57 = vrot.slane %v2171_v1, 4  ;;  %v2215_v17 = vperm.slane %v2209_v34, %v6768_v25  ;;  %v5113_v1 = vld [vmem:[%s8014_s2 + $0xcc] sm:$0xf0]  ;;  %v5651_v20 = vld [vmem:[%s8014_s2 + $0x40] sm:$0xf0] }
 0x18c   : > { %v720_v35 = vsel %vm611_vm1, %v719_v45, %v682_v3  ;;  %v2236_v48 = vrot.slane %v2219_v27, 4  ;;  %v2238_v43 = vrot.slane %v2195_v33, 4  ;;  %v2191_v47 = vperm.slane %v2185_v59, %v6768_v25  ;;  %v6040_v41 = vld [vmem:[%s6305_s26 + $0x4] sm:$0xf] }
 0x18d   : > { %5947 = vxpose.xlu0.b32.start.end [1/1] (short) (narrow) %v5946_v55, 8  ;;  %v5932_v28 = vpack.i.bf16 %v722_v42, %v720_v35  ;;  %v2198_v2 = vrot.slane %v6870_v56, 4  ;;  %v2232_v52 = vrot.slane %v2215_v17, 4  ;;  %v2223_v40 = vsel %vm611_vm1, %v6919_v13, %v2222_v57  ;;  %v5119_v56 = vld [vmem:[%s8014_s2 + $0xb0] sm:$0xf]  ;;  %v7209_v35 = vpop.permute.xlu1 %5961 }
 0x18e   : > { %v2237_v24 = vsel %vm611_vm1, %v2236_v48, %v2195_v33  ;;  %v2239_v51 = vsel %vm611_vm1, %v2219_v27, %v2238_v43  ;;  %v5152_v4 = vor.u32 %v5673_v31, %v5149_v10  ;;  %v5156_v22 = vor.u32 %v5678_v30, %v5155_v58 }
 0x18f   : > { %5933 = vxpose.xlu2.b32.start.end [1/1] (short) (narrow) %v5932_v28, 8  ;;  %v5972_v13 = vpack.i.bf16 %v2239_v51, %v2237_v24  ;;  %v2233_v5 = vsel %vm611_vm1, %v2232_v52, %v2191_v47  ;;  %v2234_v9 = vrot.slane %v2191_v47, 4  ;;  %v2231_v15 = vperm.slane %v2223_v40, %v6768_v25 }
 0x190   : > { %2092 = vmatpush.bf16.msra.mxu0 %v5152_v4  ;;  %v2199_v6 = vsel %vm611_vm1, %v6831_v21, %v2198_v2  ;;  %2105 = vmatpush.bf16.msra.mxu1 %v5156_v22  ;;  %v5116_v18 = vor.u32 %v5664_v38, %v5113_v1  ;;  %v5120_v14 = vor.u32 %v5669_v49, %v5119_v56  ;;  %v5660_v21 = vld [vmem:[%s8014_s2 + $0x88] sm:$0xf0] }
 0x191   : > { %v2235_v53 = vsel %vm611_vm1, %v2215_v17, %v2234_v9  ;;  %v2207_v54 = vperm.slane %v2199_v6, %v6768_v25  ;;  %v2244_v3 = vrot.slane %v2231_v15, 4  ;;  %v5080_v32 = vor.u32 %v5655_v23, %v5077_v8 }
 0x192   : > { %5973 = vxpose.xlu1.b32.start.end [1/1] (short) (narrow) %v5972_v13, 8  ;;  %v5939_v19 = vpack.i.bf16 %v2235_v53, %v2233_v5  ;;  %v5084_v36 = vor.u32 %v5660_v21, %v5083_v37  ;;  %v5044_v33 = vor.u32 %v5646_v60, %v5041_v26  ;;  %v5048_v11 = vor.u32 %v5651_v20, %v5047_v0 }
 0x193   : > { %v2245_v44 = vsel %vm611_vm1, %v2244_v3, %v2207_v54  ;;  %v2246_v12 = vrot.slane %v2207_v54, 4 }
 0x194   : > { %2093 = vmatpush.bf16.msra.mxu0 %v5116_v18  ;;  %2106 = vmatpush.bf16.msra.mxu1 %v5120_v14 }
 0x195   : > { %v2247_v29 = vsel %vm611_vm1, %v2231_v15, %v2246_v12 }
 0x196   : > { %v5953_v45 = vpack.i.bf16 %v2247_v29, %v2245_v44 }
 0x197   : > { %5940 = vxpose.xlu2.b32.start.end [1/1] (short) (narrow) %v5939_v19, 8 }
 0x198   : > { %2094 = vmatpush.bf16.msra.mxu0 %v5080_v32  ;;  %2107 = vmatpush.bf16.msra.mxu1 %v5084_v36 }
 0x19c   : > { %2095 = vmatpush.bf16.msra.mxu0 %v5044_v33  ;;  %2108 = vmatpush.bf16.msra.mxu1 %v5048_v11 }
 0x19f   : > { %5954 = vxpose.xlu2.b32.start.end [1/1] (short) (narrow) %v5953_v45, 8  ;;  %5164 = vmatmul.msk.bf16.vlgmr.msra.gmra.mxu0 %vm467_vm0, %v6040_v41 }
 0x1a0   : > { %5165 = vmatmul.msk.bf16.vlgmr.msra.gmra.mxu1 %vm467_vm0, %v6040_v41 }
 0x21e   : > { %v5920_v27 = vpop.trf.xlu2 }
 0x21f   : > { %v5924_v31 = vunpack.i.h.bf16 %v5920_v27  ;;  %v5921_v10 = vunpack.i.l.bf16 %v5920_v27 }
 0x221   : > { %v5927_v55 = vpop.trf.xlu0  ;;  %v991_v52 = vrot.slane %v5924_v31, 4  ;;  %v979_v40 = vrot.slane %v5921_v10, 4 }
 0x222   : > { %v5931_v59 = vunpack.i.h.bf16 %v5927_v55  ;;  %v5928_v34 = vunpack.i.l.bf16 %v5927_v55 }
 0x224   : > { %v1017_v48 = vrot.slane %v5931_v59, 4  ;;  %v1005_v57 = vrot.slane %v5928_v34, 4 }
 0x228   : > { %v5934_v42 = vpop.trf.xlu2 }
 0x229   : > { %v5938_v28 = vunpack.i.h.bf16 %v5934_v42  ;;  %v5935_v17 = vunpack.i.l.bf16 %v5934_v42 }
 0x22b   : > { %v1015_v24 = vrot.slane %v5938_v28, 4  ;;  %v1003_v43 = vrot.slane %v5935_v17, 4  ;;  %v1006_v47 = vsel %vm611_vm1, %v5935_v17, %v1005_v57  ;;  %v1018_v58 = vsel %vm611_vm1, %v5938_v28, %v1017_v48 }
 0x22c   : > { %v7219_v51 = vperm.slane %v1006_v47, %v6747_v63  ;;  %v7225_v56 = vperm.slane %v1018_v58, %v6747_v63 }
 0x22d   : > { %v1004_v30 = vsel %vm611_vm1, %v1003_v43, %v5928_v34  ;;  %v1016_v2 = vsel %vm611_vm1, %v1015_v24, %v5931_v59 }
 0x22e   : > { %v7216_v38 = vperm.slane %v1004_v30, %v6747_v63  ;;  %v7222_v4 = vperm.slane %v1016_v2, %v6747_v63  ;;  %v5967_v1 = vpop.trf.xlu1  ;;  %v1065_v37 = vrot.slane %v7219_v51, 4  ;;  %v1063_v21 = vrot.slane %v7225_v56, 4 }
 0x22f   : > { %v5971_v49 = vunpack.i.h.bf16 %v5967_v1  ;;  %v5968_v13 = vunpack.i.l.bf16 %v5967_v1 }
 0x230   : > { %v5941_v22 = vpop.trf.xlu2  ;;  %v1053_v44 = vrot.slane %v7216_v38, 4  ;;  %v1051_v45 = vrot.slane %v7222_v4, 4 }
 0x231   : > { %v5945_v5 = vunpack.i.h.bf16 %v5941_v22  ;;  %v5942_v9 = vunpack.i.l.bf16 %v5941_v22  ;;  %v5948_v15 = vpop.trf.xlu0  ;;  %v993_v6 = vrot.slane %v5971_v49, 4  ;;  %v980_v18 = vsel %vm611_vm1, %v979_v40, %v5968_v13 }
 0x232   : > { %v981_v14 = vrot.slane %v5968_v13, 4  ;;  %v992_v23 = vsel %vm611_vm1, %v991_v52, %v5971_v49  ;;  %v986_v8 = vperm.slane %v980_v18, %v6747_v63  ;;  %v5952_v3 = vunpack.i.h.bf16 %v5948_v15 }
 0x233   : > { %v998_v53 = vperm.slane %v992_v23, %v6747_v63  ;;  %v2518_v54 = vrot.slane %v5945_v5, 4  ;;  %v2506_v32 = vrot.slane %v5942_v9, 4  ;;  %v5949_v36 = vunpack.i.l.bf16 %v5948_v15 }
 0x234   : > { %v982_v19 = vsel %vm611_vm1, %v5921_v10, %v981_v14  ;;  %v1029_v60 = vrot.slane %v986_v8, 4  ;;  %v994_v0 = vsel %vm611_vm1, %v5924_v31, %v993_v6  ;;  %v2542_v20 = vrot.slane %v5952_v3, 4 }
 0x235   : > { %v990_v26 = vperm.slane %v982_v19, %v6747_v63  ;;  %v2530_v33 = vrot.slane %v5949_v36, 4  ;;  %v1027_v29 = vrot.slane %v998_v53, 4  ;;  %v1002_v28 = vperm.slane %v994_v0, %v6747_v63 }
 0x236   : > { %v5974_v12 = vpop.trf.xlu1  ;;  %v1030_v11 = vsel %vm611_vm1, %v998_v53, %v1029_v60  ;;  %v1054_v22 = vsel %vm611_vm1, %v7222_v4, %v1053_v44  ;;  %v1052_v14 = vsel %vm611_vm1, %v1051_v45, %v7216_v38  ;;  %v1066_v53 = vsel %vm611_vm1, %v7225_v56, %v1065_v37  ;;  %v7269_v4 = vpop.f32.mrf.mxu1 }
 0x237   : > { %v5978_v41 = vunpack.i.h.bf16 %v5974_v12  ;;  %v5975_v27 = vunpack.i.l.bf16 %v5974_v12  ;;  %v1041_v24 = vrot.slane %v990_v26, 4  ;;  %v1038_v1 = vperm.slane %v1030_v11, %v6768_v25 }
 0x238   : > { %v5955_v55 = vpop.trf.xlu2  ;;  %v1062_v15 = vperm.slane %v1054_v22, %v6768_v25  ;;  %v1039_v19 = vrot.slane %v1002_v28, 4  ;;  %v1074_v38 = vperm.slane %v1066_v53, %v6768_v25  ;;  %v1064_v56 = vsel %vm611_vm1, %v1063_v21, %v7219_v51 }
 0x239   : > { %v5959_v59 = vunpack.i.h.bf16 %v5955_v55  ;;  %v5956_v34 = vunpack.i.l.bf16 %v5955_v55  ;;  %v2516_v42 = vrot.slane %v5978_v41, 4  ;;  %v2504_v48 = vrot.slane %v5975_v27, 4 }
 0x23a   : > { %v2507_v57 = vsel %vm611_vm1, %v5975_v27, %v2506_v32  ;;  %v2519_v31 = vsel %vm611_vm1, %v5978_v41, %v2518_v54  ;;  %v1081_v6 = vrot.slane %v1038_v1, 4  ;;  %v1042_v23 = vsel %vm611_vm1, %v1002_v28, %v1041_v24  ;;  %v7267_v54 = vpop.f32.mrf.mxu0 }
 0x23b   : > { %v7242_v17 = vperm.slane %v2507_v57, %v6747_v63  ;;  %v2540_v10 = vrot.slane %v5959_v59, 4  ;;  %v2505_v43 = vsel %vm611_vm1, %v2504_v48, %v5942_v9  ;;  %v2517_v47 = vsel %vm611_vm1, %v2516_v42, %v5945_v5 }
 0x23c   : > { %v2543_v58 = vsel %vm611_vm1, %v5959_v59, %v2542_v20  ;;  %v2528_v30 = vrot.slane %v5956_v34, 4  ;;  %v2511_v2 = vperm.slane %v2505_v43, %v6747_v63  ;;  %v2531_v40 = vsel %vm611_vm1, %v5956_v34, %v2530_v33 }
 0x23d   : > { %v2541_v52 = vsel %vm611_vm1, %v2540_v10, %v5952_v3  ;;  %v7254_v13 = vperm.slane %v2531_v40, %v6747_v63  ;;  %v1028_v5 = vsel %vm611_vm1, %v1027_v29, %v986_v8  ;;  %v1079_v8 = vrot.slane %v1062_v15, 4 }
 0x23e   : > { %v2529_v49 = vsel %vm611_vm1, %v2528_v30, %v5949_v36  ;;  %v1034_v18 = vperm.slane %v1028_v5, %v6768_v25  ;;  %v1082_v3 = vsel %vm611_vm1, %v1062_v15, %v1081_v6  ;;  %v1058_v32 = vperm.slane %v1052_v14, %v6768_v25 }
 0x23f   : > { %v2535_v9 = vperm.slane %v2529_v49, %v6747_v63  ;;  %v1050_v60 = vperm.slane %v1042_v23, %v6768_v25  ;;  %v1040_v0 = vsel %vm611_vm1, %v1039_v19, %v990_v26  ;;  %v1080_v37 = vsel %vm611_vm1, %v1079_v8, %v1038_v1 }
 0x240   : > { %v1077_v36 = vrot.slane %v1034_v18, 4  ;;  %v1075_v20 = vrot.slane %v1058_v32, 4  ;;  %v1046_v12 = vperm.slane %v1040_v0, %v6768_v25  ;;  %v5986_v33 = vpack.i.bf16 %v1082_v3, %v1080_v37 }
 0x241   : > { %v1087_v11 = vrot.slane %v1074_v38, 4  ;;  %v1089_v29 = vrot.slane %v1050_v60, 4  ;;  %v1070_v45 = vperm.slane %v1064_v56, %v6768_v25  ;;  %v2523_v26 = vperm.slane %v2517_v47, %v6747_v63 }
 0x242   : > { %v1078_v44 = vsel %vm611_vm1, %v1058_v32, %v1077_v36  ;;  %v1076_v41 = vsel %vm611_vm1, %v1075_v20, %v1034_v18  ;;  %v1085_v27 = vrot.slane %v1046_v12, 4  ;;  %v2547_v55 = vperm.slane %v2541_v52, %v6747_v63  ;;  %5987 = vxpose.xlu2.b32.start.end [1/1] (short) (narrow) %v5986_v33, 8  ;;  %v2099_v30 = vpop.f32.mrf.mxu0  ;;  %v2112_v52 = vpop.f32.mrf.mxu1 }
 0x243   : > { %v2527_v51 = vperm.slane %v2519_v31, %v6747_v63  ;;  %v5979_v21 = vpack.i.bf16 %v1078_v44, %v1076_v41  ;;  %v1088_v59 = vsel %vm611_vm1, %v1087_v11, %v1050_v60  ;;  %v1090_v34 = vsel %vm611_vm1, %v1074_v38, %v1089_v29 }
 0x244   : > { %v2551_v42 = vperm.slane %v2543_v58, %v6747_v63  ;;  %v6000_v48 = vpack.i.bf16 %v1090_v34, %v1088_v59  ;;  %v2554_v57 = vrot.slane %v2511_v2, 4  ;;  %v2578_v28 = vrot.slane %v2535_v9, 4 }
 0x245   : > { %5980 = vxpose.xlu0.b32.start.end [1/1] (short) (narrow) %v5979_v21, 8  ;;  %v1083_v10 = vrot.slane %v1070_v45, 4  ;;  %v2552_v24 = vrot.slane %v2523_v26, 4  ;;  %v2576_v43 = vrot.slane %v2547_v55, 4  ;;  %v2566_v47 = vrot.slane %v7242_v17, 4 }
 0x246   : > { %6001 = vxpose.xlu1.b32.start.end [1/1] (short) (narrow) %v6000_v48, 8  ;;  %v1086_v31 = vsel %vm611_vm1, %v1070_v45, %v1085_v27  ;;  %v2555_v40 = vsel %vm611_vm1, %v2523_v26, %v2554_v57  ;;  %v2579_v1 = vsel %vm611_vm1, %v2547_v55, %v2578_v28  ;;  %v2590_v58 = vrot.slane %v7254_v13, 4 }
 0x247   : > { %v2563_v49 = vperm.slane %v2555_v40, %v6768_v25  ;;  %v2587_v22 = vperm.slane %v2579_v1, %v6768_v25  ;;  %v2553_v5 = vsel %vm611_vm1, %v2552_v24, %v2511_v2  ;;  %v2577_v15 = vsel %vm611_vm1, %v2576_v43, %v2535_v9 }
 0x248   : > { %v2583_v6 = vperm.slane %v2577_v15, %v6768_v25  ;;  %v2567_v18 = vsel %vm611_vm1, %v2527_v51, %v2566_v47  ;;  %v2591_v14 = vsel %vm611_vm1, %v2551_v42, %v2590_v58  ;;  %v1084_v23 = vsel %vm611_vm1, %v1083_v10, %v1046_v12 }
 0x249   : > { %v2604_v53 = vrot.slane %v2587_v22, 4  ;;  %v2606_v19 = vrot.slane %v2563_v49, 4  ;;  %v2599_v8 = vperm.slane %v2591_v14, %v6768_v25  ;;  %v5993_v3 = vpack.i.bf16 %v1086_v31, %v1084_v23 }
 0x24a   : > { %v2559_v32 = vperm.slane %v2553_v5, %v6768_v25  ;;  %v2588_v36 = vrot.slane %v2551_v42, 4  ;;  %v2575_v60 = vperm.slane %v2567_v18, %v6768_v25  ;;  %v2564_v38 = vrot.slane %v2527_v51, 4 }
 0x24b   : > { %v2605_v2 = vsel %vm611_vm1, %v2604_v53, %v2563_v49  ;;  %v2607_v9 = vsel %vm611_vm1, %v2587_v22, %v2606_v19  ;;  %v2600_v56 = vrot.slane %v2583_v6, 4  ;;  %v2612_v37 = vrot.slane %v2599_v8, 4 }
 0x24c   : > { %v6019_v0 = vpack.i.bf16 %v2607_v9, %v2605_v2  ;;  %v2602_v20 = vrot.slane %v2559_v32, 4  ;;  %v2589_v44 = vsel %vm611_vm1, %v2588_v36, %v7254_v13  ;;  %v6007_v12 = vpack.i.bf16 %v7269_v4, %v7267_v54 }
 0x24d   : > { %5994 = vxpose.xlu0.b32.start.end [1/1] (short) (narrow) %v5993_v3, 8  ;;  %v2614_v33 = vrot.slane %v2575_v60, 4  ;;  %v2565_v11 = vsel %vm611_vm1, %v2564_v38, %v7242_v17  ;;  %v2601_v29 = vsel %vm611_vm1, %v2600_v56, %v2559_v32  ;;  %v2595_v45 = vperm.slane %v2589_v44, %v6768_v25 }
 0x24e   : > { %6020 = vxpose.xlu2.b32.start.end [1/1] (short) (narrow) %v6019_v0, 8  ;;  %v2613_v41 = vsel %vm611_vm1, %v2612_v37, %v2575_v60  ;;  %v2603_v27 = vsel %vm611_vm1, %v2583_v6, %v2602_v20  ;;  %v2571_v26 = vperm.slane %v2565_v11, %v6768_v25  ;;  %v5963_v22 = vunpack.i.l.bf16 %v7209_v35 }
 0x24f   : > { %v6012_v55 = vpack.i.bf16 %v2603_v27, %v2601_v29  ;;  %v2615_v13 = vsel %vm611_vm1, %v2599_v8, %v2614_v33  ;;  %v2608_v21 = vrot.slane %v2595_v45, 4  ;;  %v7331_v6 = vperm.slane %v7087_v16, %v6768_v25 }
 0x250   : > { %v6033_v51 = vpack.i.bf16 %v2615_v13, %v2613_v41  ;;  %v2610_v54 = vrot.slane %v2571_v26, 4  ;;  %v7335_v18 = vperm.slane %v7099_v39, %v6768_v25  ;;  %v7339_v14 = vperm.slane %v7091_v7, %v6768_v25 }
 0x251   : > { %v2609_v17 = vsel %vm611_vm1, %v2608_v21, %v2571_v26  ;;  %v5964_v53 = vunpack.i.h.bf16 %v7209_v35  ;;  %v7350_v39 = vsel %vm467_vm0, %v5917_v62, %v5963_v22 }
 0x252   : > { %v2611_v4 = vsel %vm611_vm1, %v2595_v45, %v2610_v54 }
 0x253   : > { %v6026_v59 = vpack.i.bf16 %v2611_v4, %v2609_v17  ;;  %v7357_v56 = vsel %vm467_vm0, %v5963_v22, %v5964_v53 }
 0x255   : > { %6013 = vxpose.xlu0.b32.start.end [1/1] (short) (narrow) %v6012_v55, 8 }
 0x256   : > { %6034 = vxpose.xlu2.b32.start.end [1/1] (short) (narrow) %v6033_v51, 8 }
 0x25d   : > { %6027 = vxpose.xlu0.b32.start.end [1/1] (short) (narrow) %v6026_v59, 8 }
 0x2a0   : > { %6008 = vrot.lane.b32.xlu1 %v6007_v12, %s6173_s9  ;;  %s6183_s9 = smov 8  }
 0x2db   : > { %v5988_v34 = vpop.trf.xlu2 }
 0x2dc   : > { %v5992_v42 = vunpack.i.h.bf16 %v5988_v34  ;;  %v5989_v48 = vunpack.i.l.bf16 %v5988_v34 }
 0x2de   : > { %v1359_v28 = vrot.slane %v5992_v42, 4  ;;  %v1347_v10 = vrot.slane %v5989_v48, 4 }
 0x2e7   : > { %v7322_v57 = vpop.trf.xlu2 }
 0x2e8   : > { %v6025_v9 = vunpack.i.h.bf16 %v7322_v57  ;;  %v6022_v60 = vunpack.i.l.bf16 %v7322_v57 }
 0x2e9   : > { %v5981_v24 = vpop.trf.xlu0 }
 0x2ea   : > { %v5985_v43 = vunpack.i.h.bf16 %v5981_v24  ;;  %v5982_v47 = vunpack.i.l.bf16 %v5981_v24  ;;  %v6002_v30 = vpop.trf.xlu1  ;;  %v2884_v45 = vrot.slane %v6025_v9, 4  ;;  %v2872_v41 = vrot.slane %v6022_v60, 4 }
 0x2eb   : > { %v6006_v52 = vunpack.i.h.bf16 %v6002_v30  ;;  %v6003_v31 = vunpack.i.l.bf16 %v6002_v30 }
 0x2ec   : > { %v1360_v40 = vsel %vm611_vm1, %v1359_v28, %v5985_v43  ;;  %v1361_v1 = vrot.slane %v5985_v43, 4  ;;  %v1348_v58 = vsel %vm611_vm1, %v1347_v10, %v5982_v47  ;;  %v1349_v49 = vrot.slane %v5982_v47, 4 }
 0x2ed   : > { %v1366_v5 = vperm.slane %v1360_v40, %v6747_v63  ;;  %v1354_v15 = vperm.slane %v1348_v58, %v6747_v63  ;;  %v1383_v3 = vrot.slane %v6006_v52, 4  ;;  %v1371_v36 = vrot.slane %v6003_v31, 4 }
 0x2ee   : > { %v1362_v23 = vsel %vm611_vm1, %v5992_v42, %v1361_v1  ;;  %v1350_v16 = vsel %vm611_vm1, %v5989_v48, %v1349_v49 }
 0x2ef   : > { %v1370_v19 = vperm.slane %v1362_v23, %v6747_v63  ;;  %v1395_v8 = vrot.slane %v1366_v5, 4  ;;  %v7344_v32 = vpop.trf.xlu2  ;;  %v1397_v7 = vrot.slane %v1354_v15, 4  ;;  %v1358_v20 = vperm.slane %v1350_v16, %v6747_v63 }
 0x2f0   : > { %v6039_v55 = vunpack.i.h.bf16 %v7344_v32  ;;  %v6036_v34 = vunpack.i.l.bf16 %v7344_v32 }
 0x2f1   : > { %v5995_v2 = vpop.trf.xlu0  ;;  %v1407_v37 = vrot.slane %v1370_v19, 4  ;;  %v1396_v50 = vsel %vm611_vm1, %v1395_v8, %v1354_v15  ;;  %v1398_v13 = vsel %vm611_vm1, %v1366_v5, %v1397_v7  ;;  %v1409_v4 = vrot.slane %v1358_v20, 4 }
 0x2f2   : > { %v5999_v38 = vunpack.i.h.bf16 %v5995_v2  ;;  %v5996_v0 = vunpack.i.l.bf16 %v5995_v2  ;;  %v1402_v17 = vperm.slane %v1396_v50, %v6768_v25  ;;  %v7377_v10 = vperm.slane %v1398_v13, %v6768_v25 }
 0x2f3   : > { %v1408_v42 = vsel %vm611_vm1, %v1407_v37, %v1358_v20  ;;  %v2896_v23 = vrot.slane %v6036_v34, 4 }
 0x2f4   : > { %v1384_v62 = vsel %vm611_vm1, %v1383_v3, %v5999_v38  ;;  %v1385_v44 = vrot.slane %v5999_v38, 4  ;;  %v1372_v12 = vsel %vm611_vm1, %v1371_v36, %v5996_v0  ;;  %v1373_v33 = vrot.slane %v5996_v0, 4 }
 0x2f5   : > { %v1390_v11 = vperm.slane %v1384_v62, %v6747_v63  ;;  %v1378_v29 = vperm.slane %v1372_v12, %v6747_v63  ;;  %v1445_v1 = vrot.slane %v1402_v17, 4  ;;  %v1410_v3 = vsel %vm611_vm1, %v1370_v19, %v1409_v4 }
 0x2f6   : > { %v1386_v27 = vsel %vm611_vm1, %v6006_v52, %v1385_v44  ;;  %v1374_v26 = vsel %vm611_vm1, %v6003_v31, %v1373_v33  ;;  %v2908_v52 = vrot.slane %v6039_v55, 4  ;;  %v7384_v31 = vperm.slane %v1408_v42, %v6768_v25 }
 0x2f7   : > { %v1394_v51 = vperm.slane %v1386_v27, %v6747_v63  ;;  %v1419_v21 = vrot.slane %v1390_v11, 4  ;;  %v1421_v54 = vrot.slane %v1378_v29, 4  ;;  %v1382_v59 = vperm.slane %v1374_v26, %v6747_v63 }
 0x2f8   : > { %v1449_v2 = vrot.slane %v7377_v10, 4  ;;  %v1453_v50 = vrot.slane %v7384_v31, 4  ;;  %v7404_v19 = vperm.slane %v1410_v3, %v6768_v25 }
 0x2f9   : > { %v1431_v48 = vrot.slane %v1394_v51, 4  ;;  %v6014_v28 = vpop.trf.xlu0  ;;  %v1422_v24 = vsel %vm611_vm1, %v1390_v11, %v1421_v54  ;;  %v1420_v43 = vsel %vm611_vm1, %v1419_v21, %v1378_v29  ;;  %v1433_v58 = vrot.slane %v1382_v59, 4 }
 0x2fa   : > { %v6018_v47 = vunpack.i.h.bf16 %v6014_v28  ;;  %v6015_v30 = vunpack.i.l.bf16 %v6014_v28  ;;  %v1426_v40 = vperm.slane %v1420_v43, %v6768_v25  ;;  %v7391_v8 = vperm.slane %v1422_v24, %v6768_v25 }
 0x2fb   : > { %v1432_v36 = vsel %vm611_vm1, %v1431_v48, %v1382_v59 }
 0x2fc   : > { %v2885_v49 = vsel %vm611_vm1, %v2884_v45, %v6018_v47  ;;  %v2886_v22 = vrot.slane %v6018_v47, 4  ;;  %v2873_v5 = vsel %vm611_vm1, %v2872_v41, %v6015_v30  ;;  %v1446_v7 = vsel %vm611_vm1, %v1426_v40, %v1445_v1 }
 0x2fd   : > { %v2891_v15 = vperm.slane %v2885_v49, %v6747_v63  ;;  %v2874_v37 = vrot.slane %v6015_v30, 4  ;;  %v2879_v20 = vperm.slane %v2873_v5, %v6747_v63  ;;  %v1460_v62 = vpack.c.bf16 %v1446_v7, %v1446_v7 }
 0x2fe   : > { %v2887_v16 = vsel %vm611_vm1, %v6025_v9, %v2886_v22  ;;  %v1434_v9 = vsel %vm611_vm1, %v1394_v51, %v1433_v58  ;;  %v1447_v33 = vrot.slane %v7391_v8, 4  ;;  %v1438_v11 = vperm.slane %v1432_v36, %v6768_v25 }
 0x2ff   : > { %v7399_v38 = vperm.slane %v2887_v16, %v6747_v63  ;;  %v2920_v0 = vrot.slane %v2891_v15, 4  ;;  %v1443_v29 = vrot.slane %v1426_v40, 4  ;;  %1469 = vst.msk [vmem:[#allocation2 + $0x4] sm:$0xf] %vm1467_vm3, %v1460_v62  ;;  %v2875_v27 = vsel %vm611_vm1, %v6022_v60, %v2874_v37 }
 0x300   : > { %v2922_v26 = vrot.slane %v2879_v20, 4  ;;  %v1448_v57 = vsel %vm611_vm1, %v1447_v33, %v7377_v10  ;;  %v1454_v60 = vsel %vm611_vm1, %v1438_v11, %v1453_v50  ;;  %v2883_v28 = vperm.slane %v2875_v27, %v6747_v63 }
 0x301   : > { %v6028_v44 = vpop.trf.xlu0  ;;  %v2921_v12 = vsel %vm611_vm1, %v2920_v0, %v2879_v20  ;;  %v2932_v51 = vrot.slane %v7399_v38, 4  ;;  %v1444_v47 = vsel %vm611_vm1, %v1443_v29, %v1402_v17  ;;  %v1461_v22 = vpack.c.bf16 %v1448_v57, %v1448_v57 }
 0x302   : > { %v6032_v45 = vunpack.i.h.bf16 %v6028_v44  ;;  %v6029_v41 = vunpack.i.l.bf16 %v6028_v44  ;;  %v2927_v13 = vperm.slane %v2921_v12, %v6768_v25  ;;  %v2923_v1 = vsel %vm611_vm1, %v2891_v15, %v2922_v26 }
 0x303   : > { %v2933_v49 = vsel %vm611_vm1, %v2932_v51, %v2883_v28  ;;  %v1464_v5 = vpack.c.bf16 %v1454_v60, %v1454_v60  ;;  %1470 = vst.msk [vmem:[#allocation2 + $0x8] sm:$0xf] %vm1467_vm3, %v1461_v22  ;;  %v1459_v16 = vpack.c.bf16 %v1444_v47, %v1444_v47  ;;  %v1451_v15 = vrot.slane %v1438_v11, 4 }
 0x304   : > { %v2909_v21 = vsel %vm611_vm1, %v2908_v52, %v6032_v45  ;;  %v2910_v54 = vrot.slane %v6032_v45, 4  ;;  %v2897_v4 = vsel %vm611_vm1, %v2896_v23, %v6029_v41  ;;  %v2898_v59 = vrot.slane %v6029_v41, 4 }
 0x305   : > { %v2915_v42 = vperm.slane %v2909_v21, %v6747_v63  ;;  %v2903_v48 = vperm.slane %v2897_v4, %v6747_v63  ;;  %v2970_v58 = vrot.slane %v2927_v13, 4  ;;  %v2934_v36 = vrot.slane %v2883_v28, 4  ;;  %1473 = vst.msk [vmem:[#allocation2 + $0x14] sm:$0xf] %vm1467_vm3, %v1464_v5 }
 0x306   : > { %v2911_v24 = vsel %vm611_vm1, %v6039_v55, %v2910_v54  ;;  %v2899_v43 = vsel %vm611_vm1, %v6036_v34, %v2898_v59  ;;  %v2931_v7 = vperm.slane %v2923_v1, %v6768_v25  ;;  %v2939_v0 = vperm.slane %v2933_v49, %v6768_v25  ;;  %1468 = vst.msk [vmem:[#allocation2] sm:$0xf] %vm1467_vm3, %v1459_v16 }
 0x307   : > { %v2919_v30 = vperm.slane %v2911_v24, %v6747_v63  ;;  %v2944_v52 = vrot.slane %v2915_v42, 4  ;;  %v2946_v40 = vrot.slane %v2903_v48, 4  ;;  %v2907_v32 = vperm.slane %v2899_v43, %v6747_v63 }
 0x308   : > { %v1452_v11 = vsel %vm611_vm1, %v1451_v15, %v7384_v31  ;;  %v1450_v29 = vsel %vm611_vm1, %v7391_v8, %v1449_v2  ;;  %v1442_v26 = vperm.slane %v1434_v9, %v6768_v25  ;;  %v2978_v54 = vrot.slane %v2939_v0, 4 }
 0x309   : > { %v2956_v23 = vrot.slane %v2919_v30, 4  ;;  %v2945_v55 = vsel %vm611_vm1, %v2944_v52, %v2903_v48  ;;  %v2947_v34 = vsel %vm611_vm1, %v2915_v42, %v2946_v40  ;;  %v2958_v33 = vrot.slane %v2907_v32, 4 }
 0x30a   : > { %v2951_v17 = vperm.slane %v2945_v55, %v6768_v25  ;;  %v2955_v3 = vperm.slane %v2947_v34, %v6768_v25  ;;  %v2935_v31 = vsel %vm611_vm1, %v7399_v38, %v2934_v36  ;;  %v7459_v10 = vperm.slane %v7102_v46, %v6768_v25 }
 0x30b   : > { %v2957_v37 = vsel %vm611_vm1, %v2956_v23, %v2907_v32  ;;  %v3101_v8 = vrot.slane %v7350_v39, 4  ;;  %v2974_v2 = vrot.slane %v2931_v7, 4  ;;  %v2959_v4 = vsel %vm611_vm1, %v2919_v30, %v2958_v33 }
 0x30c   : > { %v2971_v20 = vsel %vm611_vm1, %v2951_v17, %v2970_v58  ;;  %v2972_v50 = vrot.slane %v2955_v3, 4  ;;  %v2968_v62 = vrot.slane %v2951_v17, 4  ;;  %v2963_v44 = vperm.slane %v2957_v37, %v6768_v25 }
 0x30d   : > { %v2985_v12 = vpack.c.bf16 %v2971_v20, %v2971_v20  ;;  %v1462_v59 = vpack.c.bf16 %v1450_v29, %v1450_v29  ;;  %v1457_v42 = vrot.slane %v7404_v19, 4  ;;  %v3113_v38 = vrot.slane %v7357_v56, 4 }
 0x30e   : > { %v2973_v45 = vsel %vm611_vm1, %v2972_v50, %v2931_v7  ;;  %v2969_v41 = vsel %vm611_vm1, %v2968_v62, %v2927_v13  ;;  %v2976_v27 = vrot.slane %v2963_v44, 4  ;;  %v1463_v13 = vpack.c.bf16 %v1452_v11, %v1452_v11 }
 0x30f   : > { %3002 = vrot.lane.b32.xlu1 %v2985_v12, %s6183_s9  ;;  %v2986_v51 = vpack.c.bf16 %v2973_v45, %v2973_v45  ;;  %v2984_v21 = vpack.c.bf16 %v2969_v41, %v2969_v41  ;;  %v2979_v9 = vsel %vm611_vm1, %v2963_v44, %v2978_v54  ;;  %v2943_v57 = vperm.slane %v2935_v31, %v6768_v25 }
 0x310   : > { %v2977_v46 = vsel %vm611_vm1, %v2976_v27, %v2939_v0  ;;  %1472 = vst.msk [vmem:[#allocation2 + $0x10] sm:$0xf] %vm1467_vm3, %v1463_v13  ;;  %v1455_v60 = vrot.slane %v1442_v26, 4  ;;  %v2975_v43 = vsel %vm611_vm1, %v2955_v3, %v2974_v2  ;;  %v1458_v47 = vsel %vm611_vm1, %v1442_v26, %v1457_v42 }
 0x311   : > { %3004 = vrot.lane.b32.xlu2 %v2986_v51, %s6183_s9  ;;  %3000 = vrot.lane.b32.xlu0 %v2984_v21, %s6183_s9  ;;  %1471 = vst.msk [vmem:[#allocation2 + $0xc] sm:$0xf] %vm1467_vm3, %v1462_v59  ;;  %v2989_v30 = vpack.c.bf16 %v2979_v9, %v2979_v9  ;;  %v2967_v52 = vperm.slane %v2959_v4, %v6768_v25  ;;  %v2982_v16 = vrot.slane %v2943_v57, 4  ;;  %v3173_v20 = vrot.slane %v7331_v6, 4 }
 0x312   : > { %v6009_v48 = vpop.permute.xlu1 %6008  ;;  %v1466_v40 = vpack.c.bf16 %v1458_v47, %v1458_v47  ;;  %v1456_v1 = vsel %vm611_vm1, %v1455_v60, %v7404_v19  ;;  %v2988_v22 = vpack.c.bf16 %v2977_v46, %v2977_v46  ;;  %v2987_v35 = vpack.c.bf16 %v2975_v43, %v2975_v43 }
 0x313   : > { %v6011_v28 = vunpack.i.h.bf16 %v6009_v48  ;;  %v6010_v24 = vunpack.i.l.bf16 %v6009_v48  ;;  %v1465_v5 = vpack.c.bf16 %v1456_v1, %v1456_v1  ;;  %v2980_v15 = vrot.slane %v2967_v52, 4 }
 0x314   : > { %1475 = vst.msk [vmem:[#allocation2 + $0x1c] sm:$0xf] %vm1467_vm3, %v1466_v40  ;;  %v3185_v50 = vrot.slane %v7339_v14, 4  ;;  %v3181_v33 = vrot.slane %v7459_v10, 4  ;;  %v3177_v41 = vrot.slane %v7335_v18, 4 }
 0x315   : > { %v3065_v58 = vsel %vm467_vm0, %v5964_v53, %v6010_v24  ;;  %v3066_v49 = vsel %vm467_vm0, %v6010_v24, %v6011_v28  ;;  %1474 = vst.msk [vmem:[#allocation2 + $0x18] sm:$0xf] %vm1467_vm3, %v1465_v5  ;;  %v2981_v45 = vsel %vm611_vm1, %v2980_v15, %v2943_v57 }
 0x316   : > { %v3099_v23 = vrot.slane %v3065_v58, 4  ;;  %v3102_v32 = vsel %vm611_vm1, %v3065_v58, %v3101_v8  ;;  %v3111_v55 = vrot.slane %v3066_v49, 4  ;;  %v3114_v34 = vsel %vm611_vm1, %v3066_v49, %v3113_v38 }
 0x317   : > { %v3110_v17 = vperm.slane %v3102_v32, %v6747_v63  ;;  %v3122_v19 = vperm.slane %v3114_v34, %v6747_v63  ;;  %3008 = vrot.lane.b32.xlu1 %v2988_v22, %s6183_s9  ;;  %v2990_v4 = vpack.c.bf16 %v2981_v45, %v2981_v45 }
 0x318   : > { %v3100_v53 = vsel %vm611_vm1, %v3099_v23, %v7350_v39  ;;  %v3112_v3 = vsel %vm611_vm1, %v3111_v55, %v7357_v56  ;;  %v2983_v39 = vsel %vm611_vm1, %v2967_v52, %v2982_v16 }
 0x319   : > { %v3106_v36 = vperm.slane %v3100_v53, %v6747_v63  ;;  %v3118_v7 = vperm.slane %v3112_v3, %v6747_v63  ;;  %v3159_v0 = vrot.slane %v3122_v19, 4  ;;  %v3161_v37 = vrot.slane %v3110_v17, 4  ;;  %3010 = vrot.lane.b32.xlu2 %v2989_v30, %s6183_s9  ;;  %3006 = vrot.lane.b32.xlu0 %v2987_v35, %s6183_s9 }
 0x31a   : > { %v2991_v51 = vpack.c.bf16 %v2983_v39, %v2983_v39 }
 0x31b   : > { %v3147_v62 = vrot.slane %v3118_v7, 4  ;;  %v3149_v56 = vrot.slane %v3106_v36, 4  ;;  %v3160_v44 = vsel %vm611_vm1, %v3159_v0, %v3110_v17  ;;  %v3162_v12 = vsel %vm611_vm1, %v3122_v19, %v3161_v37 }
 0x31c   : > { %v3166_v11 = vperm.slane %v3160_v44, %v6768_v25  ;;  %v3170_v29 = vperm.slane %v3162_v12, %v6768_v25 }
 0x31d   : > { %v3148_v27 = vsel %vm611_vm1, %v3147_v62, %v3106_v36  ;;  %v3150_v26 = vsel %vm611_vm1, %v3118_v7, %v3149_v56 }
 0x31e   : > { %v3154_v21 = vperm.slane %v3148_v27, %v6768_v25  ;;  %v3158_v54 = vperm.slane %v3150_v26, %v6768_v25  ;;  %v3179_v31 = vrot.slane %v3166_v11, 4  ;;  %v3182_v8 = vsel %vm611_vm1, %v3166_v11, %v3181_v33 }
 0x31f   : > { %v3183_v2 = vrot.slane %v3170_v29, 4  ;;  %v3186_v13 = vsel %vm611_vm1, %v3170_v29, %v3185_v50  ;;  %v3225_v9 = vrot.slane %v3182_v8, 4  ;;  %3014 = vrot.lane.b32.xlu1 %v2991_v51, %s6183_s9 }
 0x320   : > { %v3171_v59 = vrot.slane %v3154_v21, 4  ;;  %v3174_v42 = vsel %vm611_vm1, %v3154_v21, %v3173_v20  ;;  %v3175_v38 = vrot.slane %v3158_v54, 4  ;;  %v3178_v48 = vsel %vm611_vm1, %v3158_v54, %v3177_v41 }
 0x321   : > { %v3180_v46 = vsel %vm611_vm1, %v3179_v31, %v7459_v10  ;;  %v3184_v57 = vsel %vm611_vm1, %v3183_v2, %v7339_v14  ;;  %v3199_v60 = vrot.slane %v3178_v48, 4  ;;  %v3201_v28 = vrot.slane %v3174_v42, 4  ;;  %3012 = vrot.lane.b32.xlu0 %v2990_v4, %s6183_s9 }
 0x322   : > { %v3172_v24 = vsel %vm611_vm1, %v3171_v59, %v7331_v6  ;;  %v3176_v43 = vsel %vm611_vm1, %v3175_v38, %v7335_v18  ;;  %v3211_v47 = vrot.slane %v3184_v57, 4  ;;  %v3213_v30 = vrot.slane %v3180_v46, 4 }
 0x323   : > { %v3187_v52 = vrot.slane %v3176_v43, 4  ;;  %v3189_v40 = vrot.slane %v3172_v24, 4  ;;  %v3200_v1 = vsel %vm611_vm1, %v3199_v60, %v3174_v42  ;;  %v3202_v10 = vsel %vm611_vm1, %v3178_v48, %v3201_v28 }
 0x324   : > { %v3206_v14 = vperm.slane %v3200_v1, %v6747_v63  ;;  %v3210_v58 = vperm.slane %v3202_v10, %v6747_v63  ;;  %v3212_v49 = vsel %vm611_vm1, %v3211_v47, %v3180_v46  ;;  %v3214_v22 = vsel %vm611_vm1, %v3184_v57, %v3213_v30 }
 0x325   : > { %v3188_v6 = vsel %vm611_vm1, %v3187_v52, %v3172_v24  ;;  %v3190_v18 = vsel %vm611_vm1, %v3176_v43, %v3189_v40  ;;  %v3218_v5 = vperm.slane %v3212_v49, %v6747_v63  ;;  %v3222_v23 = vperm.slane %v3214_v22, %v6747_v63 }
 0x326   : > { %v3194_v32 = vperm.slane %v3188_v6, %v6747_v63  ;;  %v3198_v55 = vperm.slane %v3190_v18, %v6747_v63  ;;  %v3223_v34 = vrot.slane %v3186_v13, 4  ;;  %v3226_v17 = vsel %vm611_vm1, %v3186_v13, %v3225_v9 }
 0x327   : > { %v3234_v19 = vperm.slane %v3226_v17, %v6747_v63  ;;  %v3235_v35 = vrot.slane %v3206_v14, 4  ;;  %v3247_v53 = vrot.slane %v3210_v58, 4  ;;  %v3261_v3 = vrot.slane %v3218_v5, 4 }
 0x328   : > { %v3224_v16 = vsel %vm611_vm1, %v3223_v34, %v3182_v8  ;;  %v3237_v15 = vrot.slane %v3194_v32, 4  ;;  %v3249_v36 = vrot.slane %v3198_v55, 4  ;;  %v3273_v7 = vrot.slane %v3222_v23, 4 }
 0x329   : > { %v3230_v0 = vperm.slane %v3224_v16, %v6747_v63  ;;  %v3236_v37 = vsel %vm611_vm1, %v3235_v35, %v3194_v32  ;;  %v3248_v20 = vsel %vm611_vm1, %v3247_v53, %v3198_v55  ;;  %v3271_v50 = vrot.slane %v3234_v19, 4 }
 0x32a   : > { %v3238_v39 = vsel %vm611_vm1, %v3206_v14, %v3237_v15  ;;  %v3242_v62 = vperm.slane %v3236_v37, %v6768_v25  ;;  %v3250_v56 = vsel %vm611_vm1, %v3210_v58, %v3249_v36  ;;  %v3254_v44 = vperm.slane %v3248_v20, %v6768_v25 }
 0x32b   : > { %v3246_v12 = vperm.slane %v3238_v39, %v6768_v25  ;;  %v3258_v33 = vperm.slane %v3250_v56, %v6768_v25  ;;  %v3259_v11 = vrot.slane %v3230_v0, 4  ;;  %v3262_v63 = vsel %vm611_vm1, %v3230_v0, %v3261_v3 }
 0x32c   : > { %v3270_v29 = vperm.slane %v3262_v63, %v6768_v25  ;;  %v3272_v45 = vsel %vm611_vm1, %v3271_v50, %v3222_v23  ;;  %v3274_v41 = vsel %vm611_vm1, %v3234_v19, %v3273_v7  ;;  %v3285_v27 = vrot.slane %v3242_v62, 4 }
 0x32d   : > { %v3260_v26 = vsel %vm611_vm1, %v3259_v11, %v3218_v5  ;;  %v3278_v51 = vperm.slane %v3272_v45, %v6768_v25  ;;  %v3282_v21 = vperm.slane %v3274_v41, %v6768_v25  ;;  %v3289_v54 = vrot.slane %v3246_v12, 4 }
 0x32e   : > { %v3266_v31 = vperm.slane %v3260_v26, %v6768_v25  ;;  %v3287_v8 = vrot.slane %v3270_v29, 4  ;;  %v3293_v2 = vrot.slane %v3254_v44, 4  ;;  %v3297_v13 = vrot.slane %v3258_v33, 4 }
 0x32f   : > { %v3290_v9 = vsel %vm611_vm1, %v3270_v29, %v3289_v54  ;;  %v3291_v4 = vrot.slane %v3278_v51, 4  ;;  %v3295_v59 = vrot.slane %v3282_v21, 4 }
 0x330   : > { %v3283_v42 = vrot.slane %v3266_v31, 4  ;;  %v3286_v38 = vsel %vm611_vm1, %v3266_v31, %v3285_v27  ;;  %v3288_v48 = vsel %vm611_vm1, %v3287_v8, %v3246_v12  ;;  %v3294_v46 = vsel %vm611_vm1, %v3278_v51, %v3293_v2 }
 0x331   : > { %v3292_v57 = vsel %vm611_vm1, %v3291_v4, %v3254_v44  ;;  %v3296_v60 = vsel %vm611_vm1, %v3295_v59, %v3258_v33  ;;  %v3298_v25 = vsel %vm611_vm1, %v3282_v21, %v3297_v13  ;;  %v3300_v28 = vsel %vm1744_vm2, 1.0, %v3286_v38 }
 0x332   : > { %v3284_v24 = vsel %vm611_vm1, %v3283_v42, %v3242_v62  ;;  %v3301_v43 = vsel %vm1744_vm2, 1.0, %v3288_v48  ;;  %v3302_v47 = vsel %vm1744_vm2, 1.0, %v3290_v9  ;;  %v3303_v52 = vsel %vm1744_vm2, 1.0, %v3292_v57 }
 0x333   : > { %v3299_v30 = vsel %vm1744_vm2, 1.0, %v3284_v24  ;;  %v3304_v40 = vsel %vm1744_vm2, 1.0, %v3294_v46  ;;  %v3308_v10 = vpack.c.bf16 %v3300_v28, %v3300_v28  ;;  %v3309_v14 = vpack.c.bf16 %v3301_v43, %v3301_v43 }
 0x334   : > { %v3307_v1 = vpack.c.bf16 %v3299_v30, %v3299_v30  ;;  %v3305_v58 = vsel %vm1744_vm2, 1.0, %v3296_v60  ;;  %v3310_v49 = vpack.c.bf16 %v3302_v47, %v3302_v47  ;;  %v3306_v22 = vsel %vm1744_vm2, 1.0, %v3298_v25 }
 0x335   : > { %v3311_v6 = vpack.c.bf16 %v3303_v52, %v3303_v52  ;;  %v3312_v18 = vpack.c.bf16 %v3304_v40, %v3304_v40  ;;  %3316 = vst [vmem:[#allocation3 + $0xc] sm:$0xf] %v3308_v10  ;;  %v3313_v5 = vpack.c.bf16 %v3305_v58, %v3305_v58  ;;  %v3314_v23 = vpack.c.bf16 %v3306_v22, %v3306_v22 }
 0x336   : > { %3315 = vst [vmem:[#allocation3 + $0x4] sm:$0xf] %v3307_v1 }
 0x337   : > { %3317 = vst [vmem:[#allocation3 + $0x14] sm:$0xf] %v3309_v14 }
 0x338   : > { %3318 = vst [vmem:[#allocation3 + $0x1c] sm:$0xf] %v3310_v49 }
 0x339   : > { %3319 = vst [vmem:[#allocation3 + $0x24] sm:$0xf] %v3311_v6 }
 0x33a   : > { %3320 = vst [vmem:[#allocation3 + $0x2c] sm:$0xf] %v3312_v18 }
 0x33b   : > { %3321 = vst [vmem:[#allocation3 + $0x34] sm:$0xf] %v3313_v5 }
 0x33c   : > { %3322 = vst [vmem:[#allocation3 + $0x3c] sm:$0xf] %v3314_v23 }
 0x36b   : > { %v3005_v32 = vpop.permute.xlu2 %3004 }
 0x36c   : > { %3027 = vst.msk [vmem:[#allocation2 + $0x8] sm:$0xf] %vm3024_vm4, %v3005_v32 }
 0x373   : > { %v3011_v55 = vpop.permute.xlu2 %3010 }
 0x374   : > { %3030 = vst.msk [vmem:[#allocation2 + $0x14] sm:$0xf] %vm3024_vm4, %v3011_v55 }
 0x381   : > { %v3003_v61 = vpop.permute.xlu1 %3002 }
 0x382   : > { %3026 = vst.msk [vmem:[#allocation2 + $0x4] sm:$0xf] %vm3024_vm4, %v3003_v61 }
 0x383   : > { %v3001_v34 = vpop.permute.xlu0 %3000 }
 0x384   : > { %3025 = vst.msk [vmem:[#allocation2] sm:$0xf] %vm3024_vm4, %v3001_v34 }
 0x389   : > { %v3009_v17 = vpop.permute.xlu1 %3008 }
 0x38a   : > { %3029 = vst.msk [vmem:[#allocation2 + $0x10] sm:$0xf] %vm3024_vm4, %v3009_v17 }
 0x38b   : > { %v3007_v19 = vpop.permute.xlu0 %3006 }
 0x38c   : > { %3028 = vst.msk [vmem:[#allocation2 + $0xc] sm:$0xf] %vm3024_vm4, %v3007_v19 }
 0x391   : > { %v3015_v35 = vpop.permute.xlu1 %3014 }
 0x392   : > { %3032 = vst.msk [vmem:[#allocation2 + $0x1c] sm:$0xf] %vm3024_vm4, %v3015_v35 }
 0x393   : > { %v3013_v53 = vpop.permute.xlu0 %3012 }
 0x394   : > { %3031 = vst.msk [vmem:[#allocation2 + $0x18] sm:$0xf] %vm3024_vm4, %v3013_v53 }
 0x395 PF: > { %v5682_v3 = vld [vmem:[%s8013_s1 + $0x18] sm:$0xff]  ;;  %v5681_v16 = vld [vmem:[%s8013_s1 + $0x10] sm:$0xff]  ;;  %s5166_s8 = sshll.u32 %s6155_s21, 3  ;;  %v5680_v15 = vld [vmem:[%s8013_s1 + $0x8] sm:$0xff]  ;;  %vm3361_vm5 = vcmask 523264   ;;  %s6184_s16 = smov 120  }
 0x396   : > { %3369 = vmatpush.bf16.msra.mxu0 %v5682_v3  ;;  %s3324_s29 = sshra.s32 %s5166_s8, 3  ;;  %v5679_v36 = vld [vmem:[%s8013_s1] sm:$0xff]  ;;  %s6185_s27 = smov 96   ;;  %v6191_v50 = vmov 1983009808   ;;  %vm3645_vm6 = vcmask 1043456  }
 0x397   : > { %s5167_s14 = sshll.u32 %s3324_s29, 2  ;;  %s6186_s17 = smov 112   ;;  %v3406_v39 = vunpack.c.l.s4 %v6191_v50  ;;  %v3633_v56 = vld [vmem:[#allocation2] sm:$0xf]  ;;  %v3634_v44 = vld [vmem:[#allocation2 + $0x4] sm:$0xf] }
 0x398   : > { %s3327_s9 = scalar_lea.vmem %s6305_s26, %s5167_s14  ;;  %s6187_s30 = smov 88   ;;  %vm3401_vm7 = vcmask 1047556   ;;  %v3647_v33 = vsel %vm3645_vm6, %v3633_v56, 0  ;;  %v3666_v11 = vsel %vm3645_vm6, %v3634_v44, 0  ;;  %v3635_v63 = vld [vmem:[#allocation2 + $0x8] sm:$0xf] }
 0x399   : > { %v3328_v7 = vld [vmem:[%s3327_s9] sm:$0xf]  ;;  %s6188_s8 = smov 80   ;;  %s6189_s29 = smov 104   ;;  %3656 = vmatpush.bf16.msra.mxu1 %v3647_v33  ;;  %3675 = vmatpush.bf16.msra.mxu2 %v3666_v11  ;;  %v3685_v41 = vsel %vm3645_vm6, %v3635_v63, 0  ;;  %v7606_v27 = vunpack.c.0.s8 %v3406_v39  ;;  %vm3641_vm8 = vcmask 64512  }
 0x39a   : > { %3370 = vmatpush.bf16.msra.mxu0 %v5681_v16  ;;  %s6190_s26 = smov 72   ;;  %3694 = vmatpush.bf16.msra.mxu3 %v3685_v41  ;;  %v6192_v2 = vmov 1934713408   ;;  %v3637_v47 = vld [vmem:[#allocation2 + $0x10] sm:$0xf]  ;;  %vm3795_vm9 = vcmask 130048  }
 0x39b   : > { %v3454_v13 = vunpack.c.l.s4 %v6192_v2  ;;  %v3639_v48 = vld [vmem:[#allocation2 + $0x18] sm:$0xf]  ;;  %v3723_v10 = vsel %vm3645_vm6, %v3637_v47, 0  ;;  %v3636_v14 = vld [vmem:[#allocation2 + $0xc] sm:$0xf]  ;;  %s6097_s10 = scalar_lea.hbm %s8017_s5, 32 }
 0x39c   : > { %v3761_v57 = vsel %vm3645_vm6, %v3639_v48, 0  ;;  %v3638_v58 = vld [vmem:[#allocation2 + $0x14] sm:$0xf]  ;;  %v3704_v18 = vsel %vm3645_vm6, %v3636_v14, 0 }
 0x39d   : > { %v7619_v1 = vunpack.c.0.s8 %v3454_v13  ;;  %3732 = vmatpush.bf16.msrb.mxu2 %v3723_v10  ;;  %3713 = vmatpush.bf16.msrb.mxu1 %v3704_v18  ;;  %v3742_v23 = vsel %vm3645_vm6, %v3638_v58, 0 }
 0x39e   : > { %3371 = vmatpush.bf16.msra.mxu0 %v5680_v15  ;;  %3751 = vmatpush.bf16.msrb.mxu3 %v3742_v23 }
 0x3a2   : > { %3372 = vmatpush.bf16.msra.mxu0 %v5679_v36 }
 0x3a5   : > { %5184 = vmatmul.msk.bf16.vlgmr.msra.gmra.mxu0 %vm3361_vm5, %v3328_v7 }
 0x3a6   : > { %3770 = vmatpush.bf16.msrb.mxu0 %v3761_v57 }
 0x422   : > { %v3374_v0 = vpop.f32.mrf.mxu0 }
 0x423   : > { %3379 = vrot.lane.b32.xlu2 %v3374_v0, %s6184_s16  ;;  %3388 = vrot.lane.b32.xlu1 %v3374_v0, %s6185_s27  ;;  %v3403_v45 = vrot.slane %v3374_v0, 4 }
 0x424   : > { %3382 = vrot.lane.b32.xlu0 %v3374_v0, %s6186_s17  ;;  %s8027_s17 = sand.u32 1, %s6147_s19  }
 0x42a   : > { %v3376_v37 = vpop.f32.mrf.mxu0 }
 0x42b   : > { %3391 = vrot.lane.b32.xlu2 %v3374_v0, %s6187_s30  ;;  %3394 = vrot.lane.b32.xlu1 %v3374_v0, %s6188_s8  ;;  %s4760_s30 = scalar_lea.sflag [#allocation5], %s8027_s17 }
 0x42c   : > { %3385 = vrot.lane.b32.xlu0 %v3374_v0, %s6189_s29  ;;  %s5602_s29 = sshll.u32 %s6159_s22, 1 }
 0x434   : > { %3397 = vrot.lane.b32.xlu0 %v3374_v0, %s6190_s26  ;;  %s4770_s26 = sadd.s32 %s6155_s21, %s5602_s29  ;;  %s8025_s21 = scalar_lea.vmem [#allocation4], %s6299_s13 }
 0x435   : > { %s5603_s12 = sshll.u32 %s4770_s26, 3  ;;  %s4774_s22 = sshll.u32 %s8025_s21, 4  ;;  %s4775_s22 = int_to_ptr.vmem [resolvable:$true] %s4774_s22 }
 0x436   : > { %s4772_s15 = scalar_lea.hbm %s8017_s5, %s5603_s12  ;;  %s8026_s27 = smov %s8025_s21 }
 0x437   : > { %s4776_s16 = sshll.u32 %s4772_s15, 4  ;;  %s4777_s16 = int_to_ptr.hbm [resolvable:$true] %s4776_s16 }
 0x438   : > { %s6091_s8 = sshra.s32 %s4777_s16, 4  ;;  %s6092_s8 = int_to_ptr.hbm [resolvable:$true] %s6091_s8 }
 0x439   : > { %s6093_s29 = scalar_lea.hbm %s6092_s8, 8  ;;  %p6098_p4 = scmp.lt.s32.totalorder %s6092_s8, %s8017_s5 }
 0x43a   : > { %p6094_p0 = scmp.ne.s32.totalorder %s6092_s8, %s6093_s29  ;;  %p6099_p5 = scmp.lt.s32.totalorder %s6097_s10, %s6093_s29 }
 0x43c   : > { %p6095_p1 = pnand %p6094_p0, %p6275_p3  ;;  %p6100_p6 = por %p6099_p5, %p6098_p4 }
 0x43e   : > { %p6096_p2 = pneg %p6095_p1 }
 0x440   : > { %p6101_p7 = pnand %p6100_p6, %p6096_p2 }
 0x47d   : > { %v3380_v29 = vpop.permute.xlu2 %3379 }
 0x47e   : > { %v3415_v21 = vrot.slane %v3380_v29, 4 }
 0x485   : > { %v3392_v30 = vpop.permute.xlu2 %3391 }
 0x486   : > { %v3439_v32 = vrot.slane %v3392_v30, 4 }
 0x495   : > { %v3389_v20 = vpop.permute.xlu1 %3388 }
 0x496   : > { %v3383_v62 = vpop.permute.xlu0 %3382  ;;  %v3427_v31 = vrot.slane %v3389_v20, 4 }
 0x497   : > { %v3400_v12 = vrot.slane %v3383_v62, 4  ;;  %v3404_v26 = vsel %vm3401_vm7, %v3383_v62, %v3403_v45 }
 0x498   : > { %v3412_v8 = vperm.slane %v3404_v26, %v7606_v27 }
 0x499   : > { %v3402_v51 = vsel %vm3401_vm7, %v3400_v12, %v3374_v0 }
 0x49a   : > { %v3408_v4 = vperm.slane %v3402_v51, %v7606_v27  ;;  %v3463_v28 = vrot.slane %v3412_v8, 4 }
 0x49c   : > { %v3451_v52 = vrot.slane %v3408_v4, 4 }
 0x49d   : > { %v3395_v54 = vpop.permute.xlu1 %3394 }
 0x49e   : > { %v3386_v9 = vpop.permute.xlu0 %3385  ;;  %v3425_v59 = vrot.slane %v3395_v54, 4  ;;  %v3428_v60 = vsel %vm3401_vm7, %v3395_v54, %v3427_v31 }
 0x49f   : > { %v3413_v42 = vrot.slane %v3386_v9, 4  ;;  %v3416_v38 = vsel %vm3401_vm7, %v3386_v9, %v3415_v21  ;;  %v3436_v49 = vperm.slane %v3428_v60, %v7606_v27 }
 0x4a0   : > { %v3424_v46 = vperm.slane %v3416_v38, %v7606_v27  ;;  %v3426_v40 = vsel %vm3401_vm7, %v3425_v59, %v3389_v20 }
 0x4a1   : > { %v3414_v25 = vsel %vm3401_vm7, %v3413_v42, %v3380_v29  ;;  %v3432_v55 = vperm.slane %v3426_v40, %v7606_v27  ;;  %v3487_v53 = vrot.slane %v3436_v49, 4 }
 0x4a2   : > { %v3420_v24 = vperm.slane %v3414_v25, %v7606_v27  ;;  %v3461_v43 = vrot.slane %v3424_v46, 4  ;;  %v3464_v6 = vsel %vm3401_vm7, %v3424_v46, %v3463_v28 }
 0x4a3   : > { %v3472_v19 = vperm.slane %v3464_v6, %v7619_v1  ;;  %v3475_v37 = vrot.slane %v3432_v55, 4 }
 0x4a4   : > { %v3449_v22 = vrot.slane %v3420_v24, 4  ;;  %v3452_v5 = vsel %vm3401_vm7, %v3420_v24, %v3451_v52  ;;  %v3462_v34 = vsel %vm3401_vm7, %v3461_v43, %v3412_v8 }
 0x4a5   : > { %v3460_v3 = vperm.slane %v3452_v5, %v7619_v1  ;;  %v3468_v36 = vperm.slane %v3462_v34, %v7619_v1  ;;  %v3511_v50 = vrot.slane %v3472_v19, 4 }
 0x4a6   : > { %v3450_v61 = vsel %vm3401_vm7, %v3449_v22, %v3408_v4  ;;  %v3398_v17 = vpop.permute.xlu0 %3397 }
 0x4a7   : > { %v3437_v35 = vrot.slane %v3398_v17, 4  ;;  %v3440_v16 = vsel %vm3401_vm7, %v3398_v17, %v3439_v32  ;;  %v3456_v15 = vperm.slane %v3450_v61, %v7619_v1  ;;  %v3503_v56 = vrot.slane %v3460_v3, 4 }
 0x4a8   : > { %v3448_v0 = vperm.slane %v3440_v16, %v7606_v27  ;;  %v3507_v63 = vrot.slane %v3468_v36, 4 }
 0x4a9   : > { %v3438_v7 = vsel %vm3401_vm7, %v3437_v35, %v3392_v30  ;;  %v3499_v11 = vrot.slane %v3456_v15, 4 }
 0x4aa   : > { %v3444_v20 = vperm.slane %v3438_v7, %v7606_v27  ;;  %v3485_v39 = vrot.slane %v3448_v0, 4  ;;  %v3488_v62 = vsel %vm3401_vm7, %v3448_v0, %v3487_v53 }
 0x4ab   : > { %v3496_v33 = vperm.slane %v3488_v62, %v7619_v1 }
 0x4ac   : > { %v3473_v44 = vrot.slane %v3444_v20, 4  ;;  %v3476_v12 = vsel %vm3401_vm7, %v3444_v20, %v3475_v37  ;;  %v3486_v45 = vsel %vm3401_vm7, %v3485_v39, %v3436_v49 }
 0x4ad   : > { %v3484_v29 = vperm.slane %v3476_v12, %v7619_v1  ;;  %v3492_v26 = vperm.slane %v3486_v45, %v7619_v1  ;;  %v3509_v51 = vrot.slane %v3496_v33, 4  ;;  %v3512_v21 = vsel %vm3401_vm7, %v3496_v33, %v3511_v50 }
 0x4ae   : > { %v3474_v41 = vsel %vm3401_vm7, %v3473_v44, %v3432_v55  ;;  %v3549_v2 = vrot.slane %v3512_v21, 4 }
 0x4af   : > { %v3480_v54 = vperm.slane %v3474_v41, %v7619_v1  ;;  %v3501_v31 = vrot.slane %v3484_v29, 4  ;;  %v3504_v8 = vsel %vm3401_vm7, %v3484_v29, %v3503_v56  ;;  %v3505_v13 = vrot.slane %v3492_v26, 4 }
 0x4b0   : > { %v3508_v9 = vsel %vm3401_vm7, %v3492_v26, %v3507_v63  ;;  %v3510_v4 = vsel %vm3401_vm7, %v3509_v51, %v3472_v19  ;;  %v3525_v59 = vrot.slane %v3504_v8, 4 }
 0x4b1   : > { %v3497_v42 = vrot.slane %v3480_v54, 4  ;;  %v3500_v38 = vsel %vm3401_vm7, %v3480_v54, %v3499_v11  ;;  %v3502_v48 = vsel %vm3401_vm7, %v3501_v31, %v3460_v3  ;;  %v3537_v46 = vrot.slane %v3510_v4, 4 }
 0x4b2   : > { %v3506_v57 = vsel %vm3401_vm7, %v3505_v13, %v3468_v36  ;;  %v3527_v60 = vrot.slane %v3500_v38, 4  ;;  %v3550_v25 = vsel %vm3401_vm7, %v3549_v2, %v3508_v9  ;;  %v3551_v28 = vrot.slane %v3508_v9, 4 }
 0x4b3   : > { %v3539_v24 = vrot.slane %v3506_v57, 4  ;;  %v3556_v43 = vperm.slane %v3550_v25, %v7606_v27  ;;  %v3498_v47 = vsel %vm3401_vm7, %v3497_v42, %v3456_v15  ;;  %v3513_v30 = vrot.slane %v3502_v48, 4 }
 0x4b4   : > { %v3552_v52 = vsel %vm3401_vm7, %v3512_v21, %v3551_v28  ;;  %v3515_v40 = vrot.slane %v3498_v47, 4  ;;  %v3526_v10 = vsel %vm3401_vm7, %v3525_v59, %v3500_v38  ;;  %v3538_v14 = vsel %vm3401_vm7, %v3537_v46, %v3506_v57  ;;  %v3640_v21 = vld [vmem:[#allocation2 + $0x1c] sm:$0xf] }
 0x4b5   : > { %v3540_v58 = vsel %vm3401_vm7, %v3510_v4, %v3539_v24  ;;  %v3514_v49 = vsel %vm3401_vm7, %v3513_v30, %v3498_v47  ;;  %v3532_v22 = vperm.slane %v3526_v10, %v7606_v27  ;;  %v3544_v5 = vperm.slane %v3538_v14, %v7606_v27 }
 0x4b6   : > { %v3548_v6 = vperm.slane %v3540_v58, %v7606_v27  ;;  %v3520_v18 = vperm.slane %v3514_v49, %v7606_v27  ;;  %v3585_v23 = vrot.slane %v3556_v43, 4  ;;  %v3560_v32 = vperm.slane %v3552_v52, %v7606_v27 }
 0x4b7   : > { %v3561_v55 = vrot.slane %v3532_v22, 4  ;;  %v3516_v61 = vsel %vm3401_vm7, %v3502_v48, %v3515_v40  ;;  %v3528_v34 = vsel %vm3401_vm7, %v3504_v8, %v3527_v60  ;;  %v3587_v35 = vrot.slane %v3544_v5, 4 }
 0x4b8   : > { %v3586_v17 = vsel %vm3401_vm7, %v3585_v23, %v3544_v5  ;;  %v3563_v19 = vrot.slane %v3520_v18, 4  ;;  %v3524_v53 = vperm.slane %v3516_v61, %v7606_v27  ;;  %v3536_v15 = vperm.slane %v3528_v34, %v7606_v27 }
 0x4b9   : > { %v3562_v3 = vsel %vm3401_vm7, %v3561_v55, %v3520_v18  ;;  %v3592_v16 = vperm.slane %v3586_v17, %v7619_v1  ;;  %v3599_v36 = vrot.slane %v3548_v6, 4  ;;  %v3588_v37 = vsel %vm3401_vm7, %v3556_v43, %v3587_v35 }
 0x4ba   : > { %v3568_v7 = vperm.slane %v3562_v3, %v7619_v1  ;;  %v3564_v0 = vsel %vm3401_vm7, %v3532_v22, %v3563_v19  ;;  %v3575_v20 = vrot.slane %v3524_v53, 4  ;;  %v3596_v62 = vperm.slane %v3588_v37, %v7619_v1  ;;  %v5683_v37 = vld [vmem:[#allocation3] sm:$0xff] }
 0x4bb   : > { %v3609_v50 = vrot.slane %v3592_v16, 4  ;;  %v3572_v39 = vperm.slane %v3564_v0, %v7619_v1  ;;  %v3600_v56 = vsel %vm3401_vm7, %v3560_v32, %v3599_v36  ;;  %v3597_v33 = vrot.slane %v3560_v32, 4 }
 0x4bc   : > { %v3611_v44 = vrot.slane %v3568_v7, 4  ;;  %v3576_v12 = vsel %vm3401_vm7, %v3536_v15, %v3575_v20  ;;  %v3608_v27 = vperm.slane %v3600_v56, %v7619_v1  ;;  %v3613_v63 = vrot.slane %v3596_v62, 4  ;;  %v5684_v20 = vld [vmem:[#allocation3 + $0x8] sm:$0xff] }
 0x4bd   : > { %v3610_v11 = vsel %vm3401_vm7, %v3609_v50, %v3568_v7  ;;  %v3584_v29 = vperm.slane %v3576_v12, %v7619_v1  ;;  %v3573_v51 = vrot.slane %v3536_v15, 4  ;;  %v3598_v9 = vsel %vm3401_vm7, %v3597_v33, %v3548_v6  ;;  %v5685_v50 = vld [vmem:[#allocation3 + $0x10] sm:$0xff] }
 0x4be   : > { %v3625_v45 = vpack.c.bf16 %v3610_v11, %v3610_v11  ;;  %v3612_v41 = vsel %vm3401_vm7, %v3592_v16, %v3611_v44  ;;  %v3621_v26 = vrot.slane %v3608_v27, 4  ;;  %v3614_v31 = vsel %vm3401_vm7, %v3613_v63, %v3572_v39  ;;  %3944 = vmatpush.bf16.msra.mxu0 %v5685_v50  ;;  %v5686_v44 = vld [vmem:[#allocation3 + $0x18] sm:$0xff] }
 0x4bf   : > { %v3626_v54 = vpack.c.bf16 %v3612_v41, %v3612_v41  ;;  %v3627_v8 = vpack.c.bf16 %v3614_v31, %v3614_v31  ;;  %v3780_v4 = vsel %vm3645_vm6, %v3640_v21, 0  ;;  %v3574_v59 = vsel %vm3401_vm7, %v3573_v51, %v3524_v53  ;;  %v5688_v21 = vld [vmem:[#allocation3 + $0x28] sm:$0xff] }
 0x4c0   : > { %5185 = vmatmul.msk.bf16.vlgmr.msra.gmra.mxu1 %vm3641_vm8, %v3625_v45  ;;  %v3622_v2 = vsel %vm3401_vm7, %v3621_v26, %v3584_v29  ;;  %v3604_v42 = vperm.slane %v3598_v9, %v7619_v1  ;;  %v3580_v38 = vperm.slane %v3574_v59, %v7619_v1  ;;  %v3615_v48 = vrot.slane %v3572_v39, 4 }
 0x4c1   : > { %5186 = vmatmul.msk.bf16.vlgmr.msra.gmra.mxu2 %vm3641_vm8, %v3626_v54  ;;  %v3631_v13 = vpack.c.bf16 %v3622_v2, %v3622_v2  ;;  %5187 = vmatmul.msk.bf16.vlgmr.msra.gmra.mxu3 %vm3641_vm8, %v3627_v8  ;;  %v3623_v30 = vrot.slane %v3584_v29, 4  ;;  %v5687_v29 = vld [vmem:[#allocation3 + $0x20] sm:$0xff]  ;;  %v5689_v54 = vld [vmem:[#allocation3 + $0x30] sm:$0xff] }
 0x4c2   : > { %3789 = vmatpush.bf16.msra.mxu1 %v3780_v4  ;;  %v3617_v46 = vrot.slane %v3604_v42, 4  ;;  %v3619_v57 = vrot.slane %v3580_v38, 4  ;;  %v3616_v60 = vsel %vm3401_vm7, %v3596_v62, %v3615_v48  ;;  %3900 = vmatpush.bf16.msra.mxu2 %v5683_v37  ;;  %v6193_v37 = vmov 8  }
 0x4c3   : > { %5191 = vmatmul.msk.bf16.vlgmr.msrb.gmra.mxu0 %vm3641_vm8, %v3631_v13  ;;  %v3628_v24 = vpack.c.bf16 %v3616_v60, %v3616_v60  ;;  %v3624_v1 = vsel %vm3401_vm7, %v3608_v27, %v3623_v30  ;;  %3922 = vmatpush.bf16.msra.mxu3 %v5684_v20 }
 0x4c4   : > { %v3618_v25 = vsel %vm3401_vm7, %v3617_v46, %v3580_v38  ;;  %v3620_v28 = vsel %vm3401_vm7, %v3604_v42, %v3619_v57  ;;  %v3632_v52 = vpack.c.bf16 %v3624_v1, %v3624_v1  ;;  %4032 = vmatpush.bf16.msrb.mxu0 %v5689_v54  ;;  %v5690_v42 = vld [vmem:[#allocation3 + $0x38] sm:$0xff]  ;;  %6042 = vset.pattern.permute.xlu0 %v6193_v37 }
 0x4c5   : > { %v3629_v43 = vpack.c.bf16 %v3618_v25, %v3618_v25  ;;  %v3630_v47 = vpack.c.bf16 %v3620_v28, %v3620_v28  ;;  %6043 = vset.pattern.permute.xlu1 %v6193_v37  ;;  %6041 = vset.pattern.permute.xlu2 %v6193_v37  ;;  %v5708_v37 = vld [vmem:[%s8015_s3 + $0x88] sm:$0xff] }
 0x4d0   : > { %5188 = vmatmul.msk.bf16.vlgmr.msrb.gmra.mxu1 %vm3641_vm8, %v3628_v24 }
 0x4d1   : > { %5189 = vmatmul.msk.bf16.vlgmr.msrb.gmra.mxu2 %vm3641_vm8, %v3629_v43  ;;  %5190 = vmatmul.msk.bf16.vlgmr.msrb.gmra.mxu3 %vm3641_vm8, %v3630_v47 }
 0x4d2   : > { %3966 = vmatpush.bf16.msrb.mxu1 %v5686_v44  ;;  %3988 = vmatpush.bf16.msrb.mxu2 %v5687_v29  ;;  %v5722_v44 = vld [vmem:[%s8015_s3 + $0xf8] sm:$0xff]  ;;  %v5721_v29 = vld [vmem:[%s8015_s3 + $0xf0] sm:$0xff] }
 0x4d3   : > { %4010 = vmatpush.bf16.msrb.mxu3 %v5688_v21  ;;  %v5720_v21 = vld [vmem:[%s8015_s3 + $0xe8] sm:$0xff] }
 0x4e0   : > { %5192 = vmatmul.msk.bf16.vlgmr.msra.gmra.mxu1 %vm3641_vm8, %v3632_v52 }
 0x4e1   : > { %4054 = vmatpush.bf16.msra.mxu1 %v5690_v42  ;;  %v5695_v42 = vld [vmem:[%s8015_s3 + $0x20] sm:$0xff] }
 0x53d   : > { %v3658_v40 = vpop.f32.mrf.mxu1 }
 0x53e   : > { %v3796_v10 = vsel %vm3795_vm9, %v3658_v40, -inf }
 0x53f   : > { %3797 = vmax.xlane.f32.xlu1 %v3796_v10 }
 0x540   : > { %v7704_v14 = vpop.f32.mrf.mxu0 }
 0x541   : > { %v3814_v34 = vsel %vm3795_vm9, %v7704_v14, -inf }
 0x544   : > { %v3677_v58 = vpop.f32.mrf.mxu2  ;;  %v3696_v22 = vpop.f32.mrf.mxu3 }
 0x545   : > { %v3660_v49 = vpop.f32.mrf.mxu1  ;;  %v3799_v6 = vsel %vm3795_vm9, %v3677_v58, -inf  ;;  %v3802_v18 = vsel %vm3795_vm9, %v3696_v22, -inf }
 0x546   : > { %3800 = vmax.xlane.f32.xlu2 %v3799_v6  ;;  %3803 = vmax.xlane.f32.xlu0 %v3802_v18 }
 0x548   : > { %v3774_v5 = vpop.f32.mrf.mxu0 }
 0x54c   : > { %v3679_v23 = vpop.f32.mrf.mxu2  ;;  %v3698_v32 = vpop.f32.mrf.mxu3 }
 0x54d   : > { %v3715_v55 = vpop.f32.mrf.mxu1 }
 0x54e   : > { %v3805_v61 = vsel %vm3795_vm9, %v3715_v55, -inf  ;;  %3815 = vmax.xlane.f32.xlu0 %v3814_v34 }
 0x54f   : > { %3806 = vmax.xlane.f32.xlu2 %v3805_v61 }
 0x554   : > { %v7711_v17 = vpop.f32.mrf.mxu2  ;;  %v7713_v35 = vpop.f32.mrf.mxu3 }
 0x555   : > { %v3717_v19 = vpop.f32.mrf.mxu1  ;;  %v3808_v53 = vsel %vm3795_vm9, %v7711_v17, -inf  ;;  %v3811_v3 = vsel %vm3795_vm9, %v7713_v35, -inf }
 0x556   : > { %3809 = vmax.xlane.f32.xlu1 %v3808_v53 }
 0x557   : > { %3812 = vmax.xlane.f32.xlu2 %v3811_v3 }
 0x55c   : > { %v3736_v16 = vpop.f32.mrf.mxu2  ;;  %v3755_v15 = vpop.f32.mrf.mxu3 }
 0x55d   : > { %v7719_v36 = vpop.f32.mrf.mxu1 }
 0x55e   : > { %v3817_v7 = vsel %vm3795_vm9, %v7719_v36, -inf }
 0x55f   : > { %3818 = vmax.xlane.f32.xlu1 %v3817_v7 }
 0x565   : > { %v3793_v0 = vpop.f32.mrf.mxu1 }
 0x5b2   : > { %v3798_v39 = vpop.xlane.xlu1 %3797 }
 0x5b3   : > { %v3820_v62 = vsub.f32 %v3658_v40, %v3798_v39 }
 0x5b5   : > { %v3828_v56 = vpack.c.bf16 %v3820_v62, %v3820_v62 }
 0x5b7   : > { %v3836_v12 = vunpack.c.l.bf16 %v3828_v56 }
 0x5b9   : > { %v3844_v27 = vmul.f32 1.442695, %v3836_v12  ;;  %v3801_v33 = vpop.xlane.xlu2 %3800  ;;  %v3804_v11 = vpop.xlane.xlu0 %3803  ;;  %v5706_v12 = vld [vmem:[%s8015_s3 + $0x78] sm:$0xff] }
 0x5ba   : > { %v3821_v63 = vsub.f32 %v3677_v58, %v3801_v33  ;;  %v3822_v45 = vsub.f32 %v3696_v22, %v3804_v11  ;;  %v5698_v33 = vld [vmem:[%s8015_s3 + $0x38] sm:$0xff] }
 0x5bb   : > { %6045 = vpow2.f32 %v3844_v27 }
 0x5bc   : > { %v3829_v41 = vpack.c.bf16 %v3821_v63, %v3821_v63  ;;  %v3830_v26 = vpack.c.bf16 %v3822_v45, %v3822_v45  ;;  %v5705_v45 = vld [vmem:[%s8015_s3 + $0x70] sm:$0xff] }
 0x5be   : > { %v3837_v51 = vunpack.c.l.bf16 %v3829_v41  ;;  %v3838_v31 = vunpack.c.l.bf16 %v3830_v26  ;;  %v5697_v41 = vld [vmem:[%s8015_s3 + $0x30] sm:$0xff]  ;;  %v5714_v26 = vld [vmem:[%s8015_s3 + $0xb8] sm:$0xff] }
 0x5c0   : > { %v3846_v8 = vmul.f32 1.442695, %v3837_v51  ;;  %v3848_v13 = vmul.f32 1.442695, %v3838_v31  ;;  %v5704_v31 = vld [vmem:[%s8015_s3 + $0x68] sm:$0xff] }
 0x5c1   : > { %v6046_v2 = vpop.eup %6045  ;;  %v3816_v59 = vpop.xlane.xlu0 %3815 }
 0x5c2   : > { %v3860_v9 = vpack.c.bf16 %v6046_v2, %v6046_v2  ;;  %6047 = vpow2.f32 %v3846_v8  ;;  %v3807_v4 = vpop.xlane.xlu2 %3806  ;;  %v3826_v48 = vsub.f32 %v7704_v14, %v3816_v59  ;;  %v5696_v8 = vld [vmem:[%s8015_s3 + $0x28] sm:$0xff]  ;;  %v5713_v2 = vld [vmem:[%s8015_s3 + $0xb0] sm:$0xff]  ;;  %v5703_v59 = vld [vmem:[%s8015_s3 + $0x60] sm:$0xff] }
 0x5c3   : > { %6049 = vpow2.f32 %v3848_v13  ;;  %v3823_v38 = vsub.f32 %v3715_v55, %v3807_v4  ;;  %v5719_v4 = vld [vmem:[%s8015_s3 + $0xe0] sm:$0xff] }
 0x5c4   : > { %5197 = vmatmul.msk.bf16.vlgmr.msra.gmra.mxu2 %vm3795_vm9, %v3860_v9  ;;  %v3834_v57 = vpack.c.bf16 %v3826_v48, %v3826_v48 }
 0x5c5   : > { %v3831_v46 = vpack.c.bf16 %v3823_v38, %v3823_v38  ;;  %4205 = vmatpush.bf16.msra.mxu2 %v5706_v12  ;;  %v5712_v38 = vld [vmem:[%s8015_s3 + $0xa8] sm:$0xff]  ;;  %v5707_v12 = vld [vmem:[%s8015_s3 + $0x80] sm:$0xff] }
 0x5c6   : > { %v3842_v47 = vunpack.c.l.bf16 %v3834_v57 }
 0x5c7   : > { %v3839_v60 = vunpack.c.l.bf16 %v3831_v46  ;;  %v5718_v46 = vld [vmem:[%s8015_s3 + $0xd8] sm:$0xff] }
 0x5c8   : > { %v6048_v25 = vpop.eup %6047  ;;  %v3856_v58 = vmul.f32 1.442695, %v3842_v47  ;;  %v5717_v47 = vld [vmem:[%s8015_s3 + $0xd0] sm:$0xff] }
 0x5c9   : > { %v6050_v28 = vpop.eup %6049  ;;  %v3861_v24 = vpack.c.bf16 %v6048_v25, %v6048_v25  ;;  %v3850_v43 = vmul.f32 1.442695, %v3839_v60  ;;  %v3810_v30 = vpop.xlane.xlu1 %3809  ;;  %4206 = vmatpush.bf16.msra.mxu2 %v5705_v45  ;;  %v5702_v60 = vld [vmem:[%s8015_s3 + $0x58] sm:$0xff]  ;;  %v5727_v45 = vld [vmem:[%s8015_s3 + $0x120] sm:$0xff] }
 0x5ca   : > { %v3862_v1 = vpack.c.bf16 %v6050_v28, %v6050_v28  ;;  %v3824_v52 = vsub.f32 %v7711_v17, %v3810_v30  ;;  %v3813_v40 = vpop.xlane.xlu2 %3812  ;;  %v5694_v28 = vld [vmem:[%s8015_s3 + $0x18] sm:$0xff]  ;;  %v5701_v30 = vld [vmem:[%s8015_s3 + $0x50] sm:$0xff] }
 0x5cb   : > { %6051 = vpow2.f32 %v3850_v43  ;;  %v3825_v10 = vsub.f32 %v7713_v35, %v3813_v40  ;;  %5202 = vmatmul.msk.bf16.vlgmr.msra.gmra.mxu3 %vm3795_vm9, %v3861_v24  ;;  %v5716_v40 = vld [vmem:[%s8015_s3 + $0xc8] sm:$0xff] }
 0x5cc   : > { %v3832_v14 = vpack.c.bf16 %v3824_v52, %v3824_v52  ;;  %5207 = vmatmul.msk.bf16.vlgmr.msra.gmra.mxu0 %vm3795_vm9, %v3862_v1  ;;  %6053 = vpow2.f32 %v3856_v58  ;;  %4266 = vmatpush.bf16.msra.mxu3 %v5698_v33  ;;  %v5693_v1 = vld [vmem:[%s8015_s3 + $0x10] sm:$0xff]  ;;  %v5700_v58 = vld [vmem:[%s8015_s3 + $0x48] sm:$0xff]  ;;  %v5734_v33 = vld [vmem:[%s8015_s3 + $0x158] sm:$0xff] }
 0x5cd   : > { %v3833_v49 = vpack.c.bf16 %v3825_v10, %v3825_v10  ;;  %4344 = vmatpush.bf16.msra.mxu0 %v5714_v26  ;;  %4207 = vmatpush.bf16.msra.mxu2 %v5704_v31  ;;  %v5745_v26 = vld [vmem:[%s8015_s3 + $0x1b0] sm:$0xff]  ;;  %v5744_v31 = vld [vmem:[%s8015_s3 + $0x1a8] sm:$0xff] }
 0x5ce   : > { %v3840_v22 = vunpack.c.l.bf16 %v3832_v14 }
 0x5cf   : > { %v3841_v6 = vunpack.c.l.bf16 %v3833_v49 }
 0x5d0   : > { %v3852_v18 = vmul.f32 1.442695, %v3840_v22  ;;  %4267 = vmatpush.bf16.msra.mxu3 %v5697_v41  ;;  %v5733_v41 = vld [vmem:[%s8015_s3 + $0x150] sm:$0xff] }
 0x5d1   : > { %v6052_v5 = vpop.eup %6051  ;;  %v3854_v23 = vmul.f32 1.442695, %v3841_v6  ;;  %4345 = vmatpush.bf16.msra.mxu0 %v5713_v2  ;;  %4208 = vmatpush.bf16.msra.mxu2 %v5703_v59  ;;  %v5715_v6 = vld [vmem:[%s8015_s3 + $0xc0] sm:$0xff] }
 0x5d2   : > { %v3863_v32 = vpack.c.bf16 %v6052_v5, %v6052_v5  ;;  %6055 = vpow2.f32 %v3852_v18  ;;  %v3819_v55 = vpop.xlane.xlu1 %3818  ;;  %v6054_v17 = vpop.eup %6053  ;;  %v5754_v18 = vld [vmem:[%s8015_s3 + $0x1f8] sm:$0xff] }
 0x5d3   : > { %6057 = vpow2.f32 %v3854_v23  ;;  %v3827_v61 = vsub.f32 %v7719_v36, %v3819_v55  ;;  %v3866_v15 = vpack.c.bf16 %v6054_v17, %v6054_v17  ;;  %v5699_v55 = vld [vmem:[%s8015_s3 + $0x40] sm:$0xff] }
 0x5d4   : > { %5212 = vmatmul.msk.bf16.vlgmr.msrb.gmra.mxu1 %vm3795_vm9, %v3863_v32  ;;  %4268 = vmatpush.bf16.msra.mxu3 %v5696_v8  ;;  %v5692_v32 = vld [vmem:[%s8015_s3 + $0x8] sm:$0xff]  ;;  %v5691_v17 = vld [vmem:[%s8015_s3] sm:$0xff] }
 0x5d5   : > { %v3835_v34 = vpack.c.bf16 %v3827_v61, %v3827_v61  ;;  %4423 = vmatpush.bf16.msrb.mxu1 %v5722_v44  ;;  %4346 = vmatpush.bf16.msra.mxu0 %v5712_v38  ;;  %v5753_v61 = vld [vmem:[%s8015_s3 + $0x1f0] sm:$0xff]  ;;  %v5742_v38 = vld [vmem:[%s8015_s3 + $0x198] sm:$0xff] }
 0x5d6   : > { %4209 = vmatpush.bf16.msra.mxu2 %v5702_v60  ;;  %v5749_v44 = vld [vmem:[%s8015_s3 + $0x1d0] sm:$0xff] }
 0x5d7   : > { %v3843_v19 = vunpack.c.l.bf16 %v3835_v34  ;;  %v5711_v34 = vld [vmem:[%s8015_s3 + $0xa0] sm:$0xff] }
 0x5d8   : > { %v6056_v35 = vpop.eup %6055  ;;  %4269 = vmatpush.bf16.msra.mxu3 %v5695_v42  ;;  %v5743_v42 = vld [vmem:[%s8015_s3 + $0x1a0] sm:$0xff] }
 0x5d9   : > { %v6058_v53 = vpop.eup %6057  ;;  %v3864_v3 = vpack.c.bf16 %v6056_v35, %v6056_v35  ;;  %v3858_v16 = vmul.f32 1.442695, %v3843_v19  ;;  %4424 = vmatpush.bf16.msrb.mxu1 %v5721_v29  ;;  %4347 = vmatpush.bf16.msra.mxu0 %v5711_v34  ;;  %v5738_v19 = vld [vmem:[%s8015_s3 + $0x178] sm:$0xff]  ;;  %v5752_v35 = vld [vmem:[%s8015_s3 + $0x1e8] sm:$0xff] }
 0x5da   : > { %v3865_v7 = vpack.c.bf16 %v6058_v53, %v6058_v53  ;;  %4210 = vmatpush.bf16.msra.mxu2 %v5701_v30  ;;  %v5710_v53 = vld [vmem:[%s8015_s3 + $0x98] sm:$0xff]  ;;  %v5748_v29 = vld [vmem:[%s8015_s3 + $0x1c8] sm:$0xff] }
 0x5db   : > { %6059 = vpow2.f32 %v3858_v16  ;;  %5217 = vmatmul.msk.bf16.vlgmr.msrb.gmra.mxu2 %vm3795_vm9, %v3864_v3  ;;  %v5737_v3 = vld [vmem:[%s8015_s3 + $0x170] sm:$0xff]  ;;  %v5751_v16 = vld [vmem:[%s8015_s3 + $0x1e0] sm:$0xff] }
 0x5dc   : > { %5222 = vmatmul.msk.bf16.vlgmr.msrb.gmra.mxu3 %vm3795_vm9, %v3865_v7  ;;  %5227 = vmatmul.msk.bf16.vlgmr.msrb.gmra.mxu0 %vm3795_vm9, %v3866_v15  ;;  %v5709_v15 = vld [vmem:[%s8015_s3 + $0x90] sm:$0xff]  ;;  %v5730_v7 = vld [vmem:[%s8015_s3 + $0x138] sm:$0xff] }
 0x5dd   : > { %4425 = vmatpush.bf16.msrb.mxu1 %v5720_v21  ;;  %4270 = vmatpush.bf16.msra.mxu3 %v5694_v28  ;;  %v5726_v21 = vld [vmem:[%s8015_s3 + $0x118] sm:$0xff]  ;;  %v5723_v28 = vld [vmem:[%s8015_s3 + $0x100] sm:$0xff] }
 0x5de   : > { %4211 = vmatpush.bf16.msra.mxu2 %v5700_v58  ;;  %4348 = vmatpush.bf16.msra.mxu0 %v5710_v53 }
 0x5e1   : > { %v6060_v0 = vpop.eup %6059  ;;  %4426 = vmatpush.bf16.msrb.mxu1 %v5719_v4  ;;  %4271 = vmatpush.bf16.msra.mxu3 %v5693_v1  ;;  %v5731_v4 = vld [vmem:[%s8015_s3 + $0x140] sm:$0xff] }
 0x5e2   : > { %v3867_v36 = vpack.c.bf16 %v6060_v0, %v6060_v0  ;;  %4212 = vmatpush.bf16.msra.mxu2 %v5699_v55  ;;  %v5736_v0 = vld [vmem:[%s8015_s3 + $0x168] sm:$0xff]  ;;  %4349 = vmatpush.bf16.msra.mxu0 %v5709_v15 }
 0x5e4   : > { %5232 = vmatmul.msk.bf16.vlgmr.msra.gmra.mxu1 %vm3795_vm9, %v3867_v36  ;;  %v5750_v36 = vld [vmem:[%s8015_s3 + $0x1d8] sm:$0xff] }
 0x5e5   : > { %4427 = vmatpush.bf16.msrb.mxu1 %v5718_v46  ;;  %4272 = vmatpush.bf16.msra.mxu3 %v5692_v32 }
 0x5e6   : > { %4502 = vmatpush.bf16.msrb.mxu2 %v5730_v7  ;;  %4350 = vmatpush.bf16.msra.mxu0 %v5708_v37 }
 0x5e9   : > { %4428 = vmatpush.bf16.msrb.mxu1 %v5717_v47  ;;  %4273 = vmatpush.bf16.msra.mxu3 %v5691_v17  ;;  %v5740_v47 = vld [vmem:[%s8015_s3 + $0x188] sm:$0xff] }
 0x5ea   : > { %4351 = vmatpush.bf16.msra.mxu0 %v5707_v12 }
 0x5ed   : > { %4429 = vmatpush.bf16.msrb.mxu1 %v5716_v40  ;;  %4581 = vmatpush.bf16.msrb.mxu3 %v5738_v19  ;;  %v5739_v40 = vld [vmem:[%s8015_s3 + $0x180] sm:$0xff] }
 0x5f1   : > { %4430 = vmatpush.bf16.msrb.mxu1 %v5715_v6  ;;  %4582 = vmatpush.bf16.msrb.mxu3 %v5737_v3 }
 0x5f5   : > { %4739 = vmatpush.bf16.msra.mxu1 %v5754_v18  ;;  %4583 = vmatpush.bf16.msrb.mxu3 %v5736_v0 }
 0x5f9   : > { %4740 = vmatpush.bf16.msra.mxu1 %v5753_v61 }
 0x5fd   : > { %4741 = vmatpush.bf16.msra.mxu1 %v5752_v35 }
 0x601   : > { %4742 = vmatpush.bf16.msra.mxu1 %v5751_v16 }
 0x605   : > { %4743 = vmatpush.bf16.msra.mxu1 %v5750_v36 }
 0x609   : > { %4744 = vmatpush.bf16.msra.mxu1 %v5749_v44 }
 0x60d   : > { %4745 = vmatpush.bf16.msra.mxu1 %v5748_v29 }
 0x647   : > { %v7735_v20 = vpop.f32.mrf.mxu2 }
 0x648   : > { %6061 = vrcp.f32 %v7735_v20 }
 0x649   : > { %v7738_v50 = vpop.f32.mrf.mxu0 }
 0x64a   : > { %6063 = vrcp.f32 %v7738_v50 }
 0x64e   : > { %v6062_v39 = vpop.eup %6061  ;;  %v7741_v62 = vpop.f32.mrf.mxu3 }
 0x64f   : > { %v3904_v56 = vpop.f32.mrf.mxu2  ;;  %6065 = vrcp.f32 %v7741_v62  ;;  %4070 = vperm.xlu0 %6042, %v6062_v39   ;;  %v5729_v39 = vld [vmem:[%s8015_s3 + $0x130] sm:$0xff] }
 0x650   : > { %v6064_v27 = vpop.eup %6063  ;;  %v5735_v56 = vld [vmem:[%s8015_s3 + $0x160] sm:$0xff]  ;;  %4503 = vmatpush.bf16.msrb.mxu2 %v5729_v39 }
 0x651   : > { %v7753_v11 = vpop.f32.mrf.mxu1  ;;  %4080 = vperm.xlu1 %6043, %v6064_v27   ;;  %v3948_v63 = vpop.f32.mrf.mxu0  ;;  %4584 = vmatpush.bf16.msrb.mxu3 %v5735_v56  ;;  %v5728_v27 = vld [vmem:[%s8015_s3 + $0x128] sm:$0xff] }
 0x652   : > { %6067 = vrcp.f32 %v7753_v11  ;;  %v5746_v63 = vld [vmem:[%s8015_s3 + $0x1b8] sm:$0xff] }
 0x653   : > { %4660 = vmatpush.bf16.msrb.mxu0 %v5746_v63 }
 0x654   : > { %4504 = vmatpush.bf16.msrb.mxu2 %v5728_v27  ;;  %v6044_v27 = vld [vmem:[%s8016_s4] ss:$0 sm:$0xff] }
 0x655   : > { %v6066_v51 = vpop.eup %6065  ;;  %4585 = vmatpush.bf16.msrb.mxu3 %v5734_v33 }
 0x656   : > { %v3926_v54 = vpop.f32.mrf.mxu3  ;;  %4075 = vperm.xlu2 %6041, %v6066_v51   ;;  %v5747_v51 = vld [vmem:[%s8015_s3 + $0x1c0] sm:$0xff] }
 0x657   : > { %v5732_v54 = vld [vmem:[%s8015_s3 + $0x148] sm:$0xff]  ;;  %4661 = vmatpush.bf16.msrb.mxu0 %v5745_v26  ;;  %4746 = vmatpush.bf16.msra.mxu1 %v5747_v51 }
 0x658   : > { %v6068_v48 = vpop.eup %6067  ;;  %4505 = vmatpush.bf16.msrb.mxu2 %v5727_v45 }
 0x659   : > { %v3970_v13 = vpop.f32.mrf.mxu1  ;;  %v7780_v9 = vpop.f32.mrf.mxu0  ;;  %4586 = vmatpush.bf16.msrb.mxu3 %v5733_v41 }
 0x65a   : > { %v5725_v13 = vld [vmem:[%s8015_s3 + $0x110] sm:$0xff] }
 0x65b   : > { %4662 = vmatpush.bf16.msrb.mxu0 %v5744_v31 }
 0x65c   : > { %4506 = vmatpush.bf16.msrb.mxu2 %v5726_v21 }
 0x65d   : > { %4587 = vmatpush.bf16.msrb.mxu3 %v5732_v54 }
 0x65e   : > { %v7797_v57 = vpop.f32.mrf.mxu2  ;;  %4085 = vperm.xlu2 %6041, %v6068_v48  }
 0x65f   : > { %6069 = vrcp.f32 %v7797_v57  ;;  %v7803_v25 = vpop.f32.mrf.mxu3  ;;  %4663 = vmatpush.bf16.msrb.mxu0 %v5743_v42 }
 0x660   : > { %6071 = vrcp.f32 %v7803_v25  ;;  %4507 = vmatpush.bf16.msrb.mxu2 %v5725_v13 }
 0x661   : > { %v4036_v24 = vpop.f32.mrf.mxu0  ;;  %v7809_v43 = vpop.f32.mrf.mxu1  ;;  %6073 = vrcp.f32 %v7780_v9  ;;  %4588 = vmatpush.bf16.msrb.mxu3 %v5731_v4 }
 0x662   : > { %6075 = vrcp.f32 %v7809_v43  ;;  %v5741_v24 = vld [vmem:[%s8015_s3 + $0x190] sm:$0xff] }
 0x663   : > { %4664 = vmatpush.bf16.msrb.mxu0 %v5742_v38 }
 0x665   : > { %v6070_v52 = vpop.eup %6069 }
 0x666   : > { %v6072_v10 = vpop.eup %6071  ;;  %v3992_v14 = vpop.f32.mrf.mxu2  ;;  %4090 = vperm.xlu1 %6043, %v6070_v52  }
 0x667   : > { %v4014_v49 = vpop.f32.mrf.mxu3  ;;  %4095 = vperm.xlu2 %6041, %v6072_v10   ;;  %v6074_v5 = vpop.eup %6073  ;;  %4665 = vmatpush.bf16.msrb.mxu0 %v5741_v24 }
 0x668   : > { %v6076_v23 = vpop.eup %6075 }
 0x669   : > { %v4058_v22 = vpop.f32.mrf.mxu1 }
 0x66b   : > { %4666 = vmatpush.bf16.msrb.mxu0 %v5740_v47 }
 0x66e   : > { %4100 = vperm.xlu1 %6043, %v6074_v5  }
 0x66f   : > { %4105 = vperm.xlu2 %6041, %v6076_v23   ;;  %4667 = vmatpush.bf16.msrb.mxu0 %v5739_v40 }
 0x6b0   : > { %v4076_v8 = vpop.permute.xlu2 %4075 }
 0x6b1   : > { %v4109_v2 = vmul.f32 %v4076_v8, %v7741_v62  ;;  %v5724_v62 = vld [vmem:[%s8015_s3 + $0x108] sm:$0xff] }
 0x6b2   : > { %4508 = vmatpush.bf16.msrb.mxu2 %v5724_v62 }
 0x6b3   : > { %v4117_v59 = vpack.c.bf16 %v4109_v2, %v4109_v2 }
 0x6b5   : > { %4213 = vmatmul.bf16.vlgmr.msra.gmra.mxu2 %v4117_v59 }
 0x6b6   : > { %4509 = vmatpush.bf16.msrb.mxu2 %v5723_v28 }
 0x6b8   : > { %v4086_v48 = vpop.permute.xlu2 %4085 }
 0x6b9   : > { %v4111_v46 = vmul.f32 %v4086_v48, %v7753_v11 }
 0x6bb   : > { %v4119_v60 = vpack.c.bf16 %v4111_v46, %v4111_v46 }
 0x6bd   : > { %4431 = vmatmul.bf16.vlgmr.msrb.gmra.mxu1 %v4119_v60 }
 0x6c1   : > { %v4096_v30 = vpop.permute.xlu2 %4095  ;;  %v4071_v11 = vpop.permute.xlu0 %4070 }
 0x6c2   : > { %v4108_v1 = vmul.f32 %v4071_v11, %v7735_v20  ;;  %v4113_v20 = vmul.f32 %v4096_v30, %v7803_v25 }
 0x6c3   : > { %v4081_v52 = vpop.permute.xlu1 %4080 }
 0x6c4   : > { %v4116_v10 = vpack.c.bf16 %v4108_v1, %v4108_v1  ;;  %v4110_v14 = vmul.f32 %v4081_v52, %v7738_v50  ;;  %v4121_v18 = vpack.c.bf16 %v4113_v20, %v4113_v20 }
 0x6c6   : > { %v4118_v58 = vpack.c.bf16 %v4110_v14, %v4110_v14  ;;  %4274 = vmatmul.bf16.vlgmr.msra.gmra.mxu3 %v4116_v10 }
 0x6c8   : > { %4352 = vmatmul.bf16.vlgmr.msra.gmra.mxu0 %v4118_v58 }
 0x6c9   : > { %v4106_v49 = vpop.permute.xlu2 %4105 }
 0x6ca   : > { %v4115_v22 = vmul.f32 %v4106_v49, %v7809_v43 }
 0x6cc   : > { %v4123_v6 = vpack.c.bf16 %v4115_v22, %v4115_v22 }
 0x6ce   : > { %4747 = vmatmul.bf16.vlgmr.msra.gmra.mxu1 %v4123_v6 }
 0x6d6   : > { %4589 = vmatmul.bf16.vlgmr.msrb.gmra.mxu3 %v4121_v18 }
 0x6d8   : > { %v4091_v5 = vpop.permute.xlu1 %4090 }
 0x6d9   : > { %v4112_v23 = vmul.f32 %v4091_v5, %v7797_v57 }
 0x6db   : > { %v4120_v32 = vpack.c.bf16 %v4112_v23, %v4112_v23 }
 0x6dd   : > { %4510 = vmatmul.bf16.vlgmr.msrb.gmra.mxu2 %v4120_v32 }
 0x6e0   : > { %v4101_v55 = vpop.permute.xlu1 %4100 }
 0x6e1   : > { %v4114_v50 = vmul.f32 %v4101_v55, %v7780_v9 }
 0x6e3   : > { %v4122_v61 = vpack.c.bf16 %v4114_v50, %v4114_v50 }
 0x6e5   : > { %4668 = vmatmul.bf16.vlgmr.msrb.gmra.mxu0 %v4122_v61 }
 0x738   : > { %v4214_v34 = vpop.f32.mrf.mxu2 }
 0x73a   : > { %v4432_v43 = vpop.f32.mrf.mxu1 }
 0x740   : > { %v4216_v17 = vpop.f32.mrf.mxu2 }
 0x742   : > { %v4434_v19 = vpop.f32.mrf.mxu1 }
 0x745   : > { %v4353_v35 = vpop.f32.mrf.mxu0 }
 0x749   : > { %v4275_v25 = vpop.f32.mrf.mxu3 }
 0x74a   : > { %v4276_v57 = vadd.f32 %v4275_v25, %v4214_v34 }
 0x74b   : > { %v4748_v53 = vpop.f32.mrf.mxu1 }
 0x74c   : > { %v4357_v0 = vadd.f32 %v4353_v35, %v4276_v57 }
 0x74d   : > { %v4355_v3 = vpop.f32.mrf.mxu0 }
 0x74e   : > { %v4436_v9 = vadd.f32 %v4432_v43, %v4357_v0 }
 0x751   : > { %v4277_v16 = vpop.f32.mrf.mxu3 }
 0x753   : > { %v4750_v15 = vpop.f32.mrf.mxu1 }
 0x759   : > { %v4590_v7 = vpop.f32.mrf.mxu3 }
 0x760   : > { %v4511_v36 = vpop.f32.mrf.mxu2 }
 0x761   : > { %v4515_v37 = vadd.f32 %v4511_v36, %v4436_v9  ;;  %v4592_v39 = vpop.f32.mrf.mxu3 }
 0x762   : > { %v4669_v56 = vpop.f32.mrf.mxu0 }
 0x763   : > { %v4594_v44 = vadd.f32 %v4590_v7, %v4515_v37 }
 0x765   : > { %v4673_v12 = vadd.f32 %v4669_v56, %v4594_v44 }
 0x767   : > { %v4752_v33 = vadd.f32 %v4748_v53, %v4673_v12 }
 0x768   : > { %v4513_v63 = vpop.f32.mrf.mxu2 }
 0x769   : > { %v4757_v29 = vadd.f32 %v6044_v27, %v4752_v33 }
 0x76a   : > { %v4671_v45 = vpop.f32.mrf.mxu0 }
 0x76b   : > { %4758 = vst.msk [vmem:[%s8026_s27] sm:$0xff] %vm3361_vm5, %v4757_v29 }
 0x76c   : > { %6104 = shalt.err (!%p6101_p7)
}
 0x76d   : > { %5755 = dma.vmem_to_hbm [thread:$0]  (%p6275_p3), %s4775_s22, 128, %s4777_s16, %s4760_s30  }
 0x76e PF: > { %p5761_p9 = scmp.ge.s32.totalorder %s6171_s25, 2  ;;  %s4788_s13 = sand.u32 1, %s6143_s18  }
 0x76f   : > { %s4789_s0 = scalar_lea.sflag [#allocation5], %s4788_s13 }
 0x770   : > { %p5758_p10 = pnand %p5761_p9, %p6284_p8 }
 0x772   : > { %p5759_p11 = pneg %p5758_p10 }
 0x774   : > { %6138 = dma.done.wait (%p5759_p11), %s4789_s0, 128  }
 0x775   : > { %6140 = vsyncadd (%p5759_p11), %s4789_s0, 4294967168  ;;  %s18_s25 = sadd.s32 1, %s6171_s25   ;;  %s8028_s6 = sld [smem:[#allocation7_spill]] }
 0x776   : > { %p15_p12 = scmp.ge.s32.totalorder %s18_s25, 6   ;;  %s8029_s18 = smov %s6147_s19 }
 0x777   : > { %s8030_s19 = smov %s6151_s20  ;;  %s8031_s20 = smov %s6293_s11 }
 0x778   : > { %s8032_s21 = smov %s6163_s23  ;;  %s8033_s22 = smov %s6167_s24 }
 0x779   : > { %s8034_s23 = smov %s8037_s28  ;;  %17 = sbr.rel (!%p15_p12) target bundleno = 7 (0x7), region = 87 }
 0x77b   : > { %s8035_s24 = smov %s8028_s6 }
 0x77e   :  { %4795 = vsyncpa [#allocation5], 1 }
 0x77f   :  { %4797 = vsyncpa [#allocation5 + $0x1], 1 }

// kernel: tpu_custom_call.1
= control target key start
LH: loop header
LB: loop body
LE: loop exit
PB: predicated region body
PF: predicated region fallthrough
CT: control target
= control target key end

     0   :  { %s8012_s0 = inlined_call_operand.vmem [shape: bf16[2,16,64], index: 0, kind: input, shape index: {}]   ;;  %s8013_s1 = inlined_call_operand.vmem [shape: bf16[64,64], index: 1, kind: input, shape index: {}]   ;;  %s8014_s2 = inlined_call_operand.vmem [shape: bf16[64,1088], index: 2, kind: input, shape index: {}]   ;;  %s8015_s3 = inlined_call_operand.vmem [shape: bf16[8,128,64], index: 3, kind: input, shape index: {}]   ;;  %s8016_s4 = inlined_call_operand.vmem [shape: f32[1,64], index: 4, kind: input, shape index: {}]   ;;  %s8017_s5 = inlined_call_operand.hbm [shape: f32[2,16,64], index: 5, kind: output, shape index: {}]  }
   0x1   :  { %8020 = sst [smem:[#allocation8_spill]] %s8012_s0 }
   0x2   :  { %10 = vsyncpa [#allocation5], 0 }
   0x3   :  { %12 = vsyncpa [#allocation5 + $0x1], 0  ;;  %s6224_s18 = smov 0   ;;  %s6226_s19 = smov 0  }
   0x4   :  { %s6228_s20 = smov 0   ;;  %s6230_s21 = smov 0  }
   0x5   :  { %s6232_s22 = smov 0   ;;  %s6234_s23 = smov 0  }
   0x6   :  { %s6236_s24 = smov 0   ;;  %s6238_s25 = smov 0  }
   0x7 LB: > { %s4851_s26 = sadd.s32 4294967295, %s6171_s25   ;;  %s4852_s27 = sadd.s32 4294967294, %s6171_s25   ;;  %s6171_s25 = sphi %s6238_s25, %s18_s25   ;;  %s6167_s24 = sphi %s6236_s24, %s8035_s24   ;;  %s6163_s23 = sphi %s6234_s23, %s8034_s23   ;;  %s6159_s22 = sphi %s6232_s22, %s8033_s22   ;;  %s6155_s21 = sphi %s6230_s21, %s8032_s21   ;;  %s6151_s20 = sphi %s6228_s20, %s8031_s20   ;;  %s6147_s19 = sphi %s6226_s19, %s8030_s19   ;;  %s6143_s18 = sphi %s6224_s18, %s8029_s18  }
   0x8   : > { %s27_s28 = sadd.s32 1, %s6163_s23  ;;  %s30_s29 = sadd.s32 1, %s6167_s24 }
   0x9   : > { %p28_p0 = scmp.ge.s32.totalorder %s27_s28, 2  ;;  %p159_p1 = scmp.ne.s32.totalorder %s6151_s20, %s6147_s19 }
   0xa   : > { %p160_p2 = scmp.eq.s32.totalorder %s4851_s26, 3  ;;  %p165_p5 = scmp.ne.s32.totalorder %s6147_s19, %s6143_s18 }
   0xb   : > { %s8037_s28 = smov (%p28_p0, %s27_s28), 0  ;;  %s8039_s29 = smov (!%p28_p0, %s30_s29), %s6167_s24 }
   0xc   : > { %s145_s30 = ssub.s32 %s6163_s23, %s8037_s28  ;;  %p6275_p3 = por %p160_p2, %p159_p1 }
   0xd   : > { %p32_p4 = scmp.ge.s32.totalorder %s8039_s29, 2  ;;  %p166_p6 = scmp.eq.s32.totalorder %s4852_s27, 3 }
   0xe   : > { %p4855_p7 = scmp.ge.s32.totalorder %s6171_s25, 1  ;;  %p204_p9 = scmp.lt.s32.totalorder %s6171_s25, 5 }
   0xf   : > { %s8041_s29 = smov (%p32_p4, %s8039_s29), 0  ;;  %p6284_p8 = por %p166_p6, %p165_p5 }
  0x10   : > { %8022 = sst [smem:[#allocation7_spill]] %s8041_s29  ;;  %s144_s8 = ssub.s32 %s6167_s24, %s8041_s29 }
  0x11   : > { %s149_s9 = sadd.s32 1, %s6151_s20  ;;  %s146_s10 = sor.u32 %s145_s30, %s144_s8 }
  0x12   : > { %p205_p10 = pnand %p4855_p7, %p204_p9  ;;  %p147_p11 = scmp.eq.s32.totalorder %s146_s10, 0 }
  0x13   : > { %s8018_s12 = sand.u32 (!%p205_p10), 1, %s6147_s19   ;;  %p232_p12 = scmp.lt.s32.totalorder (!%p205_p10), %s6159_s22, 1 }
  0x14   : > { %s6293_s11 = scalar_select %p147_p11, %s6151_s20, %s149_s9  }
  0x15   : > { %208 = sbr.rel (%p205_p10) target bundleno = 1902 (0x76e), region = 40  ;;  %s6299_s13 = sshll.u32 (!%p205_p10), %s8018_s12, 3 }
  0x16   : > { %s8024_s0 = sld [smem:[#allocation8_spill]] (!%p205_p10)  ;;  %p4859_p13 = scmp.ne.s32.totalorder (!%p205_p10), %s6155_s21, 0 }
  0x1a   : > { %s233_s14 = scalar_select %p232_p12, %s6159_s22, 1 }
  0x1b   : > { %241 = sbr.rel (%p4859_p13) target bundleno = 917 (0x395), region = 44  ;;  %s6173_s9 = smov (!%p4859_p13), 64  }
  0x1c   : > { %s5606_s15 = sshll.u32 %s233_s14, 3  ;;  %s6174_s29 = smov (!%p4859_p13), 120  }
  0x1d   : > { %s6305_s26 = scalar_lea.vmem %s8024_s0, %s5606_s15  ;;  %s6175_s12 = smov (!%p4859_p13), 88  }
  0x1e   : > { %s6176_s10 = smov (!%p4859_p13), 104   ;;  %s6177_s14 = smov (!%p4859_p13), 112  }
  0x1f   : > { %s6178_s15 = smov (!%p4859_p13), 80   ;;  %s6179_s0 = smov (!%p4859_p13), 96  }
  0x20   : > { %v4970_v0 = vld [vmem:[%s8014_s2 + $0xd8] sm:$0xf]  ;;  %v5638_v1 = vld [vmem:[%s8014_s2 + $0xf8] sm:$0xf0]  ;;  %v4972_v4 = vld [vmem:[%s8014_s2 + $0xfc] sm:$0xf0] }
  0x21   : > { %v5634_v2 = vld [vmem:[%s8014_s2 + $0xdc] sm:$0xf]  ;;  %v4971_v3 = vor.u32 %v5638_v1, %v4970_v0  ;;  %v4978_v5 = vld [vmem:[%s8014_s2 + $0xe0] sm:$0xf]  ;;  %v5639_v6 = vld [vmem:[%s8014_s2 + $0x100] sm:$0xf0] }
  0x22   : > { %v4975_v7 = vor.u32 %v5634_v2, %v4972_v4  ;;  %v4979_v8 = vor.u32 %v5639_v6, %v4978_v5  ;;  %v5635_v9 = vld [vmem:[%s8014_s2 + $0xe4] sm:$0xf]  ;;  %v4980_v10 = vld [vmem:[%s8014_s2 + $0x104] sm:$0xf0]  ;;  %v4934_v11 = vld [vmem:[%s8014_s2 + $0x90] sm:$0xf] }
  0x23   : > { %475 = vmatpush.bf16.msra.mxu0 %v4971_v3  ;;  %v4983_v12 = vor.u32 %v5635_v9, %v4980_v10  ;;  %v5629_v13 = vld [vmem:[%s8014_s2 + $0xb0] sm:$0xf0]  ;;  %v4936_v15 = vld [vmem:[%s8014_s2 + $0xb4] sm:$0xf0]  ;;  %v5630_v19 = vld [vmem:[%s8014_s2 + $0xb8] sm:$0xf0] }
  0x24   : > { %v5625_v14 = vld [vmem:[%s8014_s2 + $0x94] sm:$0xf]  ;;  %488 = vmatpush.bf16.msra.mxu1 %v4975_v7  ;;  %501 = vmatpush.bf16.msra.mxu2 %v4979_v8  ;;  %v4935_v16 = vor.u32 %v5629_v13, %v4934_v11  ;;  %v4942_v18 = vld [vmem:[%s8014_s2 + $0x98] sm:$0xf]  ;;  %v5626_v20 = vld [vmem:[%s8014_s2 + $0x9c] sm:$0xf] }
  0x25   : > { %v4939_v17 = vor.u32 %v5625_v14, %v4936_v15  ;;  %514 = vmatpush.bf16.msra.mxu3 %v4983_v12  ;;  %v4943_v21 = vor.u32 %v5630_v19, %v4942_v18  ;;  %v4944_v22 = vld [vmem:[%s8014_s2 + $0xbc] sm:$0xf0]  ;;  %v4898_v23 = vld [vmem:[%s8014_s2 + $0x48] sm:$0xf]  ;;  %v5620_v24 = vld [vmem:[%s8014_s2 + $0x68] sm:$0xf0] }
  0x26   : > { %v4947_v25 = vor.u32 %v5626_v20, %v4944_v22  ;;  %v5616_v26 = vld [vmem:[%s8014_s2 + $0x4c] sm:$0xf]  ;;  %v4900_v27 = vld [vmem:[%s8014_s2 + $0x6c] sm:$0xf0]  ;;  %v4899_v29 = vor.u32 %v5620_v24, %v4898_v23  ;;  %v5621_v30 = vld [vmem:[%s8014_s2 + $0x70] sm:$0xf0] }
  0x27   : > { %v4906_v28 = vld [vmem:[%s8014_s2 + $0x50] sm:$0xf]  ;;  %476 = vmatpush.bf16.msra.mxu0 %v4935_v16  ;;  %v5617_v31 = vld [vmem:[%s8014_s2 + $0x54] sm:$0xf]  ;;  %v4908_v32 = vld [vmem:[%s8014_s2 + $0x74] sm:$0xf0]  ;;  %v4903_v33 = vor.u32 %v5616_v26, %v4900_v27 }
  0x28   : > { %489 = vmatpush.bf16.msra.mxu1 %v4939_v17  ;;  %502 = vmatpush.bf16.msra.mxu2 %v4943_v21  ;;  %v4907_v34 = vor.u32 %v5621_v30, %v4906_v28  ;;  %v4862_v35 = vld [vmem:[%s8014_s2] sm:$0xf]  ;;  %v5611_v36 = vld [vmem:[%s8014_s2 + $0x20] sm:$0xf0]  ;;  %v4911_v38 = vor.u32 %v5617_v31, %v4908_v32  ;;  %v4864_v39 = vld [vmem:[%s8014_s2 + $0x24] sm:$0xf0] }
  0x29   : > { %v5607_v37 = vld [vmem:[%s8014_s2 + $0x4] sm:$0xf]  ;;  %515 = vmatpush.bf16.msra.mxu3 %v4947_v25  ;;  %v4870_v40 = vld [vmem:[%s8014_s2 + $0x8] sm:$0xf]  ;;  %v5612_v41 = vld [vmem:[%s8014_s2 + $0x28] sm:$0xf0]  ;;  %v4863_v44 = vor.u32 %v5611_v36, %v4862_v35 }
  0x2a   : > { %v5608_v42 = vld [vmem:[%s8014_s2 + $0xc] sm:$0xf]  ;;  %v4872_v43 = vld [vmem:[%s8014_s2 + $0x2c] sm:$0xf0]  ;;  %v4867_v47 = vor.u32 %v5607_v37, %v4864_v39  ;;  %v4871_v48 = vor.u32 %v5612_v41, %v4870_v40  ;;  %v4986_v49 = vld [vmem:[%s8014_s2 + $0xe8] sm:$0xf] }
  0x2b   : > { %477 = vmatpush.bf16.msra.mxu0 %v4899_v29  ;;  %v5636_v45 = vld [vmem:[%s8014_s2 + $0xec] sm:$0xf]  ;;  %v4988_v46 = vld [vmem:[%s8014_s2 + $0x10c] sm:$0xf0]  ;;  %v4875_v51 = vor.u32 %v5608_v42, %v4872_v43  ;;  %v6418_v52 = vld [vmem:[%s6305_s26] sm:$0xf] }
  0x2c   : > { %490 = vmatpush.bf16.msra.mxu1 %v4903_v33  ;;  %503 = vmatpush.bf16.msra.mxu2 %v4907_v34  ;;  %v4994_v50 = vld [vmem:[%s8014_s2 + $0xf0] sm:$0xf]  ;;  %v4991_v53 = vor.u32 %v5636_v45, %v4988_v46  ;;  %v5640_v54 = vld [vmem:[%s8014_s2 + $0x108] sm:$0xf0]  ;;  %v5641_v55 = vld [vmem:[%s8014_s2 + $0x110] sm:$0xf0] }
  0x2d   : > { %516 = vmatpush.bf16.msra.mxu3 %v4911_v38  ;;  %v5637_v56 = vld [vmem:[%s8014_s2 + $0xf4] sm:$0xf]  ;;  %v4995_v57 = vor.u32 %v5641_v55, %v4994_v50  ;;  %v4996_v58 = vld [vmem:[%s8014_s2 + $0x114] sm:$0xf0]  ;;  %v5627_v59 = vld [vmem:[%s8014_s2 + $0xa4] sm:$0xf]  ;;  %v4987_v63 = vor.u32 %v5640_v54, %v4986_v49 }
  0x2e   : > { %v4952_v60 = vld [vmem:[%s8014_s2 + $0xc4] sm:$0xf0]  ;;  %vm467_vm0 = vcmask 523264   ;;  %v5632_v62 = vld [vmem:[%s8014_s2 + $0xc8] sm:$0xf0]  ;;  %v4999_v0 = vor.u32 %v5637_v56, %v4996_v58  ;;  %s6180_s16 = smov 72  }
  0x2f   : > { %478 = vmatpush.bf16.msra.mxu0 %v4863_v44  ;;  %v4958_v61 = vld [vmem:[%s8014_s2 + $0xa8] sm:$0xf]  ;;  %v4955_v1 = vor.u32 %v5627_v59, %v4952_v60  ;;  %v4950_v2 = vld [vmem:[%s8014_s2 + $0xa0] sm:$0xf]  ;;  %v5631_v3 = vld [vmem:[%s8014_s2 + $0xc0] sm:$0xf0] }
  0x30   : > { %491 = vmatpush.bf16.msra.mxu1 %v4867_v47  ;;  %504 = vmatpush.bf16.msra.mxu2 %v4871_v48  ;;  %v5628_v4 = vld [vmem:[%s8014_s2 + $0xac] sm:$0xf]  ;;  %v4959_v5 = vor.u32 %v5632_v62, %v4958_v61  ;;  %v4960_v6 = vld [vmem:[%s8014_s2 + $0xcc] sm:$0xf0]  ;;  %v5618_v7 = vld [vmem:[%s8014_s2 + $0x5c] sm:$0xf]  ;;  %v4951_v11 = vor.u32 %v5631_v3, %v4950_v2 }
  0x31   : > { %517 = vmatpush.bf16.msra.mxu3 %v4875_v51  ;;  %v4916_v8 = vld [vmem:[%s8014_s2 + $0x7c] sm:$0xf0]  ;;  %v5623_v10 = vld [vmem:[%s8014_s2 + $0x80] sm:$0xf0]  ;;  %v4914_v12 = vld [vmem:[%s8014_s2 + $0x58] sm:$0xf]  ;;  %v4963_v13 = vor.u32 %v5628_v4, %v4960_v6 }
  0x32   : > { %5004 = vmatmul.msk.bf16.vlgmr.msra.gmra.mxu0 %vm467_vm0, %v6418_v52  ;;  %v4922_v9 = vld [vmem:[%s8014_s2 + $0x60] sm:$0xf]  ;;  %v4919_v14 = vor.u32 %v5618_v7, %v4916_v8  ;;  %v5622_v15 = vld [vmem:[%s8014_s2 + $0x78] sm:$0xf0]  ;;  %v5619_v16 = vld [vmem:[%s8014_s2 + $0x64] sm:$0xf] }
  0x33   : > { %5005 = vmatmul.msk.bf16.vlgmr.msra.gmra.mxu1 %vm467_vm0, %v6418_v52  ;;  %5006 = vmatmul.msk.bf16.vlgmr.msra.gmra.mxu2 %vm467_vm0, %v6418_v52  ;;  %v4924_v17 = vld [vmem:[%s8014_s2 + $0x84] sm:$0xf0]  ;;  %v4923_v18 = vor.u32 %v5623_v10, %v4922_v9  ;;  %v5609_v19 = vld [vmem:[%s8014_s2 + $0x14] sm:$0xf]  ;;  %v4880_v20 = vld [vmem:[%s8014_s2 + $0x34] sm:$0xf0]  ;;  %v4915_v25 = vor.u32 %v5622_v15, %v4914_v12 }
  0x34   : > { %540 = vmatpush.bf16.msrb.mxu1 %v4991_v53  ;;  %553 = vmatpush.bf16.msrb.mxu2 %v4995_v57  ;;  %v4886_v21 = vld [vmem:[%s8014_s2 + $0x18] sm:$0xf]  ;;  %v5614_v22 = vld [vmem:[%s8014_s2 + $0x38] sm:$0xf0]  ;;  %v4927_v26 = vor.u32 %v5619_v16, %v4924_v17  ;;  %v4883_v27 = vor.u32 %v5609_v19, %v4880_v20  ;;  %v4878_v28 = vld [vmem:[%s8014_s2 + $0x10] sm:$0xf] }
  0x35   : > { %5007 = vmatmul.msk.bf16.vlgmr.msra.gmra.mxu3 %vm467_vm0, %v6418_v52  ;;  %527 = vmatpush.bf16.msrb.mxu0 %v4987_v63  ;;  %v5123_v23 = vld [vmem:[%s8014_s2 + $0xd8] sm:$0xf]  ;;  %v5674_v24 = vld [vmem:[%s8014_s2 + $0xf8] sm:$0xf0]  ;;  %v5613_v29 = vld [vmem:[%s8014_s2 + $0x30] sm:$0xf0]  ;;  %v4887_v31 = vor.u32 %v5614_v22, %v4886_v21 }
  0x36   : > { %566 = vmatpush.bf16.msrb.mxu3 %v4999_v0  ;;  %v5610_v30 = vld [vmem:[%s8014_s2 + $0x1c] sm:$0xf]  ;;  %v4888_v32 = vld [vmem:[%s8014_s2 + $0x3c] sm:$0xf0]  ;;  %v5124_v33 = vor.u32 %v5674_v24, %v5123_v23  ;;  %v5002_v34 = vld [vmem:[%s8014_s2 + $0xf8] sm:$0xf]  ;;  %v4879_v39 = vor.u32 %v5613_v29, %v4878_v28 }
  0x37   : > { %v5642_v35 = vld [vmem:[%s8014_s2 + $0x118] sm:$0xf0]  ;;  %v5087_v36 = vld [vmem:[%s8014_s2 + $0x90] sm:$0xf]  ;;  %v5665_v37 = vld [vmem:[%s8014_s2 + $0xb0] sm:$0xf0]  ;;  %v4891_v43 = vor.u32 %v5610_v30, %v4888_v32 }
  0x38   : > { %541 = vmatpush.bf16.msrb.mxu1 %v4955_v1  ;;  %554 = vmatpush.bf16.msrb.mxu2 %v4959_v5  ;;  %v5670_v38 = vld [vmem:[%s8014_s2 + $0xdc] sm:$0xf]  ;;  %v5125_v40 = vld [vmem:[%s8014_s2 + $0xfc] sm:$0xf0]  ;;  %v5675_v42 = vld [vmem:[%s8014_s2 + $0x100] sm:$0xf0]  ;;  %v5003_v44 = vor.u32 %v5642_v35, %v5002_v34  ;;  %v5088_v48 = vor.u32 %v5665_v37, %v5087_v36 }
  0x39   : > { %528 = vmatpush.bf16.msrb.mxu0 %v4951_v11  ;;  %v5131_v41 = vld [vmem:[%s8014_s2 + $0xe0] sm:$0xf]  ;;  %v4966_v45 = vld [vmem:[%s8014_s2 + $0xb0] sm:$0xf]  ;;  %v5633_v46 = vld [vmem:[%s8014_s2 + $0xd0] sm:$0xf0]  ;;  %v5128_v47 = vor.u32 %v5670_v38, %v5125_v40 }
  0x3a   : > { %567 = vmatpush.bf16.msrb.mxu3 %v4963_v13  ;;  %v5051_v49 = vld [vmem:[%s8014_s2 + $0x48] sm:$0xf]  ;;  %v5132_v50 = vor.u32 %v5675_v42, %v5131_v41  ;;  %v5661_v51 = vld [vmem:[%s8014_s2 + $0x94] sm:$0xf]  ;;  %v5089_v53 = vld [vmem:[%s8014_s2 + $0xb4] sm:$0xf0]  ;;  %v4967_v57 = vor.u32 %v5633_v46, %v4966_v45 }
  0x3b   : > { %v5656_v54 = vld [vmem:[%s8014_s2 + $0x68] sm:$0xf0]  ;;  %v5095_v55 = vld [vmem:[%s8014_s2 + $0x98] sm:$0xf]  ;;  %v5666_v56 = vld [vmem:[%s8014_s2 + $0xb8] sm:$0xf0]  ;;  %v5092_v60 = vor.u32 %v5661_v51, %v5089_v53 }
  0x3c   : > { %542 = vmatpush.bf16.msrb.mxu1 %v4919_v14  ;;  %555 = vmatpush.bf16.msrb.mxu2 %v4923_v18  ;;  %v4930_v58 = vld [vmem:[%s8014_s2 + $0x68] sm:$0xf]  ;;  %v5624_v59 = vld [vmem:[%s8014_s2 + $0x88] sm:$0xf0]  ;;  %v5052_v61 = vor.u32 %v5656_v54, %v5051_v49  ;;  %v5015_v62 = vld [vmem:[%s8014_s2] sm:$0xf]  ;;  %v5096_v63 = vor.u32 %v5666_v56, %v5095_v55 }
  0x3d   : > { %529 = vmatpush.bf16.msrb.mxu0 %v4915_v25  ;;  %v5652_v0 = vld [vmem:[%s8014_s2 + $0x4c] sm:$0xf]  ;;  %v5053_v1 = vld [vmem:[%s8014_s2 + $0x6c] sm:$0xf0]  ;;  %v5647_v2 = vld [vmem:[%s8014_s2 + $0x20] sm:$0xf0]  ;;  %v4931_v7 = vor.u32 %v5624_v59, %v4930_v58 }
  0x3e   : > { %568 = vmatpush.bf16.msrb.mxu3 %v4927_v26  ;;  %v5059_v3 = vld [vmem:[%s8014_s2 + $0x50] sm:$0xf]  ;;  %v5657_v4 = vld [vmem:[%s8014_s2 + $0x70] sm:$0xf0]  ;;  %v5139_v5 = vld [vmem:[%s8014_s2 + $0xe8] sm:$0xf]  ;;  %v5056_v10 = vor.u32 %v5652_v0, %v5053_v1  ;;  %v5016_v12 = vor.u32 %v5647_v2, %v5015_v62 }
  0x3f   : > { %v5676_v6 = vld [vmem:[%s8014_s2 + $0x108] sm:$0xf0]  ;;  %v4894_v8 = vld [vmem:[%s8014_s2 + $0x20] sm:$0xf]  ;;  %v5615_v9 = vld [vmem:[%s8014_s2 + $0x40] sm:$0xf0]  ;;  %v5060_v13 = vor.u32 %v5657_v4, %v5059_v3 }
  0x40   : > { %543 = vmatpush.bf16.msrb.mxu1 %v4883_v27  ;;  %556 = vmatpush.bf16.msrb.mxu2 %v4887_v31  ;;  %v5643_v11 = vld [vmem:[%s8014_s2 + $0x4] sm:$0xf]  ;;  %v5017_v14 = vld [vmem:[%s8014_s2 + $0x24] sm:$0xf0]  ;;  %v5648_v16 = vld [vmem:[%s8014_s2 + $0x28] sm:$0xf0]  ;;  %v5140_v19 = vor.u32 %v5676_v6, %v5139_v5  ;;  %v4895_v24 = vor.u32 %v5615_v9, %v4894_v8 }
  0x41   : > { %530 = vmatpush.bf16.msrb.mxu0 %v4879_v39  ;;  %v5023_v15 = vld [vmem:[%s8014_s2 + $0x8] sm:$0xf]  ;;  %v5671_v17 = vld [vmem:[%s8014_s2 + $0xe4] sm:$0xf]  ;;  %v5103_v20 = vld [vmem:[%s8014_s2 + $0xa0] sm:$0xf]  ;;  %v5020_v25 = vor.u32 %v5643_v11, %v5017_v14 }
  0x42   : > { %569 = vmatpush.bf16.msrb.mxu3 %v4891_v43  ;;  %v5133_v18 = vld [vmem:[%s8014_s2 + $0x104] sm:$0xf0]  ;;  %v5667_v21 = vld [vmem:[%s8014_s2 + $0xc0] sm:$0xf0]  ;;  %v5672_v22 = vld [vmem:[%s8014_s2 + $0xec] sm:$0xf]  ;;  %v5024_v28 = vor.u32 %v5648_v16, %v5023_v15 }
  0x43   : > { %5009 = vmatmul.msk.bf16.vlgmr.msrb.gmra.mxu1 %vm467_vm0, %v6418_v52  ;;  %5010 = vmatmul.msk.bf16.vlgmr.msrb.gmra.mxu2 %vm467_vm0, %v6418_v52  ;;  %v5141_v23 = vld [vmem:[%s8014_s2 + $0x10c] sm:$0xf0]  ;;  %v5677_v27 = vld [vmem:[%s8014_s2 + $0x110] sm:$0xf0]  ;;  %v5136_v29 = vor.u32 %v5671_v17, %v5133_v18  ;;  %v5662_v30 = vld [vmem:[%s8014_s2 + $0x9c] sm:$0xf]  ;;  %v5104_v32 = vor.u32 %v5667_v21, %v5103_v20 }
  0x44   : > { %2001 = vmatpush.bf16.msra.mxu1 %v5124_v33  ;;  %2014 = vmatpush.bf16.msra.mxu2 %v5128_v47  ;;  %v5147_v26 = vld [vmem:[%s8014_s2 + $0xf0] sm:$0xf]  ;;  %v5097_v31 = vld [vmem:[%s8014_s2 + $0xbc] sm:$0xf0]  ;;  %v5144_v33 = vor.u32 %v5672_v22, %v5141_v23  ;;  %v5653_v35 = vld [vmem:[%s8014_s2 + $0x54] sm:$0xf] }
  0x45   : > { %579 = vmatpush.bf16.msra.mxu0 %v5003_v44  ;;  %5011 = vmatmul.msk.bf16.vlgmr.msrb.gmra.mxu3 %vm467_vm0, %v6418_v52  ;;  %v5148_v34 = vor.u32 %v5677_v27, %v5147_v26  ;;  %v5067_v36 = vld [vmem:[%s8014_s2 + $0x58] sm:$0xf]  ;;  %v5100_v37 = vor.u32 %v5662_v30, %v5097_v31  ;;  %v5658_v38 = vld [vmem:[%s8014_s2 + $0x78] sm:$0xf0]  ;;  %v5663_v39 = vld [vmem:[%s8014_s2 + $0xa4] sm:$0xf] }
  0x46   : > { %2027 = vmatpush.bf16.msra.mxu3 %v5132_v50  ;;  %5008 = vmatmul.msk.bf16.vlgmr.msrb.gmra.mxu0 %vm467_vm0, %v6418_v52  ;;  %v5105_v40 = vld [vmem:[%s8014_s2 + $0xc4] sm:$0xf0]  ;;  %v5061_v41 = vld [vmem:[%s8014_s2 + $0x74] sm:$0xf0]  ;;  %v5668_v43 = vld [vmem:[%s8014_s2 + $0xc8] sm:$0xf0]  ;;  %v5068_v45 = vor.u32 %v5658_v38, %v5067_v36 }
  0x47   : > { %v5111_v42 = vld [vmem:[%s8014_s2 + $0xa8] sm:$0xf]  ;;  %v1769_v44 = vld [vmem:[%s6305_s26 + $0x4] sm:$0xf]  ;;  %v5644_v46 = vld [vmem:[%s8014_s2 + $0xc] sm:$0xf]  ;;  %v5064_v49 = vor.u32 %v5653_v35, %v5061_v41 }
  0x48   : > { %2002 = vmatpush.bf16.msra.mxu1 %v5088_v48  ;;  %2015 = vmatpush.bf16.msra.mxu2 %v5092_v60  ;;  %v5031_v47 = vld [vmem:[%s8014_s2 + $0x10] sm:$0xf]  ;;  %v5108_v48 = vor.u32 %v5663_v39, %v5105_v40  ;;  %v5649_v50 = vld [vmem:[%s8014_s2 + $0x30] sm:$0xf0]  ;;  %v5112_v51 = vor.u32 %v5668_v43, %v5111_v42  ;;  %v5654_v53 = vld [vmem:[%s8014_s2 + $0x5c] sm:$0xf] }
  0x49   : > { %580 = vmatpush.bf16.msra.mxu0 %v4967_v57  ;;  %v5069_v54 = vld [vmem:[%s8014_s2 + $0x7c] sm:$0xf0]  ;;  %v5025_v55 = vld [vmem:[%s8014_s2 + $0x2c] sm:$0xf0]  ;;  %v5659_v57 = vld [vmem:[%s8014_s2 + $0x80] sm:$0xf0] }
  0x4a   : > { %2028 = vmatpush.bf16.msra.mxu3 %v5096_v63  ;;  %v5075_v56 = vld [vmem:[%s8014_s2 + $0x60] sm:$0xf]  ;;  %v5072_v58 = vor.u32 %v5654_v53, %v5069_v54  ;;  %v5028_v59 = vor.u32 %v5644_v46, %v5025_v55  ;;  %v5033_v62 = vld [vmem:[%s8014_s2 + $0x34] sm:$0xf0]  ;;  %v5650_v0 = vld [vmem:[%s8014_s2 + $0x38] sm:$0xf0] }
  0x4b   : > { %v5076_v60 = vor.u32 %v5659_v57, %v5075_v56  ;;  %v5039_v63 = vld [vmem:[%s8014_s2 + $0x18] sm:$0xf]  ;;  %v6181_v55 = vmov 1983009808   ;;  %vm611_vm1 = vcmask 1047556   ;;  %vm1467_vm3 = vcmask 60416  }
  0x4c   : > { %2003 = vmatpush.bf16.msra.mxu1 %v5052_v61  ;;  %2016 = vmatpush.bf16.msra.mxu2 %v5056_v10  ;;  %v5645_v61 = vld [vmem:[%s8014_s2 + $0x14] sm:$0xf]  ;;  %v5040_v2 = vor.u32 %v5650_v0, %v5039_v63  ;;  %v616_v56 = vunpack.c.l.s4 %v6181_v55  ;;  %vm3024_vm4 = vcmask 126016  }
  0x4d   : > { %581 = vmatpush.bf16.msra.mxu0 %v4931_v7  ;;  %v5036_v1 = vor.u32 %v5645_v61, %v5033_v62 }
  0x4e   : > { %2029 = vmatpush.bf16.msra.mxu3 %v5060_v13  ;;  %v6747_v63 = vunpack.c.0.s8 %v616_v56 }
  0x50   : > { %2004 = vmatpush.bf16.msra.mxu1 %v5016_v12  ;;  %2017 = vmatpush.bf16.msra.mxu2 %v5020_v25 }
  0x51   : > { %582 = vmatpush.bf16.msra.mxu0 %v4895_v24 }
  0x52   : > { %2030 = vmatpush.bf16.msra.mxu3 %v5024_v28 }
  0x53   : > { %5157 = vmatmul.msk.bf16.vlgmr.msra.gmra.mxu1 %vm467_vm0, %v1769_v44  ;;  %5158 = vmatmul.msk.bf16.vlgmr.msra.gmra.mxu2 %vm467_vm0, %v1769_v44 }
  0x54   : > { %2053 = vmatpush.bf16.msrb.mxu1 %v5140_v19  ;;  %2066 = vmatpush.bf16.msrb.mxu2 %v5144_v33 }
  0x55   : > { %2040 = vmatpush.bf16.msrb.mxu0 %v5136_v29  ;;  %5159 = vmatmul.msk.bf16.vlgmr.msra.gmra.mxu3 %vm467_vm0, %v1769_v44 }
  0x56   : > { %2079 = vmatpush.bf16.msrb.mxu3 %v5148_v34  ;;  %5012 = vmatmul.msk.bf16.vlgmr.msra.gmra.mxu0 %vm467_vm0, %v6418_v52  ;;  %v5032_v52 = vor.u32 %v5649_v50, %v5031_v47 }
  0x58   : > { %2054 = vmatpush.bf16.msrb.mxu1 %v5104_v32  ;;  %2067 = vmatpush.bf16.msrb.mxu2 %v5108_v48 }
  0x59   : > { %2041 = vmatpush.bf16.msrb.mxu0 %v5100_v37 }
  0x5a   : > { %2080 = vmatpush.bf16.msrb.mxu3 %v5112_v51 }
  0x5c   : > { %2055 = vmatpush.bf16.msrb.mxu1 %v5068_v45  ;;  %2068 = vmatpush.bf16.msrb.mxu2 %v5072_v58 }
  0x5d   : > { %2042 = vmatpush.bf16.msrb.mxu0 %v5064_v49 }
  0x5e   : > { %2081 = vmatpush.bf16.msrb.mxu3 %v5076_v60 }
  0x60   : > { %2056 = vmatpush.bf16.msrb.mxu1 %v5032_v52  ;;  %2069 = vmatpush.bf16.msrb.mxu2 %v5036_v1 }
  0x61   : > { %2043 = vmatpush.bf16.msrb.mxu0 %v5028_v59 }
  0x62   : > { %2082 = vmatpush.bf16.msrb.mxu3 %v5040_v2 }
  0x63   : > { %5161 = vmatmul.msk.bf16.vlgmr.msrb.gmra.mxu1 %vm467_vm0, %v1769_v44  ;;  %5162 = vmatmul.msk.bf16.vlgmr.msrb.gmra.mxu2 %vm467_vm0, %v1769_v44 }
  0x65   : > { %5163 = vmatmul.msk.bf16.vlgmr.msrb.gmra.mxu3 %vm467_vm0, %v1769_v44 }
  0x66   : > { %5160 = vmatmul.msk.bf16.vlgmr.msrb.gmra.mxu0 %vm467_vm0, %v1769_v44 }
  0xaf   : > { %v6722_v3 = vpop.f32.mrf.mxu0 }
  0xb0   : > { %v493_v4 = vpop.f32.mrf.mxu1 }
  0xb1   : > { %v5848_v5 = vpack.i.bf16 %v493_v4, %v6722_v3 }
  0xb3   : > { %5849 = vrot.lane.b32.xlu2 %v5848_v5, %s6173_s9 }
  0xb6   : > { %v506_v6 = vpop.f32.mrf.mxu2 }
  0xb7   : > { %v482_v8 = vpop.f32.mrf.mxu0 }
  0xb8   : > { %v519_v7 = vpop.f32.mrf.mxu3  ;;  %v495_v10 = vpop.f32.mrf.mxu1 }
  0xb9   : > { %v5853_v9 = vpack.i.bf16 %v519_v7, %v506_v6 }
  0xbb   : > { %5854 = vrot.lane.b32.xlu0 %v5853_v9, %s6173_s9 }
  0xbe   : > { %v508_v11 = vpop.f32.mrf.mxu2 }
  0xbf   : > { %v6182_v11 = vmov 1934713408  }
  0xc0   : > { %v521_v12 = vpop.f32.mrf.mxu3  ;;  %v545_v14 = vpop.f32.mrf.mxu1 }
  0xc1   : > { %v664_v12 = vunpack.c.l.s4 %v6182_v11 }
  0xc3   : > { %v532_v13 = vpop.f32.mrf.mxu0 }
  0xc4   : > { %v5858_v15 = vpack.i.bf16 %v545_v14, %v532_v13 }
  0xc6   : > { %5859 = vrot.lane.b32.xlu1 %v5858_v15, %s6173_s9  ;;  %v558_v16 = vpop.f32.mrf.mxu2 }
  0xc8   : > { %v571_v17 = vpop.f32.mrf.mxu3  ;;  %v547_v19 = vpop.f32.mrf.mxu1 }
  0xc9   : > { %v5863_v20 = vpack.i.bf16 %v571_v17, %v558_v16 }
  0xcb   : > { %v534_v18 = vpop.f32.mrf.mxu0 }
  0xce   : > { %5864 = vrot.lane.b32.xlu1 %v5863_v20, %s6173_s9  ;;  %v560_v21 = vpop.f32.mrf.mxu2 }
  0xd0   : > { %v573_v22 = vpop.f32.mrf.mxu3  ;;  %v6729_v24 = vpop.f32.mrf.mxu1 }
  0xd1   : > { %v5868_v25 = vpack.i.bf16 %v6729_v24, %v6722_v3  ;;  %v613_v22 = vrot.slane %v6722_v3, 4 }
  0xd3   : > { %v584_v23 = vpop.f32.mrf.mxu0  ;;  %5869 = vrot.lane.b32.xlu0 %v5868_v25, %s6174_s29  ;;  %5889 = vrot.lane.b32.xlu2 %v5868_v25, %s6175_s12 }
  0xd4   : > { %v5903_v35 = vpack.i.bf16 %v6729_v24, %v584_v23 }
  0xd6   : > { %5879 = vrot.lane.b32.xlu1 %v5868_v25, %s6176_s10  ;;  %v2019_v26 = vpop.f32.mrf.mxu2 }
  0xd8   : > { %v2032_v27 = vpop.f32.mrf.mxu3  ;;  %v2008_v28 = vpop.f32.mrf.mxu1 }
  0xd9   : > { %v5908_v36 = vpack.i.bf16 %v2032_v27, %v2019_v26  ;;  %v2138_v27 = vrot.slane %v6729_v24, 4 }
  0xdb   : > { %v586_v29 = vpop.f32.mrf.mxu0  ;;  %5874 = vrot.lane.b32.xlu0 %v5868_v25, %s6177_s14  ;;  %5894 = vrot.lane.b32.xlu2 %v5868_v25, %s6178_s15 }
  0xde   : > { %5884 = vrot.lane.b32.xlu1 %v5868_v25, %s6179_s0  ;;  %v2021_v30 = vpop.f32.mrf.mxu2 }
  0xe0   : > { %v2034_v31 = vpop.f32.mrf.mxu3  ;;  %v2058_v33 = vpop.f32.mrf.mxu1 }
  0xe3   : > { %v2045_v32 = vpop.f32.mrf.mxu0  ;;  %5899 = vrot.lane.b32.xlu0 %v5868_v25, %s6180_s16  ;;  %v6768_v25 = vunpack.c.0.s8 %v664_v12 }
  0xe4   : > { %v5913_v34 = vpack.i.bf16 %v2058_v33, %v2045_v32 }
  0xe6   : > { %5914 = vrot.lane.b32.xlu2 %v5913_v34, %s6173_s9  ;;  %5904 = vrot.lane.b32.xlu1 %v5903_v35, %s6173_s9  ;;  %v2071_v39 = vpop.f32.mrf.mxu2 }
  0xe8   : > { %v2060_v38 = vpop.f32.mrf.mxu1  ;;  %v2084_v40 = vpop.f32.mrf.mxu3 }
  0xe9   : > { %v5960_v41 = vpack.i.bf16 %v2084_v40, %v2071_v39 }
  0xeb   : > { %v2047_v37 = vpop.f32.mrf.mxu0 }
  0xee   : > { %5909 = vrot.lane.b32.xlu1 %v5908_v36, %s6173_s9  ;;  %v2073_v42 = vpop.f32.mrf.mxu2 }
  0xf0   : > { %v2086_v43 = vpop.f32.mrf.mxu3 }
  0xf6   : > { %5961 = vrot.lane.b32.xlu1 %v5960_v41, %s6173_s9 }
 0x10d   : > { %v5850_v44 = vpop.permute.xlu2 %5849 }
 0x10e   : > { %v5852_v48 = vunpack.i.h.bf16 %v5850_v44  ;;  %v5851_v49 = vunpack.i.l.bf16 %v5850_v44 }
 0x110   : > { %v1502_v54 = vsel %vm467_vm0, %v5851_v49, %v5852_v48 }
 0x111   : > { %v1520_v61 = vrot.slane %v1502_v54, 4 }
 0x12d   : > { %v5855_v45 = vpop.permute.xlu0 %5854  ;;  %v6743_v57 = vpop.permute.xlu2 %5889 }
 0x12e   : > { %v5857_v46 = vunpack.i.h.bf16 %v5855_v45  ;;  %v5856_v47 = vunpack.i.l.bf16 %v5855_v45  ;;  %v5892_v15 = vunpack.i.h.bf16 %v6743_v57  ;;  %v5891_v16 = vunpack.i.l.bf16 %v6743_v57 }
 0x12f   : > { %v1742_v45 = vlaneseq }
 0x130   : > { %v1503_v50 = vsel %vm467_vm0, %v5852_v48, %v5856_v47  ;;  %v1504_v51 = vsel %vm467_vm0, %v5856_v47, %v5857_v46  ;;  %v6776_v28 = vrot.slane %v5892_v15, 4  ;;  %v6780_v29 = vrot.slane %v5891_v16, 4 }
 0x131   : > { %v1518_v58 = vrot.slane %v1504_v51, 4  ;;  %v1532_v59 = vrot.slane %v1503_v50, 4  ;;  %v1521_v1 = vsel %vm611_vm1, %v1504_v51, %v1520_v61  ;;  %v6815_v61 = vand.u32 127, %v1742_v45 }
 0x132   : > { %v1529_v7 = vperm.slane %v1521_v1, %v6747_v63 }
 0x133   : > { %v1519_v4 = vsel %vm611_vm1, %v1518_v58, %v1502_v54  ;;  %vm1744_vm2 = vcmp.eq.s32.totalorder %v6815_v61, 8 }
 0x134   : > { %v1525_v10 = vperm.slane %v1519_v4, %v6747_v63  ;;  %v1580_v19 = vrot.slane %v1529_v7, 4 }
 0x135   : > { %v6764_v17 = vpop.permute.xlu2 %5894 }
 0x136   : > { %v1568_v23 = vrot.slane %v1525_v10, 4  ;;  %v5897_v30 = vunpack.i.h.bf16 %v6764_v17  ;;  %v5896_v32 = vunpack.i.l.bf16 %v6764_v17 }
 0x138   : > { %v6740_v53 = vpop.permute.xlu1 %5859  ;;  %v635_v56 = vrot.slane %v5896_v32, 4 }
 0x139   : > { %v5861_v52 = vunpack.i.l.bf16 %v6740_v53  ;;  %v5862_v8 = vunpack.i.h.bf16 %v6740_v53 }
 0x13b   : > { %v1505_v60 = vsel %vm467_vm0, %v5857_v46, %v5861_v52  ;;  %v1506_v20 = vsel %vm467_vm0, %v5861_v52, %v5862_v8  ;;  %v2160_v46 = vrot.slane %v5897_v30, 4 }
 0x13c   : > { %v1530_v62 = vrot.slane %v1505_v60, 4  ;;  %v1533_v0 = vsel %vm611_vm1, %v1505_v60, %v1532_v59  ;;  %v1544_v33 = vrot.slane %v1506_v20, 4 }
 0x13d   : > { %v1541_v5 = vperm.slane %v1533_v0, %v6747_v63 }
 0x13e   : > { %v1531_v2 = vsel %vm611_vm1, %v1530_v62, %v1503_v50 }
 0x13f   : > { %v1537_v9 = vperm.slane %v1531_v2, %v6747_v63  ;;  %v1578_v18 = vrot.slane %v1541_v5, 4  ;;  %v1581_v31 = vsel %vm611_vm1, %v1541_v5, %v1580_v19 }
 0x140   : > { %v6754_v6 = vpop.permute.xlu1 %5864  ;;  %v6789_v42 = vperm.slane %v1581_v31, %v6768_v25  ;;  %v6800_v50 = vpop.permute.xlu2 %5914 }
 0x141   : > { %v5867_v13 = vunpack.i.h.bf16 %v6754_v6  ;;  %v5866_v14 = vunpack.i.l.bf16 %v6754_v6  ;;  %v1566_v21 = vrot.slane %v1537_v9, 4  ;;  %v1569_v34 = vsel %vm611_vm1, %v1537_v9, %v1568_v23 }
 0x142   : > { %v1579_v35 = vsel %vm611_vm1, %v1578_v18, %v1529_v7  ;;  %v6795_v47 = vperm.slane %v1569_v34, %v6768_v25  ;;  %v1628_v60 = vrot.slane %v6789_v42, 4  ;;  %v5917_v62 = vunpack.i.h.bf16 %v6800_v50 }
 0x143   : > { %v1508_v26 = vsel %vm467_vm0, %v5866_v14, %v5867_v13  ;;  %v1567_v37 = vsel %vm611_vm1, %v1566_v21, %v1525_v10  ;;  %v6798_v48 = vperm.slane %v1579_v35, %v6768_v25  ;;  %v6806_v53 = vsel %vm467_vm0, %v5862_v8, %v5866_v14 }
 0x144   : > { %v1542_v38 = vrot.slane %v1508_v26, 4  ;;  %v1545_v43 = vsel %vm611_vm1, %v1508_v26, %v1544_v33  ;;  %v6803_v51 = vperm.slane %v1567_v37, %v6768_v25  ;;  %v5916_v0 = vunpack.i.l.bf16 %v6800_v50 }
 0x145   : > { %v5870_v36 = vpop.permute.xlu0 %5869  ;;  %v6812_v58 = vperm.slane %v1545_v43, %v6747_v63  ;;  %v1620_v1 = vrot.slane %v6795_v47, 4  ;;  %v1624_v2 = vrot.slane %v6798_v48, 4  ;;  %v1556_v4 = vrot.slane %v6806_v53, 4 }
 0x146   : > { %v5872_v39 = vunpack.i.h.bf16 %v5870_v36  ;;  %v5871_v40 = vunpack.i.l.bf16 %v5870_v36  ;;  %v1543_v52 = vsel %vm611_vm1, %v1542_v38, %v1506_v20  ;;  %v1616_v7 = vrot.slane %v6803_v51, 4 }
 0x147   : > { %v6825_v8 = vperm.slane %v1543_v52, %v6747_v63  ;;  %v1604_v12 = vrot.slane %v6812_v58, 4  ;;  %v6838_v31 = vsel %vm467_vm0, %v5916_v0, %v5917_v62 }
 0x148   : > { %v5880_v41 = vpop.permute.xlu1 %5879  ;;  %v2150_v49 = vrot.slane %v5872_v39, 4  ;;  %v625_v54 = vrot.slane %v5871_v40, 4 }
 0x149   : > { %v5881_v44 = vunpack.i.l.bf16 %v5880_v41  ;;  %v5882_v55 = vunpack.i.h.bf16 %v5880_v41  ;;  %v1592_v37 = vrot.slane %v6825_v8, 4 }
 0x14b   : > { %v623_v59 = vrot.slane %v5881_v44, 4  ;;  %v2151_v5 = vsel %vm611_vm1, %v5882_v55, %v2150_v49  ;;  %v2148_v9 = vrot.slane %v5882_v55, 4  ;;  %v626_v10 = vsel %vm611_vm1, %v5881_v44, %v625_v54 }
 0x14c   : > { %v6831_v21 = vperm.slane %v2151_v5, %v6747_v63  ;;  %v6841_v33 = vperm.slane %v626_v10, %v6747_v63  ;;  %v3087_v55 = vrot.slane %v6838_v31, 4 }
 0x14d   : > { %v5875_v11 = vpop.permute.xlu0 %5874  ;;  %v624_v14 = vsel %vm611_vm1, %v623_v59, %v5871_v40  ;;  %v2149_v38 = vsel %vm611_vm1, %v2148_v9, %v5872_v39 }
 0x14e   : > { %v5877_v18 = vunpack.i.h.bf16 %v5875_v11  ;;  %v5876_v19 = vunpack.i.l.bf16 %v5875_v11  ;;  %v6847_v40 = vperm.slane %v624_v14, %v6747_v63  ;;  %v671_v52 = vrot.slane %v6841_v33, 4 }
 0x150   : > { %v5885_v20 = vpop.permute.xlu1 %5884  ;;  %v2136_v34 = vrot.slane %v5877_v18, 4  ;;  %v610_v35 = vrot.slane %v5876_v19, 4  ;;  %v614_v36 = vsel %vm611_vm1, %v5876_v19, %v613_v22  ;;  %v2139_v41 = vsel %vm611_vm1, %v5877_v18, %v2138_v27 }
 0x151   : > { %v5887_v23 = vunpack.i.h.bf16 %v5885_v20  ;;  %v5886_v26 = vunpack.i.l.bf16 %v5885_v20  ;;  %v6853_v44 = vperm.slane %v614_v36, %v6747_v63  ;;  %v6864_v27 = vperm.slane %v2149_v38, %v6747_v63 }
 0x152   : > { %v612_v43 = vsel %vm611_vm1, %v610_v35, %v6722_v3  ;;  %v2137_v22 = vsel %vm611_vm1, %v2136_v34, %v6729_v24  ;;  %v2196_v3 = vrot.slane %v6831_v21, 4 }
 0x153   : > { %v2161_v45 = vsel %vm611_vm1, %v2160_v46, %v5887_v23  ;;  %v636_v49 = vsel %vm611_vm1, %v635_v56, %v5886_v26  ;;  %v6860_v39 = vperm.slane %v612_v43, %v6747_v63  ;;  %v2162_v54 = vrot.slane %v5887_v23, 4 }
 0x154   : > { %v637_v59 = vrot.slane %v5886_v26, 4  ;;  %v659_v46 = vrot.slane %v6847_v40, 4  ;;  %v6870_v56 = vperm.slane %v2139_v41, %v6747_v63  ;;  %v6873_v24 = vperm.slane %v2161_v45, %v6747_v63 }
 0x155   : > { %v6876_v5 = vperm.slane %v636_v49, %v6747_v63  ;;  %v5900_v9 = vpop.permute.xlu0 %5899  ;;  %v6879_v10 = vperm.slane %v2137_v22, %v6747_v63  ;;  %v673_v11 = vrot.slane %v6853_v44, 4  ;;  %v661_v20 = vrot.slane %v6860_v39, 4 }
 0x156   : > { %v5902_v14 = vunpack.i.h.bf16 %v5900_v9  ;;  %v5901_v18 = vunpack.i.l.bf16 %v5900_v9  ;;  %v6888_v23 = vsel %vm611_vm1, %v5897_v30, %v2162_v54  ;;  %v638_v26 = vsel %vm611_vm1, %v5896_v32, %v637_v59 }
 0x157   : > { %v685_v43 = vrot.slane %v6876_v5, 4  ;;  %v672_v30 = vsel %vm611_vm1, %v671_v52, %v6853_v44  ;;  %v6908_v32 = vperm.slane %v638_v26, %v6747_v63  ;;  %v6939_v57 = vsel %vm611_vm1, %v6847_v40, %v661_v20 }
 0x158   : > { %v6882_v19 = vpop.permute.xlu1 %5904  ;;  %v2172_v35 = vrot.slane %v5902_v14, 4  ;;  %v647_v36 = vrot.slane %v5901_v18, 4  ;;  %v650_v38 = vsel %vm611_vm1, %v5901_v18, %v6780_v29  ;;  %v2175_v41 = vsel %vm611_vm1, %v5902_v14, %v6776_v28 }
 0x159   : > { %v5906_v34 = vunpack.i.l.bf16 %v6882_v19  ;;  %v6900_v45 = vperm.slane %v650_v38, %v6747_v63  ;;  %v5907_v54 = vunpack.i.h.bf16 %v6882_v19  ;;  %v6931_v59 = vperm.slane %v672_v30, %v6768_v25 }
 0x15a   : > { %v648_v29 = vsel %vm611_vm1, %v647_v36, %v5891_v16  ;;  %v6925_v52 = vsel %vm611_vm1, %v2172_v35, %v5892_v15 }
 0x15b   : > { %v1509_v17 = vsel %vm467_vm0, %v5867_v13, %v5906_v34  ;;  %v6915_v22 = vperm.slane %v648_v29, %v6747_v63  ;;  %v695_v6 = vrot.slane %v6900_v45, 4  ;;  %v6919_v13 = vperm.slane %v2175_v41, %v6747_v63 }
 0x15c   : > { %v1554_v28 = vrot.slane %v1509_v17, 4  ;;  %v1557_v49 = vsel %vm611_vm1, %v1509_v17, %v1556_v4  ;;  %v717_v35 = vrot.slane %v6931_v59, 4 }
 0x15d   : > { %v1565_v4 = vperm.slane %v1557_v49, %v6747_v63  ;;  %v683_v9 = vrot.slane %v6915_v22, 4  ;;  %v696_v18 = vsel %vm611_vm1, %v695_v6, %v6908_v32 }
 0x15e   : > { %v1555_v16 = vsel %vm611_vm1, %v1554_v28, %v6806_v53  ;;  %v6947_v34 = vperm.slane %v696_v18, %v6768_v25 }
 0x15f   : > { %v1561_v14 = vperm.slane %v1555_v16, %v6747_v63  ;;  %v1602_v15 = vrot.slane %v1565_v4, 4  ;;  %v1605_v53 = vsel %vm611_vm1, %v1565_v4, %v1604_v12  ;;  %v684_v40 = vsel %vm611_vm1, %v683_v9, %v6876_v5 }
 0x160   : > { %v6944_v26 = vpop.permute.xlu1 %5909  ;;  %v1613_v41 = vperm.slane %v1605_v53, %v6768_v25  ;;  %v715_v29 = vrot.slane %v6947_v34, 4  ;;  %v2210_v5 = vrot.slane %v6873_v24, 4  ;;  %v690_v9 = vperm.slane %v684_v40, %v6768_v25 }
 0x161   : > { %v1590_v36 = vrot.slane %v1561_v14, 4  ;;  %v1593_v38 = vsel %vm611_vm1, %v1561_v14, %v1592_v37  ;;  %v5912_v20 = vunpack.i.h.bf16 %v6944_v26  ;;  %v1603_v30 = vsel %vm611_vm1, %v1602_v15, %v6812_v58 }
 0x162   : > { %v1601_v17 = vperm.slane %v1593_v38, %v6768_v25  ;;  %v5911_v12 = vunpack.i.l.bf16 %v6944_v26  ;;  %v1609_v49 = vperm.slane %v1603_v30, %v6768_v25  ;;  %v1626_v6 = vrot.slane %v1613_v41, 4 }
 0x163   : > { %v1591_v28 = vsel %vm611_vm1, %v1590_v36, %v6825_v8  ;;  %v1629_v37 = vsel %vm611_vm1, %v1613_v41, %v1628_v60  ;;  %v716_v19 = vsel %vm611_vm1, %v715_v29, %v6931_v59  ;;  %v718_v26 = vsel %vm611_vm1, %v6947_v34, %v717_v35 }
 0x164   : > { %v1597_v16 = vperm.slane %v1591_v28, %v6768_v25  ;;  %v1618_v4 = vrot.slane %v1601_v17, 4  ;;  %v1621_v58 = vsel %vm611_vm1, %v1601_v17, %v1620_v1  ;;  %v1666_v14 = vrot.slane %v1629_v37, 4 }
 0x165   : > { %v1622_v18 = vrot.slane %v1609_v49, 4  ;;  %v1625_v8 = vsel %vm611_vm1, %v1609_v49, %v1624_v2  ;;  %v1627_v15 = vsel %vm611_vm1, %v1626_v6, %v6789_v42  ;;  %v1642_v53 = vrot.slane %v1621_v58, 4 }
 0x166   : > { %v1614_v36 = vrot.slane %v1597_v16, 4  ;;  %v1617_v60 = vsel %vm611_vm1, %v1597_v16, %v1616_v7  ;;  %v1619_v38 = vsel %vm611_vm1, %v1618_v4, %v6795_v47  ;;  %v1654_v41 = vrot.slane %v1627_v15, 4 }
 0x167   : > { %v1623_v1 = vsel %vm611_vm1, %v1622_v18, %v6798_v48  ;;  %v1630_v17 = vrot.slane %v1619_v38, 4  ;;  %v1643_v30 = vsel %vm611_vm1, %v1642_v53, %v1617_v60  ;;  %v1644_v2 = vrot.slane %v1617_v60, 4 }
 0x168   : > { %v1615_v42 = vsel %vm611_vm1, %v1614_v36, %v6803_v51  ;;  %v1649_v28 = vperm.slane %v1643_v30, %v6747_v63  ;;  %v1655_v49 = vsel %vm611_vm1, %v1654_v41, %v1623_v1  ;;  %v1656_v6 = vrot.slane %v1623_v1, 4 }
 0x169   : > { %v1631_v7 = vsel %vm611_vm1, %v1630_v17, %v1615_v42  ;;  %v1632_v16 = vrot.slane %v1615_v42, 4  ;;  %v1645_v47 = vsel %vm611_vm1, %v1621_v58, %v1644_v2  ;;  %v1661_v4 = vperm.slane %v1655_v49, %v6747_v63 }
 0x16a   : > { %v1637_v48 = vperm.slane %v1631_v7, %v6747_v63  ;;  %v1653_v18 = vperm.slane %v1645_v47, %v6747_v63  ;;  %v1657_v53 = vsel %vm611_vm1, %v1627_v15, %v1656_v6  ;;  %v1667_v51 = vsel %vm611_vm1, %v1666_v14, %v1625_v8 }
 0x16b   : > { %v1633_v36 = vsel %vm611_vm1, %v1619_v38, %v1632_v16  ;;  %v1665_v60 = vperm.slane %v1657_v53, %v6747_v63  ;;  %v1668_v41 = vrot.slane %v1625_v8, 4  ;;  %v1673_v1 = vperm.slane %v1667_v51, %v6747_v63 }
 0x16c   : > { %v1641_v58 = vperm.slane %v1633_v36, %v6747_v63  ;;  %v1678_v17 = vrot.slane %v1649_v28, 4  ;;  %v1680_v30 = vrot.slane %v1637_v48, 4  ;;  %v1690_v2 = vrot.slane %v1653_v18, 4 }
 0x16d   : > { %v1669_v42 = vsel %vm611_vm1, %v1629_v37, %v1668_v41  ;;  %v1702_v49 = vrot.slane %v1673_v1, 4  ;;  %v1704_v15 = vrot.slane %v1661_v4, 4  ;;  %v1716_v6 = vrot.slane %v1665_v60, 4 }
 0x16e   : > { %v1677_v14 = vperm.slane %v1669_v42, %v6747_v63  ;;  %v1679_v7 = vsel %vm611_vm1, %v1678_v17, %v1637_v48  ;;  %v1681_v38 = vsel %vm611_vm1, %v1649_v28, %v1680_v30  ;;  %v1691_v8 = vsel %vm611_vm1, %v1690_v2, %v1641_v58 }
 0x16f   : > { %v1685_v16 = vperm.slane %v1679_v7, %v6768_v25  ;;  %v1689_v47 = vperm.slane %v1681_v38, %v6768_v25  ;;  %v1692_v53 = vrot.slane %v1641_v58, 4  ;;  %v1697_v51 = vperm.slane %v1691_v8, %v6768_v25 }
 0x170   : > { %v1703_v37 = vsel %vm611_vm1, %v1702_v49, %v1661_v4  ;;  %v1705_v36 = vsel %vm611_vm1, %v1673_v1, %v1704_v15  ;;  %v1714_v41 = vrot.slane %v1677_v14, 4  ;;  %v1717_v42 = vsel %vm611_vm1, %v1677_v14, %v1716_v6 }
 0x171   : > { %v1693_v48 = vsel %vm611_vm1, %v1653_v18, %v1692_v53  ;;  %v1709_v28 = vperm.slane %v1703_v37, %v6768_v25  ;;  %v1713_v17 = vperm.slane %v1705_v36, %v6768_v25  ;;  %v1725_v30 = vperm.slane %v1717_v42, %v6768_v25 }
 0x172   : > { %v1701_v2 = vperm.slane %v1693_v48, %v6768_v25  ;;  %v1715_v58 = vsel %vm611_vm1, %v1714_v41, %v1665_v60  ;;  %v1728_v7 = vrot.slane %v1685_v16, 4  ;;  %v1732_v38 = vrot.slane %v1689_v47, 4 }
 0x173   : > { %v1721_v4 = vperm.slane %v1715_v58, %v6768_v25  ;;  %v1726_v1 = vrot.slane %v1709_v28, 4  ;;  %v1730_v49 = vrot.slane %v1713_v17, 4  ;;  %v1736_v15 = vrot.slane %v1697_v51, 4 }
 0x174   : > { %v1729_v6 = vsel %vm611_vm1, %v1709_v28, %v1728_v7  ;;  %v1733_v18 = vsel %vm611_vm1, %v1713_v17, %v1732_v38  ;;  %v1738_v14 = vrot.slane %v1725_v30, 4  ;;  %v1740_v8 = vrot.slane %v1701_v2, 4 }
 0x175   : > { %v1727_v53 = vsel %vm611_vm1, %v1726_v1, %v1685_v16  ;;  %v1731_v37 = vsel %vm611_vm1, %v1730_v49, %v1689_v47  ;;  %v1734_v36 = vrot.slane %v1721_v4, 4  ;;  %v1737_v60 = vsel %vm611_vm1, %v1721_v4, %v1736_v15 }
 0x176   : > { %v1739_v41 = vsel %vm611_vm1, %v1738_v14, %v1701_v2  ;;  %v1741_v42 = vsel %vm611_vm1, %v1725_v30, %v1740_v8  ;;  %v1745_v48 = vsel %vm1744_vm2, 1.0, %v1727_v53  ;;  %v1746_v28 = vsel %vm1744_vm2, 1.0, %v1729_v6 }
 0x177   : > { %v1735_v17 = vsel %vm611_vm1, %v1734_v36, %v1697_v51  ;;  %v1747_v16 = vsel %vm1744_vm2, 1.0, %v1731_v37  ;;  %v1748_v47 = vsel %vm1744_vm2, 1.0, %v1733_v18  ;;  %v1750_v58 = vsel %vm1744_vm2, 1.0, %v1737_v60 }
 0x178   : > { %v1749_v30 = vsel %vm1744_vm2, 1.0, %v1735_v17  ;;  %v1751_v2 = vsel %vm1744_vm2, 1.0, %v1739_v41  ;;  %v1752_v7 = vsel %vm1744_vm2, 1.0, %v1741_v42  ;;  %v1753_v38 = vpack.c.bf16 %v1745_v48, %v1745_v48 }
 0x179   : > { %v1754_v51 = vpack.c.bf16 %v1746_v28, %v1746_v28  ;;  %v1755_v4 = vpack.c.bf16 %v1747_v16, %v1747_v16  ;;  %v1756_v1 = vpack.c.bf16 %v1748_v47, %v1748_v47  ;;  %v1757_v49 = vpack.c.bf16 %v1749_v30, %v1749_v30 }
 0x17a   : > { %v1758_v15 = vpack.c.bf16 %v1750_v58, %v1750_v58  ;;  %v1759_v6 = vpack.c.bf16 %v1751_v2, %v1751_v2  ;;  %v1760_v18 = vpack.c.bf16 %v1752_v7, %v1752_v7  ;;  %1761 = vst [vmem:[#allocation3] sm:$0xf] %v1753_v38  ;;  %v3059_v14 = vsel %vm467_vm0, %v5907_v54, %v5911_v12 }
 0x17b   : > { %1762 = vst [vmem:[#allocation3 + $0x8] sm:$0xf] %v1754_v51  ;;  %v3060_v8 = vsel %vm467_vm0, %v5911_v12, %v5912_v20  ;;  %v3061_v53 = vsel %vm467_vm0, %v5912_v20, %v5916_v0  ;;  %v3077_v37 = vrot.slane %v3059_v14, 4  ;;  %v5925_v12 = vpack.i.bf16 %v718_v26, %v716_v19 }
 0x17c   : > { %1763 = vst [vmem:[#allocation3 + $0x10] sm:$0xf] %v1755_v4  ;;  %v3075_v54 = vrot.slane %v3061_v53, 4  ;;  %v3088_v36 = vsel %vm611_vm1, %v3087_v55, %v3060_v8  ;;  %v3089_v60 = vrot.slane %v3060_v8, 4  ;;  %v670_v29 = vperm.slane %v6939_v57, %v6768_v25 }
 0x17d   : > { %1764 = vst [vmem:[#allocation3 + $0x18] sm:$0xf] %v1756_v1  ;;  %v3078_v0 = vsel %vm611_vm1, %v3061_v53, %v3077_v37  ;;  %v3094_v20 = vperm.slane %v3088_v36, %v6747_v63  ;;  %v686_v34 = vsel %vm611_vm1, %v6915_v22, %v685_v43  ;;  %5926 = vxpose.xlu0.b32.start.end [1/1] (short) (narrow) %v5925_v12, 8  ;;  %v2220_v2 = vrot.slane %v6919_v13, 4 }
 0x17e   : > { %1765 = vst [vmem:[#allocation3 + $0x20] sm:$0xf] %v1757_v49  ;;  %v3076_v41 = vsel %vm611_vm1, %v3075_v54, %v3059_v14  ;;  %v3086_v55 = vperm.slane %v3078_v0, %v6747_v63  ;;  %v3090_v59 = vsel %vm611_vm1, %v6838_v31, %v3089_v60  ;;  %v694_v57 = vperm.slane %v686_v34, %v6768_v25 }
 0x17f   : > { %1766 = vst [vmem:[#allocation3 + $0x28] sm:$0xf] %v1758_v15  ;;  %v3082_v35 = vperm.slane %v3076_v41, %v6747_v63  ;;  %v3098_v42 = vperm.slane %v3090_v59, %v6747_v63  ;;  %v3123_v48 = vrot.slane %v3094_v20, 4  ;;  %v2179_v28 = vperm.slane %v6925_v52, %v6747_v63 }
 0x180   : > { %1767 = vst [vmem:[#allocation3 + $0x30] sm:$0xf] %v1759_v6  ;;  %v3137_v17 = vrot.slane %v3086_v55, 4  ;;  %v713_v31 = vrot.slane %v670_v29, 4  ;;  %v660_v43 = vsel %vm611_vm1, %v659_v46, %v6860_v39  ;;  %v711_v30 = vrot.slane %v694_v57, 4 }
 0x181   : > { %1768 = vst [vmem:[#allocation3 + $0x38] sm:$0xf] %v1760_v18  ;;  %v7087_v16 = vsel %vm611_vm1, %v3123_v48, %v3082_v35  ;;  %v3125_v47 = vrot.slane %v3082_v35, 4  ;;  %v3135_v58 = vrot.slane %v3098_v42, 4  ;;  %v666_v51 = vperm.slane %v660_v43, %v6768_v25 }
 0x182   : > { %v7091_v7 = vsel %vm611_vm1, %v3098_v42, %v3137_v17  ;;  %v714_v52 = vsel %vm611_vm1, %v694_v57, %v713_v31  ;;  %v712_v38 = vsel %vm611_vm1, %v711_v30, %v670_v29  ;;  %v2186_v4 = vrot.slane %v6879_v10, 4  ;;  %v5673_v31 = vld [vmem:[%s8014_s2 + $0xf4] sm:$0xf]  ;;  %v5678_v30 = vld [vmem:[%s8014_s2 + $0x118] sm:$0xf0] }
 0x183   : > { %v7099_v39 = vsel %vm611_vm1, %v3094_v20, %v3125_v47  ;;  %v7102_v46 = vsel %vm611_vm1, %v3135_v58, %v3086_v55  ;;  %v2171_v1 = vperm.slane %v6888_v23, %v6747_v63  ;;  %v5918_v49 = vpack.i.bf16 %v714_v52, %v712_v38  ;;  %v5155_v58 = vld [vmem:[%s8014_s2 + $0xf8] sm:$0xf]  ;;  %v5664_v38 = vld [vmem:[%s8014_s2 + $0xac] sm:$0xf] }
 0x184   : > { %v2184_v22 = vrot.slane %v6864_v27, 4  ;;  %v2197_v15 = vsel %vm611_vm1, %v2196_v3, %v6870_v56  ;;  %v697_v6 = vrot.slane %v6908_v32, 4  ;;  %v2208_v18 = vrot.slane %v2179_v28, 4 }
 0x185   : > { %5919 = vxpose.xlu2.b32.start.end [1/1] (short) (narrow) %v5918_v49, 8  ;;  %v2203_v14 = vperm.slane %v2197_v15, %v6768_v25  ;;  %v2221_v23 = vsel %vm611_vm1, %v2220_v2, %v2171_v1  ;;  %v707_v8 = vrot.slane %v690_v9, 4  ;;  %v709_v53 = vrot.slane %v666_v51, 4  ;;  %v5669_v49 = vld [vmem:[%s8014_s2 + $0xd0] sm:$0xf0] }
 0x186   : > { %v2227_v37 = vperm.slane %v2221_v23, %v6768_v25  ;;  %v674_v19 = vsel %vm611_vm1, %v6841_v33, %v673_v11  ;;  %v698_v32 = vsel %vm611_vm1, %v6900_v45, %v697_v6  ;;  %v2187_v36 = vsel %vm611_vm1, %v6864_v27, %v2186_v4  ;;  %v5655_v23 = vld [vmem:[%s8014_s2 + $0x64] sm:$0xf] }
 0x187   : > { %v2242_v54 = vrot.slane %v2203_v14, 4  ;;  %v682_v3 = vperm.slane %v674_v19, %v6768_v25  ;;  %v708_v60 = vsel %vm611_vm1, %v707_v8, %v666_v51  ;;  %v710_v26 = vsel %vm611_vm1, %v690_v9, %v709_v53  ;;  %v5077_v8 = vld [vmem:[%s8014_s2 + $0x84] sm:$0xf0] }
 0x188   : > { %v2240_v0 = vrot.slane %v2227_v37, 4  ;;  %v706_v20 = vperm.slane %v698_v32, %v6768_v25  ;;  %v5965_v44 = vpack.i.bf16 %v710_v26, %v708_v60  ;;  %v2195_v33 = vperm.slane %v2187_v36, %v6768_v25  ;;  %v5646_v60 = vld [vmem:[%s8014_s2 + $0x1c] sm:$0xf]  ;;  %v5041_v26 = vld [vmem:[%s8014_s2 + $0x3c] sm:$0xf0] }
 0x189   : > { %v2243_v12 = vsel %vm611_vm1, %v2227_v37, %v2242_v54  ;;  %v2211_v11 = vsel %vm611_vm1, %v2179_v28, %v2210_v5  ;;  %v721_v41 = vrot.slane %v682_v3, 4  ;;  %v2185_v59 = vsel %vm611_vm1, %v2184_v22, %v6879_v10  ;;  %v5149_v10 = vld [vmem:[%s8014_s2 + $0x114] sm:$0xf0]  ;;  %v5083_v37 = vld [vmem:[%s8014_s2 + $0x68] sm:$0xf] }
 0x18a   : > { %v2241_v29 = vsel %vm611_vm1, %v2240_v0, %v2203_v14  ;;  %v719_v45 = vrot.slane %v706_v20, 4  ;;  %v2219_v27 = vperm.slane %v2211_v11, %v6768_v25  ;;  %5966 = vxpose.xlu1.b32.start.end [1/1] (short) (narrow) %v5965_v44, 8  ;;  %v2209_v34 = vsel %vm611_vm1, %v2208_v18, %v6873_v24  ;;  %v5047_v0 = vld [vmem:[%s8014_s2 + $0x20] sm:$0xf] }
 0x18b   : > { %v5946_v55 = vpack.i.bf16 %v2243_v12, %v2241_v29  ;;  %v722_v42 = vsel %vm611_vm1, %v706_v20, %v721_v41  ;;  %v2222_v57 = vrot.slane %v2171_v1, 4  ;;  %v2215_v17 = vperm.slane %v2209_v34, %v6768_v25  ;;  %v5113_v1 = vld [vmem:[%s8014_s2 + $0xcc] sm:$0xf0]  ;;  %v5651_v20 = vld [vmem:[%s8014_s2 + $0x40] sm:$0xf0] }
 0x18c   : > { %v720_v35 = vsel %vm611_vm1, %v719_v45, %v682_v3  ;;  %v2236_v48 = vrot.slane %v2219_v27, 4  ;;  %v2238_v43 = vrot.slane %v2195_v33, 4  ;;  %v2191_v47 = vperm.slane %v2185_v59, %v6768_v25  ;;  %v6040_v41 = vld [vmem:[%s6305_s26 + $0x4] sm:$0xf] }
 0x18d   : > { %5947 = vxpose.xlu0.b32.start.end [1/1] (short) (narrow) %v5946_v55, 8  ;;  %v5932_v28 = vpack.i.bf16 %v722_v42, %v720_v35  ;;  %v2198_v2 = vrot.slane %v6870_v56, 4  ;;  %v2232_v52 = vrot.slane %v2215_v17, 4  ;;  %v2223_v40 = vsel %vm611_vm1, %v6919_v13, %v2222_v57  ;;  %v5119_v56 = vld [vmem:[%s8014_s2 + $0xb0] sm:$0xf]  ;;  %v7209_v35 = vpop.permute.xlu1 %5961 }
 0x18e   : > { %v2237_v24 = vsel %vm611_vm1, %v2236_v48, %v2195_v33  ;;  %v2239_v51 = vsel %vm611_vm1, %v2219_v27, %v2238_v43  ;;  %v5152_v4 = vor.u32 %v5673_v31, %v5149_v10  ;;  %v5156_v22 = vor.u32 %v5678_v30, %v5155_v58 }
 0x18f   : > { %5933 = vxpose.xlu2.b32.start.end [1/1] (short) (narrow) %v5932_v28, 8  ;;  %v5972_v13 = vpack.i.bf16 %v2239_v51, %v2237_v24  ;;  %v2233_v5 = vsel %vm611_vm1, %v2232_v52, %v2191_v47  ;;  %v2234_v9 = vrot.slane %v2191_v47, 4  ;;  %v2231_v15 = vperm.slane %v2223_v40, %v6768_v25 }
 0x190   : > { %2092 = vmatpush.bf16.msra.mxu0 %v5152_v4  ;;  %v2199_v6 = vsel %vm611_vm1, %v6831_v21, %v2198_v2  ;;  %2105 = vmatpush.bf16.msra.mxu1 %v5156_v22  ;;  %v5116_v18 = vor.u32 %v5664_v38, %v5113_v1  ;;  %v5120_v14 = vor.u32 %v5669_v49, %v5119_v56  ;;  %v5660_v21 = vld [vmem:[%s8014_s2 + $0x88] sm:$0xf0] }
 0x191   : > { %v2235_v53 = vsel %vm611_vm1, %v2215_v17, %v2234_v9  ;;  %v2207_v54 = vperm.slane %v2199_v6, %v6768_v25  ;;  %v2244_v3 = vrot.slane %v2231_v15, 4  ;;  %v5080_v32 = vor.u32 %v5655_v23, %v5077_v8 }
 0x192   : > { %5973 = vxpose.xlu1.b32.start.end [1/1] (short) (narrow) %v5972_v13, 8  ;;  %v5939_v19 = vpack.i.bf16 %v2235_v53, %v2233_v5  ;;  %v5084_v36 = vor.u32 %v5660_v21, %v5083_v37  ;;  %v5044_v33 = vor.u32 %v5646_v60, %v5041_v26  ;;  %v5048_v11 = vor.u32 %v5651_v20, %v5047_v0 }
 0x193   : > { %v2245_v44 = vsel %vm611_vm1, %v2244_v3, %v2207_v54  ;;  %v2246_v12 = vrot.slane %v2207_v54, 4 }
 0x194   : > { %2093 = vmatpush.bf16.msra.mxu0 %v5116_v18  ;;  %2106 = vmatpush.bf16.msra.mxu1 %v5120_v14 }
 0x195   : > { %v2247_v29 = vsel %vm611_vm1, %v2231_v15, %v2246_v12 }
 0x196   : > { %v5953_v45 = vpack.i.bf16 %v2247_v29, %v2245_v44 }
 0x197   : > { %5940 = vxpose.xlu2.b32.start.end [1/1] (short) (narrow) %v5939_v19, 8 }
 0x198   : > { %2094 = vmatpush.bf16.msra.mxu0 %v5080_v32  ;;  %2107 = vmatpush.bf16.msra.mxu1 %v5084_v36 }
 0x19c   : > { %2095 = vmatpush.bf16.msra.mxu0 %v5044_v33  ;;  %2108 = vmatpush.bf16.msra.mxu1 %v5048_v11 }
 0x19f   : > { %5954 = vxpose.xlu2.b32.start.end [1/1] (short) (narrow) %v5953_v45, 8  ;;  %5164 = vmatmul.msk.bf16.vlgmr.msra.gmra.mxu0 %vm467_vm0, %v6040_v41 }
 0x1a0   : > { %5165 = vmatmul.msk.bf16.vlgmr.msra.gmra.mxu1 %vm467_vm0, %v6040_v41 }
 0x21e   : > { %v5920_v27 = vpop.trf.xlu2 }
 0x21f   : > { %v5924_v31 = vunpack.i.h.bf16 %v5920_v27  ;;  %v5921_v10 = vunpack.i.l.bf16 %v5920_v27 }
 0x221   : > { %v5927_v55 = vpop.trf.xlu0  ;;  %v991_v52 = vrot.slane %v5924_v31, 4  ;;  %v979_v40 = vrot.slane %v5921_v10, 4 }
 0x222   : > { %v5931_v59 = vunpack.i.h.bf16 %v5927_v55  ;;  %v5928_v34 = vunpack.i.l.bf16 %v5927_v55 }
 0x224   : > { %v1017_v48 = vrot.slane %v5931_v59, 4  ;;  %v1005_v57 = vrot.slane %v5928_v34, 4 }
 0x228   : > { %v5934_v42 = vpop.trf.xlu2 }
 0x229   : > { %v5938_v28 = vunpack.i.h.bf16 %v5934_v42  ;;  %v5935_v17 = vunpack.i.l.bf16 %v5934_v42 }
 0x22b   : > { %v1015_v24 = vrot.slane %v5938_v28, 4  ;;  %v1003_v43 = vrot.slane %v5935_v17, 4  ;;  %v1006_v47 = vsel %vm611_vm1, %v5935_v17, %v1005_v57  ;;  %v1018_v58 = vsel %vm611_vm1, %v5938_v28, %v1017_v48 }
 0x22c   : > { %v7219_v51 = vperm.slane %v1006_v47, %v6747_v63  ;;  %v7225_v56 = vperm.slane %v1018_v58, %v6747_v63 }
 0x22d   : > { %v1004_v30 = vsel %vm611_vm1, %v1003_v43, %v5928_v34  ;;  %v1016_v2 = vsel %vm611_vm1, %v1015_v24, %v5931_v59 }
 0x22e   : > { %v7216_v38 = vperm.slane %v1004_v30, %v6747_v63  ;;  %v7222_v4 = vperm.slane %v1016_v2, %v6747_v63  ;;  %v5967_v1 = vpop.trf.xlu1  ;;  %v1065_v37 = vrot.slane %v7219_v51, 4  ;;  %v1063_v21 = vrot.slane %v7225_v56, 4 }
 0x22f   : > { %v5971_v49 = vunpack.i.h.bf16 %v5967_v1  ;;  %v5968_v13 = vunpack.i.l.bf16 %v5967_v1 }
 0x230   : > { %v5941_v22 = vpop.trf.xlu2  ;;  %v1053_v44 = vrot.slane %v7216_v38, 4  ;;  %v1051_v45 = vrot.slane %v7222_v4, 4 }
 0x231   : > { %v5945_v5 = vunpack.i.h.bf16 %v5941_v22  ;;  %v5942_v9 = vunpack.i.l.bf16 %v5941_v22  ;;  %v5948_v15 = vpop.trf.xlu0  ;;  %v993_v6 = vrot.slane %v5971_v49, 4  ;;  %v980_v18 = vsel %vm611_vm1, %v979_v40, %v5968_v13 }
 0x232   : > { %v981_v14 = vrot.slane %v5968_v13, 4  ;;  %v992_v23 = vsel %vm611_vm1, %v991_v52, %v5971_v49  ;;  %v986_v8 = vperm.slane %v980_v18, %v6747_v63  ;;  %v5952_v3 = vunpack.i.h.bf16 %v5948_v15 }
 0x233   : > { %v998_v53 = vperm.slane %v992_v23, %v6747_v63  ;;  %v2518_v54 = vrot.slane %v5945_v5, 4  ;;  %v2506_v32 = vrot.slane %v5942_v9, 4  ;;  %v5949_v36 = vunpack.i.l.bf16 %v5948_v15 }
 0x234   : > { %v982_v19 = vsel %vm611_vm1, %v5921_v10, %v981_v14  ;;  %v1029_v60 = vrot.slane %v986_v8, 4  ;;  %v994_v0 = vsel %vm611_vm1, %v5924_v31, %v993_v6  ;;  %v2542_v20 = vrot.slane %v5952_v3, 4 }
 0x235   : > { %v990_v26 = vperm.slane %v982_v19, %v6747_v63  ;;  %v2530_v33 = vrot.slane %v5949_v36, 4  ;;  %v1027_v29 = vrot.slane %v998_v53, 4  ;;  %v1002_v28 = vperm.slane %v994_v0, %v6747_v63 }
 0x236   : > { %v5974_v12 = vpop.trf.xlu1  ;;  %v1030_v11 = vsel %vm611_vm1, %v998_v53, %v1029_v60  ;;  %v1054_v22 = vsel %vm611_vm1, %v7222_v4, %v1053_v44  ;;  %v1052_v14 = vsel %vm611_vm1, %v1051_v45, %v7216_v38  ;;  %v1066_v53 = vsel %vm611_vm1, %v7225_v56, %v1065_v37  ;;  %v7269_v4 = vpop.f32.mrf.mxu1 }
 0x237   : > { %v5978_v41 = vunpack.i.h.bf16 %v5974_v12  ;;  %v5975_v27 = vunpack.i.l.bf16 %v5974_v12  ;;  %v1041_v24 = vrot.slane %v990_v26, 4  ;;  %v1038_v1 = vperm.slane %v1030_v11, %v6768_v25 }
 0x238   : > { %v5955_v55 = vpop.trf.xlu2  ;;  %v1062_v15 = vperm.slane %v1054_v22, %v6768_v25  ;;  %v1039_v19 = vrot.slane %v1002_v28, 4  ;;  %v1074_v38 = vperm.slane %v1066_v53, %v6768_v25  ;;  %v1064_v56 = vsel %vm611_vm1, %v1063_v21, %v7219_v51 }
 0x239   : > { %v5959_v59 = vunpack.i.h.bf16 %v5955_v55  ;;  %v5956_v34 = vunpack.i.l.bf16 %v5955_v55  ;;  %v2516_v42 = vrot.slane %v5978_v41, 4  ;;  %v2504_v48 = vrot.slane %v5975_v27, 4 }
 0x23a   : > { %v2507_v57 = vsel %vm611_vm1, %v5975_v27, %v2506_v32  ;;  %v2519_v31 = vsel %vm611_vm1, %v5978_v41, %v2518_v54  ;;  %v1081_v6 = vrot.slane %v1038_v1, 4  ;;  %v1042_v23 = vsel %vm611_vm1, %v1002_v28, %v1041_v24  ;;  %v7267_v54 = vpop.f32.mrf.mxu0 }
 0x23b   : > { %v7242_v17 = vperm.slane %v2507_v57, %v6747_v63  ;;  %v2540_v10 = vrot.slane %v5959_v59, 4  ;;  %v2505_v43 = vsel %vm611_vm1, %v2504_v48, %v5942_v9  ;;  %v2517_v47 = vsel %vm611_vm1, %v2516_v42, %v5945_v5 }
 0x23c   : > { %v2543_v58 = vsel %vm611_vm1, %v5959_v59, %v2542_v20  ;;  %v2528_v30 = vrot.slane %v5956_v34, 4  ;;  %v2511_v2 = vperm.slane %v2505_v43, %v6747_v63  ;;  %v2531_v40 = vsel %vm611_vm1, %v5956_v34, %v2530_v33 }
 0x23d   : > { %v2541_v52 = vsel %vm611_vm1, %v2540_v10, %v5952_v3  ;;  %v7254_v13 = vperm.slane %v2531_v40, %v6747_v63  ;;  %v1028_v5 = vsel %vm611_vm1, %v1027_v29, %v986_v8  ;;  %v1079_v8 = vrot.slane %v1062_v15, 4 }
 0x23e   : > { %v2529_v49 = vsel %vm611_vm1, %v2528_v30, %v5949_v36  ;;  %v1034_v18 = vperm.slane %v1028_v5, %v6768_v25  ;;  %v1082_v3 = vsel %vm611_vm1, %v1062_v15, %v1081_v6  ;;  %v1058_v32 = vperm.slane %v1052_v14, %v6768_v25 }
 0x23f   : > { %v2535_v9 = vperm.slane %v2529_v49, %v6747_v63  ;;  %v1050_v60 = vperm.slane %v1042_v23, %v6768_v25  ;;  %v1040_v0 = vsel %vm611_vm1, %v1039_v19, %v990_v26  ;;  %v1080_v37 = vsel %vm611_vm1, %v1079_v8, %v1038_v1 }
 0x240   : > { %v1077_v36 = vrot.slane %v1034_v18, 4  ;;  %v1075_v20 = vrot.slane %v1058_v32, 4  ;;  %v1046_v12 = vperm.slane %v1040_v0, %v6768_v25  ;;  %v5986_v33 = vpack.i.bf16 %v1082_v3, %v1080_v37 }
 0x241   : > { %v1087_v11 = vrot.slane %v1074_v38, 4  ;;  %v1089_v29 = vrot.slane %v1050_v60, 4  ;;  %v1070_v45 = vperm.slane %v1064_v56, %v6768_v25  ;;  %v2523_v26 = vperm.slane %v2517_v47, %v6747_v63 }
 0x242   : > { %v1078_v44 = vsel %vm611_vm1, %v1058_v32, %v1077_v36  ;;  %v1076_v41 = vsel %vm611_vm1, %v1075_v20, %v1034_v18  ;;  %v1085_v27 = vrot.slane %v1046_v12, 4  ;;  %v2547_v55 = vperm.slane %v2541_v52, %v6747_v63  ;;  %5987 = vxpose.xlu2.b32.start.end [1/1] (short) (narrow) %v5986_v33, 8  ;;  %v2099_v30 = vpop.f32.mrf.mxu0  ;;  %v2112_v52 = vpop.f32.mrf.mxu1 }
 0x243   : > { %v2527_v51 = vperm.slane %v2519_v31, %v6747_v63  ;;  %v5979_v21 = vpack.i.bf16 %v1078_v44, %v1076_v41  ;;  %v1088_v59 = vsel %vm611_vm1, %v1087_v11, %v1050_v60  ;;  %v1090_v34 = vsel %vm611_vm1, %v1074_v38, %v1089_v29 }
 0x244   : > { %v2551_v42 = vperm.slane %v2543_v58, %v6747_v63  ;;  %v6000_v48 = vpack.i.bf16 %v1090_v34, %v1088_v59  ;;  %v2554_v57 = vrot.slane %v2511_v2, 4  ;;  %v2578_v28 = vrot.slane %v2535_v9, 4 }
 0x245   : > { %5980 = vxpose.xlu0.b32.start.end [1/1] (short) (narrow) %v5979_v21, 8  ;;  %v1083_v10 = vrot.slane %v1070_v45, 4  ;;  %v2552_v24 = vrot.slane %v2523_v26, 4  ;;  %v2576_v43 = vrot.slane %v2547_v55, 4  ;;  %v2566_v47 = vrot.slane %v7242_v17, 4 }
 0x246   : > { %6001 = vxpose.xlu1.b32.start.end [1/1] (short) (narrow) %v6000_v48, 8  ;;  %v1086_v31 = vsel %vm611_vm1, %v1070_v45, %v1085_v27  ;;  %v2555_v40 = vsel %vm611_vm1, %v2523_v26, %v2554_v57  ;;  %v2579_v1 = vsel %vm611_vm1, %v2547_v55, %v2578_v28  ;;  %v2590_v58 = vrot.slane %v7254_v13, 4 }
 0x247   : > { %v2563_v49 = vperm.slane %v2555_v40, %v6768_v25  ;;  %v2587_v22 = vperm.slane %v2579_v1, %v6768_v25  ;;  %v2553_v5 = vsel %vm611_vm1, %v2552_v24, %v2511_v2  ;;  %v2577_v15 = vsel %vm611_vm1, %v2576_v43, %v2535_v9 }
 0x248   : > { %v2583_v6 = vperm.slane %v2577_v15, %v6768_v25  ;;  %v2567_v18 = vsel %vm611_vm1, %v2527_v51, %v2566_v47  ;;  %v2591_v14 = vsel %vm611_vm1, %v2551_v42, %v2590_v58  ;;  %v1084_v23 = vsel %vm611_vm1, %v1083_v10, %v1046_v12 }
 0x249   : > { %v2604_v53 = vrot.slane %v2587_v22, 4  ;;  %v2606_v19 = vrot.slane %v2563_v49, 4  ;;  %v2599_v8 = vperm.slane %v2591_v14, %v6768_v25  ;;  %v5993_v3 = vpack.i.bf16 %v1086_v31, %v1084_v23 }
 0x24a   : > { %v2559_v32 = vperm.slane %v2553_v5, %v6768_v25  ;;  %v2588_v36 = vrot.slane %v2551_v42, 4  ;;  %v2575_v60 = vperm.slane %v2567_v18, %v6768_v25  ;;  %v2564_v38 = vrot.slane %v2527_v51, 4 }
 0x24b   : > { %v2605_v2 = vsel %vm611_vm1, %v2604_v53, %v2563_v49  ;;  %v2607_v9 = vsel %vm611_vm1, %v2587_v22, %v2606_v19  ;;  %v2600_v56 = vrot.slane %v2583_v6, 4  ;;  %v2612_v37 = vrot.slane %v2599_v8, 4 }
 0x24c   : > { %v6019_v0 = vpack.i.bf16 %v2607_v9, %v2605_v2  ;;  %v2602_v20 = vrot.slane %v2559_v32, 4  ;;  %v2589_v44 = vsel %vm611_vm1, %v2588_v36, %v7254_v13  ;;  %v6007_v12 = vpack.i.bf16 %v7269_v4, %v7267_v54 }
 0x24d   : > { %5994 = vxpose.xlu0.b32.start.end [1/1] (short) (narrow) %v5993_v3, 8  ;;  %v2614_v33 = vrot.slane %v2575_v60, 4  ;;  %v2565_v11 = vsel %vm611_vm1, %v2564_v38, %v7242_v17  ;;  %v2601_v29 = vsel %vm611_vm1, %v2600_v56, %v2559_v32  ;;  %v2595_v45 = vperm.slane %v2589_v44, %v6768_v25 }
 0x24e   : > { %6020 = vxpose.xlu2.b32.start.end [1/1] (short) (narrow) %v6019_v0, 8  ;;  %v2613_v41 = vsel %vm611_vm1, %v2612_v37, %v2575_v60  ;;  %v2603_v27 = vsel %vm611_vm1, %v2583_v6, %v2602_v20  ;;  %v2571_v26 = vperm.slane %v2565_v11, %v6768_v25  ;;  %v5963_v22 = vunpack.i.l.bf16 %v7209_v35 }
 0x24f   : > { %v6012_v55 = vpack.i.bf16 %v2603_v27, %v2601_v29  ;;  %v2615_v13 = vsel %vm611_vm1, %v2599_v8, %v2614_v33  ;;  %v2608_v21 = vrot.slane %v2595_v45, 4  ;;  %v7331_v6 = vperm.slane %v7087_v16, %v6768_v25 }
 0x250   : > { %v6033_v51 = vpack.i.bf16 %v2615_v13, %v2613_v41  ;;  %v2610_v54 = vrot.slane %v2571_v26, 4  ;;  %v7335_v18 = vperm.slane %v7099_v39, %v6768_v25  ;;  %v7339_v14 = vperm.slane %v7091_v7, %v6768_v25 }
 0x251   : > { %v2609_v17 = vsel %vm611_vm1, %v2608_v21, %v2571_v26  ;;  %v5964_v53 = vunpack.i.h.bf16 %v7209_v35  ;;  %v7350_v39 = vsel %vm467_vm0, %v5917_v62, %v5963_v22 }
 0x252   : > { %v2611_v4 = vsel %vm611_vm1, %v2595_v45, %v2610_v54 }
 0x253   : > { %v6026_v59 = vpack.i.bf16 %v2611_v4, %v2609_v17  ;;  %v7357_v56 = vsel %vm467_vm0, %v5963_v22, %v5964_v53 }
 0x255   : > { %6013 = vxpose.xlu0.b32.start.end [1/1] (short) (narrow) %v6012_v55, 8 }
 0x256   : > { %6034 = vxpose.xlu2.b32.start.end [1/1] (short) (narrow) %v6033_v51, 8 }
 0x25d   : > { %6027 = vxpose.xlu0.b32.start.end [1/1] (short) (narrow) %v6026_v59, 8 }
 0x2a0   : > { %6008 = vrot.lane.b32.xlu1 %v6007_v12, %s6173_s9  ;;  %s6183_s9 = smov 8  }
 0x2db   : > { %v5988_v34 = vpop.trf.xlu2 }
 0x2dc   : > { %v5992_v42 = vunpack.i.h.bf16 %v5988_v34  ;;  %v5989_v48 = vunpack.i.l.bf16 %v5988_v34 }
 0x2de   : > { %v1359_v28 = vrot.slane %v5992_v42, 4  ;;  %v1347_v10 = vrot.slane %v5989_v48, 4 }
 0x2e7   : > { %v7322_v57 = vpop.trf.xlu2 }
 0x2e8   : > { %v6025_v9 = vunpack.i.h.bf16 %v7322_v57  ;;  %v6022_v60 = vunpack.i.l.bf16 %v7322_v57 }
 0x2e9   : > { %v5981_v24 = vpop.trf.xlu0 }
 0x2ea   : > { %v5985_v43 = vunpack.i.h.bf16 %v5981_v24  ;;  %v5982_v47 = vunpack.i.l.bf16 %v5981_v24  ;;  %v6002_v30 = vpop.trf.xlu1  ;;  %v2884_v45 = vrot.slane %v6025_v9, 4  ;;  %v2872_v41 = vrot.slane %v6022_v60, 4 }
 0x2eb   : > { %v6006_v52 = vunpack.i.h.bf16 %v6002_v30  ;;  %v6003_v31 = vunpack.i.l.bf16 %v6002_v30 }
 0x2ec   : > { %v1360_v40 = vsel %vm611_vm1, %v1359_v28, %v5985_v43  ;;  %v1361_v1 = vrot.slane %v5985_v43, 4  ;;  %v1348_v58 = vsel %vm611_vm1, %v1347_v10, %v5982_v47  ;;  %v1349_v49 = vrot.slane %v5982_v47, 4 }
 0x2ed   : > { %v1366_v5 = vperm.slane %v1360_v40, %v6747_v63  ;;  %v1354_v15 = vperm.slane %v1348_v58, %v6747_v63  ;;  %v1383_v3 = vrot.slane %v6006_v52, 4  ;;  %v1371_v36 = vrot.slane %v6003_v31, 4 }
 0x2ee   : > { %v1362_v23 = vsel %vm611_vm1, %v5992_v42, %v1361_v1  ;;  %v1350_v16 = vsel %vm611_vm1, %v5989_v48, %v1349_v49 }
 0x2ef   : > { %v1370_v19 = vperm.slane %v1362_v23, %v6747_v63  ;;  %v1395_v8 = vrot.slane %v1366_v5, 4  ;;  %v7344_v32 = vpop.trf.xlu2  ;;  %v1397_v7 = vrot.slane %v1354_v15, 4  ;;  %v1358_v20 = vperm.slane %v1350_v16, %v6747_v63 }
 0x2f0   : > { %v6039_v55 = vunpack.i.h.bf16 %v7344_v32  ;;  %v6036_v34 = vunpack.i.l.bf16 %v7344_v32 }
 0x2f1   : > { %v5995_v2 = vpop.trf.xlu0  ;;  %v1407_v37 = vrot.slane %v1370_v19, 4  ;;  %v1396_v50 = vsel %vm611_vm1, %v1395_v8, %v1354_v15  ;;  %v1398_v13 = vsel %vm611_vm1, %v1366_v5, %v1397_v7  ;;  %v1409_v4 = vrot.slane %v1358_v20, 4 }
 0x2f2   : > { %v5999_v38 = vunpack.i.h.bf16 %v5995_v2  ;;  %v5996_v0 = vunpack.i.l.bf16 %v5995_v2  ;;  %v1402_v17 = vperm.slane %v1396_v50, %v6768_v25  ;;  %v7377_v10 = vperm.slane %v1398_v13, %v6768_v25 }
 0x2f3   : > { %v1408_v42 = vsel %vm611_vm1, %v1407_v37, %v1358_v20  ;;  %v2896_v23 = vrot.slane %v6036_v34, 4 }
 0x2f4   : > { %v1384_v62 = vsel %vm611_vm1, %v1383_v3, %v5999_v38  ;;  %v1385_v44 = vrot.slane %v5999_v38, 4  ;;  %v1372_v12 = vsel %vm611_vm1, %v1371_v36, %v5996_v0  ;;  %v1373_v33 = vrot.slane %v5996_v0, 4 }
 0x2f5   : > { %v1390_v11 = vperm.slane %v1384_v62, %v6747_v63  ;;  %v1378_v29 = vperm.slane %v1372_v12, %v6747_v63  ;;  %v1445_v1 = vrot.slane %v1402_v17, 4  ;;  %v1410_v3 = vsel %vm611_vm1, %v1370_v19, %v1409_v4 }
 0x2f6   : > { %v1386_v27 = vsel %vm611_vm1, %v6006_v52, %v1385_v44  ;;  %v1374_v26 = vsel %vm611_vm1, %v6003_v31, %v1373_v33  ;;  %v2908_v52 = vrot.slane %v6039_v55, 4  ;;  %v7384_v31 = vperm.slane %v1408_v42, %v6768_v25 }
 0x2f7   : > { %v1394_v51 = vperm.slane %v1386_v27, %v6747_v63  ;;  %v1419_v21 = vrot.slane %v1390_v11, 4  ;;  %v1421_v54 = vrot.slane %v1378_v29, 4  ;;  %v1382_v59 = vperm.slane %v1374_v26, %v6747_v63 }
 0x2f8   : > { %v1449_v2 = vrot.slane %v7377_v10, 4  ;;  %v1453_v50 = vrot.slane %v7384_v31, 4  ;;  %v7404_v19 = vperm.slane %v1410_v3, %v6768_v25 }
 0x2f9   : > { %v1431_v48 = vrot.slane %v1394_v51, 4  ;;  %v6014_v28 = vpop.trf.xlu0  ;;  %v1422_v24 = vsel %vm611_vm1, %v1390_v11, %v1421_v54  ;;  %v1420_v43 = vsel %vm611_vm1, %v1419_v21, %v1378_v29  ;;  %v1433_v58 = vrot.slane %v1382_v59, 4 }
 0x2fa   : > { %v6018_v47 = vunpack.i.h.bf16 %v6014_v28  ;;  %v6015_v30 = vunpack.i.l.bf16 %v6014_v28  ;;  %v1426_v40 = vperm.slane %v1420_v43, %v6768_v25  ;;  %v7391_v8 = vperm.slane %v1422_v24, %v6768_v25 }
 0x2fb   : > { %v1432_v36 = vsel %vm611_vm1, %v1431_v48, %v1382_v59 }
 0x2fc   : > { %v2885_v49 = vsel %vm611_vm1, %v2884_v45, %v6018_v47  ;;  %v2886_v22 = vrot.slane %v6018_v47, 4  ;;  %v2873_v5 = vsel %vm611_vm1, %v2872_v41, %v6015_v30  ;;  %v1446_v7 = vsel %vm611_vm1, %v1426_v40, %v1445_v1 }
 0x2fd   : > { %v2891_v15 = vperm.slane %v2885_v49, %v6747_v63  ;;  %v2874_v37 = vrot.slane %v6015_v30, 4  ;;  %v2879_v20 = vperm.slane %v2873_v5, %v6747_v63  ;;  %v1460_v62 = vpack.c.bf16 %v1446_v7, %v1446_v7 }
 0x2fe   : > { %v2887_v16 = vsel %vm611_vm1, %v6025_v9, %v2886_v22  ;;  %v1434_v9 = vsel %vm611_vm1, %v1394_v51, %v1433_v58  ;;  %v1447_v33 = vrot.slane %v7391_v8, 4  ;;  %v1438_v11 = vperm.slane %v1432_v36, %v6768_v25 }
 0x2ff   : > { %v7399_v38 = vperm.slane %v2887_v16, %v6747_v63  ;;  %v2920_v0 = vrot.slane %v2891_v15, 4  ;;  %v1443_v29 = vrot.slane %v1426_v40, 4  ;;  %1469 = vst.msk [vmem:[#allocation2 + $0x4] sm:$0xf] %vm1467_vm3, %v1460_v62  ;;  %v2875_v27 = vsel %vm611_vm1, %v6022_v60, %v2874_v37 }
 0x300   : > { %v2922_v26 = vrot.slane %v2879_v20, 4  ;;  %v1448_v57 = vsel %vm611_vm1, %v1447_v33, %v7377_v10  ;;  %v1454_v60 = vsel %vm611_vm1, %v1438_v11, %v1453_v50  ;;  %v2883_v28 = vperm.slane %v2875_v27, %v6747_v63 }
 0x301   : > { %v6028_v44 = vpop.trf.xlu0  ;;  %v2921_v12 = vsel %vm611_vm1, %v2920_v0, %v2879_v20  ;;  %v2932_v51 = vrot.slane %v7399_v38, 4  ;;  %v1444_v47 = vsel %vm611_vm1, %v1443_v29, %v1402_v17  ;;  %v1461_v22 = vpack.c.bf16 %v1448_v57, %v1448_v57 }
 0x302   : > { %v6032_v45 = vunpack.i.h.bf16 %v6028_v44  ;;  %v6029_v41 = vunpack.i.l.bf16 %v6028_v44  ;;  %v2927_v13 = vperm.slane %v2921_v12, %v6768_v25  ;;  %v2923_v1 = vsel %vm611_vm1, %v2891_v15, %v2922_v26 }
 0x303   : > { %v2933_v49 = vsel %vm611_vm1, %v2932_v51, %v2883_v28  ;;  %v1464_v5 = vpack.c.bf16 %v1454_v60, %v1454_v60  ;;  %1470 = vst.msk [vmem:[#allocation2 + $0x8] sm:$0xf] %vm1467_vm3, %v1461_v22  ;;  %v1459_v16 = vpack.c.bf16 %v1444_v47, %v1444_v47  ;;  %v1451_v15 = vrot.slane %v1438_v11, 4 }
 0x304   : > { %v2909_v21 = vsel %vm611_vm1, %v2908_v52, %v6032_v45  ;;  %v2910_v54 = vrot.slane %v6032_v45, 4  ;;  %v2897_v4 = vsel %vm611_vm1, %v2896_v23, %v6029_v41  ;;  %v2898_v59 = vrot.slane %v6029_v41, 4 }
 0x305   : > { %v2915_v42 = vperm.slane %v2909_v21, %v6747_v63  ;;  %v2903_v48 = vperm.slane %v2897_v4, %v6747_v63  ;;  %v2970_v58 = vrot.slane %v2927_v13, 4  ;;  %v2934_v36 = vrot.slane %v2883_v28, 4  ;;  %1473 = vst.msk [vmem:[#allocation2 + $0x14] sm:$0xf] %vm1467_vm3, %v1464_v5 }
 0x306   : > { %v2911_v24 = vsel %vm611_vm1, %v6039_v55, %v2910_v54  ;;  %v2899_v43 = vsel %vm611_vm1, %v6036_v34, %v2898_v59  ;;  %v2931_v7 = vperm.slane %v2923_v1, %v6768_v25  ;;  %v2939_v0 = vperm.slane %v2933_v49, %v6768_v25  ;;  %1468 = vst.msk [vmem:[#allocation2] sm:$0xf] %vm1467_vm3, %v1459_v16 }
 0x307   : > { %v2919_v30 = vperm.slane %v2911_v24, %v6747_v63  ;;  %v2944_v52 = vrot.slane %v2915_v42, 4  ;;  %v2946_v40 = vrot.slane %v2903_v48, 4  ;;  %v2907_v32 = vperm.slane %v2899_v43, %v6747_v63 }
 0x308   : > { %v1452_v11 = vsel %vm611_vm1, %v1451_v15, %v7384_v31  ;;  %v1450_v29 = vsel %vm611_vm1, %v7391_v8, %v1449_v2  ;;  %v1442_v26 = vperm.slane %v1434_v9, %v6768_v25  ;;  %v2978_v54 = vrot.slane %v2939_v0, 4 }
 0x309   : > { %v2956_v23 = vrot.slane %v2919_v30, 4  ;;  %v2945_v55 = vsel %vm611_vm1, %v2944_v52, %v2903_v48  ;;  %v2947_v34 = vsel %vm611_vm1, %v2915_v42, %v2946_v40  ;;  %v2958_v33 = vrot.slane %v2907_v32, 4 }
 0x30a   : > { %v2951_v17 = vperm.slane %v2945_v55, %v6768_v25  ;;  %v2955_v3 = vperm.slane %v2947_v34, %v6768_v25  ;;  %v2935_v31 = vsel %vm611_vm1, %v7399_v38, %v2934_v36  ;;  %v7459_v10 = vperm.slane %v7102_v46, %v6768_v25 }
 0x30b   : > { %v2957_v37 = vsel %vm611_vm1, %v2956_v23, %v2907_v32  ;;  %v3101_v8 = vrot.slane %v7350_v39, 4  ;;  %v2974_v2 = vrot.slane %v2931_v7, 4  ;;  %v2959_v4 = vsel %vm611_vm1, %v2919_v30, %v2958_v33 }
 0x30c   : > { %v2971_v20 = vsel %vm611_vm1, %v2951_v17, %v2970_v58  ;;  %v2972_v50 = vrot.slane %v2955_v3, 4  ;;  %v2968_v62 = vrot.slane %v2951_v17, 4  ;;  %v2963_v44 = vperm.slane %v2957_v37, %v6768_v25 }
 0x30d   : > { %v2985_v12 = vpack.c.bf16 %v2971_v20, %v2971_v20  ;;  %v1462_v59 = vpack.c.bf16 %v1450_v29, %v1450_v29  ;;  %v1457_v42 = vrot.slane %v7404_v19, 4  ;;  %v3113_v38 = vrot.slane %v7357_v56, 4 }
 0x30e   : > { %v2973_v45 = vsel %vm611_vm1, %v2972_v50, %v2931_v7  ;;  %v2969_v41 = vsel %vm611_vm1, %v2968_v62, %v2927_v13  ;;  %v2976_v27 = vrot.slane %v2963_v44, 4  ;;  %v1463_v13 = vpack.c.bf16 %v1452_v11, %v1452_v11 }
 0x30f   : > { %3002 = vrot.lane.b32.xlu1 %v2985_v12, %s6183_s9  ;;  %v2986_v51 = vpack.c.bf16 %v2973_v45, %v2973_v45  ;;  %v2984_v21 = vpack.c.bf16 %v2969_v41, %v2969_v41  ;;  %v2979_v9 = vsel %vm611_vm1, %v2963_v44, %v2978_v54  ;;  %v2943_v57 = vperm.slane %v2935_v31, %v6768_v25 }
 0x310   : > { %v2977_v46 = vsel %vm611_vm1, %v2976_v27, %v2939_v0  ;;  %1472 = vst.msk [vmem:[#allocation2 + $0x10] sm:$0xf] %vm1467_vm3, %v1463_v13  ;;  %v1455_v60 = vrot.slane %v1442_v26, 4  ;;  %v2975_v43 = vsel %vm611_vm1, %v2955_v3, %v2974_v2  ;;  %v1458_v47 = vsel %vm611_vm1, %v1442_v26, %v1457_v42 }
 0x311   : > { %3004 = vrot.lane.b32.xlu2 %v2986_v51, %s6183_s9  ;;  %3000 = vrot.lane.b32.xlu0 %v2984_v21, %s6183_s9  ;;  %1471 = vst.msk [vmem:[#allocation2 + $0xc] sm:$0xf] %vm1467_vm3, %v1462_v59  ;;  %v2989_v30 = vpack.c.bf16 %v2979_v9, %v2979_v9  ;;  %v2967_v52 = vperm.slane %v2959_v4, %v6768_v25  ;;  %v2982_v16 = vrot.slane %v2943_v57, 4  ;;  %v3173_v20 = vrot.slane %v7331_v6, 4 }
 0x312   : > { %v6009_v48 = vpop.permute.xlu1 %6008  ;;  %v1466_v40 = vpack.c.bf16 %v1458_v47, %v1458_v47  ;;  %v1456_v1 = vsel %vm611_vm1, %v1455_v60, %v7404_v19  ;;  %v2988_v22 = vpack.c.bf16 %v2977_v46, %v2977_v46  ;;  %v2987_v35 = vpack.c.bf16 %v2975_v43, %v2975_v43 }
 0x313   : > { %v6011_v28 = vunpack.i.h.bf16 %v6009_v48  ;;  %v6010_v24 = vunpack.i.l.bf16 %v6009_v48  ;;  %v1465_v5 = vpack.c.bf16 %v1456_v1, %v1456_v1  ;;  %v2980_v15 = vrot.slane %v2967_v52, 4 }
 0x314   : > { %1475 = vst.msk [vmem:[#allocation2 + $0x1c] sm:$0xf] %vm1467_vm3, %v1466_v40  ;;  %v3185_v50 = vrot.slane %v7339_v14, 4  ;;  %v3181_v33 = vrot.slane %v7459_v10, 4  ;;  %v3177_v41 = vrot.slane %v7335_v18, 4 }
 0x315   : > { %v3065_v58 = vsel %vm467_vm0, %v5964_v53, %v6010_v24  ;;  %v3066_v49 = vsel %vm467_vm0, %v6010_v24, %v6011_v28  ;;  %1474 = vst.msk [vmem:[#allocation2 + $0x18] sm:$0xf] %vm1467_vm3, %v1465_v5  ;;  %v2981_v45 = vsel %vm611_vm1, %v2980_v15, %v2943_v57 }
 0x316   : > { %v3099_v23 = vrot.slane %v3065_v58, 4  ;;  %v3102_v32 = vsel %vm611_vm1, %v3065_v58, %v3101_v8  ;;  %v3111_v55 = vrot.slane %v3066_v49, 4  ;;  %v3114_v34 = vsel %vm611_vm1, %v3066_v49, %v3113_v38 }
 0x317   : > { %v3110_v17 = vperm.slane %v3102_v32, %v6747_v63  ;;  %v3122_v19 = vperm.slane %v3114_v34, %v6747_v63  ;;  %3008 = vrot.lane.b32.xlu1 %v2988_v22, %s6183_s9  ;;  %v2990_v4 = vpack.c.bf16 %v2981_v45, %v2981_v45 }
 0x318   : > { %v3100_v53 = vsel %vm611_vm1, %v3099_v23, %v7350_v39  ;;  %v3112_v3 = vsel %vm611_vm1, %v3111_v55, %v7357_v56  ;;  %v2983_v39 = vsel %vm611_vm1, %v2967_v52, %v2982_v16 }
 0x319   : > { %v3106_v36 = vperm.slane %v3100_v53, %v6747_v63  ;;  %v3118_v7 = vperm.slane %v3112_v3, %v6747_v63  ;;  %v3159_v0 = vrot.slane %v3122_v19, 4  ;;  %v3161_v37 = vrot.slane %v3110_v17, 4  ;;  %3010 = vrot.lane.b32.xlu2 %v2989_v30, %s6183_s9  ;;  %3006 = vrot.lane.b32.xlu0 %v2987_v35, %s6183_s9 }
 0x31a   : > { %v2991_v51 = vpack.c.bf16 %v2983_v39, %v2983_v39 }
 0x31b   : > { %v3147_v62 = vrot.slane %v3118_v7, 4  ;;  %v3149_v56 = vrot.slane %v3106_v36, 4  ;;  %v3160_v44 = vsel %vm611_vm1, %v3159_v0, %v3110_v17  ;;  %v3162_v12 = vsel %vm611_vm1, %v3122_v19, %v3161_v37 }
 0x31c   : > { %v3166_v11 = vperm.slane %v3160_v44, %v6768_v25  ;;  %v3170_v29 = vperm.slane %v3162_v12, %v6768_v25 }
 0x31d   : > { %v3148_v27 = vsel %vm611_vm1, %v3147_v62, %v3106_v36  ;;  %v3150_v26 = vsel %vm611_vm1, %v3118_v7, %v3149_v56 }
 0x31e   : > { %v3154_v21 = vperm.slane %v3148_v27, %v6768_v25  ;;  %v3158_v54 = vperm.slane %v3150_v26, %v6768_v25  ;;  %v3179_v31 = vrot.slane %v3166_v11, 4  ;;  %v3182_v8 = vsel %vm611_vm1, %v3166_v11, %v3181_v33 }
 0x31f   : > { %v3183_v2 = vrot.slane %v3170_v29, 4  ;;  %v3186_v13 = vsel %vm611_vm1, %v3170_v29, %v3185_v50  ;;  %v3225_v9 = vrot.slane %v3182_v8, 4  ;;  %3014 = vrot.lane.b32.xlu1 %v2991_v51, %s6183_s9 }
 0x320   : > { %v3171_v59 = vrot.slane %v3154_v21, 4  ;;  %v3174_v42 = vsel %vm611_vm1, %v3154_v21, %v3173_v20  ;;  %v3175_v38 = vrot.slane %v3158_v54, 4  ;;  %v3178_v48 = vsel %vm611_vm1, %v3158_v54, %v3177_v41 }
 0x321   : > { %v3180_v46 = vsel %vm611_vm1, %v3179_v31, %v7459_v10  ;;  %v3184_v57 = vsel %vm611_vm1, %v3183_v2, %v7339_v14  ;;  %v3199_v60 = vrot.slane %v3178_v48, 4  ;;  %v3201_v28 = vrot.slane %v3174_v42, 4  ;;  %3012 = vrot.lane.b32.xlu0 %v2990_v4, %s6183_s9 }
 0x322   : > { %v3172_v24 = vsel %vm611_vm1, %v3171_v59, %v7331_v6  ;;  %v3176_v43 = vsel %vm611_vm1, %v3175_v38, %v7335_v18  ;;  %v3211_v47 = vrot.slane %v3184_v57, 4  ;;  %v3213_v30 = vrot.slane %v3180_v46, 4 }
 0x323   : > { %v3187_v52 = vrot.slane %v3176_v43, 4  ;;  %v3189_v40 = vrot.slane %v3172_v24, 4  ;;  %v3200_v1 = vsel %vm611_vm1, %v3199_v60, %v3174_v42  ;;  %v3202_v10 = vsel %vm611_vm1, %v3178_v48, %v3201_v28 }
 0x324   : > { %v3206_v14 = vperm.slane %v3200_v1, %v6747_v63  ;;  %v3210_v58 = vperm.slane %v3202_v10, %v6747_v63  ;;  %v3212_v49 = vsel %vm611_vm1, %v3211_v47, %v3180_v46  ;;  %v3214_v22 = vsel %vm611_vm1, %v3184_v57, %v3213_v30 }
 0x325   : > { %v3188_v6 = vsel %vm611_vm1, %v3187_v52, %v3172_v24  ;;  %v3190_v18 = vsel %vm611_vm1, %v3176_v43, %v3189_v40  ;;  %v3218_v5 = vperm.slane %v3212_v49, %v6747_v63  ;;  %v3222_v23 = vperm.slane %v3214_v22, %v6747_v63 }
 0x326   : > { %v3194_v32 = vperm.slane %v3188_v6, %v6747_v63  ;;  %v3198_v55 = vperm.slane %v3190_v18, %v6747_v63  ;;  %v3223_v34 = vrot.slane %v3186_v13, 4  ;;  %v3226_v17 = vsel %vm611_vm1, %v3186_v13, %v3225_v9 }
 0x327   : > { %v3234_v19 = vperm.slane %v3226_v17, %v6747_v63  ;;  %v3235_v35 = vrot.slane %v3206_v14, 4  ;;  %v3247_v53 = vrot.slane %v3210_v58, 4  ;;  %v3261_v3 = vrot.slane %v3218_v5, 4 }
 0x328   : > { %v3224_v16 = vsel %vm611_vm1, %v3223_v34, %v3182_v8  ;;  %v3237_v15 = vrot.slane %v3194_v32, 4  ;;  %v3249_v36 = vrot.slane %v3198_v55, 4  ;;  %v3273_v7 = vrot.slane %v3222_v23, 4 }
 0x329   : > { %v3230_v0 = vperm.slane %v3224_v16, %v6747_v63  ;;  %v3236_v37 = vsel %vm611_vm1, %v3235_v35, %v3194_v32  ;;  %v3248_v20 = vsel %vm611_vm1, %v3247_v53, %v3198_v55  ;;  %v3271_v50 = vrot.slane %v3234_v19, 4 }
 0x32a   : > { %v3238_v39 = vsel %vm611_vm1, %v3206_v14, %v3237_v15  ;;  %v3242_v62 = vperm.slane %v3236_v37, %v6768_v25  ;;  %v3250_v56 = vsel %vm611_vm1, %v3210_v58, %v3249_v36  ;;  %v3254_v44 = vperm.slane %v3248_v20, %v6768_v25 }
 0x32b   : > { %v3246_v12 = vperm.slane %v3238_v39, %v6768_v25  ;;  %v3258_v33 = vperm.slane %v3250_v56, %v6768_v25  ;;  %v3259_v11 = vrot.slane %v3230_v0, 4  ;;  %v3262_v63 = vsel %vm611_vm1, %v3230_v0, %v3261_v3 }
 0x32c   : > { %v3270_v29 = vperm.slane %v3262_v63, %v6768_v25  ;;  %v3272_v45 = vsel %vm611_vm1, %v3271_v50, %v3222_v23  ;;  %v3274_v41 = vsel %vm611_vm1, %v3234_v19, %v3273_v7  ;;  %v3285_v27 = vrot.slane %v3242_v62, 4 }
 0x32d   : > { %v3260_v26 = vsel %vm611_vm1, %v3259_v11, %v3218_v5  ;;  %v3278_v51 = vperm.slane %v3272_v45, %v6768_v25  ;;  %v3282_v21 = vperm.slane %v3274_v41, %v6768_v25  ;;  %v3289_v54 = vrot.slane %v3246_v12, 4 }
 0x32e   : > { %v3266_v31 = vperm.slane %v3260_v26, %v6768_v25  ;;  %v3287_v8 = vrot.slane %v3270_v29, 4  ;;  %v3293_v2 = vrot.slane %v3254_v44, 4  ;;  %v3297_v13 = vrot.slane %v3258_v33, 4 }
 0x32f   : > { %v3290_v9 = vsel %vm611_vm1, %v3270_v29, %v3289_v54  ;;  %v3291_v4 = vrot.slane %v3278_v51, 4  ;;  %v3295_v59 = vrot.slane %v3282_v21, 4 }
 0x330   : > { %v3283_v42 = vrot.slane %v3266_v31, 4  ;;  %v3286_v38 = vsel %vm611_vm1, %v3266_v31, %v3285_v27  ;;  %v3288_v48 = vsel %vm611_vm1, %v3287_v8, %v3246_v12  ;;  %v3294_v46 = vsel %vm611_vm1, %v3278_v51, %v3293_v2 }
 0x331   : > { %v3292_v57 = vsel %vm611_vm1, %v3291_v4, %v3254_v44  ;;  %v3296_v60 = vsel %vm611_vm1, %v3295_v59, %v3258_v33  ;;  %v3298_v25 = vsel %vm611_vm1, %v3282_v21, %v3297_v13  ;;  %v3300_v28 = vsel %vm1744_vm2, 1.0, %v3286_v38 }
 0x332   : > { %v3284_v24 = vsel %vm611_vm1, %v3283_v42, %v3242_v62  ;;  %v3301_v43 = vsel %vm1744_vm2, 1.0, %v3288_v48  ;;  %v3302_v47 = vsel %vm1744_vm2, 1.0, %v3290_v9  ;;  %v3303_v52 = vsel %vm1744_vm2, 1.0, %v3292_v57 }
 0x333   : > { %v3299_v30 = vsel %vm1744_vm2, 1.0, %v3284_v24  ;;  %v3304_v40 = vsel %vm1744_vm2, 1.0, %v3294_v46  ;;  %v3308_v10 = vpack.c.bf16 %v3300_v28, %v3300_v28  ;;  %v3309_v14 = vpack.c.bf16 %v3301_v43, %v3301_v43 }
 0x334   : > { %v3307_v1 = vpack.c.bf16 %v3299_v30, %v3299_v30  ;;  %v3305_v58 = vsel %vm1744_vm2, 1.0, %v3296_v60  ;;  %v3310_v49 = vpack.c.bf16 %v3302_v47, %v3302_v47  ;;  %v3306_v22 = vsel %vm1744_vm2, 1.0, %v3298_v25 }
 0x335   : > { %v3311_v6 = vpack.c.bf16 %v3303_v52, %v3303_v52  ;;  %v3312_v18 = vpack.c.bf16 %v3304_v40, %v3304_v40  ;;  %3316 = vst [vmem:[#allocation3 + $0xc] sm:$0xf] %v3308_v10  ;;  %v3313_v5 = vpack.c.bf16 %v3305_v58, %v3305_v58  ;;  %v3314_v23 = vpack.c.bf16 %v3306_v22, %v3306_v22 }
 0x336   : > { %3315 = vst [vmem:[#allocation3 + $0x4] sm:$0xf] %v3307_v1 }
 0x337   : > { %3317 = vst [vmem:[#allocation3 + $0x14] sm:$0xf] %v3309_v14 }
 0x338   : > { %3318 = vst [vmem:[#allocation3 + $0x1c] sm:$0xf] %v3310_v49 }
 0x339   : > { %3319 = vst [vmem:[#allocation3 + $0x24] sm:$0xf] %v3311_v6 }
 0x33a   : > { %3320 = vst [vmem:[#allocation3 + $0x2c] sm:$0xf] %v3312_v18 }
 0x33b   : > { %3321 = vst [vmem:[#allocation3 + $0x34] sm:$0xf] %v3313_v5 }
 0x33c   : > { %3322 = vst [vmem:[#allocation3 + $0x3c] sm:$0xf] %v3314_v23 }
 0x36b   : > { %v3005_v32 = vpop.permute.xlu2 %3004 }
 0x36c   : > { %3027 = vst.msk [vmem:[#allocation2 + $0x8] sm:$0xf] %vm3024_vm4, %v3005_v32 }
 0x373   : > { %v3011_v55 = vpop.permute.xlu2 %3010 }
 0x374   : > { %3030 = vst.msk [vmem:[#allocation2 + $0x14] sm:$0xf] %vm3024_vm4, %v3011_v55 }
 0x381   : > { %v3003_v61 = vpop.permute.xlu1 %3002 }
 0x382   : > { %3026 = vst.msk [vmem:[#allocation2 + $0x4] sm:$0xf] %vm3024_vm4, %v3003_v61 }
 0x383   : > { %v3001_v34 = vpop.permute.xlu0 %3000 }
 0x384   : > { %3025 = vst.msk [vmem:[#allocation2] sm:$0xf] %vm3024_vm4, %v3001_v34 }
 0x389   : > { %v3009_v17 = vpop.permute.xlu1 %3008 }
 0x38a   : > { %3029 = vst.msk [vmem:[#allocation2 + $0x10] sm:$0xf] %vm3024_vm4, %v3009_v17 }
 0x38b   : > { %v3007_v19 = vpop.permute.xlu0 %3006 }
 0x38c   : > { %3028 = vst.msk [vmem:[#allocation2 + $0xc] sm:$0xf] %vm3024_vm4, %v3007_v19 }
 0x391   : > { %v3015_v35 = vpop.permute.xlu1 %3014 }
 0x392   : > { %3032 = vst.msk [vmem:[#allocation2 + $0x1c] sm:$0xf] %vm3024_vm4, %v3015_v35 }
 0x393   : > { %v3013_v53 = vpop.permute.xlu0 %3012 }
 0x394   : > { %3031 = vst.msk [vmem:[#allocation2 + $0x18] sm:$0xf] %vm3024_vm4, %v3013_v53 }
 0x395 PF: > { %v5682_v3 = vld [vmem:[%s8013_s1 + $0x18] sm:$0xff]  ;;  %v5681_v16 = vld [vmem:[%s8013_s1 + $0x10] sm:$0xff]  ;;  %s5166_s8 = sshll.u32 %s6155_s21, 3  ;;  %v5680_v15 = vld [vmem:[%s8013_s1 + $0x8] sm:$0xff]  ;;  %vm3361_vm5 = vcmask 523264   ;;  %s6184_s16 = smov 120  }
 0x396   : > { %3369 = vmatpush.bf16.msra.mxu0 %v5682_v3  ;;  %s3324_s29 = sshra.s32 %s5166_s8, 3  ;;  %v5679_v36 = vld [vmem:[%s8013_s1] sm:$0xff]  ;;  %s6185_s27 = smov 96   ;;  %v6191_v50 = vmov 1983009808   ;;  %vm3645_vm6 = vcmask 1043456  }
 0x397   : > { %s5167_s14 = sshll.u32 %s3324_s29, 2  ;;  %s6186_s17 = smov 112   ;;  %v3406_v39 = vunpack.c.l.s4 %v6191_v50  ;;  %v3633_v56 = vld [vmem:[#allocation2] sm:$0xf]  ;;  %v3634_v44 = vld [vmem:[#allocation2 + $0x4] sm:$0xf] }
 0x398   : > { %s3327_s9 = scalar_lea.vmem %s6305_s26, %s5167_s14  ;;  %s6187_s30 = smov 88   ;;  %vm3401_vm7 = vcmask 1047556   ;;  %v3647_v33 = vsel %vm3645_vm6, %v3633_v56, 0  ;;  %v3666_v11 = vsel %vm3645_vm6, %v3634_v44, 0  ;;  %v3635_v63 = vld [vmem:[#allocation2 + $0x8] sm:$0xf] }
 0x399   : > { %v3328_v7 = vld [vmem:[%s3327_s9] sm:$0xf]  ;;  %s6188_s8 = smov 80   ;;  %s6189_s29 = smov 104   ;;  %3656 = vmatpush.bf16.msra.mxu1 %v3647_v33  ;;  %3675 = vmatpush.bf16.msra.mxu2 %v3666_v11  ;;  %v3685_v41 = vsel %vm3645_vm6, %v3635_v63, 0  ;;  %v7606_v27 = vunpack.c.0.s8 %v3406_v39  ;;  %vm3641_vm8 = vcmask 64512  }
 0x39a   : > { %3370 = vmatpush.bf16.msra.mxu0 %v5681_v16  ;;  %s6190_s26 = smov 72   ;;  %3694 = vmatpush.bf16.msra.mxu3 %v3685_v41  ;;  %v6192_v2 = vmov 1934713408   ;;  %v3637_v47 = vld [vmem:[#allocation2 + $0x10] sm:$0xf]  ;;  %vm3795_vm9 = vcmask 130048  }
 0x39b   : > { %v3454_v13 = vunpack.c.l.s4 %v6192_v2  ;;  %v3639_v48 = vld [vmem:[#allocation2 + $0x18] sm:$0xf]  ;;  %v3723_v10 = vsel %vm3645_vm6, %v3637_v47, 0  ;;  %v3636_v14 = vld [vmem:[#allocation2 + $0xc] sm:$0xf]  ;;  %s6097_s10 = scalar_lea.hbm %s8017_s5, 32 }
 0x39c   : > { %v3761_v57 = vsel %vm3645_vm6, %v3639_v48, 0  ;;  %v3638_v58 = vld [vmem:[#allocation2 + $0x14] sm:$0xf]  ;;  %v3704_v18 = vsel %vm3645_vm6, %v3636_v14, 0 }
 0x39d   : > { %v7619_v1 = vunpack.c.0.s8 %v3454_v13  ;;  %3732 = vmatpush.bf16.msrb.mxu2 %v3723_v10  ;;  %3713 = vmatpush.bf16.msrb.mxu1 %v3704_v18  ;;  %v3742_v23 = vsel %vm3645_vm6, %v3638_v58, 0 }
 0x39e   : > { %3371 = vmatpush.bf16.msra.mxu0 %v5680_v15  ;;  %3751 = vmatpush.bf16.msrb.mxu3 %v3742_v23 }
 0x3a2   : > { %3372 = vmatpush.bf16.msra.mxu0 %v5679_v36 }
 0x3a5   : > { %5184 = vmatmul.msk.bf16.vlgmr.msra.gmra.mxu0 %vm3361_vm5, %v3328_v7 }
 0x3a6   : > { %3770 = vmatpush.bf16.msrb.mxu0 %v3761_v57 }
 0x422   : > { %v3374_v0 = vpop.f32.mrf.mxu0 }
 0x423   : > { %3379 = vrot.lane.b32.xlu2 %v3374_v0, %s6184_s16  ;;  %3388 = vrot.lane.b32.xlu1 %v3374_v0, %s6185_s27  ;;  %v3403_v45 = vrot.slane %v3374_v0, 4 }
 0x424   : > { %3382 = vrot.lane.b32.xlu0 %v3374_v0, %s6186_s17  ;;  %s8027_s17 = sand.u32 1, %s6147_s19  }
 0x42a   : > { %v3376_v37 = vpop.f32.mrf.mxu0 }
 0x42b   : > { %3391 = vrot.lane.b32.xlu2 %v3374_v0, %s6187_s30  ;;  %3394 = vrot.lane.b32.xlu1 %v3374_v0, %s6188_s8  ;;  %s4760_s30 = scalar_lea.sflag [#allocation5], %s8027_s17 }
 0x42c   : > { %3385 = vrot.lane.b32.xlu0 %v3374_v0, %s6189_s29  ;;  %s5602_s29 = sshll.u32 %s6159_s22, 1 }
 0x434   : > { %3397 = vrot.lane.b32.xlu0 %v3374_v0, %s6190_s26  ;;  %s4770_s26 = sadd.s32 %s6155_s21, %s5602_s29  ;;  %s8025_s21 = scalar_lea.vmem [#allocation4], %s6299_s13 }
 0x435   : > { %s5603_s12 = sshll.u32 %s4770_s26, 3  ;;  %s4774_s22 = sshll.u32 %s8025_s21, 4  ;;  %s4775_s22 = int_to_ptr.vmem [resolvable:$true] %s4774_s22 }
 0x436   : > { %s4772_s15 = scalar_lea.hbm %s8017_s5, %s5603_s12  ;;  %s8026_s27 = smov %s8025_s21 }
 0x437   : > { %s4776_s16 = sshll.u32 %s4772_s15, 4  ;;  %s4777_s16 = int_to_ptr.hbm [resolvable:$true] %s4776_s16 }
 0x438   : > { %s6091_s8 = sshra.s32 %s4777_s16, 4  ;;  %s6092_s8 = int_to_ptr.hbm [resolvable:$true] %s6091_s8 }
 0x439   : > { %s6093_s29 = scalar_lea.hbm %s6092_s8, 8  ;;  %p6098_p4 = scmp.lt.s32.totalorder %s6092_s8, %s8017_s5 }
 0x43a   : > { %p6094_p0 = scmp.ne.s32.totalorder %s6092_s8, %s6093_s29  ;;  %p6099_p5 = scmp.lt.s32.totalorder %s6097_s10, %s6093_s29 }
 0x43c   : > { %p6095_p1 = pnand %p6094_p0, %p6275_p3  ;;  %p6100_p6 = por %p6099_p5, %p6098_p4 }
 0x43e   : > { %p6096_p2 = pneg %p6095_p1 }
 0x440   : > { %p6101_p7 = pnand %p6100_p6, %p6096_p2 }
 0x47d   : > { %v3380_v29 = vpop.permute.xlu2 %3379 }
 0x47e   : > { %v3415_v21 = vrot.slane %v3380_v29, 4 }
 0x485   : > { %v3392_v30 = vpop.permute.xlu2 %3391 }
 0x486   : > { %v3439_v32 = vrot.slane %v3392_v30, 4 }
 0x495   : > { %v3389_v20 = vpop.permute.xlu1 %3388 }
 0x496   : > { %v3383_v62 = vpop.permute.xlu0 %3382  ;;  %v3427_v31 = vrot.slane %v3389_v20, 4 }
 0x497   : > { %v3400_v12 = vrot.slane %v3383_v62, 4  ;;  %v3404_v26 = vsel %vm3401_vm7, %v3383_v62, %v3403_v45 }
 0x498   : > { %v3412_v8 = vperm.slane %v3404_v26, %v7606_v27 }
 0x499   : > { %v3402_v51 = vsel %vm3401_vm7, %v3400_v12, %v3374_v0 }
 0x49a   : > { %v3408_v4 = vperm.slane %v3402_v51, %v7606_v27  ;;  %v3463_v28 = vrot.slane %v3412_v8, 4 }
 0x49c   : > { %v3451_v52 = vrot.slane %v3408_v4, 4 }
 0x49d   : > { %v3395_v54 = vpop.permute.xlu1 %3394 }
 0x49e   : > { %v3386_v9 = vpop.permute.xlu0 %3385  ;;  %v3425_v59 = vrot.slane %v3395_v54, 4  ;;  %v3428_v60 = vsel %vm3401_vm7, %v3395_v54, %v3427_v31 }
 0x49f   : > { %v3413_v42 = vrot.slane %v3386_v9, 4  ;;  %v3416_v38 = vsel %vm3401_vm7, %v3386_v9, %v3415_v21  ;;  %v3436_v49 = vperm.slane %v3428_v60, %v7606_v27 }
 0x4a0   : > { %v3424_v46 = vperm.slane %v3416_v38, %v7606_v27  ;;  %v3426_v40 = vsel %vm3401_vm7, %v3425_v59, %v3389_v20 }
 0x4a1   : > { %v3414_v25 = vsel %vm3401_vm7, %v3413_v42, %v3380_v29  ;;  %v3432_v55 = vperm.slane %v3426_v40, %v7606_v27  ;;  %v3487_v53 = vrot.slane %v3436_v49, 4 }
 0x4a2   : > { %v3420_v24 = vperm.slane %v3414_v25, %v7606_v27  ;;  %v3461_v43 = vrot.slane %v3424_v46, 4  ;;  %v3464_v6 = vsel %vm3401_vm7, %v3424_v46, %v3463_v28 }
 0x4a3   : > { %v3472_v19 = vperm.slane %v3464_v6, %v7619_v1  ;;  %v3475_v37 = vrot.slane %v3432_v55, 4 }
 0x4a4   : > { %v3449_v22 = vrot.slane %v3420_v24, 4  ;;  %v3452_v5 = vsel %vm3401_vm7, %v3420_v24, %v3451_v52  ;;  %v3462_v34 = vsel %vm3401_vm7, %v3461_v43, %v3412_v8 }
 0x4a5   : > { %v3460_v3 = vperm.slane %v3452_v5, %v7619_v1  ;;  %v3468_v36 = vperm.slane %v3462_v34, %v7619_v1  ;;  %v3511_v50 = vrot.slane %v3472_v19, 4 }
 0x4a6   : > { %v3450_v61 = vsel %vm3401_vm7, %v3449_v22, %v3408_v4  ;;  %v3398_v17 = vpop.permute.xlu0 %3397 }
 0x4a7   : > { %v3437_v35 = vrot.slane %v3398_v17, 4  ;;  %v3440_v16 = vsel %vm3401_vm7, %v3398_v17, %v3439_v32  ;;  %v3456_v15 = vperm.slane %v3450_v61, %v7619_v1  ;;  %v3503_v56 = vrot.slane %v3460_v3, 4 }
 0x4a8   : > { %v3448_v0 = vperm.slane %v3440_v16, %v7606_v27  ;;  %v3507_v63 = vrot.slane %v3468_v36, 4 }
 0x4a9   : > { %v3438_v7 = vsel %vm3401_vm7, %v3437_v35, %v3392_v30  ;;  %v3499_v11 = vrot.slane %v3456_v15, 4 }
 0x4aa   : > { %v3444_v20 = vperm.slane %v3438_v7, %v7606_v27  ;;  %v3485_v39 = vrot.slane %v3448_v0, 4  ;;  %v3488_v62 = vsel %vm3401_vm7, %v3448_v0, %v3487_v53 }
 0x4ab   : > { %v3496_v33 = vperm.slane %v3488_v62, %v7619_v1 }
 0x4ac   : > { %v3473_v44 = vrot.slane %v3444_v20, 4  ;;  %v3476_v12 = vsel %vm3401_vm7, %v3444_v20, %v3475_v37  ;;  %v3486_v45 = vsel %vm3401_vm7, %v3485_v39, %v3436_v49 }
 0x4ad   : > { %v3484_v29 = vperm.slane %v3476_v12, %v7619_v1  ;;  %v3492_v26 = vperm.slane %v3486_v45, %v7619_v1  ;;  %v3509_v51 = vrot.slane %v3496_v33, 4  ;;  %v3512_v21 = vsel %vm3401_vm7, %v3496_v33, %v3511_v50 }
 0x4ae   : > { %v3474_v41 = vsel %vm3401_vm7, %v3473_v44, %v3432_v55  ;;  %v3549_v2 = vrot.slane %v3512_v21, 4 }
 0x4af   : > { %v3480_v54 = vperm.slane %v3474_v41, %v7619_v1  ;;  %v3501_v31 = vrot.slane %v3484_v29, 4  ;;  %v3504_v8 = vsel %vm3401_vm7, %v3484_v29, %v3503_v56  ;;  %v3505_v13 = vrot.slane %v3492_v26, 4 }
 0x4b0   : > { %v3508_v9 = vsel %vm3401_vm7, %v3492_v26, %v3507_v63  ;;  %v3510_v4 = vsel %vm3401_vm7, %v3509_v51, %v3472_v19  ;;  %v3525_v59 = vrot.slane %v3504_v8, 4 }
 0x4b1   : > { %v3497_v42 = vrot.slane %v3480_v54, 4  ;;  %v3500_v38 = vsel %vm3401_vm7, %v3480_v54, %v3499_v11  ;;  %v3502_v48 = vsel %vm3401_vm7, %v3501_v31, %v3460_v3  ;;  %v3537_v46 = vrot.slane %v3510_v4, 4 }
 0x4b2   : > { %v3506_v57 = vsel %vm3401_vm7, %v3505_v13, %v3468_v36  ;;  %v3527_v60 = vrot.slane %v3500_v38, 4  ;;  %v3550_v25 = vsel %vm3401_vm7, %v3549_v2, %v3508_v9  ;;  %v3551_v28 = vrot.slane %v3508_v9, 4 }
 0x4b3   : > { %v3539_v24 = vrot.slane %v3506_v57, 4  ;;  %v3556_v43 = vperm.slane %v3550_v25, %v7606_v27  ;;  %v3498_v47 = vsel %vm3401_vm7, %v3497_v42, %v3456_v15  ;;  %v3513_v30 = vrot.slane %v3502_v48, 4 }
 0x4b4   : > { %v3552_v52 = vsel %vm3401_vm7, %v3512_v21, %v3551_v28  ;;  %v3515_v40 = vrot.slane %v3498_v47, 4  ;;  %v3526_v10 = vsel %vm3401_vm7, %v3525_v59, %v3500_v38  ;;  %v3538_v14 = vsel %vm3401_vm7, %v3537_v46, %v3506_v57  ;;  %v3640_v21 = vld [vmem:[#allocation2 + $0x1c] sm:$0xf] }
 0x4b5   : > { %v3540_v58 = vsel %vm3401_vm7, %v3510_v4, %v3539_v24  ;;  %v3514_v49 = vsel %vm3401_vm7, %v3513_v30, %v3498_v47  ;;  %v3532_v22 = vperm.slane %v3526_v10, %v7606_v27  ;;  %v3544_v5 = vperm.slane %v3538_v14, %v7606_v27 }
 0x4b6   : > { %v3548_v6 = vperm.slane %v3540_v58, %v7606_v27  ;;  %v3520_v18 = vperm.slane %v3514_v49, %v7606_v27  ;;  %v3585_v23 = vrot.slane %v3556_v43, 4  ;;  %v3560_v32 = vperm.slane %v3552_v52, %v7606_v27 }
 0x4b7   : > { %v3561_v55 = vrot.slane %v3532_v22, 4  ;;  %v3516_v61 = vsel %vm3401_vm7, %v3502_v48, %v3515_v40  ;;  %v3528_v34 = vsel %vm3401_vm7, %v3504_v8, %v3527_v60  ;;  %v3587_v35 = vrot.slane %v3544_v5, 4 }
 0x4b8   : > { %v3586_v17 = vsel %vm3401_vm7, %v3585_v23, %v3544_v5  ;;  %v3563_v19 = vrot.slane %v3520_v18, 4  ;;  %v3524_v53 = vperm.slane %v3516_v61, %v7606_v27  ;;  %v3536_v15 = vperm.slane %v3528_v34, %v7606_v27 }
 0x4b9   : > { %v3562_v3 = vsel %vm3401_vm7, %v3561_v55, %v3520_v18  ;;  %v3592_v16 = vperm.slane %v3586_v17, %v7619_v1  ;;  %v3599_v36 = vrot.slane %v3548_v6, 4  ;;  %v3588_v37 = vsel %vm3401_vm7, %v3556_v43, %v3587_v35 }
 0x4ba   : > { %v3568_v7 = vperm.slane %v3562_v3, %v7619_v1  ;;  %v3564_v0 = vsel %vm3401_vm7, %v3532_v22, %v3563_v19  ;;  %v3575_v20 = vrot.slane %v3524_v53, 4  ;;  %v3596_v62 = vperm.slane %v3588_v37, %v7619_v1  ;;  %v5683_v37 = vld [vmem:[#allocation3] sm:$0xff] }
 0x4bb   : > { %v3609_v50 = vrot.slane %v3592_v16, 4  ;;  %v3572_v39 = vperm.slane %v3564_v0, %v7619_v1  ;;  %v3600_v56 = vsel %vm3401_vm7, %v3560_v32, %v3599_v36  ;;  %v3597_v33 = vrot.slane %v3560_v32, 4 }
 0x4bc   : > { %v3611_v44 = vrot.slane %v3568_v7, 4  ;;  %v3576_v12 = vsel %vm3401_vm7, %v3536_v15, %v3575_v20  ;;  %v3608_v27 = vperm.slane %v3600_v56, %v7619_v1  ;;  %v3613_v63 = vrot.slane %v3596_v62, 4  ;;  %v5684_v20 = vld [vmem:[#allocation3 + $0x8] sm:$0xff] }
 0x4bd   : > { %v3610_v11 = vsel %vm3401_vm7, %v3609_v50, %v3568_v7  ;;  %v3584_v29 = vperm.slane %v3576_v12, %v7619_v1  ;;  %v3573_v51 = vrot.slane %v3536_v15, 4  ;;  %v3598_v9 = vsel %vm3401_vm7, %v3597_v33, %v3548_v6  ;;  %v5685_v50 = vld [vmem:[#allocation3 + $0x10] sm:$0xff] }
 0x4be   : > { %v3625_v45 = vpack.c.bf16 %v3610_v11, %v3610_v11  ;;  %v3612_v41 = vsel %vm3401_vm7, %v3592_v16, %v3611_v44  ;;  %v3621_v26 = vrot.slane %v3608_v27, 4  ;;  %v3614_v31 = vsel %vm3401_vm7, %v3613_v63, %v3572_v39  ;;  %3944 = vmatpush.bf16.msra.mxu0 %v5685_v50  ;;  %v5686_v44 = vld [vmem:[#allocation3 + $0x18] sm:$0xff] }
 0x4bf   : > { %v3626_v54 = vpack.c.bf16 %v3612_v41, %v3612_v41  ;;  %v3627_v8 = vpack.c.bf16 %v3614_v31, %v3614_v31  ;;  %v3780_v4 = vsel %vm3645_vm6, %v3640_v21, 0  ;;  %v3574_v59 = vsel %vm3401_vm7, %v3573_v51, %v3524_v53  ;;  %v5688_v21 = vld [vmem:[#allocation3 + $0x28] sm:$0xff] }
 0x4c0   : > { %5185 = vmatmul.msk.bf16.vlgmr.msra.gmra.mxu1 %vm3641_vm8, %v3625_v45  ;;  %v3622_v2 = vsel %vm3401_vm7, %v3621_v26, %v3584_v29  ;;  %v3604_v42 = vperm.slane %v3598_v9, %v7619_v1  ;;  %v3580_v38 = vperm.slane %v3574_v59, %v7619_v1  ;;  %v3615_v48 = vrot.slane %v3572_v39, 4 }
 0x4c1   : > { %5186 = vmatmul.msk.bf16.vlgmr.msra.gmra.mxu2 %vm3641_vm8, %v3626_v54  ;;  %v3631_v13 = vpack.c.bf16 %v3622_v2, %v3622_v2  ;;  %5187 = vmatmul.msk.bf16.vlgmr.msra.gmra.mxu3 %vm3641_vm8, %v3627_v8  ;;  %v3623_v30 = vrot.slane %v3584_v29, 4  ;;  %v5687_v29 = vld [vmem:[#allocation3 + $0x20] sm:$0xff]  ;;  %v5689_v54 = vld [vmem:[#allocation3 + $0x30] sm:$0xff] }
 0x4c2   : > { %3789 = vmatpush.bf16.msra.mxu1 %v3780_v4  ;;  %v3617_v46 = vrot.slane %v3604_v42, 4  ;;  %v3619_v57 = vrot.slane %v3580_v38, 4  ;;  %v3616_v60 = vsel %vm3401_vm7, %v3596_v62, %v3615_v48  ;;  %3900 = vmatpush.bf16.msra.mxu2 %v5683_v37  ;;  %v6193_v37 = vmov 8  }
 0x4c3   : > { %5191 = vmatmul.msk.bf16.vlgmr.msrb.gmra.mxu0 %vm3641_vm8, %v3631_v13  ;;  %v3628_v24 = vpack.c.bf16 %v3616_v60, %v3616_v60  ;;  %v3624_v1 = vsel %vm3401_vm7, %v3608_v27, %v3623_v30  ;;  %3922 = vmatpush.bf16.msra.mxu3 %v5684_v20 }
 0x4c4   : > { %v3618_v25 = vsel %vm3401_vm7, %v3617_v46, %v3580_v38  ;;  %v3620_v28 = vsel %vm3401_vm7, %v3604_v42, %v3619_v57  ;;  %v3632_v52 = vpack.c.bf16 %v3624_v1, %v3624_v1  ;;  %4032 = vmatpush.bf16.msrb.mxu0 %v5689_v54  ;;  %v5690_v42 = vld [vmem:[#allocation3 + $0x38] sm:$0xff]  ;;  %6042 = vset.pattern.permute.xlu0 %v6193_v37 }
 0x4c5   : > { %v3629_v43 = vpack.c.bf16 %v3618_v25, %v3618_v25  ;;  %v3630_v47 = vpack.c.bf16 %v3620_v28, %v3620_v28  ;;  %6043 = vset.pattern.permute.xlu1 %v6193_v37  ;;  %6041 = vset.pattern.permute.xlu2 %v6193_v37  ;;  %v5708_v37 = vld [vmem:[%s8015_s3 + $0x88] sm:$0xff] }
 0x4d0   : > { %5188 = vmatmul.msk.bf16.vlgmr.msrb.gmra.mxu1 %vm3641_vm8, %v3628_v24 }
 0x4d1   : > { %5189 = vmatmul.msk.bf16.vlgmr.msrb.gmra.mxu2 %vm3641_vm8, %v3629_v43  ;;  %5190 = vmatmul.msk.bf16.vlgmr.msrb.gmra.mxu3 %vm3641_vm8, %v3630_v47 }
 0x4d2   : > { %3966 = vmatpush.bf16.msrb.mxu1 %v5686_v44  ;;  %3988 = vmatpush.bf16.msrb.mxu2 %v5687_v29  ;;  %v5722_v44 = vld [vmem:[%s8015_s3 + $0xf8] sm:$0xff]  ;;  %v5721_v29 = vld [vmem:[%s8015_s3 + $0xf0] sm:$0xff] }
 0x4d3   : > { %4010 = vmatpush.bf16.msrb.mxu3 %v5688_v21  ;;  %v5720_v21 = vld [vmem:[%s8015_s3 + $0xe8] sm:$0xff] }
 0x4e0   : > { %5192 = vmatmul.msk.bf16.vlgmr.msra.gmra.mxu1 %vm3641_vm8, %v3632_v52 }
 0x4e1   : > { %4054 = vmatpush.bf16.msra.mxu1 %v5690_v42  ;;  %v5695_v42 = vld [vmem:[%s8015_s3 + $0x20] sm:$0xff] }
 0x53d   : > { %v3658_v40 = vpop.f32.mrf.mxu1 }
 0x53e   : > { %v3796_v10 = vsel %vm3795_vm9, %v3658_v40, -inf }
 0x53f   : > { %3797 = vmax.xlane.f32.xlu1 %v3796_v10 }
 0x540   : > { %v7704_v14 = vpop.f32.mrf.mxu0 }
 0x541   : > { %v3814_v34 = vsel %vm3795_vm9, %v7704_v14, -inf }
 0x544   : > { %v3677_v58 = vpop.f32.mrf.mxu2  ;;  %v3696_v22 = vpop.f32.mrf.mxu3 }
 0x545   : > { %v3660_v49 = vpop.f32.mrf.mxu1  ;;  %v3799_v6 = vsel %vm3795_vm9, %v3677_v58, -inf  ;;  %v3802_v18 = vsel %vm3795_vm9, %v3696_v22, -inf }
 0x546   : > { %3800 = vmax.xlane.f32.xlu2 %v3799_v6  ;;  %3803 = vmax.xlane.f32.xlu0 %v3802_v18 }
 0x548   : > { %v3774_v5 = vpop.f32.mrf.mxu0 }
 0x54c   : > { %v3679_v23 = vpop.f32.mrf.mxu2  ;;  %v3698_v32 = vpop.f32.mrf.mxu3 }
 0x54d   : > { %v3715_v55 = vpop.f32.mrf.mxu1 }
 0x54e   : > { %v3805_v61 = vsel %vm3795_vm9, %v3715_v55, -inf  ;;  %3815 = vmax.xlane.f32.xlu0 %v3814_v34 }
 0x54f   : > { %3806 = vmax.xlane.f32.xlu2 %v3805_v61 }
 0x554   : > { %v7711_v17 = vpop.f32.mrf.mxu2  ;;  %v7713_v35 = vpop.f32.mrf.mxu3 }
 0x555   : > { %v3717_v19 = vpop.f32.mrf.mxu1  ;;  %v3808_v53 = vsel %vm3795_vm9, %v7711_v17, -inf  ;;  %v3811_v3 = vsel %vm3795_vm9, %v7713_v35, -inf }
 0x556   : > { %3809 = vmax.xlane.f32.xlu1 %v3808_v53 }
 0x557   : > { %3812 = vmax.xlane.f32.xlu2 %v3811_v3 }
 0x55c   : > { %v3736_v16 = vpop.f32.mrf.mxu2  ;;  %v3755_v15 = vpop.f32.mrf.mxu3 }
 0x55d   : > { %v7719_v36 = vpop.f32.mrf.mxu1 }
 0x55e   : > { %v3817_v7 = vsel %vm3795_vm9, %v7719_v36, -inf }
 0x55f   : > { %3818 = vmax.xlane.f32.xlu1 %v3817_v7 }
 0x565   : > { %v3793_v0 = vpop.f32.mrf.mxu1 }
 0x5b2   : > { %v3798_v39 = vpop.xlane.xlu1 %3797 }
 0x5b3   : > { %v3820_v62 = vsub.f32 %v3658_v40, %v3798_v39 }
 0x5b5   : > { %v3828_v56 = vpack.c.bf16 %v3820_v62, %v3820_v62 }
 0x5b7   : > { %v3836_v12 = vunpack.c.l.bf16 %v3828_v56 }
 0x5b9   : > { %v3844_v27 = vmul.f32 1.442695, %v3836_v12  ;;  %v3801_v33 = vpop.xlane.xlu2 %3800  ;;  %v3804_v11 = vpop.xlane.xlu0 %3803  ;;  %v5706_v12 = vld [vmem:[%s8015_s3 + $0x78] sm:$0xff] }
 0x5ba   : > { %v3821_v63 = vsub.f32 %v3677_v58, %v3801_v33  ;;  %v3822_v45 = vsub.f32 %v3696_v22, %v3804_v11  ;;  %v5698_v33 = vld [vmem:[%s8015_s3 + $0x38] sm:$0xff] }
 0x5bb   : > { %6045 = vpow2.f32 %v3844_v27 }
 0x5bc   : > { %v3829_v41 = vpack.c.bf16 %v3821_v63, %v3821_v63  ;;  %v3830_v26 = vpack.c.bf16 %v3822_v45, %v3822_v45  ;;  %v5705_v45 = vld [vmem:[%s8015_s3 + $0x70] sm:$0xff] }
 0x5be   : > { %v3837_v51 = vunpack.c.l.bf16 %v3829_v41  ;;  %v3838_v31 = vunpack.c.l.bf16 %v3830_v26  ;;  %v5697_v41 = vld [vmem:[%s8015_s3 + $0x30] sm:$0xff]  ;;  %v5714_v26 = vld [vmem:[%s8015_s3 + $0xb8] sm:$0xff] }
 0x5c0   : > { %v3846_v8 = vmul.f32 1.442695, %v3837_v51  ;;  %v3848_v13 = vmul.f32 1.442695, %v3838_v31  ;;  %v5704_v31 = vld [vmem:[%s8015_s3 + $0x68] sm:$0xff] }
 0x5c1   : > { %v6046_v2 = vpop.eup %6045  ;;  %v3816_v59 = vpop.xlane.xlu0 %3815 }
 0x5c2   : > { %v3860_v9 = vpack.c.bf16 %v6046_v2, %v6046_v2  ;;  %6047 = vpow2.f32 %v3846_v8  ;;  %v3807_v4 = vpop.xlane.xlu2 %3806  ;;  %v3826_v48 = vsub.f32 %v7704_v14, %v3816_v59  ;;  %v5696_v8 = vld [vmem:[%s8015_s3 + $0x28] sm:$0xff]  ;;  %v5713_v2 = vld [vmem:[%s8015_s3 + $0xb0] sm:$0xff]  ;;  %v5703_v59 = vld [vmem:[%s8015_s3 + $0x60] sm:$0xff] }
 0x5c3   : > { %6049 = vpow2.f32 %v3848_v13  ;;  %v3823_v38 = vsub.f32 %v3715_v55, %v3807_v4  ;;  %v5719_v4 = vld [vmem:[%s8015_s3 + $0xe0] sm:$0xff] }
 0x5c4   : > { %5197 = vmatmul.msk.bf16.vlgmr.msra.gmra.mxu2 %vm3795_vm9, %v3860_v9  ;;  %v3834_v57 = vpack.c.bf16 %v3826_v48, %v3826_v48 }
 0x5c5   : > { %v3831_v46 = vpack.c.bf16 %v3823_v38, %v3823_v38  ;;  %4205 = vmatpush.bf16.msra.mxu2 %v5706_v12  ;;  %v5712_v38 = vld [vmem:[%s8015_s3 + $0xa8] sm:$0xff]  ;;  %v5707_v12 = vld [vmem:[%s8015_s3 + $0x80] sm:$0xff] }
 0x5c6   : > { %v3842_v47 = vunpack.c.l.bf16 %v3834_v57 }
 0x5c7   : > { %v3839_v60 = vunpack.c.l.bf16 %v3831_v46  ;;  %v5718_v46 = vld [vmem:[%s8015_s3 + $0xd8] sm:$0xff] }
 0x5c8   : > { %v6048_v25 = vpop.eup %6047  ;;  %v3856_v58 = vmul.f32 1.442695, %v3842_v47  ;;  %v5717_v47 = vld [vmem:[%s8015_s3 + $0xd0] sm:$0xff] }
 0x5c9   : > { %v6050_v28 = vpop.eup %6049  ;;  %v3861_v24 = vpack.c.bf16 %v6048_v25, %v6048_v25  ;;  %v3850_v43 = vmul.f32 1.442695, %v3839_v60  ;;  %v3810_v30 = vpop.xlane.xlu1 %3809  ;;  %4206 = vmatpush.bf16.msra.mxu2 %v5705_v45  ;;  %v5702_v60 = vld [vmem:[%s8015_s3 + $0x58] sm:$0xff]  ;;  %v5727_v45 = vld [vmem:[%s8015_s3 + $0x120] sm:$0xff] }
 0x5ca   : > { %v3862_v1 = vpack.c.bf16 %v6050_v28, %v6050_v28  ;;  %v3824_v52 = vsub.f32 %v7711_v17, %v3810_v30  ;;  %v3813_v40 = vpop.xlane.xlu2 %3812  ;;  %v5694_v28 = vld [vmem:[%s8015_s3 + $0x18] sm:$0xff]  ;;  %v5701_v30 = vld [vmem:[%s8015_s3 + $0x50] sm:$0xff] }
 0x5cb   : > { %6051 = vpow2.f32 %v3850_v43  ;;  %v3825_v10 = vsub.f32 %v7713_v35, %v3813_v40  ;;  %5202 = vmatmul.msk.bf16.vlgmr.msra.gmra.mxu3 %vm3795_vm9, %v3861_v24  ;;  %v5716_v40 = vld [vmem:[%s8015_s3 + $0xc8] sm:$0xff] }
 0x5cc   : > { %v3832_v14 = vpack.c.bf16 %v3824_v52, %v3824_v52  ;;  %5207 = vmatmul.msk.bf16.vlgmr.msra.gmra.mxu0 %vm3795_vm9, %v3862_v1  ;;  %6053 = vpow2.f32 %v3856_v58  ;;  %4266 = vmatpush.bf16.msra.mxu3 %v5698_v33  ;;  %v5693_v1 = vld [vmem:[%s8015_s3 + $0x10] sm:$0xff]  ;;  %v5700_v58 = vld [vmem:[%s8015_s3 + $0x48] sm:$0xff]  ;;  %v5734_v33 = vld [vmem:[%s8015_s3 + $0x158] sm:$0xff] }
 0x5cd   : > { %v3833_v49 = vpack.c.bf16 %v3825_v10, %v3825_v10  ;;  %4344 = vmatpush.bf16.msra.mxu0 %v5714_v26  ;;  %4207 = vmatpush.bf16.msra.mxu2 %v5704_v31  ;;  %v5745_v26 = vld [vmem:[%s8015_s3 + $0x1b0] sm:$0xff]  ;;  %v5744_v31 = vld [vmem:[%s8015_s3 + $0x1a8] sm:$0xff] }
 0x5ce   : > { %v3840_v22 = vunpack.c.l.bf16 %v3832_v14 }
 0x5cf   : > { %v3841_v6 = vunpack.c.l.bf16 %v3833_v49 }
 0x5d0   : > { %v3852_v18 = vmul.f32 1.442695, %v3840_v22  ;;  %4267 = vmatpush.bf16.msra.mxu3 %v5697_v41  ;;  %v5733_v41 = vld [vmem:[%s8015_s3 + $0x150] sm:$0xff] }
 0x5d1   : > { %v6052_v5 = vpop.eup %6051  ;;  %v3854_v23 = vmul.f32 1.442695, %v3841_v6  ;;  %4345 = vmatpush.bf16.msra.mxu0 %v5713_v2  ;;  %4208 = vmatpush.bf16.msra.mxu2 %v5703_v59  ;;  %v5715_v6 = vld [vmem:[%s8015_s3 + $0xc0] sm:$0xff] }
 0x5d2   : > { %v3863_v32 = vpack.c.bf16 %v6052_v5, %v6052_v5  ;;  %6055 = vpow2.f32 %v3852_v18  ;;  %v3819_v55 = vpop.xlane.xlu1 %3818  ;;  %v6054_v17 = vpop.eup %6053  ;;  %v5754_v18 = vld [vmem:[%s8015_s3 + $0x1f8] sm:$0xff] }
 0x5d3   : > { %6057 = vpow2.f32 %v3854_v23  ;;  %v3827_v61 = vsub.f32 %v7719_v36, %v3819_v55  ;;  %v3866_v15 = vpack.c.bf16 %v6054_v17, %v6054_v17  ;;  %v5699_v55 = vld [vmem:[%s8015_s3 + $0x40] sm:$0xff] }
 0x5d4   : > { %5212 = vmatmul.msk.bf16.vlgmr.msrb.gmra.mxu1 %vm3795_vm9, %v3863_v32  ;;  %4268 = vmatpush.bf16.msra.mxu3 %v5696_v8  ;;  %v5692_v32 = vld [vmem:[%s8015_s3 + $0x8] sm:$0xff]  ;;  %v5691_v17 = vld [vmem:[%s8015_s3] sm:$0xff] }
 0x5d5   : > { %v3835_v34 = vpack.c.bf16 %v3827_v61, %v3827_v61  ;;  %4423 = vmatpush.bf16.msrb.mxu1 %v5722_v44  ;;  %4346 = vmatpush.bf16.msra.mxu0 %v5712_v38  ;;  %v5753_v61 = vld [vmem:[%s8015_s3 + $0x1f0] sm:$0xff]  ;;  %v5742_v38 = vld [vmem:[%s8015_s3 + $0x198] sm:$0xff] }
 0x5d6   : > { %4209 = vmatpush.bf16.msra.mxu2 %v5702_v60  ;;  %v5749_v44 = vld [vmem:[%s8015_s3 + $0x1d0] sm:$0xff] }
 0x5d7   : > { %v3843_v19 = vunpack.c.l.bf16 %v3835_v34  ;;  %v5711_v34 = vld [vmem:[%s8015_s3 + $0xa0] sm:$0xff] }
 0x5d8   : > { %v6056_v35 = vpop.eup %6055  ;;  %4269 = vmatpush.bf16.msra.mxu3 %v5695_v42  ;;  %v5743_v42 = vld [vmem:[%s8015_s3 + $0x1a0] sm:$0xff] }
 0x5d9   : > { %v6058_v53 = vpop.eup %6057  ;;  %v3864_v3 = vpack.c.bf16 %v6056_v35, %v6056_v35  ;;  %v3858_v16 = vmul.f32 1.442695, %v3843_v19  ;;  %4424 = vmatpush.bf16.msrb.mxu1 %v5721_v29  ;;  %4347 = vmatpush.bf16.msra.mxu0 %v5711_v34  ;;  %v5738_v19 = vld [vmem:[%s8015_s3 + $0x178] sm:$0xff]  ;;  %v5752_v35 = vld [vmem:[%s8015_s3 + $0x1e8] sm:$0xff] }
 0x5da   : > { %v3865_v7 = vpack.c.bf16 %v6058_v53, %v6058_v53  ;;  %4210 = vmatpush.bf16.msra.mxu2 %v5701_v30  ;;  %v5710_v53 = vld [vmem:[%s8015_s3 + $0x98] sm:$0xff]  ;;  %v5748_v29 = vld [vmem:[%s8015_s3 + $0x1c8] sm:$0xff] }
 0x5db   : > { %6059 = vpow2.f32 %v3858_v16  ;;  %5217 = vmatmul.msk.bf16.vlgmr.msrb.gmra.mxu2 %vm3795_vm9, %v3864_v3  ;;  %v5737_v3 = vld [vmem:[%s8015_s3 + $0x170] sm:$0xff]  ;;  %v5751_v16 = vld [vmem:[%s8015_s3 + $0x1e0] sm:$0xff] }
 0x5dc   : > { %5222 = vmatmul.msk.bf16.vlgmr.msrb.gmra.mxu3 %vm3795_vm9, %v3865_v7  ;;  %5227 = vmatmul.msk.bf16.vlgmr.msrb.gmra.mxu0 %vm3795_vm9, %v3866_v15  ;;  %v5709_v15 = vld [vmem:[%s8015_s3 + $0x90] sm:$0xff]  ;;  %v5730_v7 = vld [vmem:[%s8015_s3 + $0x138] sm:$0xff] }
 0x5dd   : > { %4425 = vmatpush.bf16.msrb.mxu1 %v5720_v21  ;;  %4270 = vmatpush.bf16.msra.mxu3 %v5694_v28  ;;  %v5726_v21 = vld [vmem:[%s8015_s3 + $0x118] sm:$0xff]  ;;  %v5723_v28 = vld [vmem:[%s8015_s3 + $0x100] sm:$0xff] }
 0x5de   : > { %4211 = vmatpush.bf16.msra.mxu2 %v5700_v58  ;;  %4348 = vmatpush.bf16.msra.mxu0 %v5710_v53 }
 0x5e1   : > { %v6060_v0 = vpop.eup %6059  ;;  %4426 = vmatpush.bf16.msrb.mxu1 %v5719_v4  ;;  %4271 = vmatpush.bf16.msra.mxu3 %v5693_v1  ;;  %v5731_v4 = vld [vmem:[%s8015_s3 + $0x140] sm:$0xff] }
 0x5e2   : > { %v3867_v36 = vpack.c.bf16 %v6060_v0, %v6060_v0  ;;  %4212 = vmatpush.bf16.msra.mxu2 %v5699_v55  ;;  %v5736_v0 = vld [vmem:[%s8015_s3 + $0x168] sm:$0xff]  ;;  %4349 = vmatpush.bf16.msra.mxu0 %v5709_v15 }
 0x5e4   : > { %5232 = vmatmul.msk.bf16.vlgmr.msra.gmra.mxu1 %vm3795_vm9, %v3867_v36  ;;  %v5750_v36 = vld [vmem:[%s8015_s3 + $0x1d8] sm:$0xff] }
 0x5e5   : > { %4427 = vmatpush.bf16.msrb.mxu1 %v5718_v46  ;;  %4272 = vmatpush.bf16.msra.mxu3 %v5692_v32 }
 0x5e6   : > { %4502 = vmatpush.bf16.msrb.mxu2 %v5730_v7  ;;  %4350 = vmatpush.bf16.msra.mxu0 %v5708_v37 }
 0x5e9   : > { %4428 = vmatpush.bf16.msrb.mxu1 %v5717_v47  ;;  %4273 = vmatpush.bf16.msra.mxu3 %v5691_v17  ;;  %v5740_v47 = vld [vmem:[%s8015_s3 + $0x188] sm:$0xff] }
 0x5ea   : > { %4351 = vmatpush.bf16.msra.mxu0 %v5707_v12 }
 0x5ed   : > { %4429 = vmatpush.bf16.msrb.mxu1 %v5716_v40  ;;  %4581 = vmatpush.bf16.msrb.mxu3 %v5738_v19  ;;  %v5739_v40 = vld [vmem:[%s8015_s3 + $0x180] sm:$0xff] }
 0x5f1   : > { %4430 = vmatpush.bf16.msrb.mxu1 %v5715_v6  ;;  %4582 = vmatpush.bf16.msrb.mxu3 %v5737_v3 }
 0x5f5   : > { %4739 = vmatpush.bf16.msra.mxu1 %v5754_v18  ;;  %4583 = vmatpush.bf16.msrb.mxu3 %v5736_v0 }
 0x5f9   : > { %4740 = vmatpush.bf16.msra.mxu1 %v5753_v61 }
 0x5fd   : > { %4741 = vmatpush.bf16.msra.mxu1 %v5752_v35 }
 0x601   : > { %4742 = vmatpush.bf16.msra.mxu1 %v5751_v16 }
 0x605   : > { %4743 = vmatpush.bf16.msra.mxu1 %v5750_v36 }
 0x609   : > { %4744 = vmatpush.bf16.msra.mxu1 %v5749_v44 }
 0x60d   : > { %4745 = vmatpush.bf16.msra.mxu1 %v5748_v29 }
 0x647   : > { %v7735_v20 = vpop.f32.mrf.mxu2 }
 0x648   : > { %6061 = vrcp.f32 %v7735_v20 }
 0x649   : > { %v7738_v50 = vpop.f32.mrf.mxu0 }
 0x64a   : > { %6063 = vrcp.f32 %v7738_v50 }
 0x64e   : > { %v6062_v39 = vpop.eup %6061  ;;  %v7741_v62 = vpop.f32.mrf.mxu3 }
 0x64f   : > { %v3904_v56 = vpop.f32.mrf.mxu2  ;;  %6065 = vrcp.f32 %v7741_v62  ;;  %4070 = vperm.xlu0 %6042, %v6062_v39   ;;  %v5729_v39 = vld [vmem:[%s8015_s3 + $0x130] sm:$0xff] }
 0x650   : > { %v6064_v27 = vpop.eup %6063  ;;  %v5735_v56 = vld [vmem:[%s8015_s3 + $0x160] sm:$0xff]  ;;  %4503 = vmatpush.bf16.msrb.mxu2 %v5729_v39 }
 0x651   : > { %v7753_v11 = vpop.f32.mrf.mxu1  ;;  %4080 = vperm.xlu1 %6043, %v6064_v27   ;;  %v3948_v63 = vpop.f32.mrf.mxu0  ;;  %4584 = vmatpush.bf16.msrb.mxu3 %v5735_v56  ;;  %v5728_v27 = vld [vmem:[%s8015_s3 + $0x128] sm:$0xff] }
 0x652   : > { %6067 = vrcp.f32 %v7753_v11  ;;  %v5746_v63 = vld [vmem:[%s8015_s3 + $0x1b8] sm:$0xff] }
 0x653   : > { %4660 = vmatpush.bf16.msrb.mxu0 %v5746_v63 }
 0x654   : > { %4504 = vmatpush.bf16.msrb.mxu2 %v5728_v27  ;;  %v6044_v27 = vld [vmem:[%s8016_s4] ss:$0 sm:$0xff] }
 0x655   : > { %v6066_v51 = vpop.eup %6065  ;;  %4585 = vmatpush.bf16.msrb.mxu3 %v5734_v33 }
 0x656   : > { %v3926_v54 = vpop.f32.mrf.mxu3  ;;  %4075 = vperm.xlu2 %6041, %v6066_v51   ;;  %v5747_v51 = vld [vmem:[%s8015_s3 + $0x1c0] sm:$0xff] }
 0x657   : > { %v5732_v54 = vld [vmem:[%s8015_s3 + $0x148] sm:$0xff]  ;;  %4661 = vmatpush.bf16.msrb.mxu0 %v5745_v26  ;;  %4746 = vmatpush.bf16.msra.mxu1 %v5747_v51 }
 0x658   : > { %v6068_v48 = vpop.eup %6067  ;;  %4505 = vmatpush.bf16.msrb.mxu2 %v5727_v45 }
 0x659   : > { %v3970_v13 = vpop.f32.mrf.mxu1  ;;  %v7780_v9 = vpop.f32.mrf.mxu0  ;;  %4586 = vmatpush.bf16.msrb.mxu3 %v5733_v41 }
 0x65a   : > { %v5725_v13 = vld [vmem:[%s8015_s3 + $0x110] sm:$0xff] }
 0x65b   : > { %4662 = vmatpush.bf16.msrb.mxu0 %v5744_v31 }
 0x65c   : > { %4506 = vmatpush.bf16.msrb.mxu2 %v5726_v21 }
 0x65d   : > { %4587 = vmatpush.bf16.msrb.mxu3 %v5732_v54 }
 0x65e   : > { %v7797_v57 = vpop.f32.mrf.mxu2  ;;  %4085 = vperm.xlu2 %6041, %v6068_v48  }
 0x65f   : > { %6069 = vrcp.f32 %v7797_v57  ;;  %v7803_v25 = vpop.f32.mrf.mxu3  ;;  %4663 = vmatpush.bf16.msrb.mxu0 %v5743_v42 }
 0x660   : > { %6071 = vrcp.f32 %v7803_v25  ;;  %4507 = vmatpush.bf16.msrb.mxu2 %v5725_v13 }
 0x661   : > { %v4036_v24 = vpop.f32.mrf.mxu0  ;;  %v7809_v43 = vpop.f32.mrf.mxu1  ;;  %6073 = vrcp.f32 %v7780_v9  ;;  %4588 = vmatpush.bf16.msrb.mxu3 %v5731_v4 }
 0x662   : > { %6075 = vrcp.f32 %v7809_v43  ;;  %v5741_v24 = vld [vmem:[%s8015_s3 + $0x190] sm:$0xff] }
 0x663   : > { %4664 = vmatpush.bf16.msrb.mxu0 %v5742_v38 }
 0x665   : > { %v6070_v52 = vpop.eup %6069 }
 0x666   : > { %v6072_v10 = vpop.eup %6071  ;;  %v3992_v14 = vpop.f32.mrf.mxu2  ;;  %4090 = vperm.xlu1 %6043, %v6070_v52  }
 0x667   : > { %v4014_v49 = vpop.f32.mrf.mxu3  ;;  %4095 = vperm.xlu2 %6041, %v6072_v10   ;;  %v6074_v5 = vpop.eup %6073  ;;  %4665 = vmatpush.bf16.msrb.mxu0 %v5741_v24 }
 0x668   : > { %v6076_v23 = vpop.eup %6075 }
 0x669   : > { %v4058_v22 = vpop.f32.mrf.mxu1 }
 0x66b   : > { %4666 = vmatpush.bf16.msrb.mxu0 %v5740_v47 }
 0x66e   : > { %4100 = vperm.xlu1 %6043, %v6074_v5  }
 0x66f   : > { %4105 = vperm.xlu2 %6041, %v6076_v23   ;;  %4667 = vmatpush.bf16.msrb.mxu0 %v5739_v40 }
 0x6b0   : > { %v4076_v8 = vpop.permute.xlu2 %4075 }
 0x6b1   : > { %v4109_v2 = vmul.f32 %v4076_v8, %v7741_v62  ;;  %v5724_v62 = vld [vmem:[%s8015_s3 + $0x108] sm:$0xff] }
 0x6b2   : > { %4508 = vmatpush.bf16.msrb.mxu2 %v5724_v62 }
 0x6b3   : > { %v4117_v59 = vpack.c.bf16 %v4109_v2, %v4109_v2 }
 0x6b5   : > { %4213 = vmatmul.bf16.vlgmr.msra.gmra.mxu2 %v4117_v59 }
 0x6b6   : > { %4509 = vmatpush.bf16.msrb.mxu2 %v5723_v28 }
 0x6b8   : > { %v4086_v48 = vpop.permute.xlu2 %4085 }
 0x6b9   : > { %v4111_v46 = vmul.f32 %v4086_v48, %v7753_v11 }
 0x6bb   : > { %v4119_v60 = vpack.c.bf16 %v4111_v46, %v4111_v46 }
 0x6bd   : > { %4431 = vmatmul.bf16.vlgmr.msrb.gmra.mxu1 %v4119_v60 }
 0x6c1   : > { %v4096_v30 = vpop.permute.xlu2 %4095  ;;  %v4071_v11 = vpop.permute.xlu0 %4070 }
 0x6c2   : > { %v4108_v1 = vmul.f32 %v4071_v11, %v7735_v20  ;;  %v4113_v20 = vmul.f32 %v4096_v30, %v7803_v25 }
 0x6c3   : > { %v4081_v52 = vpop.permute.xlu1 %4080 }
 0x6c4   : > { %v4116_v10 = vpack.c.bf16 %v4108_v1, %v4108_v1  ;;  %v4110_v14 = vmul.f32 %v4081_v52, %v7738_v50  ;;  %v4121_v18 = vpack.c.bf16 %v4113_v20, %v4113_v20 }
 0x6c6   : > { %v4118_v58 = vpack.c.bf16 %v4110_v14, %v4110_v14  ;;  %4274 = vmatmul.bf16.vlgmr.msra.gmra.mxu3 %v4116_v10 }
 0x6c8   : > { %4352 = vmatmul.bf16.vlgmr.msra.gmra.mxu0 %v4118_v58 }
 0x6c9   : > { %v4106_v49 = vpop.permute.xlu2 %4105 }
 0x6ca   : > { %v4115_v22 = vmul.f32 %v4106_v49, %v7809_v43 }
 0x6cc   : > { %v4123_v6 = vpack.c.bf16 %v4115_v22, %v4115_v22 }
 0x6ce   : > { %4747 = vmatmul.bf16.vlgmr.msra.gmra.mxu1 %v4123_v6 }
 0x6d6   : > { %4589 = vmatmul.bf16.vlgmr.msrb.gmra.mxu3 %v4121_v18 }
 0x6d8   : > { %v4091_v5 = vpop.permute.xlu1 %4090 }
 0x6d9   : > { %v4112_v23 = vmul.f32 %v4091_v5, %v7797_v57 }
 0x6db   : > { %v4120_v32 = vpack.c.bf16 %v4112_v23, %v4112_v23 }
 0x6dd   : > { %4510 = vmatmul.bf16.vlgmr.msrb.gmra.mxu2 %v4120_v32 }
 0x6e0   : > { %v4101_v55 = vpop.permute.xlu1 %4100 }
 0x6e1   : > { %v4114_v50 = vmul.f32 %v4101_v55, %v7780_v9 }
 0x6e3   : > { %v4122_v61 = vpack.c.bf16 %v4114_v50, %v4114_v50 }
 0x6e5   : > { %4668 = vmatmul.bf16.vlgmr.msrb.gmra.mxu0 %v4122_v61 }
 0x738   : > { %v4214_v34 = vpop.f32.mrf.mxu2 }
 0x73a   : > { %v4432_v43 = vpop.f32.mrf.mxu1 }
 0x740   : > { %v4216_v17 = vpop.f32.mrf.mxu2 }
 0x742   : > { %v4434_v19 = vpop.f32.mrf.mxu1 }
 0x745   : > { %v4353_v35 = vpop.f32.mrf.mxu0 }
 0x749   : > { %v4275_v25 = vpop.f32.mrf.mxu3 }
 0x74a   : > { %v4276_v57 = vadd.f32 %v4275_v25, %v4214_v34 }
 0x74b   : > { %v4748_v53 = vpop.f32.mrf.mxu1 }
 0x74c   : > { %v4357_v0 = vadd.f32 %v4353_v35, %v4276_v57 }
 0x74d   : > { %v4355_v3 = vpop.f32.mrf.mxu0 }
 0x74e   : > { %v4436_v9 = vadd.f32 %v4432_v43, %v4357_v0 }
 0x751   : > { %v4277_v16 = vpop.f32.mrf.mxu3 }
 0x753   : > { %v4750_v15 = vpop.f32.mrf.mxu1 }
 0x759   : > { %v4590_v7 = vpop.f32.mrf.mxu3 }
 0x760   : > { %v4511_v36 = vpop.f32.mrf.mxu2 }
 0x761   : > { %v4515_v37 = vadd.f32 %v4511_v36, %v4436_v9  ;;  %v4592_v39 = vpop.f32.mrf.mxu3 }
 0x762   : > { %v4669_v56 = vpop.f32.mrf.mxu0 }
 0x763   : > { %v4594_v44 = vadd.f32 %v4590_v7, %v4515_v37 }
 0x765   : > { %v4673_v12 = vadd.f32 %v4669_v56, %v4594_v44 }
 0x767   : > { %v4752_v33 = vadd.f32 %v4748_v53, %v4673_v12 }
 0x768   : > { %v4513_v63 = vpop.f32.mrf.mxu2 }
 0x769   : > { %v4757_v29 = vadd.f32 %v6044_v27, %v4752_v33 }
 0x76a   : > { %v4671_v45 = vpop.f32.mrf.mxu0 }
 0x76b   : > { %4758 = vst.msk [vmem:[%s8026_s27] sm:$0xff] %vm3361_vm5, %v4757_v29 }
 0x76c   : > { %6104 = shalt.err (!%p6101_p7)
}
 0x76d   : > { %5755 = dma.vmem_to_hbm [thread:$0]  (%p6275_p3), %s4775_s22, 128, %s4777_s16, %s4760_s30  }
 0x76e PF: > { %p5761_p9 = scmp.ge.s32.totalorder %s6171_s25, 2  ;;  %s4788_s13 = sand.u32 1, %s6143_s18  }
 0x76f   : > { %s4789_s0 = scalar_lea.sflag [#allocation5], %s4788_s13 }
 0x770   : > { %p5758_p10 = pnand %p5761_p9, %p6284_p8 }
 0x772   : > { %p5759_p11 = pneg %p5758_p10 }
 0x774   : > { %6138 = dma.done.wait (%p5759_p11), %s4789_s0, 128  }
 0x775   : > { %6140 = vsyncadd (%p5759_p11), %s4789_s0, 4294967168  ;;  %s18_s25 = sadd.s32 1, %s6171_s25   ;;  %s8028_s6 = sld [smem:[#allocation7_spill]] }
 0x776   : > { %p15_p12 = scmp.ge.s32.totalorder %s18_s25, 6   ;;  %s8029_s18 = smov %s6147_s19 }
 0x777   : > { %s8030_s19 = smov %s6151_s20  ;;  %s8031_s20 = smov %s6293_s11 }
 0x778   : > { %s8032_s21 = smov %s6163_s23  ;;  %s8033_s22 = smov %s6167_s24 }
 0x779   : > { %s8034_s23 = smov %s8037_s28  ;;  %17 = sbr.rel (!%p15_p12) target bundleno = 7 (0x7), region = 87 }
 0x77b   : > { %s8035_s24 = smov %s8028_s6 }
 0x77e   :  { %4795 = vsyncpa [#allocation5], 1 }
 0x77f   :  { %4797 = vsyncpa [#allocation5 + $0x1], 1 }

</bundles_post_ra>
